<compile_context>
chip_gen: v7x
topology: tpu7x:2x2x1
jax: 0.10.0
libtpu: 0.0.40
codegen_flags: <defaults>
</compile_context>

<pallas_src>
import jax
import jax.numpy as jnp
import numpy as np
from jax import lax
from jax.experimental import pallas as pl
from jax.experimental.pallas import tpu as pltpu

# ----------------------------- model dims ----------------------------------
VOCAB = 512           # n_vocab   (49408 in the real model)
D = 256               # n_embd    (768)
N_POS = 16            # n_token   (77)   -- sequence length must equal this
N_HEAD = 2            # heads     (12)
D_HEAD = D // N_HEAD  # head dim  (64 in the real model; 128 here -> lane aligned)
N_LAYERS = 12
EPS = 1e-5            # nn.LayerNorm default
BATCH = 2
BS = BATCH * N_POS    # rows fed to every matmul (batch folded into M)
SCALE = np.float32(1.0 / np.sqrt(D_HEAD))

PARAM_ORDER = [
    "ln1_g", "ln1_b", "w_qkv", "b_qkv", "w_out", "b_out",
    "ln2_g", "ln2_b", "w_fc1", "b_fc1", "w_fc2", "b_fc2",
]


# ------------------------------ shared math ---------------------------------
def _layernorm(v, g, b):
    mu = jnp.mean(v, axis=-1, keepdims=True)
    var = jnp.mean((v - mu) ** 2, axis=-1, keepdims=True)
    return (v - mu) * lax.rsqrt(var + EPS) * g + b


# --------------------------- fused CLIP kernel -------------------------------
def _clip_fused_kernel(tokens_ref,                    # (BS,) int32 in SMEM (prefetch)
                       tok_emb_hbm,                   # (VOCAB, D) in HBM (pl.ANY)
                       pos_ref,                       # (BS, D) positional emb (tiled)
                       mask_ref,                      # (BS, BS) additive mask 0 / -inf
                       ln1_g_ref, ln1_b_ref,
                       w_qkv_ref, b_qkv_ref,
                       w_out_ref, b_out_ref,
                       ln2_g_ref, ln2_b_ref,
                       w_fc1_ref, b_fc1_ref,
                       w_fc2_ref, b_fc2_ref,
                       lnf_g_ref, lnf_b_ref,
                       out_ref,                       # (BS, D) written on last layer
                       x_scratch,                     # (BS, D) resident activation
                       gather_sem):                   # (BS,) DMA semaphores
    l = pl.program_id(0)

    # ---- embedding: HBM row gather + positional add, once at layer 0 --------
    @pl.when(l == 0)
    def _embed():
        # Gather only the B*S rows that are actually used, straight into the
        # resident activation scratch (the table never enters VMEM whole).
        # All starts are issued before any wait so the row DMAs overlap.
        # TODO(synk): at real-model size (77*B rows) use pl.loop + a shallow
        # double-buffered gather instead of a fully unrolled static loop.
        copies = []
        for r in range(BS):
            tok = tokens_ref[r]
            copies.append(pltpu.make_async_copy(
                tok_emb_hbm.at[pl.ds(tok, 1)],
                x_scratch.at[pl.ds(r, 1)],
                gather_sem.at[r]))
        for c in copies:
            c.start()
        for c in copies:
            c.wait()
        x_scratch[...] = x_scratch[...] + pos_ref[...]

    x = x_scratch[...]                                # (BS, D)

    # ---------------- self-attention (causal, batch block-diagonal) ----------
    residue = x
    xn = _layernorm(x, ln1_g_ref[0], ln1_b_ref[0])
    qkv = jnp.dot(xn, w_qkv_ref[0],
                  preferred_element_type=jnp.float32) + b_qkv_ref[0]
    q = qkv[:, 0:D] * SCALE                           # fold 1/sqrt(d) into Q once
    k = qkv[:, D:2 * D]
    v = qkv[:, 2 * D:3 * D]
    mask = mask_ref[...]

    # out_proj folded into the head loop:  concat_h(o_h) @ W_out
    #   = sum_h o_h @ W_out[h*dh:(h+1)*dh, :]
    # D_HEAD == 128 here, so every head slice is lane-aligned (no tile splits).
    attn = jnp.broadcast_to(b_out_ref[0], (BS, D))
    for h in range(N_HEAD):
        sl = slice(h * D_HEAD, (h + 1) * D_HEAD)
        qh, kh, vh = q[:, sl], k[:, sl], v[:, sl]     # (BS, D_HEAD)
        scores = lax.dot_general(qh, kh, (((1,), (1,)), ((), ())),
                                 preferred_element_type=jnp.float32)  # (BS, BS)
        scores = scores + mask                        # -inf where disallowed
        m = jnp.max(scores, axis=-1, keepdims=True)
        e = jnp.exp(scores - m)
        probs = e * pl.reciprocal(jnp.sum(e, axis=-1, keepdims=True), approx=True)
        oh = jnp.dot(probs, vh, preferred_element_type=jnp.float32)
        attn = attn + jnp.dot(oh, w_out_ref[0, sl, :],
                              preferred_element_type=jnp.float32)
    x = residue + attn

    # ---------------- feed-forward block (QuickGELU) -------------------------
    residue = x
    xn = _layernorm(x, ln2_g_ref[0], ln2_b_ref[0])
    h1 = jnp.dot(xn, w_fc1_ref[0],
                 preferred_element_type=jnp.float32) + b_fc1_ref[0]
    h1 = h1 * pl.reciprocal(1.0 + jnp.exp(-1.702 * h1), approx=True)
    h2 = jnp.dot(h1, w_fc2_ref[0],
                 preferred_element_type=jnp.float32) + b_fc2_ref[0]
    x = residue + h2

    x_scratch[...] = x                                # stays resident in VMEM

    # ---- final LayerNorm + single lane-dense output store on last layer -----
    @pl.when(l == N_LAYERS - 1)
    def _final():
        out_ref[...] = _layernorm(x, lnf_g_ref[...], lnf_b_ref[...])


# ------------------------------ full forward --------------------------------
@jax.jit
def clip_forward(tokens, params):
    B, S = tokens.shape
    assert S == N_POS and B == BATCH
    tokens_flat = tokens.reshape(-1).astype(jnp.int32)

    # Constants hoisted out of the kernel (computed once, DMA'd once):
    #  * positional embedding tiled over the batch -> (BS, D)
    #  * block-diagonal causal additive mask        -> (BS, BS)
    pos_full = jnp.tile(params["pos_emb"], (B, 1))
    row = jnp.arange(BS)
    same_batch = (row[:, None] // S) == (row[None, :] // S)
    causal_ok = (row[None, :] % S) <= (row[:, None] % S)
    mask = jnp.where(same_batch & causal_ok, 0.0, -jnp.inf).astype(jnp.float32)

    # Stack per-layer params along a leading N_LAYERS axis for weight streaming.
    stacked = [jnp.stack([lp[name] for lp in params["layers"]], axis=0)
               for name in PARAM_ORDER]

    grid_spec = pltpu.PrefetchScalarGridSpec(
        num_scalar_prefetch=1,                        # tokens -> SMEM
        grid=(N_LAYERS,),
        in_specs=[
            pl.BlockSpec(memory_space=pl.ANY),                       # tok_emb (HBM)
            pl.BlockSpec((BS, D), lambda l, tok: (0, 0)),            # pos_full
            pl.BlockSpec((BS, BS), lambda l, tok: (0, 0)),           # mask
            pl.BlockSpec((1, 1, D), lambda l, tok: (l, 0, 0)),       # ln1_g
            pl.BlockSpec((1, 1, D), lambda l, tok: (l, 0, 0)),       # ln1_b
            pl.BlockSpec((1, D, 3 * D), lambda l, tok: (l, 0, 0)),   # w_qkv
            pl.BlockSpec((1, 1, 3 * D), lambda l, tok: (l, 0, 0)),   # b_qkv
            pl.BlockSpec((1, D, D), lambda l, tok: (l, 0, 0)),       # w_out
            pl.BlockSpec((1, 1, D), lambda l, tok: (l, 0, 0)),       # b_out
            pl.BlockSpec((1, 1, D), lambda l, tok: (l, 0, 0)),       # ln2_g
            pl.BlockSpec((1, 1, D), lambda l, tok: (l, 0, 0)),       # ln2_b
            pl.BlockSpec((1, D, 4 * D), lambda l, tok: (l, 0, 0)),   # w_fc1
            pl.BlockSpec((1, 1, 4 * D), lambda l, tok: (l, 0, 0)),   # b_fc1
            pl.BlockSpec((1, 4 * D, D), lambda l, tok: (l, 0, 0)),   # w_fc2
            pl.BlockSpec((1, 1, D), lambda l, tok: (l, 0, 0)),       # b_fc2
            pl.BlockSpec((1, D), lambda l, tok: (0, 0)),             # lnf_g
            pl.BlockSpec((1, D), lambda l, tok: (0, 0)),             # lnf_b
        ],
        out_specs=pl.BlockSpec((BS, D), lambda l, tok: (0, 0)),
        scratch_shapes=[
            pltpu.VMEM((BS, D), jnp.float32),        # resident activation
            pltpu.SemaphoreType.DMA((BS,)),          # embedding gather sems
        ],
    )

    out = pl.pallas_call(
        _clip_fused_kernel,
        out_shape=jax.ShapeDtypeStruct((BS, D), jnp.float32),
        grid_spec=grid_spec,
        compiler_params=pltpu.CompilerParams(
            dimension_semantics=("arbitrary",),      # layers are sequential
            vmem_limit_bytes=32 << 20),              # working set ~7 MiB (dbl-buf)
    )(tokens_flat, params["tok_emb"], pos_full, mask, *stacked,
      params["lnf_g"], params["lnf_b"])

    return out.reshape(B, S, D)


# ------------------------- deterministic parameters --------------------------
def init_params(key):
    # Note: linear weights are stored pre-transposed, i.e. (in_dim, out_dim),
    # which is W.T of the corresponding nn.Linear weight.
    ks = jax.random.split(key, 2 + N_LAYERS)
    params = {
        "tok_emb": 0.02 * jax.random.normal(ks[0], (VOCAB, D), jnp.float32),
        "pos_emb": 0.01 * jax.random.normal(ks[1], (N_POS, D), jnp.float32),
        "lnf_g": jnp.ones((1, D), jnp.float32),
        "lnf_b": jnp.zeros((1, D), jnp.float32),
        "layers": [],
    }
    for i in range(N_LAYERS):
        lk = jax.random.split(ks[2 + i], 8)
        params["layers"].append({
            "ln1_g": jnp.ones((1, D), jnp.float32),
            "ln1_b": jnp.zeros((1, D), jnp.float32),
            "w_qkv": 0.02 * jax.random.normal(lk[0], (D, 3 * D), jnp.float32),
            "b_qkv": 0.02 * jax.random.normal(lk[1], (1, 3 * D), jnp.float32),
            "w_out": 0.02 * jax.random.normal(lk[2], (D, D), jnp.float32),
            "b_out": 0.02 * jax.random.normal(lk[3], (1, D), jnp.float32),
            "ln2_g": jnp.ones((1, D), jnp.float32),
            "ln2_b": jnp.zeros((1, D), jnp.float32),
            "w_fc1": 0.02 * jax.random.normal(lk[4], (D, 4 * D), jnp.float32),
            "b_fc1": 0.02 * jax.random.normal(lk[5], (1, 4 * D), jnp.float32),
            "w_fc2": 0.02 * jax.random.normal(lk[6], (4 * D, D), jnp.float32),
            "b_fc2": 0.02 * jax.random.normal(lk[7], (1, D), jnp.float32),
        })
    return params


# ------------------------------ pure-JAX reference ---------------------------
def _ln_ref(v, g, b):
    mu = jnp.mean(v, axis=-1, keepdims=True)
    var = jnp.mean((v - mu) ** 2, axis=-1, keepdims=True)
    return (v - mu) * jax.lax.rsqrt(var + EPS) * g + b


def reference_forward(tokens, params):
    x = params["tok_emb"][tokens] + params["pos_emb"][None]
    B, S, _ = x.shape
    mask = jnp.triu(jnp.ones((S, S), bool), 1)
    for lp in params["layers"]:
        res = x
        xn = _ln_ref(x, lp["ln1_g"], lp["ln1_b"])
        qkv = xn @ lp["w_qkv"] + lp["b_qkv"]
        q, k, v = jnp.split(qkv, 3, axis=-1)
        split = lambda t: t.reshape(B, S, N_HEAD, D_HEAD).transpose(0, 2, 1, 3)
        qh, kh, vh = split(q), split(k), split(v)
        scores = jnp.einsum("bhqd,bhkd->bhqk", qh, kh)
        scores = jnp.where(mask, -jnp.inf, scores) / np.sqrt(D_HEAD)
        probs = jax.nn.softmax(scores, axis=-1)
        o = jnp.einsum("bhqk,bhkd->bhqd", probs, vh)
        o = o.transpose(0, 2, 1, 3).reshape(B, S, D)
        x = res + o @ lp["w_out"] + lp["b_out"]
        res = x
        xn = _ln_ref(x, lp["ln2_g"], lp["ln2_b"])
        h1 = xn @ lp["w_fc1"] + lp["b_fc1"]
        h1 = h1 * (1.0 / (1.0 + jnp.exp(-1.702 * h1)))
        x = res + h1 @ lp["w_fc2"] + lp["b_fc2"]
    return _ln_ref(x, params["lnf_g"], params["lnf_b"])


# ----------------------------------- main ------------------------------------
if __name__ == "__main__":
    key = jax.random.PRNGKey(0)
    pkey, tkey = jax.random.split(key)
    params = init_params(pkey)
    tokens = jax.random.randint(tkey, (BATCH, N_POS), 0, VOCAB, dtype=jnp.int32)

    out = jax.block_until_ready(clip_forward(tokens, params))
    assert out.shape == (BATCH, N_POS, D) and out.dtype == jnp.float32

    ref = jax.block_until_ready(reference_forward(tokens, params))
    np.testing.assert_allclose(np.asarray(out), np.asarray(ref),
                               rtol=2e-2, atol=2e-2)
    print("KERNEL_OK")
</pallas_src>

<mosaic_0001>
module attributes {stable_mosaic.version = 11 : i64} {
  func.func @_clip_fused_kernel(%arg0: i32, %arg1: memref<32xi32, #tpu.memory_space<smem>>, %arg2: memref<512x256xf32, #tpu.memory_space<any>>, %arg3: memref<32x256xf32, #tpu.memory_space<vmem>>, %arg4: memref<32x32xf32, #tpu.memory_space<vmem>>, %arg5: memref<1x1x256xf32, #tpu.memory_space<vmem>>, %arg6: memref<1x1x256xf32, #tpu.memory_space<vmem>>, %arg7: memref<1x256x768xf32, #tpu.memory_space<vmem>>, %arg8: memref<1x1x768xf32, #tpu.memory_space<vmem>>, %arg9: memref<1x256x256xf32, #tpu.memory_space<vmem>>, %arg10: memref<1x1x256xf32, #tpu.memory_space<vmem>>, %arg11: memref<1x1x256xf32, #tpu.memory_space<vmem>>, %arg12: memref<1x1x256xf32, #tpu.memory_space<vmem>>, %arg13: memref<1x256x1024xf32, #tpu.memory_space<vmem>>, %arg14: memref<1x1x1024xf32, #tpu.memory_space<vmem>>, %arg15: memref<1x1024x256xf32, #tpu.memory_space<vmem>>, %arg16: memref<1x1x256xf32, #tpu.memory_space<vmem>>, %arg17: memref<1x256xf32, #tpu.memory_space<vmem>>, %arg18: memref<1x256xf32, #tpu.memory_space<vmem>>, %arg19: memref<32x256xf32, #tpu.memory_space<vmem>>, %arg20: memref<32x256xf32, #tpu.memory_space<vmem>>, %arg21: memref<32x!tpu.dma_semaphore, #tpu.memory_space<semaphore_mem>>) attributes {dimension_semantics = [#tpu.dimension_semantics<arbitrary>], iteration_bounds = array<i64: 12>, scalar_prefetch = 1 : i64, scratch_operands = 2 : i64, tpu.core_type = #tpu.core_type<tc>, window_params = [{}, {pipeline_mode = #tpu.pipeline_mode<synchronous>, transform_indices = @transform_1, window_bounds = array<i64: 32, 256>}, {pipeline_mode = #tpu.pipeline_mode<synchronous>, transform_indices = @transform_2, window_bounds = array<i64: 32, 32>}, {transform_indices = @transform_3, window_bounds = array<i64: 1, 1, 256>}, {transform_indices = @transform_4, window_bounds = array<i64: 1, 1, 256>}, {transform_indices = @transform_5, window_bounds = array<i64: 1, 256, 768>}, {transform_indices = @transform_6, window_bounds = array<i64: 1, 1, 768>}, {transform_indices = @transform_7, window_bounds = array<i64: 1, 256, 256>}, {transform_indices = @transform_8, window_bounds = array<i64: 1, 1, 256>}, {transform_indices = @transform_9, window_bounds = array<i64: 1, 1, 256>}, {transform_indices = @transform_10, window_bounds = array<i64: 1, 1, 256>}, {transform_indices = @transform_11, window_bounds = array<i64: 1, 256, 1024>}, {transform_indices = @transform_12, window_bounds = array<i64: 1, 1, 1024>}, {transform_indices = @transform_13, window_bounds = array<i64: 1, 1024, 256>}, {transform_indices = @transform_14, window_bounds = array<i64: 1, 1, 256>}, {pipeline_mode = #tpu.pipeline_mode<synchronous>, transform_indices = @transform_15, window_bounds = array<i64: 1, 256>}, {pipeline_mode = #tpu.pipeline_mode<synchronous>, transform_indices = @transform_16, window_bounds = array<i64: 1, 256>}, {pipeline_mode = #tpu.pipeline_mode<synchronous>, transform_indices = @transform_17, window_bounds = array<i64: 32, 256>}]} {
    %c0_i32 = arith.constant 0 : i32
    %0 = arith.cmpi eq, %arg0, %c0_i32 : i32
    %1 = arith.extui %0 : i1 to i32
    %c0_i32_0 = arith.constant 0 : i32
    %2 = arith.cmpi ne, %1, %c0_i32_0 : i32
    scf.if %2 {
      %c0_70 = arith.constant 0 : index
      %140 = memref.load %arg1[%c0_70] : memref<32xi32, #tpu.memory_space<smem>>
      %c1 = arith.constant 1 : index
      %141 = memref.load %arg1[%c1] : memref<32xi32, #tpu.memory_space<smem>>
      %c2 = arith.constant 2 : index
      %142 = memref.load %arg1[%c2] : memref<32xi32, #tpu.memory_space<smem>>
      %c3 = arith.constant 3 : index
      %143 = memref.load %arg1[%c3] : memref<32xi32, #tpu.memory_space<smem>>
      %c4 = arith.constant 4 : index
      %144 = memref.load %arg1[%c4] : memref<32xi32, #tpu.memory_space<smem>>
      %c5 = arith.constant 5 : index
      %145 = memref.load %arg1[%c5] : memref<32xi32, #tpu.memory_space<smem>>
      %c6 = arith.constant 6 : index
      %146 = memref.load %arg1[%c6] : memref<32xi32, #tpu.memory_space<smem>>
      %c7 = arith.constant 7 : index
      %147 = memref.load %arg1[%c7] : memref<32xi32, #tpu.memory_space<smem>>
      %c8 = arith.constant 8 : index
      %148 = memref.load %arg1[%c8] : memref<32xi32, #tpu.memory_space<smem>>
      %c9 = arith.constant 9 : index
      %149 = memref.load %arg1[%c9] : memref<32xi32, #tpu.memory_space<smem>>
      %c10 = arith.constant 10 : index
      %150 = memref.load %arg1[%c10] : memref<32xi32, #tpu.memory_space<smem>>
      %c11 = arith.constant 11 : index
      %151 = memref.load %arg1[%c11] : memref<32xi32, #tpu.memory_space<smem>>
      %c12 = arith.constant 12 : index
      %152 = memref.load %arg1[%c12] : memref<32xi32, #tpu.memory_space<smem>>
      %c13 = arith.constant 13 : index
      %153 = memref.load %arg1[%c13] : memref<32xi32, #tpu.memory_space<smem>>
      %c14 = arith.constant 14 : index
      %154 = memref.load %arg1[%c14] : memref<32xi32, #tpu.memory_space<smem>>
      %c15 = arith.constant 15 : index
      %155 = memref.load %arg1[%c15] : memref<32xi32, #tpu.memory_space<smem>>
      %c16 = arith.constant 16 : index
      %156 = memref.load %arg1[%c16] : memref<32xi32, #tpu.memory_space<smem>>
      %c17 = arith.constant 17 : index
      %157 = memref.load %arg1[%c17] : memref<32xi32, #tpu.memory_space<smem>>
      %c18 = arith.constant 18 : index
      %158 = memref.load %arg1[%c18] : memref<32xi32, #tpu.memory_space<smem>>
      %c19 = arith.constant 19 : index
      %159 = memref.load %arg1[%c19] : memref<32xi32, #tpu.memory_space<smem>>
      %c20 = arith.constant 20 : index
      %160 = memref.load %arg1[%c20] : memref<32xi32, #tpu.memory_space<smem>>
      %c21 = arith.constant 21 : index
      %161 = memref.load %arg1[%c21] : memref<32xi32, #tpu.memory_space<smem>>
      %c22 = arith.constant 22 : index
      %162 = memref.load %arg1[%c22] : memref<32xi32, #tpu.memory_space<smem>>
      %c23 = arith.constant 23 : index
      %163 = memref.load %arg1[%c23] : memref<32xi32, #tpu.memory_space<smem>>
      %c24 = arith.constant 24 : index
      %164 = memref.load %arg1[%c24] : memref<32xi32, #tpu.memory_space<smem>>
      %c25 = arith.constant 25 : index
      %165 = memref.load %arg1[%c25] : memref<32xi32, #tpu.memory_space<smem>>
      %c26 = arith.constant 26 : index
      %166 = memref.load %arg1[%c26] : memref<32xi32, #tpu.memory_space<smem>>
      %c27 = arith.constant 27 : index
      %167 = memref.load %arg1[%c27] : memref<32xi32, #tpu.memory_space<smem>>
      %c28 = arith.constant 28 : index
      %168 = memref.load %arg1[%c28] : memref<32xi32, #tpu.memory_space<smem>>
      %c29 = arith.constant 29 : index
      %169 = memref.load %arg1[%c29] : memref<32xi32, #tpu.memory_space<smem>>
      %c30 = arith.constant 30 : index
      %170 = memref.load %arg1[%c30] : memref<32xi32, #tpu.memory_space<smem>>
      %c31 = arith.constant 31 : index
      %171 = memref.load %arg1[%c31] : memref<32xi32, #tpu.memory_space<smem>>
      %c0_i32_71 = arith.constant 0 : i32
      %c0_i32_72 = arith.constant 0 : i32
      %172 = tpu.memref_slice %arg2[%140, %c0_i32_72] : memref<512x256xf32, #tpu.memory_space<any>> -> memref<1x256xf32, #tpu.memory_space<any>>
      %c0_i32_73 = arith.constant 0 : i32
      %c0_i32_74 = arith.constant 0 : i32
      %173 = tpu.memref_slice %arg20[%c0_i32_73, %c0_i32_74] : memref<32x256xf32, #tpu.memory_space<vmem>> -> memref<1x256xf32, #tpu.memory_space<vmem>>
      %174 = tpu.memref_slice %arg21[%c0_i32_71] : memref<32x!tpu.dma_semaphore, #tpu.memory_space<semaphore_mem>> -> memref<1x!tpu.dma_semaphore, #tpu.memory_space<semaphore_mem>>
      %175 = tpu.memref_squeeze %174 : memref<1x!tpu.dma_semaphore, #tpu.memory_space<semaphore_mem>> -> memref<!tpu.dma_semaphore, #tpu.memory_space<semaphore_mem>>
      tpu.enqueue_dma source(%172 : memref<1x256xf32, #tpu.memory_space<any>>) target(%173 : memref<1x256xf32, #tpu.memory_space<vmem>>) target_semaphore(%175 : memref<!tpu.dma_semaphore, #tpu.memory_space<semaphore_mem>>)
      %c1_i32 = arith.constant 1 : i32
      %c0_i32_75 = arith.constant 0 : i32
      %176 = tpu.memref_slice %arg2[%141, %c0_i32_75] : memref<512x256xf32, #tpu.memory_space<any>> -> memref<1x256xf32, #tpu.memory_space<any>>
      %c1_i32_76 = arith.constant 1 : i32
      %c0_i32_77 = arith.constant 0 : i32
      %177 = tpu.memref_slice %arg20[%c1_i32_76, %c0_i32_77] : memref<32x256xf32, #tpu.memory_space<vmem>> -> memref<1x256xf32, #tpu.memory_space<vmem>>
      %178 = tpu.memref_slice %arg21[%c1_i32] : memref<32x!tpu.dma_semaphore, #tpu.memory_space<semaphore_mem>> -> memref<1x!tpu.dma_semaphore, #tpu.memory_space<semaphore_mem>>
      %179 = tpu.memref_squeeze %178 : memref<1x!tpu.dma_semaphore, #tpu.memory_space<semaphore_mem>> -> memref<!tpu.dma_semaphore, #tpu.memory_space<semaphore_mem>>
      tpu.enqueue_dma source(%176 : memref<1x256xf32, #tpu.memory_space<any>>) target(%177 : memref<1x256xf32, #tpu.memory_space<vmem>>) target_semaphore(%179 : memref<!tpu.dma_semaphore, #tpu.memory_space<semaphore_mem>>)
      %c2_i32 = arith.constant 2 : i32
      %c0_i32_78 = arith.constant 0 : i32
      %180 = tpu.memref_slice %arg2[%142, %c0_i32_78] : memref<512x256xf32, #tpu.memory_space<any>> -> memref<1x256xf32, #tpu.memory_space<any>>
      %c2_i32_79 = arith.constant 2 : i32
      %c0_i32_80 = arith.constant 0 : i32
      %181 = tpu.memref_slice %arg20[%c2_i32_79, %c0_i32_80] : memref<32x256xf32, #tpu.memory_space<vmem>> -> memref<1x256xf32, #tpu.memory_space<vmem>>
      %182 = tpu.memref_slice %arg21[%c2_i32] : memref<32x!tpu.dma_semaphore, #tpu.memory_space<semaphore_mem>> -> memref<1x!tpu.dma_semaphore, #tpu.memory_space<semaphore_mem>>
      %183 = tpu.memref_squeeze %182 : memref<1x!tpu.dma_semaphore, #tpu.memory_space<semaphore_mem>> -> memref<!tpu.dma_semaphore, #tpu.memory_space<semaphore_mem>>
      tpu.enqueue_dma source(%180 : memref<1x256xf32, #tpu.memory_space<any>>) target(%181 : memref<1x256xf32, #tpu.memory_space<vmem>>) target_semaphore(%183 : memref<!tpu.dma_semaphore, #tpu.memory_space<semaphore_mem>>)
      %c3_i32 = arith.constant 3 : i32
      %c0_i32_81 = arith.constant 0 : i32
      %184 = tpu.memref_slice %arg2[%143, %c0_i32_81] : memref<512x256xf32, #tpu.memory_space<any>> -> memref<1x256xf32, #tpu.memory_space<any>>
      %c3_i32_82 = arith.constant 3 : i32
      %c0_i32_83 = arith.constant 0 : i32
      %185 = tpu.memref_slice %arg20[%c3_i32_82, %c0_i32_83] : memref<32x256xf32, #tpu.memory_space<vmem>> -> memref<1x256xf32, #tpu.memory_space<vmem>>
      %186 = tpu.memref_slice %arg21[%c3_i32] : memref<32x!tpu.dma_semaphore, #tpu.memory_space<semaphore_mem>> -> memref<1x!tpu.dma_semaphore, #tpu.memory_space<semaphore_mem>>
      %187 = tpu.memref_squeeze %186 : memref<1x!tpu.dma_semaphore, #tpu.memory_space<semaphore_mem>> -> memref<!tpu.dma_semaphore, #tpu.memory_space<semaphore_mem>>
      tpu.enqueue_dma source(%184 : memref<1x256xf32, #tpu.memory_space<any>>) target(%185 : memref<1x256xf32, #tpu.memory_space<vmem>>) target_semaphore(%187 : memref<!tpu.dma_semaphore, #tpu.memory_space<semaphore_mem>>)
      %c4_i32 = arith.constant 4 : i32
      %c0_i32_84 = arith.constant 0 : i32
      %188 = tpu.memref_slice %arg2[%144, %c0_i32_84] : memref<512x256xf32, #tpu.memory_space<any>> -> memref<1x256xf32, #tpu.memory_space<any>>
      %c4_i32_85 = arith.constant 4 : i32
      %c0_i32_86 = arith.constant 0 : i32
      %189 = tpu.memref_slice %arg20[%c4_i32_85, %c0_i32_86] : memref<32x256xf32, #tpu.memory_space<vmem>> -> memref<1x256xf32, #tpu.memory_space<vmem>>
      %190 = tpu.memref_slice %arg21[%c4_i32] : memref<32x!tpu.dma_semaphore, #tpu.memory_space<semaphore_mem>> -> memref<1x!tpu.dma_semaphore, #tpu.memory_space<semaphore_mem>>
      %191 = tpu.memref_squeeze %190 : memref<1x!tpu.dma_semaphore, #tpu.memory_space<semaphore_mem>> -> memref<!tpu.dma_semaphore, #tpu.memory_space<semaphore_mem>>
      tpu.enqueue_dma source(%188 : memref<1x256xf32, #tpu.memory_space<any>>) target(%189 : memref<1x256xf32, #tpu.memory_space<vmem>>) target_semaphore(%191 : memref<!tpu.dma_semaphore, #tpu.memory_space<semaphore_mem>>)
      %c5_i32 = arith.constant 5 : i32
      %c0_i32_87 = arith.constant 0 : i32
      %192 = tpu.memref_slice %arg2[%145, %c0_i32_87] : memref<512x256xf32, #tpu.memory_space<any>> -> memref<1x256xf32, #tpu.memory_space<any>>
      %c5_i32_88 = arith.constant 5 : i32
      %c0_i32_89 = arith.constant 0 : i32
      %193 = tpu.memref_slice %arg20[%c5_i32_88, %c0_i32_89] : memref<32x256xf32, #tpu.memory_space<vmem>> -> memref<1x256xf32, #tpu.memory_space<vmem>>
      %194 = tpu.memref_slice %arg21[%c5_i32] : memref<32x!tpu.dma_semaphore, #tpu.memory_space<semaphore_mem>> -> memref<1x!tpu.dma_semaphore, #tpu.memory_space<semaphore_mem>>
      %195 = tpu.memref_squeeze %194 : memref<1x!tpu.dma_semaphore, #tpu.memory_space<semaphore_mem>> -> memref<!tpu.dma_semaphore, #tpu.memory_space<semaphore_mem>>
      tpu.enqueue_dma source(%192 : memref<1x256xf32, #tpu.memory_space<any>>) target(%193 : memref<1x256xf32, #tpu.memory_space<vmem>>) target_semaphore(%195 : memref<!tpu.dma_semaphore, #tpu.memory_space<semaphore_mem>>)
      %c6_i32 = arith.constant 6 : i32
      %c0_i32_90 = arith.constant 0 : i32
      %196 = tpu.memref_slice %arg2[%146, %c0_i32_90] : memref<512x256xf32, #tpu.memory_space<any>> -> memref<1x256xf32, #tpu.memory_space<any>>
      %c6_i32_91 = arith.constant 6 : i32
      %c0_i32_92 = arith.constant 0 : i32
      %197 = tpu.memref_slice %arg20[%c6_i32_91, %c0_i32_92] : memref<32x256xf32, #tpu.memory_space<vmem>> -> memref<1x256xf32, #tpu.memory_space<vmem>>
      %198 = tpu.memref_slice %arg21[%c6_i32] : memref<32x!tpu.dma_semaphore, #tpu.memory_space<semaphore_mem>> -> memref<1x!tpu.dma_semaphore, #tpu.memory_space<semaphore_mem>>
      %199 = tpu.memref_squeeze %198 : memref<1x!tpu.dma_semaphore, #tpu.memory_space<semaphore_mem>> -> memref<!tpu.dma_semaphore, #tpu.memory_space<semaphore_mem>>
      tpu.enqueue_dma source(%196 : memref<1x256xf32, #tpu.memory_space<any>>) target(%197 : memref<1x256xf32, #tpu.memory_space<vmem>>) target_semaphore(%199 : memref<!tpu.dma_semaphore, #tpu.memory_space<semaphore_mem>>)
      %c7_i32 = arith.constant 7 : i32
      %c0_i32_93 = arith.constant 0 : i32
      %200 = tpu.memref_slice %arg2[%147, %c0_i32_93] : memref<512x256xf32, #tpu.memory_space<any>> -> memref<1x256xf32, #tpu.memory_space<any>>
      %c7_i32_94 = arith.constant 7 : i32
      %c0_i32_95 = arith.constant 0 : i32
      %201 = tpu.memref_slice %arg20[%c7_i32_94, %c0_i32_95] : memref<32x256xf32, #tpu.memory_space<vmem>> -> memref<1x256xf32, #tpu.memory_space<vmem>>
      %202 = tpu.memref_slice %arg21[%c7_i32] : memref<32x!tpu.dma_semaphore, #tpu.memory_space<semaphore_mem>> -> memref<1x!tpu.dma_semaphore, #tpu.memory_space<semaphore_mem>>
      %203 = tpu.memref_squeeze %202 : memref<1x!tpu.dma_semaphore, #tpu.memory_space<semaphore_mem>> -> memref<!tpu.dma_semaphore, #tpu.memory_space<semaphore_mem>>
      tpu.enqueue_dma source(%200 : memref<1x256xf32, #tpu.memory_space<any>>) target(%201 : memref<1x256xf32, #tpu.memory_space<vmem>>) target_semaphore(%203 : memref<!tpu.dma_semaphore, #tpu.memory_space<semaphore_mem>>)
      %c8_i32 = arith.constant 8 : i32
      %c0_i32_96 = arith.constant 0 : i32
      %204 = tpu.memref_slice %arg2[%148, %c0_i32_96] : memref<512x256xf32, #tpu.memory_space<any>> -> memref<1x256xf32, #tpu.memory_space<any>>
      %c8_i32_97 = arith.constant 8 : i32
      %c0_i32_98 = arith.constant 0 : i32
      %205 = tpu.memref_slice %arg20[%c8_i32_97, %c0_i32_98] : memref<32x256xf32, #tpu.memory_space<vmem>> -> memref<1x256xf32, #tpu.memory_space<vmem>>
      %206 = tpu.memref_slice %arg21[%c8_i32] : memref<32x!tpu.dma_semaphore, #tpu.memory_space<semaphore_mem>> -> memref<1x!tpu.dma_semaphore, #tpu.memory_space<semaphore_mem>>
      %207 = tpu.memref_squeeze %206 : memref<1x!tpu.dma_semaphore, #tpu.memory_space<semaphore_mem>> -> memref<!tpu.dma_semaphore, #tpu.memory_space<semaphore_mem>>
      tpu.enqueue_dma source(%204 : memref<1x256xf32, #tpu.memory_space<any>>) target(%205 : memref<1x256xf32, #tpu.memory_space<vmem>>) target_semaphore(%207 : memref<!tpu.dma_semaphore, #tpu.memory_space<semaphore_mem>>)
      %c9_i32 = arith.constant 9 : i32
      %c0_i32_99 = arith.constant 0 : i32
      %208 = tpu.memref_slice %arg2[%149, %c0_i32_99] : memref<512x256xf32, #tpu.memory_space<any>> -> memref<1x256xf32, #tpu.memory_space<any>>
      %c9_i32_100 = arith.constant 9 : i32
      %c0_i32_101 = arith.constant 0 : i32
      %209 = tpu.memref_slice %arg20[%c9_i32_100, %c0_i32_101] : memref<32x256xf32, #tpu.memory_space<vmem>> -> memref<1x256xf32, #tpu.memory_space<vmem>>
      %210 = tpu.memref_slice %arg21[%c9_i32] : memref<32x!tpu.dma_semaphore, #tpu.memory_space<semaphore_mem>> -> memref<1x!tpu.dma_semaphore, #tpu.memory_space<semaphore_mem>>
      %211 = tpu.memref_squeeze %210 : memref<1x!tpu.dma_semaphore, #tpu.memory_space<semaphore_mem>> -> memref<!tpu.dma_semaphore, #tpu.memory_space<semaphore_mem>>
      tpu.enqueue_dma source(%208 : memref<1x256xf32, #tpu.memory_space<any>>) target(%209 : memref<1x256xf32, #tpu.memory_space<vmem>>) target_semaphore(%211 : memref<!tpu.dma_semaphore, #tpu.memory_space<semaphore_mem>>)
      %c10_i32 = arith.constant 10 : i32
      %c0_i32_102 = arith.constant 0 : i32
      %212 = tpu.memref_slice %arg2[%150, %c0_i32_102] : memref<512x256xf32, #tpu.memory_space<any>> -> memref<1x256xf32, #tpu.memory_space<any>>
      %c10_i32_103 = arith.constant 10 : i32
      %c0_i32_104 = arith.constant 0 : i32
      %213 = tpu.memref_slice %arg20[%c10_i32_103, %c0_i32_104] : memref<32x256xf32, #tpu.memory_space<vmem>> -> memref<1x256xf32, #tpu.memory_space<vmem>>
      %214 = tpu.memref_slice %arg21[%c10_i32] : memref<32x!tpu.dma_semaphore, #tpu.memory_space<semaphore_mem>> -> memref<1x!tpu.dma_semaphore, #tpu.memory_space<semaphore_mem>>
      %215 = tpu.memref_squeeze %214 : memref<1x!tpu.dma_semaphore, #tpu.memory_space<semaphore_mem>> -> memref<!tpu.dma_semaphore, #tpu.memory_space<semaphore_mem>>
      tpu.enqueue_dma source(%212 : memref<1x256xf32, #tpu.memory_space<any>>) target(%213 : memref<1x256xf32, #tpu.memory_space<vmem>>) target_semaphore(%215 : memref<!tpu.dma_semaphore, #tpu.memory_space<semaphore_mem>>)
      %c11_i32_105 = arith.constant 11 : i32
      %c0_i32_106 = arith.constant 0 : i32
      %216 = tpu.memref_slice %arg2[%151, %c0_i32_106] : memref<512x256xf32, #tpu.memory_space<any>> -> memref<1x256xf32, #tpu.memory_space<any>>
      %c11_i32_107 = arith.constant 11 : i32
      %c0_i32_108 = arith.constant 0 : i32
      %217 = tpu.memref_slice %arg20[%c11_i32_107, %c0_i32_108] : memref<32x256xf32, #tpu.memory_space<vmem>> -> memref<1x256xf32, #tpu.memory_space<vmem>>
      %218 = tpu.memref_slice %arg21[%c11_i32_105] : memref<32x!tpu.dma_semaphore, #tpu.memory_space<semaphore_mem>> -> memref<1x!tpu.dma_semaphore, #tpu.memory_space<semaphore_mem>>
      %219 = tpu.memref_squeeze %218 : memref<1x!tpu.dma_semaphore, #tpu.memory_space<semaphore_mem>> -> memref<!tpu.dma_semaphore, #tpu.memory_space<semaphore_mem>>
      tpu.enqueue_dma source(%216 : memref<1x256xf32, #tpu.memory_space<any>>) target(%217 : memref<1x256xf32, #tpu.memory_space<vmem>>) target_semaphore(%219 : memref<!tpu.dma_semaphore, #tpu.memory_space<semaphore_mem>>)
      %c12_i32 = arith.constant 12 : i32
      %c0_i32_109 = arith.constant 0 : i32
      %220 = tpu.memref_slice %arg2[%152, %c0_i32_109] : memref<512x256xf32, #tpu.memory_space<any>> -> memref<1x256xf32, #tpu.memory_space<any>>
      %c12_i32_110 = arith.constant 12 : i32
      %c0_i32_111 = arith.constant 0 : i32
      %221 = tpu.memref_slice %arg20[%c12_i32_110, %c0_i32_111] : memref<32x256xf32, #tpu.memory_space<vmem>> -> memref<1x256xf32, #tpu.memory_space<vmem>>
      %222 = tpu.memref_slice %arg21[%c12_i32] : memref<32x!tpu.dma_semaphore, #tpu.memory_space<semaphore_mem>> -> memref<1x!tpu.dma_semaphore, #tpu.memory_space<semaphore_mem>>
      %223 = tpu.memref_squeeze %222 : memref<1x!tpu.dma_semaphore, #tpu.memory_space<semaphore_mem>> -> memref<!tpu.dma_semaphore, #tpu.memory_space<semaphore_mem>>
      tpu.enqueue_dma source(%220 : memref<1x256xf32, #tpu.memory_space<any>>) target(%221 : memref<1x256xf32, #tpu.memory_space<vmem>>) target_semaphore(%223 : memref<!tpu.dma_semaphore, #tpu.memory_space<semaphore_mem>>)
      %c13_i32 = arith.constant 13 : i32
      %c0_i32_112 = arith.constant 0 : i32
      %224 = tpu.memref_slice %arg2[%153, %c0_i32_112] : memref<512x256xf32, #tpu.memory_space<any>> -> memref<1x256xf32, #tpu.memory_space<any>>
      %c13_i32_113 = arith.constant 13 : i32
      %c0_i32_114 = arith.constant 0 : i32
      %225 = tpu.memref_slice %arg20[%c13_i32_113, %c0_i32_114] : memref<32x256xf32, #tpu.memory_space<vmem>> -> memref<1x256xf32, #tpu.memory_space<vmem>>
      %226 = tpu.memref_slice %arg21[%c13_i32] : memref<32x!tpu.dma_semaphore, #tpu.memory_space<semaphore_mem>> -> memref<1x!tpu.dma_semaphore, #tpu.memory_space<semaphore_mem>>
      %227 = tpu.memref_squeeze %226 : memref<1x!tpu.dma_semaphore, #tpu.memory_space<semaphore_mem>> -> memref<!tpu.dma_semaphore, #tpu.memory_space<semaphore_mem>>
      tpu.enqueue_dma source(%224 : memref<1x256xf32, #tpu.memory_space<any>>) target(%225 : memref<1x256xf32, #tpu.memory_space<vmem>>) target_semaphore(%227 : memref<!tpu.dma_semaphore, #tpu.memory_space<semaphore_mem>>)
      %c14_i32 = arith.constant 14 : i32
      %c0_i32_115 = arith.constant 0 : i32
      %228 = tpu.memref_slice %arg2[%154, %c0_i32_115] : memref<512x256xf32, #tpu.memory_space<any>> -> memref<1x256xf32, #tpu.memory_space<any>>
      %c14_i32_116 = arith.constant 14 : i32
      %c0_i32_117 = arith.constant 0 : i32
      %229 = tpu.memref_slice %arg20[%c14_i32_116, %c0_i32_117] : memref<32x256xf32, #tpu.memory_space<vmem>> -> memref<1x256xf32, #tpu.memory_space<vmem>>
      %230 = tpu.memref_slice %arg21[%c14_i32] : memref<32x!tpu.dma_semaphore, #tpu.memory_space<semaphore_mem>> -> memref<1x!tpu.dma_semaphore, #tpu.memory_space<semaphore_mem>>
      %231 = tpu.memref_squeeze %230 : memref<1x!tpu.dma_semaphore, #tpu.memory_space<semaphore_mem>> -> memref<!tpu.dma_semaphore, #tpu.memory_space<semaphore_mem>>
      tpu.enqueue_dma source(%228 : memref<1x256xf32, #tpu.memory_space<any>>) target(%229 : memref<1x256xf32, #tpu.memory_space<vmem>>) target_semaphore(%231 : memref<!tpu.dma_semaphore, #tpu.memory_space<semaphore_mem>>)
      %c15_i32 = arith.constant 15 : i32
      %c0_i32_118 = arith.constant 0 : i32
      %232 = tpu.memref_slice %arg2[%155, %c0_i32_118] : memref<512x256xf32, #tpu.memory_space<any>> -> memref<1x256xf32, #tpu.memory_space<any>>
      %c15_i32_119 = arith.constant 15 : i32
      %c0_i32_120 = arith.constant 0 : i32
      %233 = tpu.memref_slice %arg20[%c15_i32_119, %c0_i32_120] : memref<32x256xf32, #tpu.memory_space<vmem>> -> memref<1x256xf32, #tpu.memory_space<vmem>>
      %234 = tpu.memref_slice %arg21[%c15_i32] : memref<32x!tpu.dma_semaphore, #tpu.memory_space<semaphore_mem>> -> memref<1x!tpu.dma_semaphore, #tpu.memory_space<semaphore_mem>>
      %235 = tpu.memref_squeeze %234 : memref<1x!tpu.dma_semaphore, #tpu.memory_space<semaphore_mem>> -> memref<!tpu.dma_semaphore, #tpu.memory_space<semaphore_mem>>
      tpu.enqueue_dma source(%232 : memref<1x256xf32, #tpu.memory_space<any>>) target(%233 : memref<1x256xf32, #tpu.memory_space<vmem>>) target_semaphore(%235 : memref<!tpu.dma_semaphore, #tpu.memory_space<semaphore_mem>>)
      %c16_i32 = arith.constant 16 : i32
      %c0_i32_121 = arith.constant 0 : i32
      %236 = tpu.memref_slice %arg2[%156, %c0_i32_121] : memref<512x256xf32, #tpu.memory_space<any>> -> memref<1x256xf32, #tpu.memory_space<any>>
      %c16_i32_122 = arith.constant 16 : i32
      %c0_i32_123 = arith.constant 0 : i32
      %237 = tpu.memref_slice %arg20[%c16_i32_122, %c0_i32_123] : memref<32x256xf32, #tpu.memory_space<vmem>> -> memref<1x256xf32, #tpu.memory_space<vmem>>
      %238 = tpu.memref_slice %arg21[%c16_i32] : memref<32x!tpu.dma_semaphore, #tpu.memory_space<semaphore_mem>> -> memref<1x!tpu.dma_semaphore, #tpu.memory_space<semaphore_mem>>
      %239 = tpu.memref_squeeze %238 : memref<1x!tpu.dma_semaphore, #tpu.memory_space<semaphore_mem>> -> memref<!tpu.dma_semaphore, #tpu.memory_space<semaphore_mem>>
      tpu.enqueue_dma source(%236 : memref<1x256xf32, #tpu.memory_space<any>>) target(%237 : memref<1x256xf32, #tpu.memory_space<vmem>>) target_semaphore(%239 : memref<!tpu.dma_semaphore, #tpu.memory_space<semaphore_mem>>)
      %c17_i32 = arith.constant 17 : i32
      %c0_i32_124 = arith.constant 0 : i32
      %240 = tpu.memref_slice %arg2[%157, %c0_i32_124] : memref<512x256xf32, #tpu.memory_space<any>> -> memref<1x256xf32, #tpu.memory_space<any>>
      %c17_i32_125 = arith.constant 17 : i32
      %c0_i32_126 = arith.constant 0 : i32
      %241 = tpu.memref_slice %arg20[%c17_i32_125, %c0_i32_126] : memref<32x256xf32, #tpu.memory_space<vmem>> -> memref<1x256xf32, #tpu.memory_space<vmem>>
      %242 = tpu.memref_slice %arg21[%c17_i32] : memref<32x!tpu.dma_semaphore, #tpu.memory_space<semaphore_mem>> -> memref<1x!tpu.dma_semaphore, #tpu.memory_space<semaphore_mem>>
      %243 = tpu.memref_squeeze %242 : memref<1x!tpu.dma_semaphore, #tpu.memory_space<semaphore_mem>> -> memref<!tpu.dma_semaphore, #tpu.memory_space<semaphore_mem>>
      tpu.enqueue_dma source(%240 : memref<1x256xf32, #tpu.memory_space<any>>) target(%241 : memref<1x256xf32, #tpu.memory_space<vmem>>) target_semaphore(%243 : memref<!tpu.dma_semaphore, #tpu.memory_space<semaphore_mem>>)
      %c18_i32 = arith.constant 18 : i32
      %c0_i32_127 = arith.constant 0 : i32
      %244 = tpu.memref_slice %arg2[%158, %c0_i32_127] : memref<512x256xf32, #tpu.memory_space<any>> -> memref<1x256xf32, #tpu.memory_space<any>>
      %c18_i32_128 = arith.constant 18 : i32
      %c0_i32_129 = arith.constant 0 : i32
      %245 = tpu.memref_slice %arg20[%c18_i32_128, %c0_i32_129] : memref<32x256xf32, #tpu.memory_space<vmem>> -> memref<1x256xf32, #tpu.memory_space<vmem>>
      %246 = tpu.memref_slice %arg21[%c18_i32] : memref<32x!tpu.dma_semaphore, #tpu.memory_space<semaphore_mem>> -> memref<1x!tpu.dma_semaphore, #tpu.memory_space<semaphore_mem>>
      %247 = tpu.memref_squeeze %246 : memref<1x!tpu.dma_semaphore, #tpu.memory_space<semaphore_mem>> -> memref<!tpu.dma_semaphore, #tpu.memory_space<semaphore_mem>>
      tpu.enqueue_dma source(%244 : memref<1x256xf32, #tpu.memory_space<any>>) target(%245 : memref<1x256xf32, #tpu.memory_space<vmem>>) target_semaphore(%247 : memref<!tpu.dma_semaphore, #tpu.memory_space<semaphore_mem>>)
      %c19_i32 = arith.constant 19 : i32
      %c0_i32_130 = arith.constant 0 : i32
      %248 = tpu.memref_slice %arg2[%159, %c0_i32_130] : memref<512x256xf32, #tpu.memory_space<any>> -> memref<1x256xf32, #tpu.memory_space<any>>
      %c19_i32_131 = arith.constant 19 : i32
      %c0_i32_132 = arith.constant 0 : i32
      %249 = tpu.memref_slice %arg20[%c19_i32_131, %c0_i32_132] : memref<32x256xf32, #tpu.memory_space<vmem>> -> memref<1x256xf32, #tpu.memory_space<vmem>>
      %250 = tpu.memref_slice %arg21[%c19_i32] : memref<32x!tpu.dma_semaphore, #tpu.memory_space<semaphore_mem>> -> memref<1x!tpu.dma_semaphore, #tpu.memory_space<semaphore_mem>>
      %251 = tpu.memref_squeeze %250 : memref<1x!tpu.dma_semaphore, #tpu.memory_space<semaphore_mem>> -> memref<!tpu.dma_semaphore, #tpu.memory_space<semaphore_mem>>
      tpu.enqueue_dma source(%248 : memref<1x256xf32, #tpu.memory_space<any>>) target(%249 : memref<1x256xf32, #tpu.memory_space<vmem>>) target_semaphore(%251 : memref<!tpu.dma_semaphore, #tpu.memory_space<semaphore_mem>>)
      %c20_i32 = arith.constant 20 : i32
      %c0_i32_133 = arith.constant 0 : i32
      %252 = tpu.memref_slice %arg2[%160, %c0_i32_133] : memref<512x256xf32, #tpu.memory_space<any>> -> memref<1x256xf32, #tpu.memory_space<any>>
      %c20_i32_134 = arith.constant 20 : i32
      %c0_i32_135 = arith.constant 0 : i32
      %253 = tpu.memref_slice %arg20[%c20_i32_134, %c0_i32_135] : memref<32x256xf32, #tpu.memory_space<vmem>> -> memref<1x256xf32, #tpu.memory_space<vmem>>
      %254 = tpu.memref_slice %arg21[%c20_i32] : memref<32x!tpu.dma_semaphore, #tpu.memory_space<semaphore_mem>> -> memref<1x!tpu.dma_semaphore, #tpu.memory_space<semaphore_mem>>
      %255 = tpu.memref_squeeze %254 : memref<1x!tpu.dma_semaphore, #tpu.memory_space<semaphore_mem>> -> memref<!tpu.dma_semaphore, #tpu.memory_space<semaphore_mem>>
      tpu.enqueue_dma source(%252 : memref<1x256xf32, #tpu.memory_space<any>>) target(%253 : memref<1x256xf32, #tpu.memory_space<vmem>>) target_semaphore(%255 : memref<!tpu.dma_semaphore, #tpu.memory_space<semaphore_mem>>)
      %c21_i32 = arith.constant 21 : i32
      %c0_i32_136 = arith.constant 0 : i32
      %256 = tpu.memref_slice %arg2[%161, %c0_i32_136] : memref<512x256xf32, #tpu.memory_space<any>> -> memref<1x256xf32, #tpu.memory_space<any>>
      %c21_i32_137 = arith.constant 21 : i32
      %c0_i32_138 = arith.constant 0 : i32
      %257 = tpu.memref_slice %arg20[%c21_i32_137, %c0_i32_138] : memref<32x256xf32, #tpu.memory_space<vmem>> -> memref<1x256xf32, #tpu.memory_space<vmem>>
      %258 = tpu.memref_slice %arg21[%c21_i32] : memref<32x!tpu.dma_semaphore, #tpu.memory_space<semaphore_mem>> -> memref<1x!tpu.dma_semaphore, #tpu.memory_space<semaphore_mem>>
      %259 = tpu.memref_squeeze %258 : memref<1x!tpu.dma_semaphore, #tpu.memory_space<semaphore_mem>> -> memref<!tpu.dma_semaphore, #tpu.memory_space<semaphore_mem>>
      tpu.enqueue_dma source(%256 : memref<1x256xf32, #tpu.memory_space<any>>) target(%257 : memref<1x256xf32, #tpu.memory_space<vmem>>) target_semaphore(%259 : memref<!tpu.dma_semaphore, #tpu.memory_space<semaphore_mem>>)
      %c22_i32 = arith.constant 22 : i32
      %c0_i32_139 = arith.constant 0 : i32
      %260 = tpu.memref_slice %arg2[%162, %c0_i32_139] : memref<512x256xf32, #tpu.memory_space<any>> -> memref<1x256xf32, #tpu.memory_space<any>>
      %c22_i32_140 = arith.constant 22 : i32
      %c0_i32_141 = arith.constant 0 : i32
      %261 = tpu.memref_slice %arg20[%c22_i32_140, %c0_i32_141] : memref<32x256xf32, #tpu.memory_space<vmem>> -> memref<1x256xf32, #tpu.memory_space<vmem>>
      %262 = tpu.memref_slice %arg21[%c22_i32] : memref<32x!tpu.dma_semaphore, #tpu.memory_space<semaphore_mem>> -> memref<1x!tpu.dma_semaphore, #tpu.memory_space<semaphore_mem>>
      %263 = tpu.memref_squeeze %262 : memref<1x!tpu.dma_semaphore, #tpu.memory_space<semaphore_mem>> -> memref<!tpu.dma_semaphore, #tpu.memory_space<semaphore_mem>>
      tpu.enqueue_dma source(%260 : memref<1x256xf32, #tpu.memory_space<any>>) target(%261 : memref<1x256xf32, #tpu.memory_space<vmem>>) target_semaphore(%263 : memref<!tpu.dma_semaphore, #tpu.memory_space<semaphore_mem>>)
      %c23_i32 = arith.constant 23 : i32
      %c0_i32_142 = arith.constant 0 : i32
      %264 = tpu.memref_slice %arg2[%163, %c0_i32_142] : memref<512x256xf32, #tpu.memory_space<any>> -> memref<1x256xf32, #tpu.memory_space<any>>
      %c23_i32_143 = arith.constant 23 : i32
      %c0_i32_144 = arith.constant 0 : i32
      %265 = tpu.memref_slice %arg20[%c23_i32_143, %c0_i32_144] : memref<32x256xf32, #tpu.memory_space<vmem>> -> memref<1x256xf32, #tpu.memory_space<vmem>>
      %266 = tpu.memref_slice %arg21[%c23_i32] : memref<32x!tpu.dma_semaphore, #tpu.memory_space<semaphore_mem>> -> memref<1x!tpu.dma_semaphore, #tpu.memory_space<semaphore_mem>>
      %267 = tpu.memref_squeeze %266 : memref<1x!tpu.dma_semaphore, #tpu.memory_space<semaphore_mem>> -> memref<!tpu.dma_semaphore, #tpu.memory_space<semaphore_mem>>
      tpu.enqueue_dma source(%264 : memref<1x256xf32, #tpu.memory_space<any>>) target(%265 : memref<1x256xf32, #tpu.memory_space<vmem>>) target_semaphore(%267 : memref<!tpu.dma_semaphore, #tpu.memory_space<semaphore_mem>>)
      %c24_i32 = arith.constant 24 : i32
      %c0_i32_145 = arith.constant 0 : i32
      %268 = tpu.memref_slice %arg2[%164, %c0_i32_145] : memref<512x256xf32, #tpu.memory_space<any>> -> memref<1x256xf32, #tpu.memory_space<any>>
      %c24_i32_146 = arith.constant 24 : i32
      %c0_i32_147 = arith.constant 0 : i32
      %269 = tpu.memref_slice %arg20[%c24_i32_146, %c0_i32_147] : memref<32x256xf32, #tpu.memory_space<vmem>> -> memref<1x256xf32, #tpu.memory_space<vmem>>
      %270 = tpu.memref_slice %arg21[%c24_i32] : memref<32x!tpu.dma_semaphore, #tpu.memory_space<semaphore_mem>> -> memref<1x!tpu.dma_semaphore, #tpu.memory_space<semaphore_mem>>
      %271 = tpu.memref_squeeze %270 : memref<1x!tpu.dma_semaphore, #tpu.memory_space<semaphore_mem>> -> memref<!tpu.dma_semaphore, #tpu.memory_space<semaphore_mem>>
      tpu.enqueue_dma source(%268 : memref<1x256xf32, #tpu.memory_space<any>>) target(%269 : memref<1x256xf32, #tpu.memory_space<vmem>>) target_semaphore(%271 : memref<!tpu.dma_semaphore, #tpu.memory_space<semaphore_mem>>)
      %c25_i32 = arith.constant 25 : i32
      %c0_i32_148 = arith.constant 0 : i32
      %272 = tpu.memref_slice %arg2[%165, %c0_i32_148] : memref<512x256xf32, #tpu.memory_space<any>> -> memref<1x256xf32, #tpu.memory_space<any>>
      %c25_i32_149 = arith.constant 25 : i32
      %c0_i32_150 = arith.constant 0 : i32
      %273 = tpu.memref_slice %arg20[%c25_i32_149, %c0_i32_150] : memref<32x256xf32, #tpu.memory_space<vmem>> -> memref<1x256xf32, #tpu.memory_space<vmem>>
      %274 = tpu.memref_slice %arg21[%c25_i32] : memref<32x!tpu.dma_semaphore, #tpu.memory_space<semaphore_mem>> -> memref<1x!tpu.dma_semaphore, #tpu.memory_space<semaphore_mem>>
      %275 = tpu.memref_squeeze %274 : memref<1x!tpu.dma_semaphore, #tpu.memory_space<semaphore_mem>> -> memref<!tpu.dma_semaphore, #tpu.memory_space<semaphore_mem>>
      tpu.enqueue_dma source(%272 : memref<1x256xf32, #tpu.memory_space<any>>) target(%273 : memref<1x256xf32, #tpu.memory_space<vmem>>) target_semaphore(%275 : memref<!tpu.dma_semaphore, #tpu.memory_space<semaphore_mem>>)
      %c26_i32 = arith.constant 26 : i32
      %c0_i32_151 = arith.constant 0 : i32
      %276 = tpu.memref_slice %arg2[%166, %c0_i32_151] : memref<512x256xf32, #tpu.memory_space<any>> -> memref<1x256xf32, #tpu.memory_space<any>>
      %c26_i32_152 = arith.constant 26 : i32
      %c0_i32_153 = arith.constant 0 : i32
      %277 = tpu.memref_slice %arg20[%c26_i32_152, %c0_i32_153] : memref<32x256xf32, #tpu.memory_space<vmem>> -> memref<1x256xf32, #tpu.memory_space<vmem>>
      %278 = tpu.memref_slice %arg21[%c26_i32] : memref<32x!tpu.dma_semaphore, #tpu.memory_space<semaphore_mem>> -> memref<1x!tpu.dma_semaphore, #tpu.memory_space<semaphore_mem>>
      %279 = tpu.memref_squeeze %278 : memref<1x!tpu.dma_semaphore, #tpu.memory_space<semaphore_mem>> -> memref<!tpu.dma_semaphore, #tpu.memory_space<semaphore_mem>>
      tpu.enqueue_dma source(%276 : memref<1x256xf32, #tpu.memory_space<any>>) target(%277 : memref<1x256xf32, #tpu.memory_space<vmem>>) target_semaphore(%279 : memref<!tpu.dma_semaphore, #tpu.memory_space<semaphore_mem>>)
      %c27_i32 = arith.constant 27 : i32
      %c0_i32_154 = arith.constant 0 : i32
      %280 = tpu.memref_slice %arg2[%167, %c0_i32_154] : memref<512x256xf32, #tpu.memory_space<any>> -> memref<1x256xf32, #tpu.memory_space<any>>
      %c27_i32_155 = arith.constant 27 : i32
      %c0_i32_156 = arith.constant 0 : i32
      %281 = tpu.memref_slice %arg20[%c27_i32_155, %c0_i32_156] : memref<32x256xf32, #tpu.memory_space<vmem>> -> memref<1x256xf32, #tpu.memory_space<vmem>>
      %282 = tpu.memref_slice %arg21[%c27_i32] : memref<32x!tpu.dma_semaphore, #tpu.memory_space<semaphore_mem>> -> memref<1x!tpu.dma_semaphore, #tpu.memory_space<semaphore_mem>>
      %283 = tpu.memref_squeeze %282 : memref<1x!tpu.dma_semaphore, #tpu.memory_space<semaphore_mem>> -> memref<!tpu.dma_semaphore, #tpu.memory_space<semaphore_mem>>
      tpu.enqueue_dma source(%280 : memref<1x256xf32, #tpu.memory_space<any>>) target(%281 : memref<1x256xf32, #tpu.memory_space<vmem>>) target_semaphore(%283 : memref<!tpu.dma_semaphore, #tpu.memory_space<semaphore_mem>>)
      %c28_i32 = arith.constant 28 : i32
      %c0_i32_157 = arith.constant 0 : i32
      %284 = tpu.memref_slice %arg2[%168, %c0_i32_157] : memref<512x256xf32, #tpu.memory_space<any>> -> memref<1x256xf32, #tpu.memory_space<any>>
      %c28_i32_158 = arith.constant 28 : i32
      %c0_i32_159 = arith.constant 0 : i32
      %285 = tpu.memref_slice %arg20[%c28_i32_158, %c0_i32_159] : memref<32x256xf32, #tpu.memory_space<vmem>> -> memref<1x256xf32, #tpu.memory_space<vmem>>
      %286 = tpu.memref_slice %arg21[%c28_i32] : memref<32x!tpu.dma_semaphore, #tpu.memory_space<semaphore_mem>> -> memref<1x!tpu.dma_semaphore, #tpu.memory_space<semaphore_mem>>
      %287 = tpu.memref_squeeze %286 : memref<1x!tpu.dma_semaphore, #tpu.memory_space<semaphore_mem>> -> memref<!tpu.dma_semaphore, #tpu.memory_space<semaphore_mem>>
      tpu.enqueue_dma source(%284 : memref<1x256xf32, #tpu.memory_space<any>>) target(%285 : memref<1x256xf32, #tpu.memory_space<vmem>>) target_semaphore(%287 : memref<!tpu.dma_semaphore, #tpu.memory_space<semaphore_mem>>)
      %c29_i32 = arith.constant 29 : i32
      %c0_i32_160 = arith.constant 0 : i32
      %288 = tpu.memref_slice %arg2[%169, %c0_i32_160] : memref<512x256xf32, #tpu.memory_space<any>> -> memref<1x256xf32, #tpu.memory_space<any>>
      %c29_i32_161 = arith.constant 29 : i32
      %c0_i32_162 = arith.constant 0 : i32
      %289 = tpu.memref_slice %arg20[%c29_i32_161, %c0_i32_162] : memref<32x256xf32, #tpu.memory_space<vmem>> -> memref<1x256xf32, #tpu.memory_space<vmem>>
      %290 = tpu.memref_slice %arg21[%c29_i32] : memref<32x!tpu.dma_semaphore, #tpu.memory_space<semaphore_mem>> -> memref<1x!tpu.dma_semaphore, #tpu.memory_space<semaphore_mem>>
      %291 = tpu.memref_squeeze %290 : memref<1x!tpu.dma_semaphore, #tpu.memory_space<semaphore_mem>> -> memref<!tpu.dma_semaphore, #tpu.memory_space<semaphore_mem>>
      tpu.enqueue_dma source(%288 : memref<1x256xf32, #tpu.memory_space<any>>) target(%289 : memref<1x256xf32, #tpu.memory_space<vmem>>) target_semaphore(%291 : memref<!tpu.dma_semaphore, #tpu.memory_space<semaphore_mem>>)
      %c30_i32 = arith.constant 30 : i32
      %c0_i32_163 = arith.constant 0 : i32
      %292 = tpu.memref_slice %arg2[%170, %c0_i32_163] : memref<512x256xf32, #tpu.memory_space<any>> -> memref<1x256xf32, #tpu.memory_space<any>>
      %c30_i32_164 = arith.constant 30 : i32
      %c0_i32_165 = arith.constant 0 : i32
      %293 = tpu.memref_slice %arg20[%c30_i32_164, %c0_i32_165] : memref<32x256xf32, #tpu.memory_space<vmem>> -> memref<1x256xf32, #tpu.memory_space<vmem>>
      %294 = tpu.memref_slice %arg21[%c30_i32] : memref<32x!tpu.dma_semaphore, #tpu.memory_space<semaphore_mem>> -> memref<1x!tpu.dma_semaphore, #tpu.memory_space<semaphore_mem>>
      %295 = tpu.memref_squeeze %294 : memref<1x!tpu.dma_semaphore, #tpu.memory_space<semaphore_mem>> -> memref<!tpu.dma_semaphore, #tpu.memory_space<semaphore_mem>>
      tpu.enqueue_dma source(%292 : memref<1x256xf32, #tpu.memory_space<any>>) target(%293 : memref<1x256xf32, #tpu.memory_space<vmem>>) target_semaphore(%295 : memref<!tpu.dma_semaphore, #tpu.memory_space<semaphore_mem>>)
      %c31_i32 = arith.constant 31 : i32
      %c0_i32_166 = arith.constant 0 : i32
      %296 = tpu.memref_slice %arg2[%171, %c0_i32_166] : memref<512x256xf32, #tpu.memory_space<any>> -> memref<1x256xf32, #tpu.memory_space<any>>
      %c31_i32_167 = arith.constant 31 : i32
      %c0_i32_168 = arith.constant 0 : i32
      %297 = tpu.memref_slice %arg20[%c31_i32_167, %c0_i32_168] : memref<32x256xf32, #tpu.memory_space<vmem>> -> memref<1x256xf32, #tpu.memory_space<vmem>>
      %298 = tpu.memref_slice %arg21[%c31_i32] : memref<32x!tpu.dma_semaphore, #tpu.memory_space<semaphore_mem>> -> memref<1x!tpu.dma_semaphore, #tpu.memory_space<semaphore_mem>>
      %299 = tpu.memref_squeeze %298 : memref<1x!tpu.dma_semaphore, #tpu.memory_space<semaphore_mem>> -> memref<!tpu.dma_semaphore, #tpu.memory_space<semaphore_mem>>
      tpu.enqueue_dma source(%296 : memref<1x256xf32, #tpu.memory_space<any>>) target(%297 : memref<1x256xf32, #tpu.memory_space<vmem>>) target_semaphore(%299 : memref<!tpu.dma_semaphore, #tpu.memory_space<semaphore_mem>>)
      %c0_i32_169 = arith.constant 0 : i32
      %c0_i32_170 = arith.constant 0 : i32
      %300 = tpu.memref_slice %arg2[%140, %c0_i32_170] : memref<512x256xf32, #tpu.memory_space<any>> -> memref<1x256xf32, #tpu.memory_space<any>>
      %c0_i32_171 = arith.constant 0 : i32
      %c0_i32_172 = arith.constant 0 : i32
      %301 = tpu.memref_slice %arg20[%c0_i32_171, %c0_i32_172] : memref<32x256xf32, #tpu.memory_space<vmem>> -> memref<1x256xf32, #tpu.memory_space<vmem>>
      %302 = tpu.memref_slice %arg21[%c0_i32_169] : memref<32x!tpu.dma_semaphore, #tpu.memory_space<semaphore_mem>> -> memref<1x!tpu.dma_semaphore, #tpu.memory_space<semaphore_mem>>
      %303 = tpu.memref_squeeze %302 : memref<1x!tpu.dma_semaphore, #tpu.memory_space<semaphore_mem>> -> memref<!tpu.dma_semaphore, #tpu.memory_space<semaphore_mem>>
      tpu.wait_dma2 semaphore(%303 : memref<!tpu.dma_semaphore, #tpu.memory_space<semaphore_mem>>) src(%300 : memref<1x256xf32, #tpu.memory_space<any>>) dst(%301 : memref<1x256xf32, #tpu.memory_space<vmem>>)
      %c1_i32_173 = arith.constant 1 : i32
      %c0_i32_174 = arith.constant 0 : i32
      %304 = tpu.memref_slice %arg2[%141, %c0_i32_174] : memref<512x256xf32, #tpu.memory_space<any>> -> memref<1x256xf32, #tpu.memory_space<any>>
      %c1_i32_175 = arith.constant 1 : i32
      %c0_i32_176 = arith.constant 0 : i32
      %305 = tpu.memref_slice %arg20[%c1_i32_175, %c0_i32_176] : memref<32x256xf32, #tpu.memory_space<vmem>> -> memref<1x256xf32, #tpu.memory_space<vmem>>
      %306 = tpu.memref_slice %arg21[%c1_i32_173] : memref<32x!tpu.dma_semaphore, #tpu.memory_space<semaphore_mem>> -> memref<1x!tpu.dma_semaphore, #tpu.memory_space<semaphore_mem>>
      %307 = tpu.memref_squeeze %306 : memref<1x!tpu.dma_semaphore, #tpu.memory_space<semaphore_mem>> -> memref<!tpu.dma_semaphore, #tpu.memory_space<semaphore_mem>>
      tpu.wait_dma2 semaphore(%307 : memref<!tpu.dma_semaphore, #tpu.memory_space<semaphore_mem>>) src(%304 : memref<1x256xf32, #tpu.memory_space<any>>) dst(%305 : memref<1x256xf32, #tpu.memory_space<vmem>>)
      %c2_i32_177 = arith.constant 2 : i32
      %c0_i32_178 = arith.constant 0 : i32
      %308 = tpu.memref_slice %arg2[%142, %c0_i32_178] : memref<512x256xf32, #tpu.memory_space<any>> -> memref<1x256xf32, #tpu.memory_space<any>>
      %c2_i32_179 = arith.constant 2 : i32
      %c0_i32_180 = arith.constant 0 : i32
      %309 = tpu.memref_slice %arg20[%c2_i32_179, %c0_i32_180] : memref<32x256xf32, #tpu.memory_space<vmem>> -> memref<1x256xf32, #tpu.memory_space<vmem>>
      %310 = tpu.memref_slice %arg21[%c2_i32_177] : memref<32x!tpu.dma_semaphore, #tpu.memory_space<semaphore_mem>> -> memref<1x!tpu.dma_semaphore, #tpu.memory_space<semaphore_mem>>
      %311 = tpu.memref_squeeze %310 : memref<1x!tpu.dma_semaphore, #tpu.memory_space<semaphore_mem>> -> memref<!tpu.dma_semaphore, #tpu.memory_space<semaphore_mem>>
      tpu.wait_dma2 semaphore(%311 : memref<!tpu.dma_semaphore, #tpu.memory_space<semaphore_mem>>) src(%308 : memref<1x256xf32, #tpu.memory_space<any>>) dst(%309 : memref<1x256xf32, #tpu.memory_space<vmem>>)
      %c3_i32_181 = arith.constant 3 : i32
      %c0_i32_182 = arith.constant 0 : i32
      %312 = tpu.memref_slice %arg2[%143, %c0_i32_182] : memref<512x256xf32, #tpu.memory_space<any>> -> memref<1x256xf32, #tpu.memory_space<any>>
      %c3_i32_183 = arith.constant 3 : i32
      %c0_i32_184 = arith.constant 0 : i32
      %313 = tpu.memref_slice %arg20[%c3_i32_183, %c0_i32_184] : memref<32x256xf32, #tpu.memory_space<vmem>> -> memref<1x256xf32, #tpu.memory_space<vmem>>
      %314 = tpu.memref_slice %arg21[%c3_i32_181] : memref<32x!tpu.dma_semaphore, #tpu.memory_space<semaphore_mem>> -> memref<1x!tpu.dma_semaphore, #tpu.memory_space<semaphore_mem>>
      %315 = tpu.memref_squeeze %314 : memref<1x!tpu.dma_semaphore, #tpu.memory_space<semaphore_mem>> -> memref<!tpu.dma_semaphore, #tpu.memory_space<semaphore_mem>>
      tpu.wait_dma2 semaphore(%315 : memref<!tpu.dma_semaphore, #tpu.memory_space<semaphore_mem>>) src(%312 : memref<1x256xf32, #tpu.memory_space<any>>) dst(%313 : memref<1x256xf32, #tpu.memory_space<vmem>>)
      %c4_i32_185 = arith.constant 4 : i32
      %c0_i32_186 = arith.constant 0 : i32
      %316 = tpu.memref_slice %arg2[%144, %c0_i32_186] : memref<512x256xf32, #tpu.memory_space<any>> -> memref<1x256xf32, #tpu.memory_space<any>>
      %c4_i32_187 = arith.constant 4 : i32
      %c0_i32_188 = arith.constant 0 : i32
      %317 = tpu.memref_slice %arg20[%c4_i32_187, %c0_i32_188] : memref<32x256xf32, #tpu.memory_space<vmem>> -> memref<1x256xf32, #tpu.memory_space<vmem>>
      %318 = tpu.memref_slice %arg21[%c4_i32_185] : memref<32x!tpu.dma_semaphore, #tpu.memory_space<semaphore_mem>> -> memref<1x!tpu.dma_semaphore, #tpu.memory_space<semaphore_mem>>
      %319 = tpu.memref_squeeze %318 : memref<1x!tpu.dma_semaphore, #tpu.memory_space<semaphore_mem>> -> memref<!tpu.dma_semaphore, #tpu.memory_space<semaphore_mem>>
      tpu.wait_dma2 semaphore(%319 : memref<!tpu.dma_semaphore, #tpu.memory_space<semaphore_mem>>) src(%316 : memref<1x256xf32, #tpu.memory_space<any>>) dst(%317 : memref<1x256xf32, #tpu.memory_space<vmem>>)
      %c5_i32_189 = arith.constant 5 : i32
      %c0_i32_190 = arith.constant 0 : i32
      %320 = tpu.memref_slice %arg2[%145, %c0_i32_190] : memref<512x256xf32, #tpu.memory_space<any>> -> memref<1x256xf32, #tpu.memory_space<any>>
      %c5_i32_191 = arith.constant 5 : i32
      %c0_i32_192 = arith.constant 0 : i32
      %321 = tpu.memref_slice %arg20[%c5_i32_191, %c0_i32_192] : memref<32x256xf32, #tpu.memory_space<vmem>> -> memref<1x256xf32, #tpu.memory_space<vmem>>
      %322 = tpu.memref_slice %arg21[%c5_i32_189] : memref<32x!tpu.dma_semaphore, #tpu.memory_space<semaphore_mem>> -> memref<1x!tpu.dma_semaphore, #tpu.memory_space<semaphore_mem>>
      %323 = tpu.memref_squeeze %322 : memref<1x!tpu.dma_semaphore, #tpu.memory_space<semaphore_mem>> -> memref<!tpu.dma_semaphore, #tpu.memory_space<semaphore_mem>>
      tpu.wait_dma2 semaphore(%323 : memref<!tpu.dma_semaphore, #tpu.memory_space<semaphore_mem>>) src(%320 : memref<1x256xf32, #tpu.memory_space<any>>) dst(%321 : memref<1x256xf32, #tpu.memory_space<vmem>>)
      %c6_i32_193 = arith.constant 6 : i32
      %c0_i32_194 = arith.constant 0 : i32
      %324 = tpu.memref_slice %arg2[%146, %c0_i32_194] : memref<512x256xf32, #tpu.memory_space<any>> -> memref<1x256xf32, #tpu.memory_space<any>>
      %c6_i32_195 = arith.constant 6 : i32
      %c0_i32_196 = arith.constant 0 : i32
      %325 = tpu.memref_slice %arg20[%c6_i32_195, %c0_i32_196] : memref<32x256xf32, #tpu.memory_space<vmem>> -> memref<1x256xf32, #tpu.memory_space<vmem>>
      %326 = tpu.memref_slice %arg21[%c6_i32_193] : memref<32x!tpu.dma_semaphore, #tpu.memory_space<semaphore_mem>> -> memref<1x!tpu.dma_semaphore, #tpu.memory_space<semaphore_mem>>
      %327 = tpu.memref_squeeze %326 : memref<1x!tpu.dma_semaphore, #tpu.memory_space<semaphore_mem>> -> memref<!tpu.dma_semaphore, #tpu.memory_space<semaphore_mem>>
      tpu.wait_dma2 semaphore(%327 : memref<!tpu.dma_semaphore, #tpu.memory_space<semaphore_mem>>) src(%324 : memref<1x256xf32, #tpu.memory_space<any>>) dst(%325 : memref<1x256xf32, #tpu.memory_space<vmem>>)
      %c7_i32_197 = arith.constant 7 : i32
      %c0_i32_198 = arith.constant 0 : i32
      %328 = tpu.memref_slice %arg2[%147, %c0_i32_198] : memref<512x256xf32, #tpu.memory_space<any>> -> memref<1x256xf32, #tpu.memory_space<any>>
      %c7_i32_199 = arith.constant 7 : i32
      %c0_i32_200 = arith.constant 0 : i32
      %329 = tpu.memref_slice %arg20[%c7_i32_199, %c0_i32_200] : memref<32x256xf32, #tpu.memory_space<vmem>> -> memref<1x256xf32, #tpu.memory_space<vmem>>
      %330 = tpu.memref_slice %arg21[%c7_i32_197] : memref<32x!tpu.dma_semaphore, #tpu.memory_space<semaphore_mem>> -> memref<1x!tpu.dma_semaphore, #tpu.memory_space<semaphore_mem>>
      %331 = tpu.memref_squeeze %330 : memref<1x!tpu.dma_semaphore, #tpu.memory_space<semaphore_mem>> -> memref<!tpu.dma_semaphore, #tpu.memory_space<semaphore_mem>>
      tpu.wait_dma2 semaphore(%331 : memref<!tpu.dma_semaphore, #tpu.memory_space<semaphore_mem>>) src(%328 : memref<1x256xf32, #tpu.memory_space<any>>) dst(%329 : memref<1x256xf32, #tpu.memory_space<vmem>>)
      %c8_i32_201 = arith.constant 8 : i32
      %c0_i32_202 = arith.constant 0 : i32
      %332 = tpu.memref_slice %arg2[%148, %c0_i32_202] : memref<512x256xf32, #tpu.memory_space<any>> -> memref<1x256xf32, #tpu.memory_space<any>>
      %c8_i32_203 = arith.constant 8 : i32
      %c0_i32_204 = arith.constant 0 : i32
      %333 = tpu.memref_slice %arg20[%c8_i32_203, %c0_i32_204] : memref<32x256xf32, #tpu.memory_space<vmem>> -> memref<1x256xf32, #tpu.memory_space<vmem>>
      %334 = tpu.memref_slice %arg21[%c8_i32_201] : memref<32x!tpu.dma_semaphore, #tpu.memory_space<semaphore_mem>> -> memref<1x!tpu.dma_semaphore, #tpu.memory_space<semaphore_mem>>
      %335 = tpu.memref_squeeze %334 : memref<1x!tpu.dma_semaphore, #tpu.memory_space<semaphore_mem>> -> memref<!tpu.dma_semaphore, #tpu.memory_space<semaphore_mem>>
      tpu.wait_dma2 semaphore(%335 : memref<!tpu.dma_semaphore, #tpu.memory_space<semaphore_mem>>) src(%332 : memref<1x256xf32, #tpu.memory_space<any>>) dst(%333 : memref<1x256xf32, #tpu.memory_space<vmem>>)
      %c9_i32_205 = arith.constant 9 : i32
      %c0_i32_206 = arith.constant 0 : i32
      %336 = tpu.memref_slice %arg2[%149, %c0_i32_206] : memref<512x256xf32, #tpu.memory_space<any>> -> memref<1x256xf32, #tpu.memory_space<any>>
      %c9_i32_207 = arith.constant 9 : i32
      %c0_i32_208 = arith.constant 0 : i32
      %337 = tpu.memref_slice %arg20[%c9_i32_207, %c0_i32_208] : memref<32x256xf32, #tpu.memory_space<vmem>> -> memref<1x256xf32, #tpu.memory_space<vmem>>
      %338 = tpu.memref_slice %arg21[%c9_i32_205] : memref<32x!tpu.dma_semaphore, #tpu.memory_space<semaphore_mem>> -> memref<1x!tpu.dma_semaphore, #tpu.memory_space<semaphore_mem>>
      %339 = tpu.memref_squeeze %338 : memref<1x!tpu.dma_semaphore, #tpu.memory_space<semaphore_mem>> -> memref<!tpu.dma_semaphore, #tpu.memory_space<semaphore_mem>>
      tpu.wait_dma2 semaphore(%339 : memref<!tpu.dma_semaphore, #tpu.memory_space<semaphore_mem>>) src(%336 : memref<1x256xf32, #tpu.memory_space<any>>) dst(%337 : memref<1x256xf32, #tpu.memory_space<vmem>>)
      %c10_i32_209 = arith.constant 10 : i32
      %c0_i32_210 = arith.constant 0 : i32
      %340 = tpu.memref_slice %arg2[%150, %c0_i32_210] : memref<512x256xf32, #tpu.memory_space<any>> -> memref<1x256xf32, #tpu.memory_space<any>>
      %c10_i32_211 = arith.constant 10 : i32
      %c0_i32_212 = arith.constant 0 : i32
      %341 = tpu.memref_slice %arg20[%c10_i32_211, %c0_i32_212] : memref<32x256xf32, #tpu.memory_space<vmem>> -> memref<1x256xf32, #tpu.memory_space<vmem>>
      %342 = tpu.memref_slice %arg21[%c10_i32_209] : memref<32x!tpu.dma_semaphore, #tpu.memory_space<semaphore_mem>> -> memref<1x!tpu.dma_semaphore, #tpu.memory_space<semaphore_mem>>
      %343 = tpu.memref_squeeze %342 : memref<1x!tpu.dma_semaphore, #tpu.memory_space<semaphore_mem>> -> memref<!tpu.dma_semaphore, #tpu.memory_space<semaphore_mem>>
      tpu.wait_dma2 semaphore(%343 : memref<!tpu.dma_semaphore, #tpu.memory_space<semaphore_mem>>) src(%340 : memref<1x256xf32, #tpu.memory_space<any>>) dst(%341 : memref<1x256xf32, #tpu.memory_space<vmem>>)
      %c11_i32_213 = arith.constant 11 : i32
      %c0_i32_214 = arith.constant 0 : i32
      %344 = tpu.memref_slice %arg2[%151, %c0_i32_214] : memref<512x256xf32, #tpu.memory_space<any>> -> memref<1x256xf32, #tpu.memory_space<any>>
      %c11_i32_215 = arith.constant 11 : i32
      %c0_i32_216 = arith.constant 0 : i32
      %345 = tpu.memref_slice %arg20[%c11_i32_215, %c0_i32_216] : memref<32x256xf32, #tpu.memory_space<vmem>> -> memref<1x256xf32, #tpu.memory_space<vmem>>
      %346 = tpu.memref_slice %arg21[%c11_i32_213] : memref<32x!tpu.dma_semaphore, #tpu.memory_space<semaphore_mem>> -> memref<1x!tpu.dma_semaphore, #tpu.memory_space<semaphore_mem>>
      %347 = tpu.memref_squeeze %346 : memref<1x!tpu.dma_semaphore, #tpu.memory_space<semaphore_mem>> -> memref<!tpu.dma_semaphore, #tpu.memory_space<semaphore_mem>>
      tpu.wait_dma2 semaphore(%347 : memref<!tpu.dma_semaphore, #tpu.memory_space<semaphore_mem>>) src(%344 : memref<1x256xf32, #tpu.memory_space<any>>) dst(%345 : memref<1x256xf32, #tpu.memory_space<vmem>>)
      %c12_i32_217 = arith.constant 12 : i32
      %c0_i32_218 = arith.constant 0 : i32
      %348 = tpu.memref_slice %arg2[%152, %c0_i32_218] : memref<512x256xf32, #tpu.memory_space<any>> -> memref<1x256xf32, #tpu.memory_space<any>>
      %c12_i32_219 = arith.constant 12 : i32
      %c0_i32_220 = arith.constant 0 : i32
      %349 = tpu.memref_slice %arg20[%c12_i32_219, %c0_i32_220] : memref<32x256xf32, #tpu.memory_space<vmem>> -> memref<1x256xf32, #tpu.memory_space<vmem>>
      %350 = tpu.memref_slice %arg21[%c12_i32_217] : memref<32x!tpu.dma_semaphore, #tpu.memory_space<semaphore_mem>> -> memref<1x!tpu.dma_semaphore, #tpu.memory_space<semaphore_mem>>
      %351 = tpu.memref_squeeze %350 : memref<1x!tpu.dma_semaphore, #tpu.memory_space<semaphore_mem>> -> memref<!tpu.dma_semaphore, #tpu.memory_space<semaphore_mem>>
      tpu.wait_dma2 semaphore(%351 : memref<!tpu.dma_semaphore, #tpu.memory_space<semaphore_mem>>) src(%348 : memref<1x256xf32, #tpu.memory_space<any>>) dst(%349 : memref<1x256xf32, #tpu.memory_space<vmem>>)
      %c13_i32_221 = arith.constant 13 : i32
      %c0_i32_222 = arith.constant 0 : i32
      %352 = tpu.memref_slice %arg2[%153, %c0_i32_222] : memref<512x256xf32, #tpu.memory_space<any>> -> memref<1x256xf32, #tpu.memory_space<any>>
      %c13_i32_223 = arith.constant 13 : i32
      %c0_i32_224 = arith.constant 0 : i32
      %353 = tpu.memref_slice %arg20[%c13_i32_223, %c0_i32_224] : memref<32x256xf32, #tpu.memory_space<vmem>> -> memref<1x256xf32, #tpu.memory_space<vmem>>
      %354 = tpu.memref_slice %arg21[%c13_i32_221] : memref<32x!tpu.dma_semaphore, #tpu.memory_space<semaphore_mem>> -> memref<1x!tpu.dma_semaphore, #tpu.memory_space<semaphore_mem>>
      %355 = tpu.memref_squeeze %354 : memref<1x!tpu.dma_semaphore, #tpu.memory_space<semaphore_mem>> -> memref<!tpu.dma_semaphore, #tpu.memory_space<semaphore_mem>>
      tpu.wait_dma2 semaphore(%355 : memref<!tpu.dma_semaphore, #tpu.memory_space<semaphore_mem>>) src(%352 : memref<1x256xf32, #tpu.memory_space<any>>) dst(%353 : memref<1x256xf32, #tpu.memory_space<vmem>>)
      %c14_i32_225 = arith.constant 14 : i32
      %c0_i32_226 = arith.constant 0 : i32
      %356 = tpu.memref_slice %arg2[%154, %c0_i32_226] : memref<512x256xf32, #tpu.memory_space<any>> -> memref<1x256xf32, #tpu.memory_space<any>>
      %c14_i32_227 = arith.constant 14 : i32
      %c0_i32_228 = arith.constant 0 : i32
      %357 = tpu.memref_slice %arg20[%c14_i32_227, %c0_i32_228] : memref<32x256xf32, #tpu.memory_space<vmem>> -> memref<1x256xf32, #tpu.memory_space<vmem>>
      %358 = tpu.memref_slice %arg21[%c14_i32_225] : memref<32x!tpu.dma_semaphore, #tpu.memory_space<semaphore_mem>> -> memref<1x!tpu.dma_semaphore, #tpu.memory_space<semaphore_mem>>
      %359 = tpu.memref_squeeze %358 : memref<1x!tpu.dma_semaphore, #tpu.memory_space<semaphore_mem>> -> memref<!tpu.dma_semaphore, #tpu.memory_space<semaphore_mem>>
      tpu.wait_dma2 semaphore(%359 : memref<!tpu.dma_semaphore, #tpu.memory_space<semaphore_mem>>) src(%356 : memref<1x256xf32, #tpu.memory_space<any>>) dst(%357 : memref<1x256xf32, #tpu.memory_space<vmem>>)
      %c15_i32_229 = arith.constant 15 : i32
      %c0_i32_230 = arith.constant 0 : i32
      %360 = tpu.memref_slice %arg2[%155, %c0_i32_230] : memref<512x256xf32, #tpu.memory_space<any>> -> memref<1x256xf32, #tpu.memory_space<any>>
      %c15_i32_231 = arith.constant 15 : i32
      %c0_i32_232 = arith.constant 0 : i32
      %361 = tpu.memref_slice %arg20[%c15_i32_231, %c0_i32_232] : memref<32x256xf32, #tpu.memory_space<vmem>> -> memref<1x256xf32, #tpu.memory_space<vmem>>
      %362 = tpu.memref_slice %arg21[%c15_i32_229] : memref<32x!tpu.dma_semaphore, #tpu.memory_space<semaphore_mem>> -> memref<1x!tpu.dma_semaphore, #tpu.memory_space<semaphore_mem>>
      %363 = tpu.memref_squeeze %362 : memref<1x!tpu.dma_semaphore, #tpu.memory_space<semaphore_mem>> -> memref<!tpu.dma_semaphore, #tpu.memory_space<semaphore_mem>>
      tpu.wait_dma2 semaphore(%363 : memref<!tpu.dma_semaphore, #tpu.memory_space<semaphore_mem>>) src(%360 : memref<1x256xf32, #tpu.memory_space<any>>) dst(%361 : memref<1x256xf32, #tpu.memory_space<vmem>>)
      %c16_i32_233 = arith.constant 16 : i32
      %c0_i32_234 = arith.constant 0 : i32
      %364 = tpu.memref_slice %arg2[%156, %c0_i32_234] : memref<512x256xf32, #tpu.memory_space<any>> -> memref<1x256xf32, #tpu.memory_space<any>>
      %c16_i32_235 = arith.constant 16 : i32
      %c0_i32_236 = arith.constant 0 : i32
      %365 = tpu.memref_slice %arg20[%c16_i32_235, %c0_i32_236] : memref<32x256xf32, #tpu.memory_space<vmem>> -> memref<1x256xf32, #tpu.memory_space<vmem>>
      %366 = tpu.memref_slice %arg21[%c16_i32_233] : memref<32x!tpu.dma_semaphore, #tpu.memory_space<semaphore_mem>> -> memref<1x!tpu.dma_semaphore, #tpu.memory_space<semaphore_mem>>
      %367 = tpu.memref_squeeze %366 : memref<1x!tpu.dma_semaphore, #tpu.memory_space<semaphore_mem>> -> memref<!tpu.dma_semaphore, #tpu.memory_space<semaphore_mem>>
      tpu.wait_dma2 semaphore(%367 : memref<!tpu.dma_semaphore, #tpu.memory_space<semaphore_mem>>) src(%364 : memref<1x256xf32, #tpu.memory_space<any>>) dst(%365 : memref<1x256xf32, #tpu.memory_space<vmem>>)
      %c17_i32_237 = arith.constant 17 : i32
      %c0_i32_238 = arith.constant 0 : i32
      %368 = tpu.memref_slice %arg2[%157, %c0_i32_238] : memref<512x256xf32, #tpu.memory_space<any>> -> memref<1x256xf32, #tpu.memory_space<any>>
      %c17_i32_239 = arith.constant 17 : i32
      %c0_i32_240 = arith.constant 0 : i32
      %369 = tpu.memref_slice %arg20[%c17_i32_239, %c0_i32_240] : memref<32x256xf32, #tpu.memory_space<vmem>> -> memref<1x256xf32, #tpu.memory_space<vmem>>
      %370 = tpu.memref_slice %arg21[%c17_i32_237] : memref<32x!tpu.dma_semaphore, #tpu.memory_space<semaphore_mem>> -> memref<1x!tpu.dma_semaphore, #tpu.memory_space<semaphore_mem>>
      %371 = tpu.memref_squeeze %370 : memref<1x!tpu.dma_semaphore, #tpu.memory_space<semaphore_mem>> -> memref<!tpu.dma_semaphore, #tpu.memory_space<semaphore_mem>>
      tpu.wait_dma2 semaphore(%371 : memref<!tpu.dma_semaphore, #tpu.memory_space<semaphore_mem>>) src(%368 : memref<1x256xf32, #tpu.memory_space<any>>) dst(%369 : memref<1x256xf32, #tpu.memory_space<vmem>>)
      %c18_i32_241 = arith.constant 18 : i32
      %c0_i32_242 = arith.constant 0 : i32
      %372 = tpu.memref_slice %arg2[%158, %c0_i32_242] : memref<512x256xf32, #tpu.memory_space<any>> -> memref<1x256xf32, #tpu.memory_space<any>>
      %c18_i32_243 = arith.constant 18 : i32
      %c0_i32_244 = arith.constant 0 : i32
      %373 = tpu.memref_slice %arg20[%c18_i32_243, %c0_i32_244] : memref<32x256xf32, #tpu.memory_space<vmem>> -> memref<1x256xf32, #tpu.memory_space<vmem>>
      %374 = tpu.memref_slice %arg21[%c18_i32_241] : memref<32x!tpu.dma_semaphore, #tpu.memory_space<semaphore_mem>> -> memref<1x!tpu.dma_semaphore, #tpu.memory_space<semaphore_mem>>
      %375 = tpu.memref_squeeze %374 : memref<1x!tpu.dma_semaphore, #tpu.memory_space<semaphore_mem>> -> memref<!tpu.dma_semaphore, #tpu.memory_space<semaphore_mem>>
      tpu.wait_dma2 semaphore(%375 : memref<!tpu.dma_semaphore, #tpu.memory_space<semaphore_mem>>) src(%372 : memref<1x256xf32, #tpu.memory_space<any>>) dst(%373 : memref<1x256xf32, #tpu.memory_space<vmem>>)
      %c19_i32_245 = arith.constant 19 : i32
      %c0_i32_246 = arith.constant 0 : i32
      %376 = tpu.memref_slice %arg2[%159, %c0_i32_246] : memref<512x256xf32, #tpu.memory_space<any>> -> memref<1x256xf32, #tpu.memory_space<any>>
      %c19_i32_247 = arith.constant 19 : i32
      %c0_i32_248 = arith.constant 0 : i32
      %377 = tpu.memref_slice %arg20[%c19_i32_247, %c0_i32_248] : memref<32x256xf32, #tpu.memory_space<vmem>> -> memref<1x256xf32, #tpu.memory_space<vmem>>
      %378 = tpu.memref_slice %arg21[%c19_i32_245] : memref<32x!tpu.dma_semaphore, #tpu.memory_space<semaphore_mem>> -> memref<1x!tpu.dma_semaphore, #tpu.memory_space<semaphore_mem>>
      %379 = tpu.memref_squeeze %378 : memref<1x!tpu.dma_semaphore, #tpu.memory_space<semaphore_mem>> -> memref<!tpu.dma_semaphore, #tpu.memory_space<semaphore_mem>>
      tpu.wait_dma2 semaphore(%379 : memref<!tpu.dma_semaphore, #tpu.memory_space<semaphore_mem>>) src(%376 : memref<1x256xf32, #tpu.memory_space<any>>) dst(%377 : memref<1x256xf32, #tpu.memory_space<vmem>>)
      %c20_i32_249 = arith.constant 20 : i32
      %c0_i32_250 = arith.constant 0 : i32
      %380 = tpu.memref_slice %arg2[%160, %c0_i32_250] : memref<512x256xf32, #tpu.memory_space<any>> -> memref<1x256xf32, #tpu.memory_space<any>>
      %c20_i32_251 = arith.constant 20 : i32
      %c0_i32_252 = arith.constant 0 : i32
      %381 = tpu.memref_slice %arg20[%c20_i32_251, %c0_i32_252] : memref<32x256xf32, #tpu.memory_space<vmem>> -> memref<1x256xf32, #tpu.memory_space<vmem>>
      %382 = tpu.memref_slice %arg21[%c20_i32_249] : memref<32x!tpu.dma_semaphore, #tpu.memory_space<semaphore_mem>> -> memref<1x!tpu.dma_semaphore, #tpu.memory_space<semaphore_mem>>
      %383 = tpu.memref_squeeze %382 : memref<1x!tpu.dma_semaphore, #tpu.memory_space<semaphore_mem>> -> memref<!tpu.dma_semaphore, #tpu.memory_space<semaphore_mem>>
      tpu.wait_dma2 semaphore(%383 : memref<!tpu.dma_semaphore, #tpu.memory_space<semaphore_mem>>) src(%380 : memref<1x256xf32, #tpu.memory_space<any>>) dst(%381 : memref<1x256xf32, #tpu.memory_space<vmem>>)
      %c21_i32_253 = arith.constant 21 : i32
      %c0_i32_254 = arith.constant 0 : i32
      %384 = tpu.memref_slice %arg2[%161, %c0_i32_254] : memref<512x256xf32, #tpu.memory_space<any>> -> memref<1x256xf32, #tpu.memory_space<any>>
      %c21_i32_255 = arith.constant 21 : i32
      %c0_i32_256 = arith.constant 0 : i32
      %385 = tpu.memref_slice %arg20[%c21_i32_255, %c0_i32_256] : memref<32x256xf32, #tpu.memory_space<vmem>> -> memref<1x256xf32, #tpu.memory_space<vmem>>
      %386 = tpu.memref_slice %arg21[%c21_i32_253] : memref<32x!tpu.dma_semaphore, #tpu.memory_space<semaphore_mem>> -> memref<1x!tpu.dma_semaphore, #tpu.memory_space<semaphore_mem>>
      %387 = tpu.memref_squeeze %386 : memref<1x!tpu.dma_semaphore, #tpu.memory_space<semaphore_mem>> -> memref<!tpu.dma_semaphore, #tpu.memory_space<semaphore_mem>>
      tpu.wait_dma2 semaphore(%387 : memref<!tpu.dma_semaphore, #tpu.memory_space<semaphore_mem>>) src(%384 : memref<1x256xf32, #tpu.memory_space<any>>) dst(%385 : memref<1x256xf32, #tpu.memory_space<vmem>>)
      %c22_i32_257 = arith.constant 22 : i32
      %c0_i32_258 = arith.constant 0 : i32
      %388 = tpu.memref_slice %arg2[%162, %c0_i32_258] : memref<512x256xf32, #tpu.memory_space<any>> -> memref<1x256xf32, #tpu.memory_space<any>>
      %c22_i32_259 = arith.constant 22 : i32
      %c0_i32_260 = arith.constant 0 : i32
      %389 = tpu.memref_slice %arg20[%c22_i32_259, %c0_i32_260] : memref<32x256xf32, #tpu.memory_space<vmem>> -> memref<1x256xf32, #tpu.memory_space<vmem>>
      %390 = tpu.memref_slice %arg21[%c22_i32_257] : memref<32x!tpu.dma_semaphore, #tpu.memory_space<semaphore_mem>> -> memref<1x!tpu.dma_semaphore, #tpu.memory_space<semaphore_mem>>
      %391 = tpu.memref_squeeze %390 : memref<1x!tpu.dma_semaphore, #tpu.memory_space<semaphore_mem>> -> memref<!tpu.dma_semaphore, #tpu.memory_space<semaphore_mem>>
      tpu.wait_dma2 semaphore(%391 : memref<!tpu.dma_semaphore, #tpu.memory_space<semaphore_mem>>) src(%388 : memref<1x256xf32, #tpu.memory_space<any>>) dst(%389 : memref<1x256xf32, #tpu.memory_space<vmem>>)
      %c23_i32_261 = arith.constant 23 : i32
      %c0_i32_262 = arith.constant 0 : i32
      %392 = tpu.memref_slice %arg2[%163, %c0_i32_262] : memref<512x256xf32, #tpu.memory_space<any>> -> memref<1x256xf32, #tpu.memory_space<any>>
      %c23_i32_263 = arith.constant 23 : i32
      %c0_i32_264 = arith.constant 0 : i32
      %393 = tpu.memref_slice %arg20[%c23_i32_263, %c0_i32_264] : memref<32x256xf32, #tpu.memory_space<vmem>> -> memref<1x256xf32, #tpu.memory_space<vmem>>
      %394 = tpu.memref_slice %arg21[%c23_i32_261] : memref<32x!tpu.dma_semaphore, #tpu.memory_space<semaphore_mem>> -> memref<1x!tpu.dma_semaphore, #tpu.memory_space<semaphore_mem>>
      %395 = tpu.memref_squeeze %394 : memref<1x!tpu.dma_semaphore, #tpu.memory_space<semaphore_mem>> -> memref<!tpu.dma_semaphore, #tpu.memory_space<semaphore_mem>>
      tpu.wait_dma2 semaphore(%395 : memref<!tpu.dma_semaphore, #tpu.memory_space<semaphore_mem>>) src(%392 : memref<1x256xf32, #tpu.memory_space<any>>) dst(%393 : memref<1x256xf32, #tpu.memory_space<vmem>>)
      %c24_i32_265 = arith.constant 24 : i32
      %c0_i32_266 = arith.constant 0 : i32
      %396 = tpu.memref_slice %arg2[%164, %c0_i32_266] : memref<512x256xf32, #tpu.memory_space<any>> -> memref<1x256xf32, #tpu.memory_space<any>>
      %c24_i32_267 = arith.constant 24 : i32
      %c0_i32_268 = arith.constant 0 : i32
      %397 = tpu.memref_slice %arg20[%c24_i32_267, %c0_i32_268] : memref<32x256xf32, #tpu.memory_space<vmem>> -> memref<1x256xf32, #tpu.memory_space<vmem>>
      %398 = tpu.memref_slice %arg21[%c24_i32_265] : memref<32x!tpu.dma_semaphore, #tpu.memory_space<semaphore_mem>> -> memref<1x!tpu.dma_semaphore, #tpu.memory_space<semaphore_mem>>
      %399 = tpu.memref_squeeze %398 : memref<1x!tpu.dma_semaphore, #tpu.memory_space<semaphore_mem>> -> memref<!tpu.dma_semaphore, #tpu.memory_space<semaphore_mem>>
      tpu.wait_dma2 semaphore(%399 : memref<!tpu.dma_semaphore, #tpu.memory_space<semaphore_mem>>) src(%396 : memref<1x256xf32, #tpu.memory_space<any>>) dst(%397 : memref<1x256xf32, #tpu.memory_space<vmem>>)
      %c25_i32_269 = arith.constant 25 : i32
      %c0_i32_270 = arith.constant 0 : i32
      %400 = tpu.memref_slice %arg2[%165, %c0_i32_270] : memref<512x256xf32, #tpu.memory_space<any>> -> memref<1x256xf32, #tpu.memory_space<any>>
      %c25_i32_271 = arith.constant 25 : i32
      %c0_i32_272 = arith.constant 0 : i32
      %401 = tpu.memref_slice %arg20[%c25_i32_271, %c0_i32_272] : memref<32x256xf32, #tpu.memory_space<vmem>> -> memref<1x256xf32, #tpu.memory_space<vmem>>
      %402 = tpu.memref_slice %arg21[%c25_i32_269] : memref<32x!tpu.dma_semaphore, #tpu.memory_space<semaphore_mem>> -> memref<1x!tpu.dma_semaphore, #tpu.memory_space<semaphore_mem>>
      %403 = tpu.memref_squeeze %402 : memref<1x!tpu.dma_semaphore, #tpu.memory_space<semaphore_mem>> -> memref<!tpu.dma_semaphore, #tpu.memory_space<semaphore_mem>>
      tpu.wait_dma2 semaphore(%403 : memref<!tpu.dma_semaphore, #tpu.memory_space<semaphore_mem>>) src(%400 : memref<1x256xf32, #tpu.memory_space<any>>) dst(%401 : memref<1x256xf32, #tpu.memory_space<vmem>>)
      %c26_i32_273 = arith.constant 26 : i32
      %c0_i32_274 = arith.constant 0 : i32
      %404 = tpu.memref_slice %arg2[%166, %c0_i32_274] : memref<512x256xf32, #tpu.memory_space<any>> -> memref<1x256xf32, #tpu.memory_space<any>>
      %c26_i32_275 = arith.constant 26 : i32
      %c0_i32_276 = arith.constant 0 : i32
      %405 = tpu.memref_slice %arg20[%c26_i32_275, %c0_i32_276] : memref<32x256xf32, #tpu.memory_space<vmem>> -> memref<1x256xf32, #tpu.memory_space<vmem>>
      %406 = tpu.memref_slice %arg21[%c26_i32_273] : memref<32x!tpu.dma_semaphore, #tpu.memory_space<semaphore_mem>> -> memref<1x!tpu.dma_semaphore, #tpu.memory_space<semaphore_mem>>
      %407 = tpu.memref_squeeze %406 : memref<1x!tpu.dma_semaphore, #tpu.memory_space<semaphore_mem>> -> memref<!tpu.dma_semaphore, #tpu.memory_space<semaphore_mem>>
      tpu.wait_dma2 semaphore(%407 : memref<!tpu.dma_semaphore, #tpu.memory_space<semaphore_mem>>) src(%404 : memref<1x256xf32, #tpu.memory_space<any>>) dst(%405 : memref<1x256xf32, #tpu.memory_space<vmem>>)
      %c27_i32_277 = arith.constant 27 : i32
      %c0_i32_278 = arith.constant 0 : i32
      %408 = tpu.memref_slice %arg2[%167, %c0_i32_278] : memref<512x256xf32, #tpu.memory_space<any>> -> memref<1x256xf32, #tpu.memory_space<any>>
      %c27_i32_279 = arith.constant 27 : i32
      %c0_i32_280 = arith.constant 0 : i32
      %409 = tpu.memref_slice %arg20[%c27_i32_279, %c0_i32_280] : memref<32x256xf32, #tpu.memory_space<vmem>> -> memref<1x256xf32, #tpu.memory_space<vmem>>
      %410 = tpu.memref_slice %arg21[%c27_i32_277] : memref<32x!tpu.dma_semaphore, #tpu.memory_space<semaphore_mem>> -> memref<1x!tpu.dma_semaphore, #tpu.memory_space<semaphore_mem>>
      %411 = tpu.memref_squeeze %410 : memref<1x!tpu.dma_semaphore, #tpu.memory_space<semaphore_mem>> -> memref<!tpu.dma_semaphore, #tpu.memory_space<semaphore_mem>>
      tpu.wait_dma2 semaphore(%411 : memref<!tpu.dma_semaphore, #tpu.memory_space<semaphore_mem>>) src(%408 : memref<1x256xf32, #tpu.memory_space<any>>) dst(%409 : memref<1x256xf32, #tpu.memory_space<vmem>>)
      %c28_i32_281 = arith.constant 28 : i32
      %c0_i32_282 = arith.constant 0 : i32
      %412 = tpu.memref_slice %arg2[%168, %c0_i32_282] : memref<512x256xf32, #tpu.memory_space<any>> -> memref<1x256xf32, #tpu.memory_space<any>>
      %c28_i32_283 = arith.constant 28 : i32
      %c0_i32_284 = arith.constant 0 : i32
      %413 = tpu.memref_slice %arg20[%c28_i32_283, %c0_i32_284] : memref<32x256xf32, #tpu.memory_space<vmem>> -> memref<1x256xf32, #tpu.memory_space<vmem>>
      %414 = tpu.memref_slice %arg21[%c28_i32_281] : memref<32x!tpu.dma_semaphore, #tpu.memory_space<semaphore_mem>> -> memref<1x!tpu.dma_semaphore, #tpu.memory_space<semaphore_mem>>
      %415 = tpu.memref_squeeze %414 : memref<1x!tpu.dma_semaphore, #tpu.memory_space<semaphore_mem>> -> memref<!tpu.dma_semaphore, #tpu.memory_space<semaphore_mem>>
      tpu.wait_dma2 semaphore(%415 : memref<!tpu.dma_semaphore, #tpu.memory_space<semaphore_mem>>) src(%412 : memref<1x256xf32, #tpu.memory_space<any>>) dst(%413 : memref<1x256xf32, #tpu.memory_space<vmem>>)
      %c29_i32_285 = arith.constant 29 : i32
      %c0_i32_286 = arith.constant 0 : i32
      %416 = tpu.memref_slice %arg2[%169, %c0_i32_286] : memref<512x256xf32, #tpu.memory_space<any>> -> memref<1x256xf32, #tpu.memory_space<any>>
      %c29_i32_287 = arith.constant 29 : i32
      %c0_i32_288 = arith.constant 0 : i32
      %417 = tpu.memref_slice %arg20[%c29_i32_287, %c0_i32_288] : memref<32x256xf32, #tpu.memory_space<vmem>> -> memref<1x256xf32, #tpu.memory_space<vmem>>
      %418 = tpu.memref_slice %arg21[%c29_i32_285] : memref<32x!tpu.dma_semaphore, #tpu.memory_space<semaphore_mem>> -> memref<1x!tpu.dma_semaphore, #tpu.memory_space<semaphore_mem>>
      %419 = tpu.memref_squeeze %418 : memref<1x!tpu.dma_semaphore, #tpu.memory_space<semaphore_mem>> -> memref<!tpu.dma_semaphore, #tpu.memory_space<semaphore_mem>>
      tpu.wait_dma2 semaphore(%419 : memref<!tpu.dma_semaphore, #tpu.memory_space<semaphore_mem>>) src(%416 : memref<1x256xf32, #tpu.memory_space<any>>) dst(%417 : memref<1x256xf32, #tpu.memory_space<vmem>>)
      %c30_i32_289 = arith.constant 30 : i32
      %c0_i32_290 = arith.constant 0 : i32
      %420 = tpu.memref_slice %arg2[%170, %c0_i32_290] : memref<512x256xf32, #tpu.memory_space<any>> -> memref<1x256xf32, #tpu.memory_space<any>>
      %c30_i32_291 = arith.constant 30 : i32
      %c0_i32_292 = arith.constant 0 : i32
      %421 = tpu.memref_slice %arg20[%c30_i32_291, %c0_i32_292] : memref<32x256xf32, #tpu.memory_space<vmem>> -> memref<1x256xf32, #tpu.memory_space<vmem>>
      %422 = tpu.memref_slice %arg21[%c30_i32_289] : memref<32x!tpu.dma_semaphore, #tpu.memory_space<semaphore_mem>> -> memref<1x!tpu.dma_semaphore, #tpu.memory_space<semaphore_mem>>
      %423 = tpu.memref_squeeze %422 : memref<1x!tpu.dma_semaphore, #tpu.memory_space<semaphore_mem>> -> memref<!tpu.dma_semaphore, #tpu.memory_space<semaphore_mem>>
      tpu.wait_dma2 semaphore(%423 : memref<!tpu.dma_semaphore, #tpu.memory_space<semaphore_mem>>) src(%420 : memref<1x256xf32, #tpu.memory_space<any>>) dst(%421 : memref<1x256xf32, #tpu.memory_space<vmem>>)
      %c31_i32_293 = arith.constant 31 : i32
      %c0_i32_294 = arith.constant 0 : i32
      %424 = tpu.memref_slice %arg2[%171, %c0_i32_294] : memref<512x256xf32, #tpu.memory_space<any>> -> memref<1x256xf32, #tpu.memory_space<any>>
      %c31_i32_295 = arith.constant 31 : i32
      %c0_i32_296 = arith.constant 0 : i32
      %425 = tpu.memref_slice %arg20[%c31_i32_295, %c0_i32_296] : memref<32x256xf32, #tpu.memory_space<vmem>> -> memref<1x256xf32, #tpu.memory_space<vmem>>
      %426 = tpu.memref_slice %arg21[%c31_i32_293] : memref<32x!tpu.dma_semaphore, #tpu.memory_space<semaphore_mem>> -> memref<1x!tpu.dma_semaphore, #tpu.memory_space<semaphore_mem>>
      %427 = tpu.memref_squeeze %426 : memref<1x!tpu.dma_semaphore, #tpu.memory_space<semaphore_mem>> -> memref<!tpu.dma_semaphore, #tpu.memory_space<semaphore_mem>>
      tpu.wait_dma2 semaphore(%427 : memref<!tpu.dma_semaphore, #tpu.memory_space<semaphore_mem>>) src(%424 : memref<1x256xf32, #tpu.memory_space<any>>) dst(%425 : memref<1x256xf32, #tpu.memory_space<vmem>>)
      %c0_297 = arith.constant 0 : index
      %c0_298 = arith.constant 0 : index
      %428 = vector.load %arg20[%c0_297, %c0_298] : memref<32x256xf32, #tpu.memory_space<vmem>>, vector<32x256xf32>
      %c0_299 = arith.constant 0 : index
      %c0_300 = arith.constant 0 : index
      %429 = vector.load %arg3[%c0_299, %c0_300] : memref<32x256xf32, #tpu.memory_space<vmem>>, vector<32x256xf32>
      %430 = arith.addf %428, %429 : vector<32x256xf32>
      %c0_301 = arith.constant 0 : index
      %c0_302 = arith.constant 0 : index
      %431 = vector.load %arg20[%c0_301, %c0_302] : memref<32x256xf32, #tpu.memory_space<vmem>>, vector<32x256xf32>
      tpu.vector_store %arg20[%c0_301, %c0_302], %430 {strides = array<i32>} : memref<32x256xf32, #tpu.memory_space<vmem>>, vector<32x256xf32>,
    } else {
    }
    %c0 = arith.constant 0 : index
    %c0_1 = arith.constant 0 : index
    %3 = vector.load %arg20[%c0, %c0_1] : memref<32x256xf32, #tpu.memory_space<vmem>>, vector<32x256xf32>
    %c0_2 = arith.constant 0 : index
    %c0_3 = arith.constant 0 : index
    %c0_4 = arith.constant 0 : index
    %4 = vector.load %arg5[%c0_2, %c0_3, %c0_4] : memref<1x1x256xf32, #tpu.memory_space<vmem>>, vector<1x1x256xf32>
    %5 = vector.shape_cast %4 : vector<1x1x256xf32> to vector<1x256xf32>
    %c0_5 = arith.constant 0 : index
    %c0_6 = arith.constant 0 : index
    %c0_7 = arith.constant 0 : index
    %6 = vector.load %arg6[%c0_5, %c0_6, %c0_7] : memref<1x1x256xf32, #tpu.memory_space<vmem>>, vector<1x1x256xf32>
    %7 = vector.shape_cast %6 : vector<1x1x256xf32> to vector<1x256xf32>
    %cst = arith.constant dense<0.000000e+00> : vector<32xf32>
    %8 = vector.multi_reduction <add>, %3, %cst [1] : vector<32x256xf32> to vector<32xf32>
    %9 = vector.shape_cast %8 : vector<32xf32> to vector<32x1xf32>
    %cst_8 = arith.constant 2.560000e+02 : f32
    %10 = vector.broadcast %cst_8 : f32 to vector<32x1xf32>
    %11 = arith.divf %9, %10 : vector<32x1xf32>
    %12 = vector.broadcast %11 : vector<32x1xf32> to vector<32x256xf32>
    %13 = arith.subf %3, %12 : vector<32x256xf32>
    %14 = arith.mulf %13, %13 : vector<32x256xf32>
    %cst_9 = arith.constant dense<0.000000e+00> : vector<32xf32>
    %15 = vector.multi_reduction <add>, %14, %cst_9 [1] : vector<32x256xf32> to vector<32xf32>
    %16 = vector.shape_cast %15 : vector<32xf32> to vector<32x1xf32>
    %cst_10 = arith.constant 2.560000e+02 : f32
    %17 = vector.broadcast %cst_10 : f32 to vector<32x1xf32>
    %18 = arith.divf %16, %17 : vector<32x1xf32>
    %19 = vector.broadcast %11 : vector<32x1xf32> to vector<32x256xf32>
    %20 = arith.subf %3, %19 : vector<32x256xf32>
    %cst_11 = arith.constant 9.99999974E-6 : f32
    %21 = vector.broadcast %cst_11 : f32 to vector<32x1xf32>
    %22 = arith.addf %18, %21 : vector<32x1xf32>
    %23 = math.rsqrt %22 : vector<32x1xf32>
    %24 = vector.broadcast %23 : vector<32x1xf32> to vector<32x256xf32>
    %25 = arith.mulf %20, %24 : vector<32x256xf32>
    %26 = vector.broadcast %5 : vector<1x256xf32> to vector<32x256xf32>
    %27 = arith.mulf %25, %26 : vector<32x256xf32>
    %28 = vector.broadcast %7 : vector<1x256xf32> to vector<32x256xf32>
    %29 = arith.addf %27, %28 : vector<32x256xf32>
    %c0_12 = arith.constant 0 : index
    %c0_13 = arith.constant 0 : index
    %c0_14 = arith.constant 0 : index
    %30 = vector.load %arg7[%c0_12, %c0_13, %c0_14] : memref<1x256x768xf32, #tpu.memory_space<vmem>>, vector<1x256x768xf32>
    %31 = vector.shape_cast %30 : vector<1x256x768xf32> to vector<256x768xf32>
    %cst_15 = arith.constant dense<0.000000e+00> : vector<32x768xf32>
    %32 = tpu.matmul %29, %31, %cst_15 {dimension_numbers = #tpu.dot_dimension_numbers<[1], [0], [0], [1], [0, 0, 1, 1], [], []>} : vector<32x256xf32>, vector<256x768xf32>, vector<32x768xf32> -> vector<32x768xf32>
    %c0_16 = arith.constant 0 : index
    %c0_17 = arith.constant 0 : index
    %c0_18 = arith.constant 0 : index
    %33 = vector.load %arg8[%c0_16, %c0_17, %c0_18] : memref<1x1x768xf32, #tpu.memory_space<vmem>>, vector<1x1x768xf32>
    %34 = vector.shape_cast %33 : vector<1x1x768xf32> to vector<1x768xf32>
    %35 = vector.broadcast %34 : vector<1x768xf32> to vector<32x768xf32>
    %36 = arith.addf %32, %35 : vector<32x768xf32>
    %37 = vector.extract_strided_slice %36 {offsets = [0, 0], sizes = [32, 256], strides = [1, 1]} : vector<32x768xf32> to vector<32x256xf32>
    %cst_19 = arith.constant 0.0883883461 : f32
    %38 = vector.broadcast %cst_19 : f32 to vector<32x256xf32>
    %39 = arith.mulf %37, %38 : vector<32x256xf32>
    %40 = vector.extract_strided_slice %36 {offsets = [0, 256], sizes = [32, 256], strides = [1, 1]} : vector<32x768xf32> to vector<32x256xf32>
    %41 = vector.extract_strided_slice %36 {offsets = [0, 512], sizes = [32, 256], strides = [1, 1]} : vector<32x768xf32> to vector<32x256xf32>
    %c0_20 = arith.constant 0 : index
    %c0_21 = arith.constant 0 : index
    %42 = vector.load %arg4[%c0_20, %c0_21] : memref<32x32xf32, #tpu.memory_space<vmem>>, vector<32x32xf32>
    %c0_22 = arith.constant 0 : index
    %c0_23 = arith.constant 0 : index
    %c0_24 = arith.constant 0 : index
    %43 = vector.load %arg10[%c0_22, %c0_23, %c0_24] : memref<1x1x256xf32, #tpu.memory_space<vmem>>, vector<1x1x256xf32>
    %44 = vector.shape_cast %43 : vector<1x1x256xf32> to vector<1x256xf32>
    %45 = vector.shape_cast %44 : vector<1x256xf32> to vector<1x256xf32>
    %46 = vector.broadcast %45 : vector<1x256xf32> to vector<32x256xf32>
    %47 = vector.extract_strided_slice %39 {offsets = [0, 0], sizes = [32, 128], strides = [1, 1]} : vector<32x256xf32> to vector<32x128xf32>
    %48 = vector.extract_strided_slice %40 {offsets = [0, 0], sizes = [32, 128], strides = [1, 1]} : vector<32x256xf32> to vector<32x128xf32>
    %49 = vector.extract_strided_slice %41 {offsets = [0, 0], sizes = [32, 128], strides = [1, 1]} : vector<32x256xf32> to vector<32x128xf32>
    %cst_25 = arith.constant dense<0.000000e+00> : vector<32x32xf32>
    %50 = tpu.matmul %47, %48, %cst_25 {dimension_numbers = #tpu.dot_dimension_numbers<[1], [1], [0], [0], [0, 0, 1, 0], [], []>} : vector<32x128xf32>, vector<32x128xf32>, vector<32x32xf32> -> vector<32x32xf32>
    %51 = arith.addf %50, %42 : vector<32x32xf32>
    %cst_26 = arith.constant dense<0xFF800000> : vector<32xf32>
    %52 = vector.multi_reduction <maximumf>, %51, %cst_26 [1] : vector<32x32xf32> to vector<32xf32>
    %53 = vector.shape_cast %52 : vector<32xf32> to vector<32x1xf32>
    %54 = vector.broadcast %53 : vector<32x1xf32> to vector<32x32xf32>
    %55 = arith.subf %51, %54 : vector<32x32xf32>
    %56 = math.exp %55 : vector<32x32xf32>
    %cst_27 = arith.constant dense<0.000000e+00> : vector<32xf32>
    %57 = vector.multi_reduction <add>, %56, %cst_27 [1] : vector<32x32xf32> to vector<32xf32>
    %58 = vector.shape_cast %57 : vector<32xf32> to vector<32x1xf32>
    %59 = tpu.reciprocal %58 {approx = true} : vector<32x1xf32> -> vector<32x1xf32>
    %60 = vector.broadcast %59 : vector<32x1xf32> to vector<32x32xf32>
    %61 = arith.mulf %56, %60 : vector<32x32xf32>
    %cst_28 = arith.constant dense<0.000000e+00> : vector<32x128xf32>
    %62 = tpu.matmul %61, %49, %cst_28 {dimension_numbers = #tpu.dot_dimension_numbers<[1], [0], [0], [1], [0, 0, 1, 1], [], []>} : vector<32x32xf32>, vector<32x128xf32>, vector<32x128xf32> -> vector<32x128xf32>
    %c0_29 = arith.constant 0 : index
    %c0_30 = arith.constant 0 : index
    %c0_31 = arith.constant 0 : index
    %63 = vector.load %arg9[%c0_29, %c0_30, %c0_31] : memref<1x256x256xf32, #tpu.memory_space<vmem>>, vector<1x128x256xf32>
    %64 = vector.shape_cast %63 : vector<1x128x256xf32> to vector<128x256xf32>
    %cst_32 = arith.constant dense<0.000000e+00> : vector<32x256xf32>
    %65 = tpu.matmul %62, %64, %cst_32 {dimension_numbers = #tpu.dot_dimension_numbers<[1], [0], [0], [1], [0, 0, 1, 1], [], []>} : vector<32x128xf32>, vector<128x256xf32>, vector<32x256xf32> -> vector<32x256xf32>
    %66 = arith.addf %46, %65 : vector<32x256xf32>
    %67 = vector.extract_strided_slice %39 {offsets = [0, 128], sizes = [32, 128], strides = [1, 1]} : vector<32x256xf32> to vector<32x128xf32>
    %68 = vector.extract_strided_slice %40 {offsets = [0, 128], sizes = [32, 128], strides = [1, 1]} : vector<32x256xf32> to vector<32x128xf32>
    %69 = vector.extract_strided_slice %41 {offsets = [0, 128], sizes = [32, 128], strides = [1, 1]} : vector<32x256xf32> to vector<32x128xf32>
    %cst_33 = arith.constant dense<0.000000e+00> : vector<32x32xf32>
    %70 = tpu.matmul %67, %68, %cst_33 {dimension_numbers = #tpu.dot_dimension_numbers<[1], [1], [0], [0], [0, 0, 1, 0], [], []>} : vector<32x128xf32>, vector<32x128xf32>, vector<32x32xf32> -> vector<32x32xf32>
    %71 = arith.addf %70, %42 : vector<32x32xf32>
    %cst_34 = arith.constant dense<0xFF800000> : vector<32xf32>
    %72 = vector.multi_reduction <maximumf>, %71, %cst_34 [1] : vector<32x32xf32> to vector<32xf32>
    %73 = vector.shape_cast %72 : vector<32xf32> to vector<32x1xf32>
    %74 = vector.broadcast %73 : vector<32x1xf32> to vector<32x32xf32>
    %75 = arith.subf %71, %74 : vector<32x32xf32>
    %76 = math.exp %75 : vector<32x32xf32>
    %cst_35 = arith.constant dense<0.000000e+00> : vector<32xf32>
    %77 = vector.multi_reduction <add>, %76, %cst_35 [1] : vector<32x32xf32> to vector<32xf32>
    %78 = vector.shape_cast %77 : vector<32xf32> to vector<32x1xf32>
    %79 = tpu.reciprocal %78 {approx = true} : vector<32x1xf32> -> vector<32x1xf32>
    %80 = vector.broadcast %79 : vector<32x1xf32> to vector<32x32xf32>
    %81 = arith.mulf %76, %80 : vector<32x32xf32>
    %cst_36 = arith.constant dense<0.000000e+00> : vector<32x128xf32>
    %82 = tpu.matmul %81, %69, %cst_36 {dimension_numbers = #tpu.dot_dimension_numbers<[1], [0], [0], [1], [0, 0, 1, 1], [], []>} : vector<32x32xf32>, vector<32x128xf32>, vector<32x128xf32> -> vector<32x128xf32>
    %c0_37 = arith.constant 0 : index
    %c128 = arith.constant 128 : index
    %c0_38 = arith.constant 0 : index
    %83 = vector.load %arg9[%c0_37, %c128, %c0_38] : memref<1x256x256xf32, #tpu.memory_space<vmem>>, vector<1x128x256xf32>
    %84 = vector.shape_cast %83 : vector<1x128x256xf32> to vector<128x256xf32>
    %cst_39 = arith.constant dense<0.000000e+00> : vector<32x256xf32>
    %85 = tpu.matmul %82, %84, %cst_39 {dimension_numbers = #tpu.dot_dimension_numbers<[1], [0], [0], [1], [0, 0, 1, 1], [], []>} : vector<32x128xf32>, vector<128x256xf32>, vector<32x256xf32> -> vector<32x256xf32>
    %86 = arith.addf %66, %85 : vector<32x256xf32>
    %87 = arith.addf %3, %86 : vector<32x256xf32>
    %c0_40 = arith.constant 0 : index
    %c0_41 = arith.constant 0 : index
    %c0_42 = arith.constant 0 : index
    %88 = vector.load %arg11[%c0_40, %c0_41, %c0_42] : memref<1x1x256xf32, #tpu.memory_space<vmem>>, vector<1x1x256xf32>
    %89 = vector.shape_cast %88 : vector<1x1x256xf32> to vector<1x256xf32>
    %c0_43 = arith.constant 0 : index
    %c0_44 = arith.constant 0 : index
    %c0_45 = arith.constant 0 : index
    %90 = vector.load %arg12[%c0_43, %c0_44, %c0_45] : memref<1x1x256xf32, #tpu.memory_space<vmem>>, vector<1x1x256xf32>
    %91 = vector.shape_cast %90 : vector<1x1x256xf32> to vector<1x256xf32>
    %cst_46 = arith.constant dense<0.000000e+00> : vector<32xf32>
    %92 = vector.multi_reduction <add>, %87, %cst_46 [1] : vector<32x256xf32> to vector<32xf32>
    %93 = vector.shape_cast %92 : vector<32xf32> to vector<32x1xf32>
    %cst_47 = arith.constant 2.560000e+02 : f32
    %94 = vector.broadcast %cst_47 : f32 to vector<32x1xf32>
    %95 = arith.divf %93, %94 : vector<32x1xf32>
    %96 = vector.broadcast %95 : vector<32x1xf32> to vector<32x256xf32>
    %97 = arith.subf %87, %96 : vector<32x256xf32>
    %98 = arith.mulf %97, %97 : vector<32x256xf32>
    %cst_48 = arith.constant dense<0.000000e+00> : vector<32xf32>
    %99 = vector.multi_reduction <add>, %98, %cst_48 [1] : vector<32x256xf32> to vector<32xf32>
    %100 = vector.shape_cast %99 : vector<32xf32> to vector<32x1xf32>
    %cst_49 = arith.constant 2.560000e+02 : f32
    %101 = vector.broadcast %cst_49 : f32 to vector<32x1xf32>
    %102 = arith.divf %100, %101 : vector<32x1xf32>
    %103 = vector.broadcast %95 : vector<32x1xf32> to vector<32x256xf32>
    %104 = arith.subf %87, %103 : vector<32x256xf32>
    %cst_50 = arith.constant 9.99999974E-6 : f32
    %105 = vector.broadcast %cst_50 : f32 to vector<32x1xf32>
    %106 = arith.addf %102, %105 : vector<32x1xf32>
    %107 = math.rsqrt %106 : vector<32x1xf32>
    %108 = vector.broadcast %107 : vector<32x1xf32> to vector<32x256xf32>
    %109 = arith.mulf %104, %108 : vector<32x256xf32>
    %110 = vector.broadcast %89 : vector<1x256xf32> to vector<32x256xf32>
    %111 = arith.mulf %109, %110 : vector<32x256xf32>
    %112 = vector.broadcast %91 : vector<1x256xf32> to vector<32x256xf32>
    %113 = arith.addf %111, %112 : vector<32x256xf32>
    %c0_51 = arith.constant 0 : index
    %c0_52 = arith.constant 0 : index
    %c0_53 = arith.constant 0 : index
    %114 = vector.load %arg13[%c0_51, %c0_52, %c0_53] : memref<1x256x1024xf32, #tpu.memory_space<vmem>>, vector<1x256x1024xf32>
    %115 = vector.shape_cast %114 : vector<1x256x1024xf32> to vector<256x1024xf32>
    %cst_54 = arith.constant dense<0.000000e+00> : vector<32x1024xf32>
    %116 = tpu.matmul %113, %115, %cst_54 {dimension_numbers = #tpu.dot_dimension_numbers<[1], [0], [0], [1], [0, 0, 1, 1], [], []>} : vector<32x256xf32>, vector<256x1024xf32>, vector<32x1024xf32> -> vector<32x1024xf32>
    %c0_55 = arith.constant 0 : index
    %c0_56 = arith.constant 0 : index
    %c0_57 = arith.constant 0 : index
    %117 = vector.load %arg14[%c0_55, %c0_56, %c0_57] : memref<1x1x1024xf32, #tpu.memory_space<vmem>>, vector<1x1x1024xf32>
    %118 = vector.shape_cast %117 : vector<1x1x1024xf32> to vector<1x1024xf32>
    %119 = vector.broadcast %118 : vector<1x1024xf32> to vector<32x1024xf32>
    %120 = arith.addf %116, %119 : vector<32x1024xf32>
    %cst_58 = arith.constant -1.702000e+00 : f32
    %121 = vector.broadcast %cst_58 : f32 to vector<32x1024xf32>
    %122 = arith.mulf %121, %120 : vector<32x1024xf32>
    %123 = math.exp %122 : vector<32x1024xf32>
    %cst_59 = arith.constant 1.000000e+00 : f32
    %124 = vector.broadcast %cst_59 : f32 to vector<32x1024xf32>
    %125 = arith.addf %124, %123 : vector<32x1024xf32>
    %126 = tpu.reciprocal %125 {approx = true} : vector<32x1024xf32> -> vector<32x1024xf32>
    %127 = arith.mulf %120, %126 : vector<32x1024xf32>
    %c0_60 = arith.constant 0 : index
    %c0_61 = arith.constant 0 : index
    %c0_62 = arith.constant 0 : index
    %128 = vector.load %arg15[%c0_60, %c0_61, %c0_62] : memref<1x1024x256xf32, #tpu.memory_space<vmem>>, vector<1x1024x256xf32>
    %129 = vector.shape_cast %128 : vector<1x1024x256xf32> to vector<1024x256xf32>
    %cst_63 = arith.constant dense<0.000000e+00> : vector<32x256xf32>
    %130 = tpu.matmul %127, %129, %cst_63 {dimension_numbers = #tpu.dot_dimension_numbers<[1], [0], [0], [1], [0, 0, 1, 1], [], []>} : vector<32x1024xf32>, vector<1024x256xf32>, vector<32x256xf32> -> vector<32x256xf32>
    %c0_64 = arith.constant 0 : index
    %c0_65 = arith.constant 0 : index
    %c0_66 = arith.constant 0 : index
    %131 = vector.load %arg16[%c0_64, %c0_65, %c0_66] : memref<1x1x256xf32, #tpu.memory_space<vmem>>, vector<1x1x256xf32>
    %132 = vector.shape_cast %131 : vector<1x1x256xf32> to vector<1x256xf32>
    %133 = vector.broadcast %132 : vector<1x256xf32> to vector<32x256xf32>
    %134 = arith.addf %130, %133 : vector<32x256xf32>
    %135 = arith.addf %87, %134 : vector<32x256xf32>
    %c0_67 = arith.constant 0 : index
    %c0_68 = arith.constant 0 : index
    %136 = vector.load %arg20[%c0_67, %c0_68] : memref<32x256xf32, #tpu.memory_space<vmem>>, vector<32x256xf32>
    tpu.vector_store %arg20[%c0_67, %c0_68], %135 {strides = array<i32>} : memref<32x256xf32, #tpu.memory_space<vmem>>, vector<32x256xf32>,
    %c11_i32 = arith.constant 11 : i32
    %137 = arith.cmpi eq, %arg0, %c11_i32 : i32
    %138 = arith.extui %137 : i1 to i32
    %c0_i32_69 = arith.constant 0 : i32
    %139 = arith.cmpi ne, %138, %c0_i32_69 : i32
    scf.if %139 {
      %c0_70 = arith.constant 0 : index
      %c0_71 = arith.constant 0 : index
      %140 = vector.load %arg17[%c0_70, %c0_71] : memref<1x256xf32, #tpu.memory_space<vmem>>, vector<1x256xf32>
      %c0_72 = arith.constant 0 : index
      %c0_73 = arith.constant 0 : index
      %141 = vector.load %arg18[%c0_72, %c0_73] : memref<1x256xf32, #tpu.memory_space<vmem>>, vector<1x256xf32>
      %cst_74 = arith.constant dense<0.000000e+00> : vector<32xf32>
      %142 = vector.multi_reduction <add>, %135, %cst_74 [1] : vector<32x256xf32> to vector<32xf32>
      %143 = vector.shape_cast %142 : vector<32xf32> to vector<32x1xf32>
      %cst_75 = arith.constant 2.560000e+02 : f32
      %144 = vector.broadcast %cst_75 : f32 to vector<32x1xf32>
      %145 = arith.divf %143, %144 : vector<32x1xf32>
      %146 = vector.broadcast %145 : vector<32x1xf32> to vector<32x256xf32>
      %147 = arith.subf %135, %146 : vector<32x256xf32>
      %148 = arith.mulf %147, %147 : vector<32x256xf32>
      %cst_76 = arith.constant dense<0.000000e+00> : vector<32xf32>
      %149 = vector.multi_reduction <add>, %148, %cst_76 [1] : vector<32x256xf32> to vector<32xf32>
      %150 = vector.shape_cast %149 : vector<32xf32> to vector<32x1xf32>
      %cst_77 = arith.constant 2.560000e+02 : f32
      %151 = vector.broadcast %cst_77 : f32 to vector<32x1xf32>
      %152 = arith.divf %150, %151 : vector<32x1xf32>
      %153 = vector.broadcast %145 : vector<32x1xf32> to vector<32x256xf32>
      %154 = arith.subf %135, %153 : vector<32x256xf32>
      %cst_78 = arith.constant 9.99999974E-6 : f32
      %155 = vector.broadcast %cst_78 : f32 to vector<32x1xf32>
      %156 = arith.addf %152, %155 : vector<32x1xf32>
      %157 = math.rsqrt %156 : vector<32x1xf32>
      %158 = vector.broadcast %157 : vector<32x1xf32> to vector<32x256xf32>
      %159 = arith.mulf %154, %158 : vector<32x256xf32>
      %160 = vector.broadcast %140 : vector<1x256xf32> to vector<32x256xf32>
      %161 = arith.mulf %159, %160 : vector<32x256xf32>
      %162 = vector.broadcast %141 : vector<1x256xf32> to vector<32x256xf32>
      %163 = arith.addf %161, %162 : vector<32x256xf32>
      %c0_79 = arith.constant 0 : index
      %c0_80 = arith.constant 0 : index
      %164 = vector.load %arg19[%c0_79, %c0_80] : memref<32x256xf32, #tpu.memory_space<vmem>>, vector<32x256xf32>
      tpu.vector_store %arg19[%c0_79, %c0_80], %163 {strides = array<i32>} : memref<32x256xf32, #tpu.memory_space<vmem>>, vector<32x256xf32>,
    } else {
    }
    return
  }
  func.func @transform_1(%arg0: i32, %arg1: memref<32xi32, #tpu.memory_space<smem>>) -> (i32, i32) {
    %c0_i32 = arith.constant 0 : i32
    %c0_i32_0 = arith.constant 0 : i32
    %c0_i32_1 = arith.constant 0 : i32
    return %c0_i32, %c0_i32_0 : i32, i32
  }
  func.func @transform_2(%arg0: i32, %arg1: memref<32xi32, #tpu.memory_space<smem>>) -> (i32, i32) {
    %c0_i32 = arith.constant 0 : i32
    %c0_i32_0 = arith.constant 0 : i32
    %c0_i32_1 = arith.constant 0 : i32
    return %c0_i32, %c0_i32_0 : i32, i32
  }
  func.func @transform_3(%arg0: i32, %arg1: memref<32xi32, #tpu.memory_space<smem>>) -> (i32, i32, i32) {
    %c0_i32 = arith.constant 0 : i32
    %c0_i32_0 = arith.constant 0 : i32
    %c0_i32_1 = arith.constant 0 : i32
    return %arg0, %c0_i32, %c0_i32_0 : i32, i32, i32
  }
  func.func @transform_4(%arg0: i32, %arg1: memref<32xi32, #tpu.memory_space<smem>>) -> (i32, i32, i32) {
    %c0_i32 = arith.constant 0 : i32
    %c0_i32_0 = arith.constant 0 : i32
    %c0_i32_1 = arith.constant 0 : i32
    return %arg0, %c0_i32, %c0_i32_0 : i32, i32, i32
  }
  func.func @transform_5(%arg0: i32, %arg1: memref<32xi32, #tpu.memory_space<smem>>) -> (i32, i32, i32) {
    %c0_i32 = arith.constant 0 : i32
    %c0_i32_0 = arith.constant 0 : i32
    %c0_i32_1 = arith.constant 0 : i32
    return %arg0, %c0_i32, %c0_i32_0 : i32, i32, i32
  }
  func.func @transform_6(%arg0: i32, %arg1: memref<32xi32, #tpu.memory_space<smem>>) -> (i32, i32, i32) {
    %c0_i32 = arith.constant 0 : i32
    %c0_i32_0 = arith.constant 0 : i32
    %c0_i32_1 = arith.constant 0 : i32
    return %arg0, %c0_i32, %c0_i32_0 : i32, i32, i32
  }
  func.func @transform_7(%arg0: i32, %arg1: memref<32xi32, #tpu.memory_space<smem>>) -> (i32, i32, i32) {
    %c0_i32 = arith.constant 0 : i32
    %c0_i32_0 = arith.constant 0 : i32
    %c0_i32_1 = arith.constant 0 : i32
    return %arg0, %c0_i32, %c0_i32_0 : i32, i32, i32
  }
  func.func @transform_8(%arg0: i32, %arg1: memref<32xi32, #tpu.memory_space<smem>>) -> (i32, i32, i32) {
    %c0_i32 = arith.constant 0 : i32
    %c0_i32_0 = arith.constant 0 : i32
    %c0_i32_1 = arith.constant 0 : i32
    return %arg0, %c0_i32, %c0_i32_0 : i32, i32, i32
  }
  func.func @transform_9(%arg0: i32, %arg1: memref<32xi32, #tpu.memory_space<smem>>) -> (i32, i32, i32) {
    %c0_i32 = arith.constant 0 : i32
    %c0_i32_0 = arith.constant 0 : i32
    %c0_i32_1 = arith.constant 0 : i32
    return %arg0, %c0_i32, %c0_i32_0 : i32, i32, i32
  }
  func.func @transform_10(%arg0: i32, %arg1: memref<32xi32, #tpu.memory_space<smem>>) -> (i32, i32, i32) {
    %c0_i32 = arith.constant 0 : i32
    %c0_i32_0 = arith.constant 0 : i32
    %c0_i32_1 = arith.constant 0 : i32
    return %arg0, %c0_i32, %c0_i32_0 : i32, i32, i32
  }
  func.func @transform_11(%arg0: i32, %arg1: memref<32xi32, #tpu.memory_space<smem>>) -> (i32, i32, i32) {
    %c0_i32 = arith.constant 0 : i32
    %c0_i32_0 = arith.constant 0 : i32
    %c0_i32_1 = arith.constant 0 : i32
    return %arg0, %c0_i32, %c0_i32_0 : i32, i32, i32
  }
  func.func @transform_12(%arg0: i32, %arg1: memref<32xi32, #tpu.memory_space<smem>>) -> (i32, i32, i32) {
    %c0_i32 = arith.constant 0 : i32
    %c0_i32_0 = arith.constant 0 : i32
    %c0_i32_1 = arith.constant 0 : i32
    return %arg0, %c0_i32, %c0_i32_0 : i32, i32, i32
  }
  func.func @transform_13(%arg0: i32, %arg1: memref<32xi32, #tpu.memory_space<smem>>) -> (i32, i32, i32) {
    %c0_i32 = arith.constant 0 : i32
    %c0_i32_0 = arith.constant 0 : i32
    %c0_i32_1 = arith.constant 0 : i32
    return %arg0, %c0_i32, %c0_i32_0 : i32, i32, i32
  }
  func.func @transform_14(%arg0: i32, %arg1: memref<32xi32, #tpu.memory_space<smem>>) -> (i32, i32, i32) {
    %c0_i32 = arith.constant 0 : i32
    %c0_i32_0 = arith.constant 0 : i32
    %c0_i32_1 = arith.constant 0 : i32
    return %arg0, %c0_i32, %c0_i32_0 : i32, i32, i32
  }
  func.func @transform_15(%arg0: i32, %arg1: memref<32xi32, #tpu.memory_space<smem>>) -> (i32, i32) {
    %c0_i32 = arith.constant 0 : i32
    %c0_i32_0 = arith.constant 0 : i32
    %c0_i32_1 = arith.constant 0 : i32
    return %c0_i32, %c0_i32_0 : i32, i32
  }
  func.func @transform_16(%arg0: i32, %arg1: memref<32xi32, #tpu.memory_space<smem>>) -> (i32, i32) {
    %c0_i32 = arith.constant 0 : i32
    %c0_i32_0 = arith.constant 0 : i32
    %c0_i32_1 = arith.constant 0 : i32
    return %c0_i32, %c0_i32_0 : i32, i32
  }
  func.func @transform_17(%arg0: i32, %arg1: memref<32xi32, #tpu.memory_space<smem>>) -> (i32, i32) {
    %c0_i32 = arith.constant 0 : i32
    %c0_i32_0 = arith.constant 0 : i32
    %c0_i32_1 = arith.constant 0 : i32
    return %c0_i32, %c0_i32_0 : i32, i32
  }
}

</mosaic_0001>

<bundles_post_ra>
// kernel: clip_forward.1
= control target key start
LH: loop header
LB: loop body
LE: loop exit
PB: predicated region body
PF: predicated region fallthrough
CT: control target
= control target key end

     0   :  { %s10179_s0 = inlined_call_operand.vmem [shape: s32[32], index: 0, kind: input, shape index: {}]   ;;  %s10180_s1 = inlined_call_operand.vmem [shape: f32[512,256], index: 1, kind: input, shape index: {}]   ;;  %s10181_s2 = inlined_call_operand.vmem [shape: f32[32,256], index: 2, kind: input, shape index: {}]   ;;  %s10182_s3 = inlined_call_operand.vmem [shape: f32[32,32], index: 3, kind: input, shape index: {}]   ;;  %s10183_s4 = inlined_call_operand.vmem [shape: f32[12,1,256], index: 4, kind: input, shape index: {}]   ;;  %s10184_s5 = inlined_call_operand.vmem [shape: f32[12,1,256], index: 5, kind: input, shape index: {}]   ;;  %s10185_s6 = inlined_call_operand.hbm [shape: f32[12,256,768], index: 6, kind: input, shape index: {}]   ;;  %s10186_s7 = inlined_call_operand.vmem [shape: f32[12,1,768], index: 7, kind: input, shape index: {}]   ;;  %s10187_s8 = inlined_call_operand.vmem [shape: f32[12,256,256], index: 8, kind: input, shape index: {}]   ;;  %s10188_s9 = inlined_call_operand.vmem [shape: f32[12,1,256], index: 9, kind: input, shape index: {}]   ;;  %s10189_s10 = inlined_call_operand.vmem [shape: f32[12,1,256], index: 10, kind: input, shape index: {}]   ;;  %s10190_s11 = inlined_call_operand.vmem [shape: f32[12,1,256], index: 11, kind: input, shape index: {}]   ;;  %s10191_s12 = inlined_call_operand.vmem [shape: f32[12,256,1024], index: 12, kind: input, shape index: {}]   ;;  %s10192_s13 = inlined_call_operand.vmem [shape: f32[12,1,1024], index: 13, kind: input, shape index: {}]   ;;  %s10193_s14 = inlined_call_operand.vmem [shape: f32[12,1024,256], index: 14, kind: input, shape index: {}]   ;;  %s10194_s15 = inlined_call_operand.vmem [shape: f32[12,1,256], index: 15, kind: input, shape index: {}]   ;;  %s10195_s16 = inlined_call_operand.hbm [shape: f32[1,256], index: 16, kind: input, shape index: {}]   ;;  %s10196_s17 = inlined_call_operand.hbm [shape: f32[1,256], index: 17, kind: input, shape index: {}]   ;;  %s10197_s18 = inlined_call_operand.hbm [shape: f32[32,256], index: 18, kind: output, shape index: {}]  }
   0x1   :  { %10235 = sst [smem:[#allocation109_spill]] %s10179_s0 }
   0x2   :  { %10236 = sst [smem:[#allocation110_spill]] %s10180_s1  ;;  %s10254_s29 = sld [smem:[#allocation109_spill]] }
   0x3   :  { %10237 = sst [smem:[#allocation111_spill]] %s10181_s2 }
   0x4   :  { %10238 = sst [smem:[#allocation112_spill]] %s10182_s3 }
   0x5   :  { %10239 = sst [smem:[#allocation113_spill]] %s10183_s4 }
   0x6   :  { %10240 = sst [smem:[#allocation114_spill]] %s10184_s5 }
   0x7   :  { %10241 = sst [smem:[#allocation115_spill]] %s10185_s6 }
   0x8   :  { %10242 = sst [smem:[#allocation116_spill]] %s10186_s7  ;;  %s23_s3 = sshll.u32 %s10254_s29, 4  ;;  %s24_s3 = int_to_ptr.vmem [resolvable:$true] %s23_s3 }
   0x9   :  { %10243 = sst [smem:[#allocation117_spill]] %s10187_s8  ;;  %s7921_s30 = scalar_lea.vmem %s24_s3, 16 }
   0xa   :  { %10244 = sst [smem:[#allocation118_spill]] %s10188_s9  ;;  %p7922_p0 = scmp.ne.s32.totalorder %s24_s3, %s7921_s30 }
   0xb   :  { %10245 = sst [smem:[#allocation119_spill]] %s10189_s10  ;;  %p7926_p1 = scmp.lt.s32.totalorder %s24_s3, %s24_s3 }
   0xc   :  { %10246 = sst [smem:[#allocation120_spill]] %s10190_s11  ;;  %p7927_p2 = scmp.lt.s32.totalorder %s7921_s30, %s7921_s30 }
   0xd   :  { %10247 = sst [smem:[#allocation121_spill]] %s10191_s12 }
   0xe   :  { %10248 = sst [smem:[#allocation122_spill]] %s10192_s13  ;;  %p7928_p3 = por %p7927_p2, %p7926_p1 }
   0xf   :  { %10249 = sst [smem:[#allocation123_spill]] %s10193_s14 }
  0x10   :  { %10250 = sst [smem:[#allocation124_spill]] %s10194_s15  ;;  %p7929_p4 = pnand %p7928_p3, %p7922_p0 }
  0x11   :  { %10251 = sst [smem:[#allocation125_spill]] %s10195_s16 }
  0x12   :  { %10252 = sst [smem:[#allocation126_spill]] %s10196_s17 }
  0x13   :  { %10253 = sst [smem:[#allocation127_spill]] %s10197_s18 }
  0x14   :  { %7932 = shalt.err (!%p7929_p4)  }
  0x15   :  { %s8155_s0 = smov [#allocation5]  }
  0x16   :  { %26 = dma.vmem_to_smem %s24_s3, 16, %s8155_s0, [#allocation4] }
  0x17   :  { %8061 = dma.done.wait [#allocation4], 16 }
  0x18   :  { %8062 = vsyncadd [#allocation4], 4294967280 }
  0x19   :  { %28 = sfence }
  0x1a   :  { %29 = vsyncpa [#allocation7], 0 }
  0x1b   :  { %31 = vsyncpa [#allocation7 + $0x1], 0 }
  0x1c   :  { %32 = vsyncpa [#allocation10], 0 }
  0x1d   :  { %33 = vsyncpa [#allocation8], 0  ;;  %s8263_s19 = smov 0   ;;  %s8265_s1 = smov 0  }
  0x1e   :  { %s8267_s20 = smov 0   ;;  %s8269_s21 = smov 0  }
  0x1f LB: > { %10255 = sst [smem:[#allocation81_spill]] %s8145_s1  ;;  %s8282_s3 = sadd.s32 4294967295, %s8153_s21   ;;  %s8153_s21 = sphi %s8269_s21, %s10352_s21   ;;  %s8149_s20 = sphi %s8267_s20, %s10355_s20   ;;  %s8145_s1 = sphi %s8265_s1, %s10354_s1   ;;  %s8141_s19 = sphi %s8263_s19, %s10353_s19  }
  0x20   : > { %10256 = sst [smem:[#allocation82_spill]] %s8149_s20  ;;  %s8285_s22 = sadd.s32 1, %s8153_s21  }
  0x21   : > { %10257 = sst [smem:[#allocation83_spill]] %s8282_s3  ;;  %s137_s2 = ssub.s32 %s8153_s21, %s8285_s22 }
  0x22   : > { %10258 = sst [smem:[#allocation84_spill]] %s8285_s22  ;;  %s140_s23 = sadd.s32 1, %s8149_s20 }
  0x23   : > { %p138_p5 = scmp.eq.s32.totalorder %s137_s2, 0  ;;  %p147_p6 = scmp.ne.s32.totalorder %s8149_s20, %s8145_s1 }
  0x24   : > { %p148_p7 = scmp.eq.s32.totalorder %s8153_s21, 0  ;;  %p153_p8 = scmp.ne.s32.totalorder %s8145_s1, %s8141_s19 }
  0x25   : > { %s8295_s24 = scalar_select %p138_p5, %s8149_s20, %s140_s23  }
  0x26   : > { %p8297_p9 = por %p148_p7, %p147_p6  ;;  %p10204_p10 = scmp.eq.s32.totalorder %s8282_s3, 0 }
  0x27   : > { %10259 = sst [smem:[#allocation85_spill]] %s8295_s24  ;;  %p6582_p11 = scmp.ge.s32.totalorder %s8153_s21, 1 }
  0x28   : > { %p461_p12 = scmp.lt.s32.totalorder %s8153_s21, 13  ;;  %p8306_p13 = por %p10204_p10, %p153_p8 }
  0x29   : > { %s8156_s28 = smov [#allocation9]   ;;  %p7682_p3 = scmp.lt.s32.totalorder %s8153_s21, 12 }
  0x2a   : > { %s10261_s26 = scalar_select %p8306_p13, 1, 0 }
  0x2b   : > { %p8311_p1 = pnand %p6582_p11, %p461_p12  ;;  %s480_s29 = sshll.u32 %s8156_s28, 4  ;;  %s481_s29 = int_to_ptr.vmem [resolvable:$true] %s480_s29 }
  0x2c   : > { %s8157_s0 = smov [#allocation11]   ;;  %p8326_p5 = pnand %p7682_p3, %p8297_p9 }
  0x2d   : > { %s10262_s27 = scalar_select %p8311_p1, 1, 0 }
  0x2e   : > { %p7669_p2 = pneg %p8311_p1  ;;  %s491_s19 = sshll.u32 %s8157_s0, 4  ;;  %s8330_s19 = int_to_ptr.vmem [resolvable:$true] %s491_s19 }
  0x2f   : > { %s10264_s2 = scalar_select %p8326_p5, 1, 0 }
  0x30   : > { %p8320_p4 = pnand %p7669_p2, %p10204_p10  ;;  %s10265_s16 = sld [smem:[#allocation125_spill]] }
  0x32   : > { %p7935_p7 = pneg %p8320_p4 }
  0x36   : > { %s7933_s22 = scalar_lea.hbm %s10265_s16, 32 }
  0x37   : > { %p7934_p6 = scmp.ne.s32.totalorder %s10265_s16, %s7933_s22  ;;  %p7940_p11 = scmp.lt.u32.totalorder %s7933_s22, %s10265_s16 }
  0x39   : > { %p7936_p8 = pnand %p7935_p7, %p7934_p6 }
  0x3b   : > { %p7937_p9 = pneg %p7936_p8 }
  0x3d   : > { %p7942_p12 = pnand %p7940_p11, %p7937_p9 }
  0x3f   : > { %7945 = shalt.err (!%p7942_p12)
}
  0x40   : > { %s7946_s23 = scalar_lea.vmem %s481_s29, 32  ;;  %p7954_p10 = scmp.lt.s32.totalorder %s481_s29, %s481_s29 }
  0x41   : > { %p7947_p2 = scmp.ne.s32.totalorder %s481_s29, %s7946_s23  ;;  %p7955_p13 = scmp.lt.s32.totalorder %s7946_s23, %s7946_s23 }
  0x43   : > { %p7949_p3 = pnand %p7947_p2, %p7935_p7  ;;  %p7956_p1 = por %p7955_p13, %p7954_p10 }
  0x45   : > { %p7950_p0 = pneg %p7949_p3 }
  0x47   : > { %p7957_p5 = pnand %p7956_p1, %p7950_p0 }
  0x49   : > { %7960 = shalt.err (!%p7957_p5)
}
  0x4a   : > { %7672 = dma.hbm_to_vmem [thread:$0]  (!%p8320_p4), %s10265_s16, 32, %s481_s29, [#allocation10]  }
  0x4b   : > { %s10266_s17 = sld [smem:[#allocation126_spill]] }
  0x51   : > { %s7961_s28 = scalar_lea.hbm %s10266_s17, 32 }
  0x52   : > { %p7962_p6 = scmp.ne.s32.totalorder %s10266_s17, %s7961_s28  ;;  %p7968_p0 = scmp.lt.u32.totalorder %s7961_s28, %s10266_s17 }
  0x54   : > { %p7964_p10 = pnand %p7962_p6, %p7935_p7 }
  0x56   : > { %p7965_p13 = pneg %p7964_p10 }
  0x58   : > { %p7970_p1 = pnand %p7968_p0, %p7965_p13 }
  0x5a   : > { %7973 = shalt.err (!%p7970_p1)
}
  0x5b   : > { %s7974_s29 = scalar_lea.vmem %s8330_s19, 32  ;;  %p7982_p11 = scmp.lt.s32.totalorder %s8330_s19, %s8330_s19 }
  0x5c   : > { %p7975_p5 = scmp.ne.s32.totalorder %s8330_s19, %s7974_s29  ;;  %p7983_p12 = scmp.lt.s32.totalorder %s7974_s29, %s7974_s29 }
  0x5e   : > { %p7977_p8 = pnand %p7975_p5, %p7935_p7  ;;  %p7984_p2 = por %p7983_p12, %p7982_p11 }
  0x60   : > { %p7978_p9 = pneg %p7977_p8 }
  0x62   : > { %p7985_p3 = pnand %p7984_p2, %p7978_p9 }
  0x64   : > { %7988 = shalt.err (!%p7985_p3)
}
  0x65   : > { %7675 = dma.hbm_to_vmem [thread:$0]  (!%p8320_p4), %s10266_s17, 32, %s8330_s19, [#allocation10]  }
  0x66   : > { %s10267_s18 = sand.u32 1, %s8149_s20   ;;  %s7652_s24 = smul.u32 24576, %s8153_s21 }
  0x67   : > { %s7651_s22 = smul.u32 1536, %s10267_s18  ;;  %s10268_s6 = sld [smem:[#allocation115_spill]] }
  0x68   : > { %s10269_s29 = smov %s10267_s18  ;;  %p10270_p7 = scmp.ne.s32.totalorder %s10264_s2, 0 }
  0x69   : > { %s520_s30 = scalar_lea.vmem [#allocation6], %s7651_s22  ;;  %s8392_s14 = scalar_lea.sflag [#allocation7], %s10269_s29 }
  0x6a   : > { %s527_s23 = sshll.u32 %s520_s30, 4  ;;  %p7991_p6 = pneg %p10270_p7  ;;  %s8388_s23 = int_to_ptr.vmem [resolvable:$true] %s527_s23 }
  0x6d   : > { %s8386_s0 = scalar_lea.hbm %s10268_s6, %s7652_s24  ;;  %s7994_s18 = scalar_lea.hbm %s10268_s6, 294912 }
  0x6e   : > { %s7989_s19 = scalar_lea.hbm %s8386_s0, 24576  ;;  %p7995_p0 = scmp.lt.u32.totalorder %s8386_s0, %s10268_s6 }
  0x6f   : > { %p7990_p4 = scmp.ne.s32.totalorder %s8386_s0, %s7989_s19  ;;  %p7996_p1 = scmp.lt.u32.totalorder %s7994_s18, %s7989_s19 }
  0x70   : > { %p7998_p8 = scmp.lt.u32.totalorder %s7989_s19, %s8386_s0 }
  0x71   : > { %p7992_p10 = pnand %p7991_p6, %p7990_p4  ;;  %p7997_p5 = por %p7996_p1, %p7995_p0 }
  0x73   : > { %p7993_p13 = pneg %p7992_p10  ;;  %p7999_p9 = por %p7998_p8, %p7997_p5 }
  0x75   : > { %p8000_p11 = pnand %p7999_p9, %p7993_p13 }
  0x77   : > { %8003 = shalt.err (!%p8000_p11)
}
  0x78   : > { %s8004_s28 = scalar_lea.vmem %s8388_s23, 24576  ;;  %s8158_s25 = smov [#allocation6]  }
  0x79   : > { %p8005_p12 = scmp.ne.s32.totalorder %s8388_s23, %s8004_s28  ;;  %s8009_s30 = sshll.u32 %s8158_s25, 4  ;;  %s8010_s30 = int_to_ptr.vmem [resolvable:$false] %s8009_s30 }
  0x7a   : > { %s8011_s29 = scalar_lea.vmem %s8010_s30, 49152  ;;  %p8012_p4 = scmp.lt.s32.totalorder %s8388_s23, %s8010_s30 }
  0x7b   : > { %p8007_p2 = pnand %p8005_p12, %p7991_p6  ;;  %p8013_p10 = scmp.lt.s32.totalorder %s8011_s29, %s8004_s28 }
  0x7d   : > { %p8008_p3 = pneg %p8007_p2  ;;  %p8014_p0 = por %p8013_p10, %p8012_p4 }
  0x7f   : > { %p8015_p1 = pnand %p8014_p0, %p8008_p3 }
  0x81   : > { %8018 = shalt.err (!%p8015_p1)
}
  0x82   : > { %s8159_s19 = smov 768   ;;  %s8160_s21 = smov 48  }
  0x83   : > { %7679 = dma.hbm_to_vmem [thread:$0]  (!%p10270_p7), %s8386_s0, 24576, %s8388_s23, %s8392_s14, %s8159_s19, %s8159_s19, %s8160_s21  }
  0x84   : > { %p10271_p6 = scmp.ne.s32.totalorder %s10262_s27, 0 }
  0x86   : > { %605 = sbr.rel (%p10271_p6) target bundleno = 3509 (0xdb5), region = 84 }
  0x8d   : > { %s607_s15 = sand.u32 1, %s8145_s1   ;;  %p10273_p13 = scmp.ne.s32.totalorder %s10261_s26, 0 }
  0x8e   : > { %s7653_s18 = smul.u32 1536, %s607_s15  ;;  %s608_s24 = scalar_lea.sflag [#allocation7], %s607_s15 }
  0x90   : > { %s8423_s22 = scalar_lea.vmem [#allocation6], %s7653_s18 }
  0x91   : > { %10272 = sst [smem:[#allocation86_spill]] %s8423_s22 }
  0x92   : > { %8064 = dma.done.wait (%p10273_p13), %s608_s24, 24576  }
  0x93   : > { %8066 = vsyncadd (%p10273_p13), %s608_s24, 4294942720  ;;  %p10274_p5 = scmp.eq.s32.totalorder %s8282_s3, 0 }
  0x95   : > { %8068 = dma.done.wait (%p10274_p5), [#allocation10], 64   ;;  %p10275_p7 = pmov %p10274_p5 }
  0x96   : > { %p710_p8 = scmp.lt.s32.totalorder %s8282_s3, 11  ;;  %s10279_s7 = sld [smem:[#allocation116_spill]] }
  0x97   : > { %8070 = vsyncadd (%p10275_p7), [#allocation10], 4294967232  ;;  %s10281_s8 = sld [smem:[#allocation117_spill]]  ;;  %s10286_s12 = sld [smem:[#allocation121_spill]] }
  0x98   : > { %s711_s27 = scalar_select %p710_p8, %s8282_s3, 11 }
  0x99   : > { %s10288_s13 = sld [smem:[#allocation122_spill]]  ;;  %s10290_s14 = sld [smem:[#allocation123_spill]] }
  0x9a   : > { %s8435_s2 = sshll.u32 %s711_s27, 1  ;;  %s7654_s26 = smul.u32 6, %s711_s27 }
  0x9b   : > { %10276 = sst [smem:[#allocation87_spill]] %s8435_s2  ;;  %s6712_s15 = sshll.u32 %s711_s27, 9 }
  0x9c   : > { %s8448_s21 = scalar_lea.vmem %s10279_s7, %s7654_s26  ;;  %s6713_s26 = sshll.u32 %s711_s27, 11 }
  0x9d   : > { %10280 = sst [smem:[#allocation88_spill]] %s8448_s21  ;;  %s8453_s6 = scalar_lea.vmem %s10281_s8, %s6712_s15 }
  0x9e   : > { %10282 = sst [smem:[#allocation89_spill]] %s8453_s6  ;;  %s6599_s19 = sshll.u32 %s711_s27, 3 }
  0x9f   : > { %s8470_s18 = scalar_lea.vmem %s10286_s12, %s6713_s26  ;;  %s8475_s16 = scalar_lea.vmem %s10288_s13, %s6599_s19 }
  0xa0   : > { %10287 = sst [smem:[#allocation90_spill]] %s8470_s18  ;;  %s8480_s23 = scalar_lea.vmem %s10290_s14, %s6713_s26 }
  0xa1   : > { %10289 = sst [smem:[#allocation91_spill]] %s8475_s16  ;;  %p10293_p9 = scmp.ne.s32.totalorder %s8282_s3, 0 }
  0xa2   : > { %10291 = sst [smem:[#allocation92_spill]] %s8480_s23 }
  0xa3   : > { %760 = sbr.rel (%p10293_p9) target bundleno = 559 (0x22f), region = 100 }
  0xaa   : > { %s8488_s7 = sld [smem:[#allocation5]]  ;;  %s8490_s20 = sld [smem:[#allocation5 + $0x1]] }
  0xab   : > { %s8492_s27 = sld [smem:[#allocation5 + $0x2]]  ;;  %s8494_s19 = sld [smem:[#allocation5 + $0x3]] }
  0xac   : > { %s8496_s15 = sld [smem:[#allocation5 + $0x4]]  ;;  %s8498_s0 = sld [smem:[#allocation5 + $0x5]] }
  0xad   : > { %s8500_s26 = sld [smem:[#allocation5 + $0x6]]  ;;  %s8502_s24 = sld [smem:[#allocation5 + $0x7]] }
  0xae   : > { %s8504_s28 = sld [smem:[#allocation5 + $0x8]]  ;;  %s8506_s17 = sld [smem:[#allocation5 + $0x9]] }
  0xaf   : > { %s8508_s14 = sld [smem:[#allocation5 + $0xa]]  ;;  %s8510_s30 = sld [smem:[#allocation5 + $0xb]] }
  0xb0   : > { %s8512_s25 = sld [smem:[#allocation5 + $0xc]]  ;;  %s8514_s29 = sld [smem:[#allocation5 + $0xd]] }
  0xb1   : > { %s8516_s8 = sld [smem:[#allocation5 + $0xe]]  ;;  %s8518_s12 = sld [smem:[#allocation5 + $0xf]] }
  0xb2   : > { %s8520_s13 = sld [smem:[#allocation5 + $0x10]]  ;;  %s8522_s1 = sld [smem:[#allocation5 + $0x11]] }
  0xb3   : > { %s8524_s3 = sld [smem:[#allocation5 + $0x12]]  ;;  %s8526_s16 = sld [smem:[#allocation5 + $0x13]] }
  0xb4   : > { %s8528_s23 = sld [smem:[#allocation5 + $0x14]]  ;;  %s8530_s11 = sld [smem:[#allocation5 + $0x15]] }
  0xb5   : > { %s8532_s10 = sld [smem:[#allocation5 + $0x16]]  ;;  %s8534_s18 = sld [smem:[#allocation5 + $0x17]] }
  0xb6   : > { %s8536_s9 = sld [smem:[#allocation5 + $0x18]]  ;;  %s8538_s6 = sld [smem:[#allocation5 + $0x19]] }
  0xb7   : > { %s8540_s21 = sld [smem:[#allocation5 + $0x1a]]  ;;  %s8542_s5 = sld [smem:[#allocation5 + $0x1b]] }
  0xb8   : > { %10294 = sst [smem:[#allocation93_spill]] %s8520_s13  ;;  %s8544_s4 = sld [smem:[#allocation5 + $0x1c]] }
  0xb9   : > { %10295 = sst [smem:[#allocation94_spill]] %s8522_s1  ;;  %s8546_s2 = sld [smem:[#allocation5 + $0x1d]] }
  0xba   : > { %10296 = sst [smem:[#allocation95_spill]] %s8524_s3  ;;  %s8548_s22 = sld [smem:[#allocation5 + $0x1e]] }
  0xbb   : > { %10297 = sst [smem:[#allocation96_spill]] %s8526_s16  ;;  %s10310_s1 = sld [smem:[#allocation110_spill]] }
  0xbc   : > { %10298 = sst [smem:[#allocation97_spill]] %s8528_s23  ;;  %s8550_s23 = sld [smem:[#allocation5 + $0x1f]] }
  0xbd   : > { %10299 = sst [smem:[#allocation98_spill]] %s8530_s11  ;;  %s793_s11 = sshrl.u32 %s8488_s7, 3 }
  0xbe   : > { %10300 = sst [smem:[#allocation99_spill]] %s8532_s10  ;;  %s794_s10 = sand.u32 7, %s8488_s7  }
  0xbf   : > { %10301 = sst [smem:[#allocation100_spill]] %s8534_s18  ;;  %s6635_s16 = sshll.u32 %s793_s11, 4 }
  0xc0   : > { %10302 = sst [smem:[#allocation101_spill]] %s8536_s9  ;;  %s796_s18 = sadd.s32 %s6635_s16, %s794_s10 }
  0xc1   : > { %10303 = sst [smem:[#allocation102_spill]] %s8538_s6  ;;  %s10311_s13 = smov %s10310_s1 }
  0xc2   : > { %10304 = sst [smem:[#allocation103_spill]] %s8540_s21  ;;  %s797_s6 = scalar_lea.vmem %s10310_s1, %s796_s18 }
  0xc3   : > { %10305 = sst [smem:[#allocation104_spill]] %s8542_s5  ;;  %v815_v0 = vld [vmem:[%s797_s6] sm:$0x1]  ;;  %v817_v1 = vld [vmem:[%s797_s6 + $0x8] sm:$0x1] }
  0xc4   : > { %10306 = sst [smem:[#allocation105_spill]] %s8544_s4  ;;  %816 = vst [vmem:[#allocation2] sm:$0x1] %v815_v0  ;;  %818 = vst [vmem:[#allocation2 + $0x8] sm:$0x1] %v817_v1 }
  0xc5   : > { %10307 = sst [smem:[#allocation106_spill]] %s8546_s2 }
  0xc6   : > { %10308 = sst [smem:[#allocation107_spill]] %s8548_s22 }
  0xc7   : > { %10309 = sst [smem:[#allocation108_spill]] %s8550_s23 }
  0xc8   : > { %845 = vsyncadd [#allocation3], 32  ;;  %s846_s2 = sshrl.u32 %s8490_s20, 3  ;;  %s847_s4 = sand.u32 7, %s8490_s20  }
  0xc9   : > { %s6636_s22 = sshll.u32 %s846_s2, 4 }
  0xca   : > { %s849_s5 = sadd.s32 %s6636_s22, %s847_s4 }
  0xcb   : > { %s850_s11 = scalar_lea.vmem %s10311_s13, %s849_s5 }
  0xcc   : > { %v870_v2 = vld [vmem:[%s850_s11] sm:$0x1]  ;;  %v872_v3 = vld [vmem:[%s850_s11 + $0x8] sm:$0x1] }
  0xcd   : > { %871 = vst [vmem:[#allocation2 + $0x1] sm:$0x1] %v870_v2  ;;  %873 = vst [vmem:[#allocation2 + $0x9] sm:$0x1] %v872_v3 }
  0xce   : > { %900 = vsyncadd [#allocation3 + $0x1], 32  ;;  %s901_s6 = sshrl.u32 %s8492_s27, 3  ;;  %s902_s9 = sand.u32 7, %s8492_s27  }
  0xcf   : > { %s6637_s10 = sshll.u32 %s901_s6, 4 }
  0xd0   : > { %s904_s1 = sadd.s32 %s6637_s10, %s902_s9 }
  0xd1   : > { %s905_s2 = scalar_lea.vmem %s10311_s13, %s904_s1 }
  0xd2   : > { %v925_v4 = vld [vmem:[%s905_s2] sm:$0x1]  ;;  %v927_v5 = vld [vmem:[%s905_s2 + $0x8] sm:$0x1] }
  0xd3   : > { %926 = vst [vmem:[#allocation2 + $0x2] sm:$0x1] %v925_v4  ;;  %928 = vst [vmem:[#allocation2 + $0xa] sm:$0x1] %v927_v5 }
  0xd4   : > { %955 = vsyncadd [#allocation3 + $0x2], 32  ;;  %s956_s4 = sshrl.u32 %s8494_s19, 3  ;;  %s957_s5 = sand.u32 7, %s8494_s19  }
  0xd5   : > { %s6638_s22 = sshll.u32 %s956_s4, 4 }
  0xd6   : > { %s959_s21 = sadd.s32 %s6638_s22, %s957_s5 }
  0xd7   : > { %s960_s7 = scalar_lea.vmem %s10311_s13, %s959_s21 }
  0xd8   : > { %v980_v6 = vld [vmem:[%s960_s7] sm:$0x1]  ;;  %v982_v7 = vld [vmem:[%s960_s7 + $0x8] sm:$0x1] }
  0xd9   : > { %981 = vst [vmem:[#allocation2 + $0x3] sm:$0x1] %v980_v6  ;;  %983 = vst [vmem:[#allocation2 + $0xb] sm:$0x1] %v982_v7 }
  0xda   : > { %1010 = vsyncadd [#allocation3 + $0x3], 32  ;;  %s1011_s20 = sshrl.u32 %s8496_s15, 3  ;;  %s1012_s27 = sand.u32 7, %s8496_s15  }
  0xdb   : > { %s6639_s11 = sshll.u32 %s1011_s20, 4 }
  0xdc   : > { %s1014_s6 = sadd.s32 %s6639_s11, %s1012_s27 }
  0xdd   : > { %s1015_s19 = scalar_lea.vmem %s10311_s13, %s1014_s6 }
  0xde   : > { %v1035_v8 = vld [vmem:[%s1015_s19] sm:$0x1]  ;;  %v1037_v9 = vld [vmem:[%s1015_s19 + $0x8] sm:$0x1] }
  0xdf   : > { %1036 = vst [vmem:[#allocation2 + $0x4] sm:$0x1] %v1035_v8  ;;  %1038 = vst [vmem:[#allocation2 + $0xc] sm:$0x1] %v1037_v9 }
  0xe0   : > { %1065 = vsyncadd [#allocation3 + $0x4], 32  ;;  %s1066_s1 = sshrl.u32 %s8498_s0, 3  ;;  %s1067_s3 = sand.u32 7, %s8498_s0  }
  0xe1   : > { %s6640_s18 = sshll.u32 %s1066_s1, 4 }
  0xe2   : > { %s1069_s2 = sadd.s32 %s6640_s18, %s1067_s3 }
  0xe3   : > { %s1070_s15 = scalar_lea.vmem %s10311_s13, %s1069_s2 }
  0xe4   : > { %v1090_v10 = vld [vmem:[%s1070_s15] sm:$0x1]  ;;  %v1092_v11 = vld [vmem:[%s1070_s15 + $0x8] sm:$0x1] }
  0xe5   : > { %1091 = vst [vmem:[#allocation2 + $0x5] sm:$0x1] %v1090_v10  ;;  %1093 = vst [vmem:[#allocation2 + $0xd] sm:$0x1] %v1092_v11 }
  0xe6   : > { %1120 = vsyncadd [#allocation3 + $0x5], 32  ;;  %s1121_s22 = sshrl.u32 %s8500_s26, 3  ;;  %s1122_s21 = sand.u32 7, %s8500_s26  }
  0xe7   : > { %s6641_s16 = sshll.u32 %s1121_s22, 4 }
  0xe8   : > { %s1124_s23 = sadd.s32 %s6641_s16, %s1122_s21 }
  0xe9   : > { %s1125_s0 = scalar_lea.vmem %s10311_s13, %s1124_s23 }
  0xea   : > { %v1145_v12 = vld [vmem:[%s1125_s0] sm:$0x1]  ;;  %v1147_v13 = vld [vmem:[%s1125_s0 + $0x8] sm:$0x1] }
  0xeb   : > { %1146 = vst [vmem:[#allocation2 + $0x6] sm:$0x1] %v1145_v12  ;;  %1148 = vst [vmem:[#allocation2 + $0xe] sm:$0x1] %v1147_v13 }
  0xec   : > { %1175 = vsyncadd [#allocation3 + $0x6], 32  ;;  %s1176_s27 = sshrl.u32 %s8502_s24, 3  ;;  %s1177_s11 = sand.u32 7, %s8502_s24  }
  0xed   : > { %s6642_s6 = sshll.u32 %s1176_s27, 4 }
  0xee   : > { %s1179_s9 = sadd.s32 %s6642_s6, %s1177_s11 }
  0xef   : > { %s1180_s26 = scalar_lea.vmem %s10311_s13, %s1179_s9 }
  0xf0   : > { %v1200_v14 = vld [vmem:[%s1180_s26] sm:$0x1]  ;;  %v1202_v15 = vld [vmem:[%s1180_s26 + $0x8] sm:$0x1] }
  0xf1   : > { %1201 = vst [vmem:[#allocation2 + $0x7] sm:$0x1] %v1200_v14  ;;  %1203 = vst [vmem:[#allocation2 + $0xf] sm:$0x1] %v1202_v15 }
  0xf2   : > { %1230 = vsyncadd [#allocation3 + $0x7], 32  ;;  %s1231_s1 = sshrl.u32 %s8504_s28, 3  ;;  %s1232_s3 = sand.u32 7, %s8504_s28  }
  0xf3   : > { %s6643_s18 = sshll.u32 %s1231_s1, 4 }
  0xf4   : > { %s1234_s2 = sadd.s32 %s6643_s18, %s1232_s3 }
  0xf5   : > { %s1235_s24 = scalar_lea.vmem %s10311_s13, %s1234_s2 }
  0xf6   : > { %v1255_v16 = vld [vmem:[%s1235_s24] sm:$0x1]  ;;  %v1257_v17 = vld [vmem:[%s1235_s24 + $0x8] sm:$0x1] }
  0xf7   : > { %1256 = vst [vmem:[#allocation2 + $0x10] sm:$0x1] %v1255_v16  ;;  %1258 = vst [vmem:[#allocation2 + $0x18] sm:$0x1] %v1257_v17 }
  0xf8   : > { %1285 = vsyncadd [#allocation3 + $0x8], 32  ;;  %s1286_s15 = sshrl.u32 %s8506_s17, 3  ;;  %s1287_s22 = sand.u32 7, %s8506_s17  }
  0xf9   : > { %s6644_s21 = sshll.u32 %s1286_s15, 4 }
  0xfa   : > { %s1289_s16 = sadd.s32 %s6644_s21, %s1287_s22 }
  0xfb   : > { %s1290_s28 = scalar_lea.vmem %s10311_s13, %s1289_s16 }
  0xfc   : > { %v1310_v18 = vld [vmem:[%s1290_s28] sm:$0x1]  ;;  %v1312_v19 = vld [vmem:[%s1290_s28 + $0x8] sm:$0x1] }
  0xfd   : > { %1311 = vst [vmem:[#allocation2 + $0x11] sm:$0x1] %v1310_v18  ;;  %1313 = vst [vmem:[#allocation2 + $0x19] sm:$0x1] %v1312_v19 }
  0xfe   : > { %1340 = vsyncadd [#allocation3 + $0x9], 32  ;;  %s1341_s20 = sshrl.u32 %s8508_s14, 3  ;;  %s1342_s0 = sand.u32 7, %s8508_s14  }
  0xff   : > { %s6645_s27 = sshll.u32 %s1341_s20, 4 }
 0x100   : > { %s1344_s11 = sadd.s32 %s6645_s27, %s1342_s0 }
 0x101   : > { %s1345_s17 = scalar_lea.vmem %s10311_s13, %s1344_s11 }
 0x102   : > { %v1365_v20 = vld [vmem:[%s1345_s17] sm:$0x1]  ;;  %v1367_v21 = vld [vmem:[%s1345_s17 + $0x8] sm:$0x1] }
 0x103   : > { %1366 = vst [vmem:[#allocation2 + $0x12] sm:$0x1] %v1365_v20  ;;  %1368 = vst [vmem:[#allocation2 + $0x1a] sm:$0x1] %v1367_v21 }
 0x104   : > { %1395 = vsyncadd [#allocation3 + $0xa], 32  ;;  %s1396_s10 = sshrl.u32 %s8510_s30, 3  ;;  %s1397_s19 = sand.u32 7, %s8510_s30  }
 0x105   : > { %s6646_s26 = sshll.u32 %s1396_s10, 4 }
 0x106   : > { %s1399_s1 = sadd.s32 %s6646_s26, %s1397_s19 }
 0x107   : > { %s1400_s14 = scalar_lea.vmem %s10311_s13, %s1399_s1 }
 0x108   : > { %v1420_v22 = vld [vmem:[%s1400_s14] sm:$0x1]  ;;  %v1422_v23 = vld [vmem:[%s1400_s14 + $0x8] sm:$0x1] }
 0x109   : > { %1421 = vst [vmem:[#allocation2 + $0x13] sm:$0x1] %v1420_v22  ;;  %1423 = vst [vmem:[#allocation2 + $0x1b] sm:$0x1] %v1422_v23 }
 0x10a   : > { %1450 = vsyncadd [#allocation3 + $0xb], 32  ;;  %s1451_s2 = sshrl.u32 %s8512_s25, 3  ;;  %s1452_s4 = sand.u32 7, %s8512_s25  }
 0x10b   : > { %s6647_s5 = sshll.u32 %s1451_s2, 4 }
 0x10c   : > { %s1454_s24 = sadd.s32 %s6647_s5, %s1452_s4 }
 0x10d   : > { %s1455_s30 = scalar_lea.vmem %s10311_s13, %s1454_s24 }
 0x10e   : > { %v1475_v24 = vld [vmem:[%s1455_s30] sm:$0x1]  ;;  %v1477_v25 = vld [vmem:[%s1455_s30 + $0x8] sm:$0x1] }
 0x10f   : > { %1476 = vst [vmem:[#allocation2 + $0x14] sm:$0x1] %v1475_v24  ;;  %1478 = vst [vmem:[#allocation2 + $0x1c] sm:$0x1] %v1477_v25 }
 0x110   : > { %1505 = vsyncadd [#allocation3 + $0xc], 32  ;;  %s1506_s21 = sshrl.u32 %s8514_s29, 3  ;;  %s1507_s16 = sand.u32 7, %s8514_s29  }
 0x111   : > { %s6648_s23 = sshll.u32 %s1506_s21, 4 }
 0x112   : > { %s1509_s7 = sadd.s32 %s6648_s23, %s1507_s16 }
 0x113   : > { %s1510_s25 = scalar_lea.vmem %s10311_s13, %s1509_s7 }
 0x114   : > { %v1530_v26 = vld [vmem:[%s1510_s25] sm:$0x1]  ;;  %v1532_v27 = vld [vmem:[%s1510_s25 + $0x8] sm:$0x1] }
 0x115   : > { %1531 = vst [vmem:[#allocation2 + $0x15] sm:$0x1] %v1530_v26  ;;  %1533 = vst [vmem:[#allocation2 + $0x1d] sm:$0x1] %v1532_v27 }
 0x116   : > { %1560 = vsyncadd [#allocation3 + $0xd], 32  ;;  %s1561_s0 = sshrl.u32 %s8516_s8, 3  ;;  %s1562_s27 = sand.u32 7, %s8516_s8  }
 0x117   : > { %s6649_s11 = sshll.u32 %s1561_s0, 4 }
 0x118   : > { %s1564_s6 = sadd.s32 %s6649_s11, %s1562_s27 }
 0x119   : > { %s1565_s29 = scalar_lea.vmem %s10311_s13, %s1564_s6 }
 0x11a   : > { %v1585_v28 = vld [vmem:[%s1565_s29] sm:$0x1]  ;;  %v1587_v29 = vld [vmem:[%s1565_s29 + $0x8] sm:$0x1] }
 0x11b   : > { %1586 = vst [vmem:[#allocation2 + $0x16] sm:$0x1] %v1585_v28  ;;  %1588 = vst [vmem:[#allocation2 + $0x1e] sm:$0x1] %v1587_v29 }
 0x11c   : > { %1615 = vsyncadd [#allocation3 + $0xe], 32  ;;  %s1616_s10 = sshrl.u32 %s8518_s12, 3  ;;  %s1617_s19 = sand.u32 7, %s8518_s12  }
 0x11d   : > { %s6650_s26 = sshll.u32 %s1616_s10, 4 }
 0x11e   : > { %s1619_s1 = sadd.s32 %s6650_s26, %s1617_s19 }
 0x11f   : > { %s1620_s8 = scalar_lea.vmem %s10311_s13, %s1619_s1 }
 0x120   : > { %v1640_v30 = vld [vmem:[%s1620_s8] sm:$0x1]  ;;  %v1642_v31 = vld [vmem:[%s1620_s8 + $0x8] sm:$0x1] }
 0x121   : > { %1641 = vst [vmem:[#allocation2 + $0x17] sm:$0x1] %v1640_v30  ;;  %1643 = vst [vmem:[#allocation2 + $0x1f] sm:$0x1] %v1642_v31 }
 0x122   : > { %1670 = vsyncadd [#allocation3 + $0xf], 32  ;;  %s10312_s14 = sld [smem:[#allocation93_spill]] }
 0x128   : > { %s1671_s2 = sshrl.u32 %s10312_s14, 3  ;;  %s1672_s4 = sand.u32 7, %s10312_s14  }
 0x129   : > { %s6651_s5 = sshll.u32 %s1671_s2, 4 }
 0x12a   : > { %s1674_s24 = sadd.s32 %s6651_s5, %s1672_s4 }
 0x12b   : > { %s1675_s12 = scalar_lea.vmem %s10311_s13, %s1674_s24 }
 0x12c   : > { %v1695_v32 = vld [vmem:[%s1675_s12] sm:$0x1]  ;;  %v1697_v33 = vld [vmem:[%s1675_s12 + $0x8] sm:$0x1] }
 0x12d   : > { %1696 = vst [vmem:[#allocation2 + $0x20] sm:$0x1] %v1695_v32  ;;  %1698 = vst [vmem:[#allocation2 + $0x28] sm:$0x1] %v1697_v33 }
 0x12e   : > { %1725 = vsyncadd [#allocation3 + $0x10], 32  ;;  %s10313_s30 = sld [smem:[#allocation94_spill]] }
 0x134   : > { %s1726_s21 = sshrl.u32 %s10313_s30, 3  ;;  %s1727_s16 = sand.u32 7, %s10313_s30  }
 0x135   : > { %s6652_s23 = sshll.u32 %s1726_s21, 4 }
 0x136   : > { %s1729_s7 = sadd.s32 %s6652_s23, %s1727_s16 }
 0x137   : > { %s1730_s25 = scalar_lea.vmem %s10311_s13, %s1729_s7 }
 0x138   : > { %v1750_v34 = vld [vmem:[%s1730_s25] sm:$0x1]  ;;  %v1752_v35 = vld [vmem:[%s1730_s25 + $0x8] sm:$0x1] }
 0x139   : > { %1751 = vst [vmem:[#allocation2 + $0x21] sm:$0x1] %v1750_v34  ;;  %1753 = vst [vmem:[#allocation2 + $0x29] sm:$0x1] %v1752_v35 }
 0x13a   : > { %1780 = vsyncadd [#allocation3 + $0x11], 32  ;;  %s10314_s0 = sld [smem:[#allocation95_spill]] }
 0x140   : > { %s1781_s27 = sshrl.u32 %s10314_s0, 3  ;;  %s1782_s11 = sand.u32 7, %s10314_s0  }
 0x141   : > { %s6653_s6 = sshll.u32 %s1781_s27, 4 }
 0x142   : > { %s1784_s9 = sadd.s32 %s6653_s6, %s1782_s11 }
 0x143   : > { %s1785_s10 = scalar_lea.vmem %s10311_s13, %s1784_s9 }
 0x144   : > { %v1805_v36 = vld [vmem:[%s1785_s10] sm:$0x1]  ;;  %v1807_v37 = vld [vmem:[%s1785_s10 + $0x8] sm:$0x1] }
 0x145   : > { %1806 = vst [vmem:[#allocation2 + $0x22] sm:$0x1] %v1805_v36  ;;  %1808 = vst [vmem:[#allocation2 + $0x2a] sm:$0x1] %v1807_v37 }
 0x146   : > { %1835 = vsyncadd [#allocation3 + $0x12], 32  ;;  %s10315_s19 = sld [smem:[#allocation96_spill]] }
 0x14c   : > { %s1836_s26 = sshrl.u32 %s10315_s19, 3  ;;  %s1837_s1 = sand.u32 7, %s10315_s19  }
 0x14d   : > { %s6654_s3 = sshll.u32 %s1836_s26, 4 }
 0x14e   : > { %s1839_s18 = sadd.s32 %s6654_s3, %s1837_s1 }
 0x14f   : > { %s1840_s2 = scalar_lea.vmem %s10311_s13, %s1839_s18 }
 0x150   : > { %v1860_v38 = vld [vmem:[%s1840_s2] sm:$0x1]  ;;  %v1862_v39 = vld [vmem:[%s1840_s2 + $0x8] sm:$0x1] }
 0x151   : > { %1861 = vst [vmem:[#allocation2 + $0x23] sm:$0x1] %v1860_v38  ;;  %1863 = vst [vmem:[#allocation2 + $0x2b] sm:$0x1] %v1862_v39 }
 0x152   : > { %1890 = vsyncadd [#allocation3 + $0x13], 32  ;;  %s10316_s4 = sld [smem:[#allocation97_spill]] }
 0x158   : > { %s1891_s5 = sshrl.u32 %s10316_s4, 3  ;;  %s1892_s24 = sand.u32 7, %s10316_s4  }
 0x159   : > { %s6655_s15 = sshll.u32 %s1891_s5, 4 }
 0x15a   : > { %s1894_s22 = sadd.s32 %s6655_s15, %s1892_s24 }
 0x15b   : > { %s1895_s21 = scalar_lea.vmem %s10311_s13, %s1894_s22 }
 0x15c   : > { %v1915_v40 = vld [vmem:[%s1895_s21] sm:$0x1]  ;;  %v1917_v41 = vld [vmem:[%s1895_s21 + $0x8] sm:$0x1] }
 0x15d   : > { %1916 = vst [vmem:[#allocation2 + $0x24] sm:$0x1] %v1915_v40  ;;  %1918 = vst [vmem:[#allocation2 + $0x2c] sm:$0x1] %v1917_v41 }
 0x15e   : > { %1945 = vsyncadd [#allocation3 + $0x14], 32  ;;  %s10317_s16 = sld [smem:[#allocation98_spill]] }
 0x164   : > { %s1946_s23 = sshrl.u32 %s10317_s16, 3  ;;  %s1947_s7 = sand.u32 7, %s10317_s16  }
 0x165   : > { %s6656_s28 = sshll.u32 %s1946_s23, 4 }
 0x166   : > { %s1949_s20 = sadd.s32 %s6656_s28, %s1947_s7 }
 0x167   : > { %s1950_s27 = scalar_lea.vmem %s10311_s13, %s1949_s20 }
 0x168   : > { %v1970_v42 = vld [vmem:[%s1950_s27] sm:$0x1]  ;;  %v1972_v43 = vld [vmem:[%s1950_s27 + $0x8] sm:$0x1] }
 0x169   : > { %1971 = vst [vmem:[#allocation2 + $0x25] sm:$0x1] %v1970_v42  ;;  %1973 = vst [vmem:[#allocation2 + $0x2d] sm:$0x1] %v1972_v43 }
 0x16a   : > { %2000 = vsyncadd [#allocation3 + $0x15], 32  ;;  %s10318_s11 = sld [smem:[#allocation99_spill]] }
 0x170   : > { %s2001_s6 = sshrl.u32 %s10318_s11, 3  ;;  %s2002_s9 = sand.u32 7, %s10318_s11  }
 0x171   : > { %s6657_s17 = sshll.u32 %s2001_s6, 4 }
 0x172   : > { %s2004_s29 = sadd.s32 %s6657_s17, %s2002_s9 }
 0x173   : > { %s2005_s26 = scalar_lea.vmem %s10311_s13, %s2004_s29 }
 0x174   : > { %v2025_v44 = vld [vmem:[%s2005_s26] sm:$0x1]  ;;  %v2027_v45 = vld [vmem:[%s2005_s26 + $0x8] sm:$0x1] }
 0x175   : > { %2026 = vst [vmem:[#allocation2 + $0x26] sm:$0x1] %v2025_v44  ;;  %2028 = vst [vmem:[#allocation2 + $0x2e] sm:$0x1] %v2027_v45 }
 0x176   : > { %2055 = vsyncadd [#allocation3 + $0x16], 32  ;;  %s10319_s1 = sld [smem:[#allocation100_spill]] }
 0x17c   : > { %s2056_s3 = sshrl.u32 %s10319_s1, 3  ;;  %s2057_s18 = sand.u32 7, %s10319_s1  }
 0x17d   : > { %s6658_s8 = sshll.u32 %s2056_s3, 4 }
 0x17e   : > { %s2059_s14 = sadd.s32 %s6658_s8, %s2057_s18 }
 0x17f   : > { %s2060_s5 = scalar_lea.vmem %s10311_s13, %s2059_s14 }
 0x180   : > { %v2080_v46 = vld [vmem:[%s2060_s5] sm:$0x1]  ;;  %v2082_v47 = vld [vmem:[%s2060_s5 + $0x8] sm:$0x1] }
 0x181   : > { %2081 = vst [vmem:[#allocation2 + $0x27] sm:$0x1] %v2080_v46  ;;  %2083 = vst [vmem:[#allocation2 + $0x2f] sm:$0x1] %v2082_v47 }
 0x182   : > { %2110 = vsyncadd [#allocation3 + $0x17], 32  ;;  %s10320_s24 = sld [smem:[#allocation101_spill]] }
 0x188   : > { %s2111_s15 = sshrl.u32 %s10320_s24, 3  ;;  %s2112_s22 = sand.u32 7, %s10320_s24  }
 0x189   : > { %s6659_s12 = sshll.u32 %s2111_s15, 4 }
 0x18a   : > { %s2114_s30 = sadd.s32 %s6659_s12, %s2112_s22 }
 0x18b   : > { %s2115_s23 = scalar_lea.vmem %s10311_s13, %s2114_s30 }
 0x18c   : > { %v2135_v48 = vld [vmem:[%s2115_s23] sm:$0x1]  ;;  %v2137_v49 = vld [vmem:[%s2115_s23 + $0x8] sm:$0x1] }
 0x18d   : > { %2136 = vst [vmem:[#allocation2 + $0x30] sm:$0x1] %v2135_v48  ;;  %2138 = vst [vmem:[#allocation2 + $0x38] sm:$0x1] %v2137_v49 }
 0x18e   : > { %2165 = vsyncadd [#allocation3 + $0x18], 32  ;;  %s10321_s7 = sld [smem:[#allocation102_spill]] }
 0x194   : > { %s2166_s28 = sshrl.u32 %s10321_s7, 3  ;;  %s2167_s20 = sand.u32 7, %s10321_s7  }
 0x195   : > { %s6660_s25 = sshll.u32 %s2166_s28, 4 }
 0x196   : > { %s2169_s0 = sadd.s32 %s6660_s25, %s2167_s20 }
 0x197   : > { %s2170_s6 = scalar_lea.vmem %s10311_s13, %s2169_s0 }
 0x198   : > { %v2190_v50 = vld [vmem:[%s2170_s6] sm:$0x1]  ;;  %v2192_v51 = vld [vmem:[%s2170_s6 + $0x8] sm:$0x1] }
 0x199   : > { %2191 = vst [vmem:[#allocation2 + $0x31] sm:$0x1] %v2190_v50  ;;  %2193 = vst [vmem:[#allocation2 + $0x39] sm:$0x1] %v2192_v51 }
 0x19a   : > { %2220 = vsyncadd [#allocation3 + $0x19], 32  ;;  %s10322_s9 = sld [smem:[#allocation103_spill]] }
 0x1a0   : > { %s2221_s17 = sshrl.u32 %s10322_s9, 3  ;;  %s2222_s29 = sand.u32 7, %s10322_s9  }
 0x1a1   : > { %s6661_s10 = sshll.u32 %s2221_s17, 4 }
 0x1a2   : > { %s2224_s19 = sadd.s32 %s6661_s10, %s2222_s29 }
 0x1a3   : > { %s2225_s3 = scalar_lea.vmem %s10311_s13, %s2224_s19 }
 0x1a4   : > { %v2245_v52 = vld [vmem:[%s2225_s3] sm:$0x1]  ;;  %v2247_v53 = vld [vmem:[%s2225_s3 + $0x8] sm:$0x1] }
 0x1a5   : > { %2246 = vst [vmem:[#allocation2 + $0x32] sm:$0x1] %v2245_v52  ;;  %2248 = vst [vmem:[#allocation2 + $0x3a] sm:$0x1] %v2247_v53 }
 0x1a6   : > { %2275 = vsyncadd [#allocation3 + $0x1a], 32  ;;  %s10323_s18 = sld [smem:[#allocation104_spill]] }
 0x1ac   : > { %s2276_s8 = sshrl.u32 %s10323_s18, 3  ;;  %s2277_s14 = sand.u32 7, %s10323_s18  }
 0x1ad   : > { %s6662_s2 = sshll.u32 %s2276_s8, 4 }
 0x1ae   : > { %s2279_s4 = sadd.s32 %s6662_s2, %s2277_s14 }
 0x1af   : > { %s2280_s15 = scalar_lea.vmem %s10311_s13, %s2279_s4 }
 0x1b0   : > { %v2300_v54 = vld [vmem:[%s2280_s15] sm:$0x1]  ;;  %v2302_v55 = vld [vmem:[%s2280_s15 + $0x8] sm:$0x1] }
 0x1b1   : > { %2301 = vst [vmem:[#allocation2 + $0x33] sm:$0x1] %v2300_v54  ;;  %2303 = vst [vmem:[#allocation2 + $0x3b] sm:$0x1] %v2302_v55 }
 0x1b2   : > { %2330 = vsyncadd [#allocation3 + $0x1b], 32  ;;  %s10324_s22 = sld [smem:[#allocation105_spill]] }
 0x1b8   : > { %s2331_s12 = sshrl.u32 %s10324_s22, 3  ;;  %s2332_s30 = sand.u32 7, %s10324_s22  }
 0x1b9   : > { %s6663_s21 = sshll.u32 %s2331_s12, 4 }
 0x1ba   : > { %s2334_s16 = sadd.s32 %s6663_s21, %s2332_s30 }
 0x1bb   : > { %s2335_s28 = scalar_lea.vmem %s10311_s13, %s2334_s16 }
 0x1bc   : > { %v2355_v56 = vld [vmem:[%s2335_s28] sm:$0x1]  ;;  %v2357_v57 = vld [vmem:[%s2335_s28 + $0x8] sm:$0x1] }
 0x1bd   : > { %2356 = vst [vmem:[#allocation2 + $0x34] sm:$0x1] %v2355_v56  ;;  %2358 = vst [vmem:[#allocation2 + $0x3c] sm:$0x1] %v2357_v57 }
 0x1be   : > { %2385 = vsyncadd [#allocation3 + $0x1c], 32  ;;  %s10325_s20 = sld [smem:[#allocation106_spill]] }
 0x1c4   : > { %s2386_s25 = sshrl.u32 %s10325_s20, 3  ;;  %s2387_s0 = sand.u32 7, %s10325_s20  }
 0x1c5   : > { %s6664_s27 = sshll.u32 %s2386_s25, 4 }
 0x1c6   : > { %s2389_s11 = sadd.s32 %s6664_s27, %s2387_s0 }
 0x1c7   : > { %s2390_s17 = scalar_lea.vmem %s10311_s13, %s2389_s11 }
 0x1c8   : > { %v2410_v58 = vld [vmem:[%s2390_s17] sm:$0x1]  ;;  %v2412_v59 = vld [vmem:[%s2390_s17 + $0x8] sm:$0x1] }
 0x1c9   : > { %2411 = vst [vmem:[#allocation2 + $0x35] sm:$0x1] %v2410_v58  ;;  %2413 = vst [vmem:[#allocation2 + $0x3d] sm:$0x1] %v2412_v59 }
 0x1ca   : > { %2440 = vsyncadd [#allocation3 + $0x1d], 32  ;;  %s10326_s29 = sld [smem:[#allocation107_spill]] }
 0x1d0   : > { %s2441_s10 = sshrl.u32 %s10326_s29, 3  ;;  %s2442_s19 = sand.u32 7, %s10326_s29  }
 0x1d1   : > { %s6665_s26 = sshll.u32 %s2441_s10, 4 }
 0x1d2   : > { %s2444_s1 = sadd.s32 %s6665_s26, %s2442_s19 }
 0x1d3   : > { %s2445_s8 = scalar_lea.vmem %s10311_s13, %s2444_s1 }
 0x1d4   : > { %v2465_v60 = vld [vmem:[%s2445_s8] sm:$0x1]  ;;  %v2467_v61 = vld [vmem:[%s2445_s8 + $0x8] sm:$0x1] }
 0x1d5   : > { %2466 = vst [vmem:[#allocation2 + $0x36] sm:$0x1] %v2465_v60  ;;  %2468 = vst [vmem:[#allocation2 + $0x3e] sm:$0x1] %v2467_v61 }
 0x1d6   : > { %2495 = vsyncadd [#allocation3 + $0x1e], 32  ;;  %s10327_s14 = sld [smem:[#allocation108_spill]] }
 0x1dc   : > { %s2496_s2 = sshrl.u32 %s10327_s14, 3  ;;  %s2497_s4 = sand.u32 7, %s10327_s14  }
 0x1dd   : > { %s6666_s5 = sshll.u32 %s2496_s2, 4 }
 0x1de   : > { %s2499_s24 = sadd.s32 %s6666_s5, %s2497_s4 }
 0x1df   : > { %s2500_s12 = scalar_lea.vmem %s10311_s13, %s2499_s24 }
 0x1e0   : > { %v2520_v62 = vld [vmem:[%s2500_s12] sm:$0x1]  ;;  %v2522_v63 = vld [vmem:[%s2500_s12 + $0x8] sm:$0x1] }
 0x1e1   : > { %2521 = vst [vmem:[#allocation2 + $0x37] sm:$0x1] %v2520_v62  ;;  %2523 = vst [vmem:[#allocation2 + $0x3f] sm:$0x1] %v2522_v63 }
 0x1e2   : > { %2550 = vsyncadd [#allocation3 + $0x1f], 32 }
 0x1e3   : > { %8071 = dma.done.wait [#allocation3], 32 }
 0x1e4   : > { %8072 = vsyncadd [#allocation3], 4294967264 }
 0x1e5   : > { %8073 = dma.done.wait [#allocation3 + $0x1], 32 }
 0x1e6   : > { %8074 = vsyncadd [#allocation3 + $0x1], 4294967264 }
 0x1e7   : > { %8075 = dma.done.wait [#allocation3 + $0x2], 32 }
 0x1e8   : > { %8076 = vsyncadd [#allocation3 + $0x2], 4294967264 }
 0x1e9   : > { %8077 = dma.done.wait [#allocation3 + $0x3], 32 }
 0x1ea   : > { %8078 = vsyncadd [#allocation3 + $0x3], 4294967264 }
 0x1eb   : > { %8079 = dma.done.wait [#allocation3 + $0x4], 32 }
 0x1ec   : > { %8080 = vsyncadd [#allocation3 + $0x4], 4294967264 }
 0x1ed   : > { %8081 = dma.done.wait [#allocation3 + $0x5], 32 }
 0x1ee   : > { %8082 = vsyncadd [#allocation3 + $0x5], 4294967264 }
 0x1ef   : > { %8083 = dma.done.wait [#allocation3 + $0x6], 32 }
 0x1f0   : > { %8084 = vsyncadd [#allocation3 + $0x6], 4294967264 }
 0x1f1   : > { %8085 = dma.done.wait [#allocation3 + $0x7], 32 }
 0x1f2   : > { %8086 = vsyncadd [#allocation3 + $0x7], 4294967264 }
 0x1f3   : > { %8087 = dma.done.wait [#allocation3 + $0x8], 32 }
 0x1f4   : > { %8088 = vsyncadd [#allocation3 + $0x8], 4294967264 }
 0x1f5   : > { %8089 = dma.done.wait [#allocation3 + $0x9], 32 }
 0x1f6   : > { %8090 = vsyncadd [#allocation3 + $0x9], 4294967264 }
 0x1f7   : > { %8091 = dma.done.wait [#allocation3 + $0xa], 32 }
 0x1f8   : > { %8092 = vsyncadd [#allocation3 + $0xa], 4294967264 }
 0x1f9   : > { %8093 = dma.done.wait [#allocation3 + $0xb], 32 }
 0x1fa   : > { %8094 = vsyncadd [#allocation3 + $0xb], 4294967264 }
 0x1fb   : > { %8095 = dma.done.wait [#allocation3 + $0xc], 32 }
 0x1fc   : > { %8096 = vsyncadd [#allocation3 + $0xc], 4294967264 }
 0x1fd   : > { %8097 = dma.done.wait [#allocation3 + $0xd], 32 }
 0x1fe   : > { %8098 = vsyncadd [#allocation3 + $0xd], 4294967264 }
 0x1ff   : > { %8099 = dma.done.wait [#allocation3 + $0xe], 32 }
 0x200   : > { %8100 = vsyncadd [#allocation3 + $0xe], 4294967264 }
 0x201   : > { %8101 = dma.done.wait [#allocation3 + $0xf], 32 }
 0x202   : > { %8102 = vsyncadd [#allocation3 + $0xf], 4294967264 }
 0x203   : > { %8103 = dma.done.wait [#allocation3 + $0x10], 32 }
 0x204   : > { %8104 = vsyncadd [#allocation3 + $0x10], 4294967264 }
 0x205   : > { %8105 = dma.done.wait [#allocation3 + $0x11], 32 }
 0x206   : > { %8106 = vsyncadd [#allocation3 + $0x11], 4294967264 }
 0x207   : > { %8107 = dma.done.wait [#allocation3 + $0x12], 32 }
 0x208   : > { %8108 = vsyncadd [#allocation3 + $0x12], 4294967264 }
 0x209   : > { %8109 = dma.done.wait [#allocation3 + $0x13], 32 }
 0x20a   : > { %8110 = vsyncadd [#allocation3 + $0x13], 4294967264 }
 0x20b   : > { %8111 = dma.done.wait [#allocation3 + $0x14], 32 }
 0x20c   : > { %8112 = vsyncadd [#allocation3 + $0x14], 4294967264 }
 0x20d   : > { %8113 = dma.done.wait [#allocation3 + $0x15], 32 }
 0x20e   : > { %8114 = vsyncadd [#allocation3 + $0x15], 4294967264 }
 0x20f   : > { %8115 = dma.done.wait [#allocation3 + $0x16], 32 }
 0x210   : > { %8116 = vsyncadd [#allocation3 + $0x16], 4294967264 }
 0x211   : > { %8117 = dma.done.wait [#allocation3 + $0x17], 32 }
 0x212   : > { %8118 = vsyncadd [#allocation3 + $0x17], 4294967264 }
 0x213   : > { %8119 = dma.done.wait [#allocation3 + $0x18], 32 }
 0x214   : > { %8120 = vsyncadd [#allocation3 + $0x18], 4294967264 }
 0x215   : > { %8121 = dma.done.wait [#allocation3 + $0x19], 32 }
 0x216   : > { %8122 = vsyncadd [#allocation3 + $0x19], 4294967264 }
 0x217   : > { %8123 = dma.done.wait [#allocation3 + $0x1a], 32 }
 0x218   : > { %8124 = vsyncadd [#allocation3 + $0x1a], 4294967264 }
 0x219   : > { %8125 = dma.done.wait [#allocation3 + $0x1b], 32 }
 0x21a   : > { %8126 = vsyncadd [#allocation3 + $0x1b], 4294967264 }
 0x21b   : > { %8127 = dma.done.wait [#allocation3 + $0x1c], 32 }
 0x21c   : > { %8128 = vsyncadd [#allocation3 + $0x1c], 4294967264 }
 0x21d   : > { %8129 = dma.done.wait [#allocation3 + $0x1d], 32 }
 0x21e   : > { %8130 = vsyncadd [#allocation3 + $0x1d], 4294967264 }
 0x21f   : > { %8131 = dma.done.wait [#allocation3 + $0x1e], 32 }
 0x220   : > { %8132 = vsyncadd [#allocation3 + $0x1e], 4294967264 }
 0x221   : > { %8133 = dma.done.wait [#allocation3 + $0x1f], 32 }
 0x222   : > { %8134 = vsyncadd [#allocation3 + $0x1f], 4294967264  ;;  %v2616_v0 = vld [vmem:[#allocation2] sm:$0xff]  ;;  %s10328_s16 = sld [smem:[#allocation111_spill]]  ;;  %v2617_v2 = vld [vmem:[#allocation2 + $0x8] sm:$0xff] }
 0x223   : > { %v2618_v5 = vld [vmem:[#allocation2 + $0x10] sm:$0xff]  ;;  %v2619_v9 = vld [vmem:[#allocation2 + $0x18] sm:$0xff]  ;;  %v2620_v11 = vld [vmem:[#allocation2 + $0x20] sm:$0xff] }
 0x224   : > { %v2621_v14 = vld [vmem:[#allocation2 + $0x28] sm:$0xff]  ;;  %v2622_v18 = vld [vmem:[#allocation2 + $0x30] sm:$0xff]  ;;  %v2623_v20 = vld [vmem:[#allocation2 + $0x38] sm:$0xff] }
 0x228   : > { %v2624_v1 = vld [vmem:[%s10328_s16] sm:$0xff]  ;;  %v2625_v4 = vld [vmem:[%s10328_s16 + $0x8] sm:$0xff]  ;;  %v2626_v6 = vld [vmem:[%s10328_s16 + $0x10] sm:$0xff] }
 0x229   : > { %v2632_v3 = vadd.f32 %v2624_v1, %v2616_v0  ;;  %v2633_v7 = vadd.f32 %v2625_v4, %v2617_v2  ;;  %v2634_v8 = vadd.f32 %v2626_v6, %v2618_v5  ;;  %v2627_v10 = vld [vmem:[%s10328_s16 + $0x18] sm:$0xff]  ;;  %v2628_v13 = vld [vmem:[%s10328_s16 + $0x20] sm:$0xff]  ;;  %v2629_v15 = vld [vmem:[%s10328_s16 + $0x28] sm:$0xff] }
 0x22a   : > { %v2635_v12 = vadd.f32 %v2627_v10, %v2619_v9  ;;  %v2636_v16 = vadd.f32 %v2628_v13, %v2620_v11  ;;  %v2637_v17 = vadd.f32 %v2629_v15, %v2621_v14  ;;  %v2630_v19 = vld [vmem:[%s10328_s16 + $0x30] sm:$0xff]  ;;  %v2631_v22 = vld [vmem:[%s10328_s16 + $0x38] sm:$0xff] }
 0x22b   : > { %2640 = vst [vmem:[#allocation2] sm:$0xff] %v2632_v3  ;;  %2641 = vst [vmem:[#allocation2 + $0x8] sm:$0xff] %v2633_v7  ;;  %v2638_v21 = vadd.f32 %v2630_v19, %v2622_v18  ;;  %v2639_v23 = vadd.f32 %v2631_v22, %v2623_v20 }
 0x22c   : > { %2642 = vst [vmem:[#allocation2 + $0x10] sm:$0xff] %v2634_v8  ;;  %2643 = vst [vmem:[#allocation2 + $0x18] sm:$0xff] %v2635_v12 }
 0x22d   : > { %2644 = vst [vmem:[#allocation2 + $0x20] sm:$0xff] %v2636_v16  ;;  %2645 = vst [vmem:[#allocation2 + $0x28] sm:$0xff] %v2637_v17 }
 0x22e   : > { %2646 = vst [vmem:[#allocation2 + $0x30] sm:$0xff] %v2638_v21  ;;  %2647 = vst [vmem:[#allocation2 + $0x38] sm:$0xff] %v2639_v23 }
 0x22f PF: > { %s10329_s26 = sld [smem:[#allocation86_spill]]  ;;  %s10330_s1 = sld [smem:[#allocation87_spill]]  ;;  %vm3361_vm0 = vcmask 261120  }
 0x230   : > { %s10331_s8 = sld [smem:[#allocation113_spill]]  ;;  %s10333_s5 = sld [smem:[#allocation114_spill]] }
 0x231   : > { %s10335_s15 = sld [smem:[#allocation88_spill]]  ;;  %s10336_s30 = sld [smem:[#allocation112_spill]] }
 0x232   : > { %v8736_v24 = vld [vmem:[#allocation2] sm:$0xff]  ;;  %v8738_v25 = vld [vmem:[#allocation2 + $0x8] sm:$0xff]  ;;  %s10337_s0 = sld [smem:[#allocation89_spill]]  ;;  %s10338_s6 = sld [smem:[#allocation118_spill]] }
 0x233   : > { %v2658_v27 = vadd.f32 %v8738_v25, %v8736_v24  ;;  %v8746_v29 = vld [vmem:[#allocation2 + $0x10] sm:$0xff]  ;;  %v8748_v30 = vld [vmem:[#allocation2 + $0x18] sm:$0xff]  ;;  %s10340_s17 = sld [smem:[#allocation90_spill]]  ;;  %s10341_s19 = sld [smem:[#allocation119_spill]] }
 0x234   : > { %v8740_v26 = vld [vmem:[#allocation2 + $0x20] sm:$0xff]  ;;  %v8744_v28 = vld [vmem:[#allocation2 + $0x28] sm:$0xff]  ;;  %v2661_v34 = vadd.f32 %v8748_v30, %v8746_v29  ;;  %s10345_s2 = sld [smem:[#allocation92_spill]]  ;;  %s10346_s4 = sld [smem:[#allocation91_spill]] }
 0x235   : > { %v2664_v31 = vadd.f32 %v8744_v28, %v8740_v26  ;;  %v8752_v32 = vld [vmem:[#allocation2 + $0x30] sm:$0xff]  ;;  %v8754_v33 = vld [vmem:[#allocation2 + $0x38] sm:$0xff]  ;;  %2659 = vadd.xlane.f32.xlu0 %v2658_v27  ;;  %v2762_v36 = vld [vmem:[%s10329_s26 + $0x8] sm:$0xff] }
 0x236   : > { %v2667_v35 = vadd.f32 %v8754_v33, %v8752_v32  ;;  %v2768_v37 = vld [vmem:[%s10329_s26 + $0x38] sm:$0xff]  ;;  %v2761_v38 = vld [vmem:[%s10329_s26] sm:$0xff]  ;;  %v2767_v40 = vld [vmem:[%s10329_s26 + $0x30] sm:$0xff]  ;;  %s10332_s14 = scalar_lea.vmem %s10331_s8, %s10330_s1  ;;  %s10334_s24 = scalar_lea.vmem %s10333_s5, %s10330_s1 }
 0x237   : > { %2665 = vadd.xlane.f32.xlu1 %v2664_v31  ;;  %v6803_v39 = vpack.c.bf16 %v2768_v37, %v2762_v36  ;;  %v2774_v41 = vld [vmem:[%s10329_s26 + $0x68] sm:$0xff]  ;;  %v2780_v42 = vld [vmem:[%s10329_s26 + $0x98] sm:$0xff]  ;;  %v6805_v43 = vpack.c.bf16 %v2767_v40, %v2761_v38  ;;  %v2773_v45 = vld [vmem:[%s10329_s26 + $0x60] sm:$0xff]  ;;  %s10343_s8 = sld [smem:[#allocation120_spill]] }
 0x238   : > { %v6807_v44 = vpack.c.bf16 %v2780_v42, %v2774_v41  ;;  %v2779_v46 = vld [vmem:[%s10329_s26 + $0x90] sm:$0xff]  ;;  %v2786_v47 = vld [vmem:[%s10329_s26 + $0xc8] sm:$0xff]  ;;  %v2792_v48 = vld [vmem:[%s10329_s26 + $0xf8] sm:$0xff]  ;;  %s10339_s9 = scalar_lea.vmem %s10338_s6, %s10330_s1 }
 0x239   : > { %2662 = vadd.xlane.f32.xlu0 %v2661_v34  ;;  %6804 = vmatprep.subr.bf16.mxu1 %v6803_v39  ;;  %v6809_v49 = vpack.c.bf16 %v2779_v46, %v2773_v45  ;;  %v6811_v50 = vpack.c.bf16 %v2792_v48, %v2786_v47  ;;  %v2785_v51 = vld [vmem:[%s10329_s26 + $0xc0] sm:$0xff]  ;;  %v2791_v52 = vld [vmem:[%s10329_s26 + $0xf0] sm:$0xff]  ;;  %v2798_v53 = vld [vmem:[%s10329_s26 + $0x128] sm:$0xff] }
 0x23a   : > { %6806 = vmatpush1.bf16.msra.mxu1 %v6805_v43  ;;  %v2804_v54 = vld [vmem:[%s10329_s26 + $0x158] sm:$0xff]  ;;  %v6813_v55 = vpack.c.bf16 %v2791_v52, %v2785_v51  ;;  %v2797_v57 = vld [vmem:[%s10329_s26 + $0x120] sm:$0xff]  ;;  %v2803_v58 = vld [vmem:[%s10329_s26 + $0x150] sm:$0xff] }
 0x23b   : > { %2668 = vadd.xlane.f32.xlu1 %v2667_v35  ;;  %6808 = vmatprep.subr.bf16.mxu1 %v6807_v44  ;;  %v6815_v56 = vpack.c.bf16 %v2804_v54, %v2798_v53  ;;  %v2810_v59 = vld [vmem:[%s10329_s26 + $0x188] sm:$0xff]  ;;  %v2816_v60 = vld [vmem:[%s10329_s26 + $0x1b8] sm:$0xff]  ;;  %v6817_v61 = vpack.c.bf16 %v2803_v58, %v2797_v57  ;;  %v2809_v63 = vld [vmem:[%s10329_s26 + $0x180] sm:$0xff] }
 0x23c   : > { %v6819_v62 = vpack.c.bf16 %v2816_v60, %v2810_v59  ;;  %v2815_v0 = vld [vmem:[%s10329_s26 + $0x1b0] sm:$0xff]  ;;  %v2822_v1 = vld [vmem:[%s10329_s26 + $0x1e8] sm:$0xff]  ;;  %v2828_v2 = vld [vmem:[%s10329_s26 + $0x218] sm:$0xff] }
 0x23d   : > { %v6821_v3 = vpack.c.bf16 %v2815_v0, %v2809_v63  ;;  %v6823_v4 = vpack.c.bf16 %v2828_v2, %v2822_v1  ;;  %v2821_v5 = vld [vmem:[%s10329_s26 + $0x1e0] sm:$0xff]  ;;  %v2827_v6 = vld [vmem:[%s10329_s26 + $0x210] sm:$0xff]  ;;  %v2834_v7 = vld [vmem:[%s10329_s26 + $0x248] sm:$0xff] }
 0x23e   : > { %6810 = vmatpush1.bf16.msra.mxu1 %v6809_v49  ;;  %v2840_v8 = vld [vmem:[%s10329_s26 + $0x278] sm:$0xff]  ;;  %v6825_v9 = vpack.c.bf16 %v2827_v6, %v2821_v5  ;;  %v2833_v11 = vld [vmem:[%s10329_s26 + $0x240] sm:$0xff]  ;;  %v2839_v12 = vld [vmem:[%s10329_s26 + $0x270] sm:$0xff] }
 0x23f   : > { %6812 = vmatprep.subr.bf16.mxu1 %v6811_v50  ;;  %v6827_v10 = vpack.c.bf16 %v2840_v8, %v2834_v7  ;;  %v2846_v13 = vld [vmem:[%s10329_s26 + $0x2a8] sm:$0xff]  ;;  %v2852_v14 = vld [vmem:[%s10329_s26 + $0x2d8] sm:$0xff]  ;;  %v6829_v15 = vpack.c.bf16 %v2839_v12, %v2833_v11  ;;  %v2845_v17 = vld [vmem:[%s10329_s26 + $0x2a0] sm:$0xff] }
 0x240   : > { %v6831_v16 = vpack.c.bf16 %v2852_v14, %v2846_v13  ;;  %v2851_v18 = vld [vmem:[%s10329_s26 + $0x2d0] sm:$0xff]  ;;  %v2858_v19 = vld [vmem:[%s10329_s26 + $0x308] sm:$0xff]  ;;  %v2864_v20 = vld [vmem:[%s10329_s26 + $0x338] sm:$0xff] }
 0x241   : > { %v6833_v21 = vpack.c.bf16 %v2851_v18, %v2845_v17  ;;  %v6835_v22 = vpack.c.bf16 %v2864_v20, %v2858_v19  ;;  %v2857_v23 = vld [vmem:[%s10329_s26 + $0x300] sm:$0xff]  ;;  %v2863_v27 = vld [vmem:[%s10329_s26 + $0x330] sm:$0xff]  ;;  %v2870_v31 = vld [vmem:[%s10329_s26 + $0x368] sm:$0xff] }
 0x242   : > { %6814 = vmatpush1.bf16.msra.mxu1 %v6813_v55  ;;  %v2876_v34 = vld [vmem:[%s10329_s26 + $0x398] sm:$0xff]  ;;  %v6837_v35 = vpack.c.bf16 %v2863_v27, %v2857_v23  ;;  %v2869_v37 = vld [vmem:[%s10329_s26 + $0x360] sm:$0xff]  ;;  %v2875_v38 = vld [vmem:[%s10329_s26 + $0x390] sm:$0xff] }
 0x243   : > { %6816 = vmatprep.subr.bf16.mxu1 %v6815_v56  ;;  %v6839_v36 = vpack.c.bf16 %v2876_v34, %v2870_v31  ;;  %v2882_v39 = vld [vmem:[%s10329_s26 + $0x3c8] sm:$0xff]  ;;  %v2888_v40 = vld [vmem:[%s10329_s26 + $0x3f8] sm:$0xff]  ;;  %v6841_v41 = vpack.c.bf16 %v2875_v38, %v2869_v37  ;;  %v2881_v43 = vld [vmem:[%s10329_s26 + $0x3c0] sm:$0xff] }
 0x244   : > { %v6843_v42 = vpack.c.bf16 %v2888_v40, %v2882_v39  ;;  %v2887_v44 = vld [vmem:[%s10329_s26 + $0x3f0] sm:$0xff]  ;;  %v2894_v2 = vld [vmem:[%s10329_s26 + $0x428] sm:$0xff]  ;;  %v2893_v5 = vld [vmem:[%s10329_s26 + $0x420] sm:$0xff] }
 0x245   : > { %v6845_v45 = vpack.c.bf16 %v2887_v44, %v2881_v43  ;;  %v2899_v6 = vld [vmem:[%s10329_s26 + $0x450] sm:$0xff]  ;;  %v2906_v8 = vld [vmem:[%s10329_s26 + $0x488] sm:$0xff]  ;;  %v2905_v11 = vld [vmem:[%s10329_s26 + $0x480] sm:$0xff] }
 0x246   : > { %6818 = vmatpush1.bf16.msra.mxu1 %v6817_v61  ;;  %v6849_v7 = vpack.c.bf16 %v2899_v6, %v2893_v5  ;;  %v2911_v12 = vld [vmem:[%s10329_s26 + $0x4b0] sm:$0xff]  ;;  %v2918_v14 = vld [vmem:[%s10329_s26 + $0x4e8] sm:$0xff]  ;;  %v2917_v17 = vld [vmem:[%s10329_s26 + $0x4e0] sm:$0xff] }
 0x247   : > { %6820 = vmatprep.subr.bf16.mxu1 %v6819_v62  ;;  %v6853_v13 = vpack.c.bf16 %v2911_v12, %v2905_v11  ;;  %v2923_v18 = vld [vmem:[%s10329_s26 + $0x510] sm:$0xff]  ;;  %v2930_v20 = vld [vmem:[%s10329_s26 + $0x548] sm:$0xff]  ;;  %v2929_v23 = vld [vmem:[%s10329_s26 + $0x540] sm:$0xff] }
 0x248   : > { %v6857_v19 = vpack.c.bf16 %v2923_v18, %v2917_v17  ;;  %v2935_v27 = vld [vmem:[%s10329_s26 + $0x570] sm:$0xff]  ;;  %v2942_v31 = vld [vmem:[%s10329_s26 + $0x5a8] sm:$0xff]  ;;  %v2764_v40 = vld [vmem:[%s10329_s26 + $0x18] sm:$0xff] }
 0x249   : > { %v6861_v34 = vpack.c.bf16 %v2935_v27, %v2929_v23  ;;  %v2947_v37 = vld [vmem:[%s10329_s26 + $0x5d0] sm:$0xff]  ;;  %v2769_v5 = vld [vmem:[%s10329_s26 + $0x40] sm:$0xff]  ;;  %v2794_v23 = vld [vmem:[%s10329_s26 + $0x108] sm:$0xff] }
 0x24a   : > { %6822 = vmatpush1.bf16.msra.mxu1 %v6821_v3  ;;  %v2900_v3 = vld [vmem:[%s10329_s26 + $0x458] sm:$0xff]  ;;  %v2781_v17 = vld [vmem:[%s10329_s26 + $0xa0] sm:$0xff] }
 0x24b   : > { %6824 = vmatprep.subr.bf16.mxu1 %v6823_v4  ;;  %v6847_v4 = vpack.c.bf16 %v2900_v3, %v2894_v2 }
 0x24e   : > { %6826 = vmatpush1.bf16.msra.mxu1 %v6825_v9  ;;  %v2912_v9 = vld [vmem:[%s10329_s26 + $0x4b8] sm:$0xff] }
 0x24f   : > { %6828 = vmatprep.subr.bf16.mxu1 %v6827_v10  ;;  %v6851_v10 = vpack.c.bf16 %v2912_v9, %v2906_v8  ;;  %v2776_v8 = vld [vmem:[%s10329_s26 + $0x78] sm:$0xff]  ;;  %v2782_v9 = vld [vmem:[%s10329_s26 + $0xa8] sm:$0xff] }
 0x252   : > { %6830 = vmatpush1.bf16.msra.mxu1 %v6829_v15  ;;  %v2924_v15 = vld [vmem:[%s10329_s26 + $0x518] sm:$0xff] }
 0x253   : > { %6832 = vmatprep.subr.bf16.mxu1 %v6831_v16  ;;  %v6855_v16 = vpack.c.bf16 %v2924_v15, %v2918_v14  ;;  %v6871_v15 = vpack.c.bf16 %v2782_v9, %v2776_v8 }
 0x256   : > { %6834 = vmatpush1.bf16.msra.mxu1 %v6833_v21  ;;  %v2936_v21 = vld [vmem:[%s10329_s26 + $0x578] sm:$0xff] }
 0x257   : > { %6836 = vmatprep.subr.bf16.mxu1 %v6835_v22  ;;  %v6859_v22 = vpack.c.bf16 %v2936_v21, %v2930_v20 }
 0x25a   : > { %6838 = vmatpush1.bf16.msra.mxu1 %v6837_v35  ;;  %v2948_v35 = vld [vmem:[%s10329_s26 + $0x5d8] sm:$0xff] }
 0x25b   : > { %6840 = vmatprep.subr.bf16.mxu1 %v6839_v36  ;;  %v2941_v36 = vld [vmem:[%s10329_s26 + $0x5a0] sm:$0xff]  ;;  %v6863_v38 = vpack.c.bf16 %v2948_v35, %v2942_v31 }
 0x25c   : > { %v6865_v39 = vpack.c.bf16 %v2947_v37, %v2941_v36  ;;  %v2787_v36 = vld [vmem:[%s10329_s26 + $0xd0] sm:$0xff]  ;;  %v2793_v37 = vld [vmem:[%s10329_s26 + $0x100] sm:$0xff] }
 0x25e   : > { %6842 = vmatpush1.bf16.msra.mxu1 %v6841_v41  ;;  %v2770_v41 = vld [vmem:[%s10329_s26 + $0x48] sm:$0xff] }
 0x25f   : > { %6844 = vmatprep.subr.bf16.mxu1 %v6843_v42  ;;  %v6867_v42 = vpack.c.bf16 %v2770_v41, %v2764_v40  ;;  %v2800_v41 = vld [vmem:[%s10329_s26 + $0x138] sm:$0xff] }
 0x262   : > { %6846 = vmatpush1.bf16.msra.mxu1 %v6845_v45  ;;  %v2724_v45 = vlaneseq }
 0x263   : > { %6848 = vmatprep.subr.bf16.mxu1 %v6847_v4  ;;  %v2763_v4 = vld [vmem:[%s10329_s26 + $0x10] sm:$0xff] }
 0x264   : > { %v6869_v11 = vpack.c.bf16 %v2769_v5, %v2763_v4  ;;  %v2835_v4 = vld [vmem:[%s10329_s26 + $0x250] sm:$0xff]  ;;  %v2841_v5 = vld [vmem:[%s10329_s26 + $0x280] sm:$0xff] }
 0x265   : > { %v6893_v8 = vpack.c.bf16 %v2841_v5, %v2835_v4  ;;  %v2943_v5 = vld [vmem:[%s10329_s26 + $0x5b0] sm:$0xff] }
 0x266   : > { %6850 = vmatpush1.bf16.msra.mxu1 %v6849_v7 }
 0x267   : > { %6852 = vmatprep.subr.bf16.mxu1 %v6851_v10 }
 0x26a   : > { %6854 = vmatpush1.bf16.msra.mxu1 %v6853_v13 }
 0x26b   : > { %6856 = vmatprep.subr.bf16.mxu1 %v6855_v16  ;;  %v2775_v16 = vld [vmem:[%s10329_s26 + $0x70] sm:$0xff] }
 0x26e   : > { %6858 = vmatpush1.bf16.msra.mxu1 %v6857_v19 }
 0x26f   : > { %6860 = vmatprep.subr.bf16.mxu1 %v6859_v22  ;;  %v2788_v22 = vld [vmem:[%s10329_s26 + $0xd8] sm:$0xff] }
 0x272   : > { %6862 = vmatpush1.bf16.msra.mxu1 %v6861_v34  ;;  %v6875_v34 = vpack.c.bf16 %v2794_v23, %v2788_v22  ;;  %v2871_v22 = vld [vmem:[%s10329_s26 + $0x370] sm:$0xff]  ;;  %v2877_v23 = vld [vmem:[%s10329_s26 + $0x3a0] sm:$0xff] }
 0x273   : > { %6864 = vmatprep.subr.bf16.mxu1 %v6863_v38 }
 0x276   : > { %6866 = vmatpush1.bf16.msra.mxu1 %v6865_v39 }
 0x277   : > { %6868 = vmatprep.subr.bf16.mxu1 %v6867_v42  ;;  %v2806_v42 = vld [vmem:[%s10329_s26 + $0x168] sm:$0xff] }
 0x2c2   : > { %v2660_v46 = vpop.xlane.xlu0 %2659 }
 0x2c3   : > { %v2671_v47 = vmul.f32 0.00390625, %v2660_v46 }
 0x2c4   : > { %v2666_v48 = vpop.xlane.xlu1 %2665 }
 0x2c5   : > { %v2673_v49 = vmul.f32 0.00390625, %v2666_v48  ;;  %v8805_v50 = vsub.f32 %v8736_v24, %v2671_v47  ;;  %v8808_v51 = vsub.f32 %v8738_v25, %v2671_v47 }
 0x2c6   : > { %v2663_v54 = vpop.xlane.xlu0 %2662 }
 0x2c7   : > { %v8811_v52 = vsub.f32 %v8740_v26, %v2673_v49  ;;  %v8814_v53 = vsub.f32 %v8744_v28, %v2673_v49  ;;  %v2672_v55 = vmul.f32 0.00390625, %v2663_v54  ;;  %v2683_v57 = vmul.f32 %v8805_v50, %v8805_v50 }
 0x2c8   : > { %v2669_v56 = vpop.xlane.xlu1 %2668  ;;  %v2684_v58 = vmul.f32 %v8808_v51, %v8808_v51 }
 0x2c9   : > { %v2674_v24 = vmul.f32 0.00390625, %v2669_v56  ;;  %v2687_v25 = vmul.f32 %v8811_v52, %v8811_v52  ;;  %v2688_v26 = vmul.f32 %v8814_v53, %v8814_v53  ;;  %v8825_v59 = vsub.f32 %v8746_v29, %v2672_v55 }
 0x2ca   : > { %v8828_v28 = vsub.f32 %v8748_v30, %v2672_v55  ;;  %v2691_v60 = vadd.f32 %v2684_v58, %v2683_v57  ;;  %v8866_v55 = vshrl.u32 %v2724_v45, 7  ;;  %v2799_v45 = vld [vmem:[%s10329_s26 + $0x130] sm:$0xff] }
 0x2cb   : > { %v8831_v61 = vsub.f32 %v8752_v32, %v2674_v24  ;;  %v8834_v62 = vsub.f32 %v8754_v33, %v2674_v24  ;;  %v2697_v63 = vadd.f32 %v2688_v26, %v2687_v25  ;;  %v2685_v29 = vmul.f32 %v8825_v59, %v8825_v59 }
 0x2cc   : > { %2692 = vadd.xlane.f32.xlu0 %v2691_v60  ;;  %v2686_v0 = vmul.f32 %v8828_v28, %v8828_v28  ;;  %v8869_v25 = vsub.s32 1, %v8866_v55  ;;  %v8872_v26 = vsub.s32 0, %v8866_v55 }
 0x2cd   : > { %v2689_v30 = vmul.f32 %v8831_v61, %v8831_v61  ;;  %v2690_v32 = vmul.f32 %v8834_v62, %v8834_v62 }
 0x2ce   : > { %v2694_v1 = vadd.f32 %v2686_v0, %v2685_v29  ;;  %v2657_v29 = vld [vmem:[%s10334_s24] sm:$0x3] }
 0x2cf   : > { %v2700_v33 = vadd.f32 %v2690_v32, %v2689_v30  ;;  %v2746_v3 = vrot.slane %v2657_v29, %v8872_v26 }
 0x2d0   : > { %2698 = vadd.xlane.f32.xlu0 %v2697_v63  ;;  %2695 = vadd.xlane.f32.xlu1 %v2694_v1  ;;  %v2656_v63 = vld [vmem:[%s10332_s14] sm:$0x3]  ;;  %s10344_s14 = scalar_lea.vmem %s10343_s8, %s10330_s1 }
 0x2d1   : > { %v2731_v0 = vrot.slane %v2656_v63, %v8869_v25  ;;  %v2727_v30 = vrot.slane %v2656_v63, %v8872_v26  ;;  %v2830_v63 = vld [vmem:[%s10329_s26 + $0x228] sm:$0xff] }
 0x2d4   : > { %2701 = vadd.xlane.f32.xlu1 %v2700_v33  ;;  %v2750_v33 = vrot.slane %v2657_v29, %v8869_v25 }
 0x359   : > { %v2693_v43 = vpop.xlane.xlu0 %2692 }
 0x35a   : > { %v2703_v44 = vmul.f32 0.00390625, %v2693_v43 }
 0x35c   : > { %v2707_v46 = vadd.f32 1e-05, %v2703_v44 }
 0x35d   : > { %v2696_v47 = vpop.xlane.xlu1 %2695  ;;  %v2699_v48 = vpop.xlane.xlu0 %2698 }
 0x35e   : > { %7728 = vrsqrt.f32 %v2707_v46  ;;  %v2704_v49 = vmul.f32 0.00390625, %v2696_v47  ;;  %v2705_v54 = vmul.f32 0.00390625, %v2699_v48  ;;  %v2805_v46 = vld [vmem:[%s10329_s26 + $0x160] sm:$0xff]  ;;  %v2812_v48 = vld [vmem:[%s10329_s26 + $0x198] sm:$0xff] }
 0x360   : > { %v2708_v56 = vadd.f32 1e-05, %v2704_v49  ;;  %v2709_v57 = vadd.f32 1e-05, %v2705_v54  ;;  %v2818_v49 = vld [vmem:[%s10329_s26 + $0x1c8] sm:$0xff]  ;;  %v6881_v54 = vpack.c.bf16 %v2805_v46, %v2799_v45  ;;  %v2907_v46 = vld [vmem:[%s10329_s26 + $0x490] sm:$0xff] }
 0x361   : > { %v2702_v58 = vpop.xlane.xlu1 %2701 }
 0x362   : > { %7730 = vrsqrt.f32 %v2708_v56  ;;  %v2706_v24 = vmul.f32 0.00390625, %v2702_v58  ;;  %v2811_v58 = vld [vmem:[%s10329_s26 + $0x190] sm:$0xff] }
 0x363   : > { %7732 = vrsqrt.f32 %v2709_v57  ;;  %v6883_v57 = vpack.c.bf16 %v2818_v49, %v2812_v48  ;;  %v2913_v48 = vld [vmem:[%s10329_s26 + $0x4c0] sm:$0xff]  ;;  %v2920_v49 = vld [vmem:[%s10329_s26 + $0x4f8] sm:$0xff] }
 0x364   : > { %v2710_v60 = vadd.f32 1e-05, %v2706_v24  ;;  %v2817_v24 = vld [vmem:[%s10329_s26 + $0x1c0] sm:$0xff] }
 0x365   : > { %v6885_v29 = vpack.c.bf16 %v2817_v24, %v2811_v58  ;;  %v2919_v24 = vld [vmem:[%s10329_s26 + $0x4f0] sm:$0xff] }
 0x366   : > { %7734 = vrsqrt.f32 %v2710_v60  ;;  %v2824_v60 = vld [vmem:[%s10329_s26 + $0x1f8] sm:$0xff] }
 0x368   : > { %v7729_v32 = vpop.eup %7728 }
 0x369   : > { %v2716_v1 = vmul.f32 %v7729_v32, %v8808_v51  ;;  %v2715_v2 = vmul.f32 %v7729_v32, %v8805_v50  ;;  %v2829_v32 = vld [vmem:[%s10329_s26 + $0x220] sm:$0xff] }
 0x36b   : > { %v2735_v6 = vmul.f32 %v2731_v0, %v2716_v1  ;;  %v2734_v7 = vmul.f32 %v2727_v30, %v2715_v2  ;;  %v2836_v1 = vld [vmem:[%s10329_s26 + $0x258] sm:$0xff] }
 0x36c   : > { %v7731_v10 = vpop.eup %7730 }
 0x36d   : > { %v7733_v12 = vpop.eup %7732  ;;  %v8894_v51 = vadd.f32 %v2750_v33, %v2735_v6  ;;  %v8896_v13 = vadd.f32 %v2746_v3, %v2734_v7  ;;  %v2718_v50 = vmul.f32 %v7731_v10, %v8828_v28  ;;  %v2717_v14 = vmul.f32 %v7731_v10, %v8825_v59  ;;  %v2848_v6 = vld [vmem:[%s10329_s26 + $0x2b8] sm:$0xff]  ;;  %v2854_v7 = vld [vmem:[%s10329_s26 + $0x2e8] sm:$0xff]  ;;  %v2847_v10 = vld [vmem:[%s10329_s26 + $0x2b0] sm:$0xff] }
 0x36e   : > { %v2720_v18 = vmul.f32 %v7733_v12, %v8814_v53  ;;  %v2719_v19 = vmul.f32 %v7733_v12, %v8811_v52  ;;  %v6873_v52 = vpack.c.bf16 %v2781_v17, %v2775_v16  ;;  %v6895_v9 = vpack.c.bf16 %v2854_v7, %v2848_v6  ;;  %v2860_v12 = vld [vmem:[%s10329_s26 + $0x318] sm:$0xff]  ;;  %v2859_v16 = vld [vmem:[%s10329_s26 + $0x310] sm:$0xff]  ;;  %v2865_v17 = vld [vmem:[%s10329_s26 + $0x340] sm:$0xff] }
 0x36f   : > { %3049 = vmatprep.mubr.f32.mxu1 %v8894_v51  ;;  %v2737_v20 = vmul.f32 %v2731_v0, %v2718_v50  ;;  %v2736_v21 = vmul.f32 %v2727_v30, %v2717_v14  ;;  %v2866_v50 = vld [vmem:[%s10329_s26 + $0x348] sm:$0xff]  ;;  %v2949_v6 = vld [vmem:[%s10329_s26 + $0x5e0] sm:$0xff] }
 0x370   : > { %v7735_v27 = vpop.eup %7734  ;;  %3050 = vmatmul.mubr.f32.vlgmr.msra.gmra.mrb[0].mxu1 %v8896_v13  ;;  %v2739_v59 = vmul.f32 %v2731_v0, %v2720_v18  ;;  %v2738_v35 = vmul.f32 %v2727_v30, %v2719_v19  ;;  %v2872_v18 = vld [vmem:[%s10329_s26 + $0x378] sm:$0xff]  ;;  %v2878_v19 = vld [vmem:[%s10329_s26 + $0x3a8] sm:$0xff] }
 0x371   : > { %6870 = vmatpush1.bf16.msra.mxu1 %v6869_v11  ;;  %v8908_v28 = vadd.f32 %v2750_v33, %v2737_v20  ;;  %v8910_v53 = vadd.f32 %v2746_v3, %v2736_v21  ;;  %v2722_v31 = vmul.f32 %v7735_v27, %v8834_v62  ;;  %v2721_v38 = vmul.f32 %v7735_v27, %v8831_v61  ;;  %v2853_v11 = vld [vmem:[%s10329_s26 + $0x2e0] sm:$0xff]  ;;  %v2884_v27 = vld [vmem:[%s10329_s26 + $0x3d8] sm:$0xff]  ;;  %v2766_v7 = vld [vmem:[%s10329_s26 + $0x28] sm:$0xff] }
 0x372   : > { %6872 = vmatprep.subr.bf16.mxu1 %v6871_v15  ;;  %v8917_v39 = vadd.f32 %v2750_v33, %v2739_v59  ;;  %v6877_v62 = vpack.c.bf16 %v2793_v37, %v2787_v36  ;;  %v8923_v43 = vadd.f32 %v2746_v3, %v2738_v35  ;;  %v6879_v61 = vpack.c.bf16 %v2806_v42, %v2800_v41  ;;  %v2890_v59 = vld [vmem:[%s10329_s26 + $0x408] sm:$0xff]  ;;  %v2889_v35 = vld [vmem:[%s10329_s26 + $0x400] sm:$0xff]  ;;  %v2896_v36 = vld [vmem:[%s10329_s26 + $0x438] sm:$0xff] }
 0x373   : > { %3055 = vmatprep.mubr.f32.mxu1 %v8908_v28  ;;  %v2741_v40 = vmul.f32 %v2731_v0, %v2722_v31  ;;  %v2740_v44 = vmul.f32 %v2727_v30, %v2721_v38  ;;  %v6887_v0 = vpack.c.bf16 %v2830_v63, %v2824_v60  ;;  %v2823_v30 = vld [vmem:[%s10329_s26 + $0x1f0] sm:$0xff]  ;;  %v6897_v14 = vpack.c.bf16 %v2853_v11, %v2847_v10  ;;  %v2902_v37 = vld [vmem:[%s10329_s26 + $0x468] sm:$0xff]  ;;  %v2901_v42 = vld [vmem:[%s10329_s26 + $0x460] sm:$0xff] }
 0x374   : > { %3056 = vmatmul.mubr.f32.gmra.mrb[2].mxu1 %v8910_v53  ;;  %v6889_v2 = vpack.c.bf16 %v2829_v32, %v2823_v30  ;;  %v6899_v15 = vpack.c.bf16 %v2866_v50, %v2860_v12  ;;  %v6901_v20 = vpack.c.bf16 %v2865_v17, %v2859_v16  ;;  %v6903_v21 = vpack.c.bf16 %v2878_v19, %v2872_v18  ;;  %v2895_v41 = vld [vmem:[%s10329_s26 + $0x430] sm:$0xff]  ;;  %v2925_v60 = vld [vmem:[%s10329_s26 + $0x520] sm:$0xff]  ;;  %v2932_v63 = vld [vmem:[%s10329_s26 + $0x558] sm:$0xff] }
 0x375   : > { %6874 = vmatpush1.bf16.msra.mxu1 %v6873_v52  ;;  %3061 = vmatprep.mubr.f32.mxu1 %v8917_v39  ;;  %v8927_v47 = vadd.f32 %v2750_v33, %v2741_v40  ;;  %v8933_v56 = vadd.f32 %v2746_v3, %v2740_v44  ;;  %v2842_v33 = vld [vmem:[%s10329_s26 + $0x288] sm:$0xff]  ;;  %v6905_v52 = vpack.c.bf16 %v2877_v23, %v2871_v22  ;;  %v2931_v32 = vld [vmem:[%s10329_s26 + $0x550] sm:$0xff]  ;;  %v2765_v11 = vld [vmem:[%s10329_s26 + $0x20] sm:$0xff] }
 0x376   : > { %6876 = vmatprep.subr.bf16.mxu1 %v6875_v34  ;;  %v6891_v3 = vpack.c.bf16 %v2842_v33, %v2836_v1  ;;  %v6907_v31 = vpack.c.bf16 %v2890_v59, %v2884_v27  ;;  %v2883_v34 = vld [vmem:[%s10329_s26 + $0x3d0] sm:$0xff]  ;;  %v6911_v40 = vpack.c.bf16 %v2902_v37, %v2896_v36  ;;  %v6913_v44 = vpack.c.bf16 %v2901_v42, %v2895_v41  ;;  %v2937_v1 = vld [vmem:[%s10329_s26 + $0x580] sm:$0xff]  ;;  %v2944_v33 = vld [vmem:[%s10329_s26 + $0x5b8] sm:$0xff] }
 0x377   : > { %v6909_v38 = vpack.c.bf16 %v2889_v35, %v2883_v34  ;;  %v2771_v12 = vld [vmem:[%s10329_s26 + $0x50] sm:$0xff]  ;;  %v2778_v50 = vld [vmem:[%s10329_s26 + $0x88] sm:$0xff]  ;;  %v2777_v17 = vld [vmem:[%s10329_s26 + $0x80] sm:$0xff] }
 0x378   : > { %3062 = vmatmul.mubr.f32.gmra.mrb[4].mxu1 %v8923_v43  ;;  %v2783_v18 = vld [vmem:[%s10329_s26 + $0xb0] sm:$0xff]  ;;  %v2790_v19 = vld [vmem:[%s10329_s26 + $0xe8] sm:$0xff]  ;;  %v2789_v23 = vld [vmem:[%s10329_s26 + $0xe0] sm:$0xff] }
 0x379   : > { %6878 = vmatpush1.bf16.msra.mxu1 %v6877_v62  ;;  %3067 = vmatprep.mubr.f32.mxu1 %v8927_v47  ;;  %v2908_v62 = vld [vmem:[%s10329_s26 + $0x498] sm:$0xff]  ;;  %v2795_v27 = vld [vmem:[%s10329_s26 + $0x110] sm:$0xff]  ;;  %v2802_v59 = vld [vmem:[%s10329_s26 + $0x148] sm:$0xff] }
 0x37a   : > { %6880 = vmatprep.subr.bf16.mxu1 %v6879_v61  ;;  %v2914_v61 = vld [vmem:[%s10329_s26 + $0x4c8] sm:$0xff]  ;;  %v2801_v35 = vld [vmem:[%s10329_s26 + $0x140] sm:$0xff]  ;;  %v2807_v36 = vld [vmem:[%s10329_s26 + $0x170] sm:$0xff] }
 0x37b   : > { %v6915_v45 = vpack.c.bf16 %v2914_v61, %v2908_v62  ;;  %v2814_v37 = vld [vmem:[%s10329_s26 + $0x1a8] sm:$0xff]  ;;  %v2813_v42 = vld [vmem:[%s10329_s26 + $0x1a0] sm:$0xff]  ;;  %v2819_v62 = vld [vmem:[%s10329_s26 + $0x1d0] sm:$0xff] }
 0x37c   : > { %3068 = vmatmul.mubr.f32.gmra.mrb[6].mxu1 %v8933_v56  ;;  %v2826_v61 = vld [vmem:[%s10329_s26 + $0x208] sm:$0xff] }
 0x37d   : > { %6882 = vmatpush1.bf16.msra.mxu1 %v6881_v54  ;;  %3138 = vmatprep.mubr.f32.mxu1 %v8894_v51  ;;  %v2926_v54 = vld [vmem:[%s10329_s26 + $0x528] sm:$0xff] }
 0x37e   : > { %6884 = vmatprep.subr.bf16.mxu1 %v6883_v57  ;;  %v6917_v57 = vpack.c.bf16 %v2913_v48, %v2907_v46  ;;  %v6919_v58 = vpack.c.bf16 %v2926_v54, %v2920_v49  ;;  %v2825_v48 = vld [vmem:[%s10329_s26 + $0x200] sm:$0xff]  ;;  %v2831_v49 = vld [vmem:[%s10329_s26 + $0x230] sm:$0xff]  ;;  %v2838_v54 = vld [vmem:[%s10329_s26 + $0x268] sm:$0xff] }
 0x381   : > { %6886 = vmatpush1.bf16.msra.mxu1 %v6885_v29  ;;  %v2938_v29 = vld [vmem:[%s10329_s26 + $0x588] sm:$0xff] }
 0x382   : > { %6888 = vmatprep.subr.bf16.mxu1 %v6887_v0  ;;  %v6921_v0 = vpack.c.bf16 %v2925_v60, %v2919_v24  ;;  %v6923_v30 = vpack.c.bf16 %v2938_v29, %v2932_v63  ;;  %v2837_v60 = vld [vmem:[%s10329_s26 + $0x260] sm:$0xff]  ;;  %v2843_v63 = vld [vmem:[%s10329_s26 + $0x290] sm:$0xff]  ;;  %v2856_v29 = vld [vmem:[%s10329_s26 + $0x2f8] sm:$0xff] }
 0x385   : > { %6890 = vmatpush1.bf16.msra.mxu1 %v6889_v2  ;;  %v2950_v2 = vld [vmem:[%s10329_s26 + $0x5e8] sm:$0xff] }
 0x386   : > { %6892 = vmatprep.subr.bf16.mxu1 %v6891_v3  ;;  %v6925_v3 = vpack.c.bf16 %v2937_v1, %v2931_v32  ;;  %v6927_v4 = vpack.c.bf16 %v2950_v2, %v2944_v33  ;;  %v2849_v32 = vld [vmem:[%s10329_s26 + $0x2c0] sm:$0xff]  ;;  %v2855_v1 = vld [vmem:[%s10329_s26 + $0x2f0] sm:$0xff]  ;;  %v2862_v33 = vld [vmem:[%s10329_s26 + $0x328] sm:$0xff] }
 0x387   : > { %v2868_v2 = vld [vmem:[%s10329_s26 + $0x358] sm:$0xff] }
 0x389   : > { %6894 = vmatpush1.bf16.msra.mxu1 %v6893_v8  ;;  %v2772_v8 = vld [vmem:[%s10329_s26 + $0x58] sm:$0xff] }
 0x38a   : > { %6896 = vmatprep.subr.bf16.mxu1 %v6895_v9  ;;  %v6929_v9 = vpack.c.bf16 %v2949_v6, %v2943_v5  ;;  %v6931_v10 = vpack.c.bf16 %v2772_v8, %v2766_v7  ;;  %v2861_v5 = vld [vmem:[%s10329_s26 + $0x320] sm:$0xff]  ;;  %v2867_v6 = vld [vmem:[%s10329_s26 + $0x350] sm:$0xff]  ;;  %v2874_v7 = vld [vmem:[%s10329_s26 + $0x388] sm:$0xff] }
 0x38b   : > { %v2880_v8 = vld [vmem:[%s10329_s26 + $0x3b8] sm:$0xff] }
 0x38d   : > { %6898 = vmatpush1.bf16.msra.mxu1 %v6897_v14  ;;  %v2784_v14 = vld [vmem:[%s10329_s26 + $0xb8] sm:$0xff] }
 0x38e   : > { %6900 = vmatprep.subr.bf16.mxu1 %v6899_v15  ;;  %v6933_v15 = vpack.c.bf16 %v2771_v12, %v2765_v11  ;;  %v6935_v16 = vpack.c.bf16 %v2784_v14, %v2778_v50  ;;  %v2873_v11 = vld [vmem:[%s10329_s26 + $0x380] sm:$0xff]  ;;  %v2879_v12 = vld [vmem:[%s10329_s26 + $0x3b0] sm:$0xff]  ;;  %v2886_v50 = vld [vmem:[%s10329_s26 + $0x3e8] sm:$0xff] }
 0x38f   : > { %v2892_v14 = vld [vmem:[%s10329_s26 + $0x418] sm:$0xff] }
 0x391   : > { %6902 = vmatpush1.bf16.msra.mxu1 %v6901_v20  ;;  %v2796_v20 = vld [vmem:[%s10329_s26 + $0x118] sm:$0xff] }
 0x392   : > { %6904 = vmatprep.subr.bf16.mxu1 %v6903_v21  ;;  %v6937_v21 = vpack.c.bf16 %v2783_v18, %v2777_v17  ;;  %v6939_v22 = vpack.c.bf16 %v2796_v20, %v2790_v19  ;;  %v2885_v17 = vld [vmem:[%s10329_s26 + $0x3e0] sm:$0xff]  ;;  %v2891_v18 = vld [vmem:[%s10329_s26 + $0x410] sm:$0xff]  ;;  %v2898_v19 = vld [vmem:[%s10329_s26 + $0x448] sm:$0xff] }
 0x393   : > { %v2904_v20 = vld [vmem:[%s10329_s26 + $0x478] sm:$0xff] }
 0x395   : > { %6906 = vmatpush1.bf16.msra.mxu1 %v6905_v52  ;;  %v2808_v52 = vld [vmem:[%s10329_s26 + $0x178] sm:$0xff] }
 0x396   : > { %6908 = vmatprep.subr.bf16.mxu1 %v6907_v31  ;;  %v6941_v31 = vpack.c.bf16 %v2795_v27, %v2789_v23  ;;  %v6943_v34 = vpack.c.bf16 %v2808_v52, %v2802_v59  ;;  %v2897_v23 = vld [vmem:[%s10329_s26 + $0x440] sm:$0xff]  ;;  %v2903_v27 = vld [vmem:[%s10329_s26 + $0x470] sm:$0xff]  ;;  %v2910_v59 = vld [vmem:[%s10329_s26 + $0x4a8] sm:$0xff] }
 0x397   : > { %v2916_v52 = vld [vmem:[%s10329_s26 + $0x4d8] sm:$0xff] }
 0x399   : > { %6910 = vmatpush1.bf16.msra.mxu1 %v6909_v38  ;;  %v2820_v38 = vld [vmem:[%s10329_s26 + $0x1d8] sm:$0xff] }
 0x39a   : > { %6912 = vmatprep.subr.bf16.mxu1 %v6911_v40  ;;  %v6945_v40 = vpack.c.bf16 %v2807_v36, %v2801_v35  ;;  %v6947_v41 = vpack.c.bf16 %v2820_v38, %v2814_v37  ;;  %v2909_v35 = vld [vmem:[%s10329_s26 + $0x4a0] sm:$0xff]  ;;  %v2915_v36 = vld [vmem:[%s10329_s26 + $0x4d0] sm:$0xff]  ;;  %v2922_v37 = vld [vmem:[%s10329_s26 + $0x508] sm:$0xff] }
 0x39b   : > { %v2928_v38 = vld [vmem:[%s10329_s26 + $0x538] sm:$0xff] }
 0x39d   : > { %6914 = vmatpush1.bf16.msra.mxu1 %v6913_v44  ;;  %v2832_v44 = vld [vmem:[%s10329_s26 + $0x238] sm:$0xff] }
 0x39e   : > { %6916 = vmatprep.subr.bf16.mxu1 %v6915_v45  ;;  %v6949_v45 = vpack.c.bf16 %v2819_v62, %v2813_v42  ;;  %v6951_v46 = vpack.c.bf16 %v2832_v44, %v2826_v61  ;;  %v2921_v42 = vld [vmem:[%s10329_s26 + $0x500] sm:$0xff]  ;;  %v2927_v62 = vld [vmem:[%s10329_s26 + $0x530] sm:$0xff]  ;;  %v2934_v61 = vld [vmem:[%s10329_s26 + $0x568] sm:$0xff] }
 0x39f   : > { %v2940_v44 = vld [vmem:[%s10329_s26 + $0x598] sm:$0xff] }
 0x3a1   : > { %6918 = vmatpush1.bf16.msra.mxu1 %v6917_v57  ;;  %v2844_v57 = vld [vmem:[%s10329_s26 + $0x298] sm:$0xff] }
 0x3a2   : > { %6920 = vmatprep.subr.bf16.mxu1 %v6919_v58  ;;  %v6953_v58 = vpack.c.bf16 %v2831_v49, %v2825_v48  ;;  %v6955_v24 = vpack.c.bf16 %v2844_v57, %v2838_v54  ;;  %v2933_v48 = vld [vmem:[%s10329_s26 + $0x560] sm:$0xff]  ;;  %v2939_v49 = vld [vmem:[%s10329_s26 + $0x590] sm:$0xff]  ;;  %v2946_v54 = vld [vmem:[%s10329_s26 + $0x5c8] sm:$0xff] }
 0x3a3   : > { %v2952_v57 = vld [vmem:[%s10329_s26 + $0x5f8] sm:$0xff] }
 0x3a5   : > { %6922 = vmatpush1.bf16.msra.mxu1 %v6921_v0  ;;  %v6957_v0 = vpack.c.bf16 %v2843_v63, %v2837_v60  ;;  %v2945_v60 = vld [vmem:[%s10329_s26 + $0x5c0] sm:$0xff]  ;;  %v2951_v63 = vld [vmem:[%s10329_s26 + $0x5f0] sm:$0xff] }
 0x3a6   : > { %6924 = vmatprep.subr.bf16.mxu1 %v6923_v30 }
 0x3a9   : > { %6926 = vmatpush1.bf16.msra.mxu1 %v6925_v3  ;;  %v6961_v3 = vpack.c.bf16 %v2855_v1, %v2849_v32 }
 0x3aa   : > { %6928 = vmatprep.subr.bf16.mxu1 %v6927_v4  ;;  %v6963_v4 = vpack.c.bf16 %v2868_v2, %v2862_v33 }
 0x3ad   : > { %6930 = vmatpush1.bf16.msra.mxu1 %v6929_v9  ;;  %v6965_v9 = vpack.c.bf16 %v2867_v6, %v2861_v5 }
 0x3ae   : > { %6932 = vmatprep.subr.bf16.mxu1 %v6931_v10  ;;  %v6967_v10 = vpack.c.bf16 %v2880_v8, %v2874_v7 }
 0x3b0   : > { %3139 = vmatmul.mubr.f32.vlgmr.msra.gmra.mrb[8].mxu1 %v8896_v13 }
 0x3b1   : > { %3144 = vmatprep.mubr.f32.mxu1 %v8908_v28  ;;  %6934 = vmatpush1.bf16.msra.mxu1 %v6933_v15  ;;  %v6969_v15 = vpack.c.bf16 %v2879_v12, %v2873_v11  ;;  %v2969_v11 = vsub.s32 3, %v8866_v55 }
 0x3b2   : > { %6936 = vmatprep.subr.bf16.mxu1 %v6935_v16  ;;  %v6971_v16 = vpack.c.bf16 %v2892_v14, %v2886_v50 }
 0x3b4   : > { %3145 = vmatmul.mubr.f32.gmra.mrb[10].mxu1 %v8910_v53 }
 0x3b5   : > { %3150 = vmatprep.mubr.f32.mxu1 %v8917_v39  ;;  %6938 = vmatpush1.bf16.msra.mxu1 %v6937_v21  ;;  %v6973_v21 = vpack.c.bf16 %v2891_v18, %v2885_v17 }
 0x3b6   : > { %6940 = vmatprep.subr.bf16.mxu1 %v6939_v22  ;;  %v6975_v22 = vpack.c.bf16 %v2904_v20, %v2898_v19 }
 0x3b8   : > { %3151 = vmatmul.mubr.f32.gmra.mrb[12].mxu1 %v8923_v43 }
 0x3b9   : > { %3156 = vmatprep.mubr.f32.mxu1 %v8927_v47  ;;  %6942 = vmatpush1.bf16.msra.mxu1 %v6941_v31  ;;  %v6977_v31 = vpack.c.bf16 %v2903_v27, %v2897_v23 }
 0x3ba   : > { %6944 = vmatprep.subr.bf16.mxu1 %v6943_v34  ;;  %v6979_v34 = vpack.c.bf16 %v2916_v52, %v2910_v59 }
 0x3bc   : > { %3157 = vmatmul.mubr.f32.gmra.mrb[14].mxu1 %v8933_v56 }
 0x3bd   : > { %6946 = vmatpush1.bf16.msra.mxu1 %v6945_v40  ;;  %3227 = vmatprep.mubr.f32.mxu1 %v8894_v51  ;;  %v2850_v51 = vld [vmem:[%s10329_s26 + $0x2c8] sm:$0xff]  ;;  %v6981_v40 = vpack.c.bf16 %v2915_v36, %v2909_v35  ;;  %s10342_s26 = scalar_lea.vmem %s10341_s19, %s10330_s1 }
 0x3be   : > { %6948 = vmatprep.subr.bf16.mxu1 %v6947_v41  ;;  %v6959_v30 = vpack.c.bf16 %v2856_v29, %v2850_v51  ;;  %v6983_v41 = vpack.c.bf16 %v2928_v38, %v2922_v37  ;;  %v6993_v51 = vpack.c.bf16 %v2951_v63, %v2945_v60  ;;  %v9063_v29 = vld [vmem:[%s10335_s15] sm:$0x3f]  ;;  %s10347_s15 = sld [smem:[#allocation124_spill]] }
 0x3c1   : > { %6950 = vmatpush1.bf16.msra.mxu1 %v6949_v45  ;;  %v6985_v45 = vpack.c.bf16 %v2927_v62, %v2921_v42 }
 0x3c2   : > { %6952 = vmatprep.subr.bf16.mxu1 %v6951_v46  ;;  %v6987_v46 = vpack.c.bf16 %v2940_v44, %v2934_v61 }
 0x3c4   : > { %s10348_s22 = scalar_lea.vmem %s10347_s15, %s10330_s1  ;;  %s10349_s1 = sld [smem:[#allocation83_spill]] }
 0x3c5   : > { %6954 = vmatpush1.bf16.msra.mxu1 %v6953_v58  ;;  %v6989_v58 = vpack.c.bf16 %v2939_v49, %v2933_v48  ;;  %v2977_v48 = vsub.s32 5, %v8866_v55 }
 0x3c6   : > { %6956 = vmatprep.subr.bf16.mxu1 %v6955_v24  ;;  %v6991_v24 = vpack.c.bf16 %v2952_v57, %v2946_v54 }
 0x3c9   : > { %6958 = vmatpush1.bf16.msra.mxu1 %v6957_v0  ;;  %v2958_v0 = vrot.slane %v9063_v29, %v8872_v26 }
 0x3ca   : > { %6960 = vmatprep.subr.bf16.mxu1 %v6959_v30  ;;  %p6675_p11 = scmp.ne.s32.totalorder %s10349_s1, 11 }
 0x3cd   : > { %6962 = vmatpush1.bf16.msra.mxu1 %v6961_v3 }
 0x3ce   : > { %6964 = vmatprep.subr.bf16.mxu1 %v6963_v4 }
 0x3d1   : > { %6966 = vmatpush1.bf16.msra.mxu1 %v6965_v9 }
 0x3d2   : > { %6968 = vmatprep.subr.bf16.mxu1 %v6967_v10  ;;  %v2965_v10 = vsub.s32 2, %v8866_v55 }
 0x3d4   : > { %v2966_v50 = vrot.slane %v9063_v29, %v2965_v10 }
 0x3d5   : > { %6970 = vmatpush1.bf16.msra.mxu1 %v6969_v15  ;;  %v2970_v15 = vrot.slane %v9063_v29, %v2969_v11 }
 0x3d6   : > { %6972 = vmatprep.subr.bf16.mxu1 %v6971_v16 }
 0x3d9   : > { %6974 = vmatpush1.bf16.msra.mxu1 %v6973_v21 }
 0x3da   : > { %6976 = vmatprep.subr.bf16.mxu1 %v6975_v22 }
 0x3dd   : > { %6978 = vmatpush1.bf16.msra.mxu1 %v6977_v31 }
 0x3de   : > { %6980 = vmatprep.subr.bf16.mxu1 %v6979_v34 }
 0x3e1   : > { %6982 = vmatpush1.bf16.msra.mxu1 %v6981_v40 }
 0x3e2   : > { %6984 = vmatprep.subr.bf16.mxu1 %v6983_v41 }
 0x3e5   : > { %6986 = vmatpush1.bf16.msra.mxu1 %v6985_v45 }
 0x3e6   : > { %6988 = vmatprep.subr.bf16.mxu1 %v6987_v46  ;;  %v2973_v46 = vsub.s32 4, %v8866_v55 }
 0x3e8   : > { %v2974_v54 = vrot.slane %v9063_v29, %v2973_v46 }
 0x3e9   : > { %6990 = vmatpush1.bf16.msra.mxu1 %v6989_v58  ;;  %v2978_v58 = vrot.slane %v9063_v29, %v2977_v48 }
 0x3ea   : > { %6992 = vmatprep.subr.bf16.mxu1 %v6991_v24 }
 0x3ed   : > { %6994 = vmatpush1.bf16.msra.mxu1 %v6993_v51 }
 0x3f0   : > { %3228 = vmatmul.mubr.f32.vlgmr.msra.gmra.mrb[16].mxu1 %v8896_v13  ;;  %v2962_v13 = vrot.slane %v9063_v29, %v8869_v25 }
 0x3f1   : > { %3233 = vmatprep.mubr.f32.mxu1 %v8908_v28 }
 0x3f4   : > { %3234 = vmatmul.mubr.f32.gmra.mrb[18].mxu1 %v8910_v53 }
 0x3f5   : > { %3239 = vmatprep.mubr.f32.mxu1 %v8917_v39 }
 0x3f8   : > { %3240 = vmatmul.mubr.f32.gmra.mrb[20].mxu1 %v8923_v43 }
 0x3f9   : > { %3245 = vmatprep.mubr.f32.mxu1 %v8927_v47 }
 0x3fc   : > { %3246 = vmatmul.mubr.f32.gmra.mrb[22].mxu1 %v8933_v56 }
 0x443   : > { %v3051_v30 = vpop.f32.mrb[0].mxu1 }
 0x444   : > { %v3052_v28 = vadd.f32 %v3051_v30, %v2958_v0  ;;  %v3053_v32 = vpop.f32.mrb[1].mxu1 }
 0x445   : > { %v3054_v53 = vadd.f32 %v3053_v32, %v2962_v13 }
 0x446   : > { %v3252_v1 = vmul.f32 0.088388346, %v3052_v28 }
 0x447   : > { %v3057_v39 = vpop.f32.mrb[2].mxu1  ;;  %v3253_v33 = vmul.f32 0.088388346, %v3054_v53 }
 0x448   : > { %v3058_v43 = vadd.f32 %v3057_v39, %v2958_v0  ;;  %v3059_v2 = vpop.f32.mrb[3].mxu1  ;;  %6755 = vmatprep.mubr.f32.mxu1 %v3252_v1 }
 0x449   : > { %v3060_v47 = vadd.f32 %v3059_v2, %v2962_v13  ;;  %6783 = vmatprep.mubr.f32.mxu0 %v3253_v33 }
 0x44a   : > { %v3254_v41 = vmul.f32 0.088388346, %v3058_v43 }
 0x44b   : > { %v3063_v56 = vpop.f32.mrb[4].mxu1  ;;  %v3255_v42 = vmul.f32 0.088388346, %v3060_v47 }
 0x44c   : > { %v3064_v3 = vadd.f32 %v3063_v56, %v2958_v0  ;;  %v3065_v4 = vpop.f32.mrb[5].mxu1 }
 0x44d   : > { %v3066_v5 = vadd.f32 %v3065_v4, %v2962_v13  ;;  %v3260_v4 = vld [vmem:[%s10336_s30] sm:$0xff] }
 0x44e   : > { %v3256_v62 = vmul.f32 0.088388346, %v3064_v3  ;;  %v3261_v3 = vld [vmem:[%s10336_s30 + $0x8] sm:$0xff] }
 0x44f   : > { %v3069_v6 = vpop.f32.mrb[6].mxu1  ;;  %v3257_v61 = vmul.f32 0.088388346, %v3066_v5 }
 0x450   : > { %v3070_v7 = vadd.f32 %v3069_v6, %v2958_v0  ;;  %v3071_v8 = vpop.f32.mrb[7].mxu1 }
 0x451   : > { %v3072_v9 = vadd.f32 %v3071_v8, %v2962_v13 }
 0x452   : > { %v3258_v44 = vmul.f32 0.088388346, %v3070_v7 }
 0x453   : > { %v3259_v45 = vmul.f32 0.088388346, %v3072_v9 }
 0x483   : > { %v3140_v12 = vpop.f32.mrb[8].mxu1 }
 0x484   : > { %v3142_v14 = vpop.f32.mrb[9].mxu1  ;;  %v3141_v17 = vadd.f32 %v3140_v12, %v2966_v50 }
 0x485   : > { %v3143_v20 = vadd.f32 %v3142_v14, %v2970_v15 }
 0x487   : > { %v3146_v16 = vpop.f32.mrb[10].mxu1 }
 0x488   : > { %v3147_v18 = vadd.f32 %v3146_v16, %v2966_v50  ;;  %v3148_v19 = vpop.f32.mrb[11].mxu1 }
 0x489   : > { %v3149_v21 = vadd.f32 %v3148_v19, %v2970_v15 }
 0x48a   : > { %v6995_v22 = vpack.c.bf16 %v3147_v18, %v3141_v17 }
 0x48b   : > { %v3152_v23 = vpop.f32.mrb[12].mxu1  ;;  %v7043_v27 = vpack.c.bf16 %v3149_v21, %v3143_v20 }
 0x48c   : > { %v3154_v59 = vpop.f32.mrb[13].mxu1  ;;  %6996 = vmatprep.subr.bf16.mxu1 %v6995_v22  ;;  %v3153_v31 = vadd.f32 %v3152_v23, %v2966_v50 }
 0x48d   : > { %6998 = vmatpush3.bf16.xpose.msra.mxu1 %v6995_v22  ;;  %7044 = vmatprep.subr.bf16.mxu0 %v7043_v27  ;;  %v3155_v36 = vadd.f32 %v3154_v59, %v2970_v15 }
 0x48e   : > { %7046 = vmatpush3.bf16.xpose.msra.mxu0 %v7043_v27 }
 0x48f   : > { %v3158_v52 = vpop.f32.mrb[14].mxu1 }
 0x490   : > { %v3159_v34 = vadd.f32 %v3158_v52, %v2966_v50  ;;  %v3160_v35 = vpop.f32.mrb[15].mxu1  ;;  %v3263_v50 = vld [vmem:[%s10336_s30 + $0x18] sm:$0xff] }
 0x491   : > { %v3161_v37 = vadd.f32 %v3160_v35, %v2970_v15  ;;  %v3262_v15 = vld [vmem:[%s10336_s30 + $0x10] sm:$0xff] }
 0x492   : > { %v6999_v38 = vpack.c.bf16 %v3159_v34, %v3153_v31 }
 0x493   : > { %v7047_v40 = vpack.c.bf16 %v3161_v37, %v3155_v36 }
 0x494   : > { %7000 = vmatprep.subr.bf16.mxu1 %v6999_v38 }
 0x495   : > { %7002 = vmatpush3.bf16.xpose.msra.mxu1 %v6999_v38  ;;  %7048 = vmatprep.subr.bf16.mxu0 %v7047_v40 }
 0x496   : > { %7050 = vmatpush3.bf16.xpose.msra.mxu0 %v7047_v40 }
 0x49c   : > { %6756 = vmatmul.mubr.f32.vlgmr.msra.gmra.mrb[24].mxu1 %v3254_v41 }
 0x49d   : > { %6758 = vmatprep.mubr.f32.mxu1 %v3256_v62  ;;  %6784 = vmatmul.mubr.f32.vlgmr.msra.gmra.mrb[0].mxu0 %v3255_v42 }
 0x49e   : > { %6786 = vmatprep.mubr.f32.mxu0 %v3257_v61 }
 0x4a0   : > { %6759 = vmatmul.mubr.f32.gmra.mrb[26].mxu1 %v3258_v44 }
 0x4a1   : > { %6787 = vmatmul.mubr.f32.gmra.mrb[2].mxu0 %v3259_v45 }
 0x4c3   : > { %v3229_v49 = vpop.f32.mrb[16].mxu1 }
 0x4c4   : > { %v3231_v57 = vpop.f32.mrb[17].mxu1  ;;  %v3230_v60 = vadd.f32 %v3229_v49, %v2974_v54 }
 0x4c5   : > { %v3232_v0 = vadd.f32 %v3231_v57, %v2978_v58 }
 0x4c7   : > { %v3235_v24 = vpop.f32.mrb[18].mxu1 }
 0x4c8   : > { %v3236_v63 = vadd.f32 %v3235_v24, %v2974_v54  ;;  %v3237_v51 = vpop.f32.mrb[19].mxu1 }
 0x4c9   : > { %v3238_v13 = vadd.f32 %v3237_v51, %v2978_v58 }
 0x4ca   : > { %v7003_v30 = vpack.c.bf16 %v3236_v63, %v3230_v60 }
 0x4cb   : > { %v7051_v28 = vpack.c.bf16 %v3238_v13, %v3232_v0  ;;  %v3241_v32 = vpop.f32.mrb[20].mxu1 }
 0x4cc   : > { %v3243_v53 = vpop.f32.mrb[21].mxu1  ;;  %7004 = vmatprep.subr.bf16.mxu1 %v7003_v30  ;;  %v3242_v39 = vadd.f32 %v3241_v32, %v2974_v54 }
 0x4cd   : > { %7006 = vmatpush3.bf16.msra.mxu1 %v7003_v30  ;;  %7052 = vmatprep.subr.bf16.mxu0 %v7051_v28  ;;  %v3244_v2 = vadd.f32 %v3243_v53, %v2978_v58 }
 0x4ce   : > { %7054 = vmatpush3.bf16.msra.mxu0 %v7051_v28 }
 0x4cf   : > { %v3247_v1 = vpop.f32.mrb[22].mxu1 }
 0x4d0   : > { %v3248_v33 = vadd.f32 %v3247_v1, %v2974_v54  ;;  %v3249_v43 = vpop.f32.mrb[23].mxu1 }
 0x4d1   : > { %v3250_v29 = vadd.f32 %v3249_v43, %v2978_v58 }
 0x4d2   : > { %v7007_v47 = vpack.c.bf16 %v3248_v33, %v3242_v39 }
 0x4d3   : > { %v7055_v56 = vpack.c.bf16 %v3250_v29, %v3244_v2 }
 0x4d4   : > { %7008 = vmatprep.subr.bf16.mxu1 %v7007_v47 }
 0x4d5   : > { %7010 = vmatpush3.bf16.msra.mxu1 %v7007_v47  ;;  %7056 = vmatprep.subr.bf16.mxu0 %v7055_v56 }
 0x4d6   : > { %7058 = vmatpush3.bf16.msra.mxu0 %v7055_v56 }
 0x56f   : > { %v6757_v5 = vpop.f32.mrb[24].mxu1 }
 0x570   : > { %v3348_v6 = vadd.f32 %v6757_v5, %v3261_v3  ;;  %v3342_v7 = vpop.f32.mrb[25].mxu1  ;;  %v6785_v8 = vpop.f32.mrb[0].mxu0 }
 0x571   : > { %v3343_v9 = vadd.f32 %v3342_v7, %v3260_v4  ;;  %v3698_v12 = vpop.f32.mrb[1].mxu0  ;;  %v3704_v23 = vadd.f32 %v6785_v8, %v3261_v3 }
 0x572   : > { %v3365_v14 = vsel %vm3361_vm0, %v3348_v6, -inf  ;;  %v3699_v59 = vadd.f32 %v3698_v12, %v3260_v4 }
 0x573   : > { %3366 = vmax.xlane.f32.xlu1 %v3365_v14  ;;  %v6760_v16 = vpop.f32.mrb[26].mxu1  ;;  %v3362_v17 = vsel %vm3361_vm0, %v3343_v9, -inf  ;;  %v3720_v31 = vsel %vm3361_vm0, %v3704_v23, -inf }
 0x574   : > { %v3358_v18 = vadd.f32 %v6760_v16, %v3263_v50  ;;  %3363 = vmax.xlane.f32.xlu0 %v3362_v17  ;;  %v3352_v19 = vpop.f32.mrb[27].mxu1  ;;  %v6788_v20 = vpop.f32.mrb[2].mxu0  ;;  %v3717_v35 = vsel %vm3361_vm0, %v3699_v59, -inf  ;;  %v3504_v16 = vld [vmem:[%s10337_s0 + $0x8] sm:$0xff]  ;;  %v3506_v17 = vld [vmem:[%s10337_s0 + $0x18] sm:$0xff] }
 0x575   : > { %v3353_v21 = vadd.f32 %v3352_v19, %v3262_v15  ;;  %v3708_v22 = vpop.f32.mrb[3].mxu0  ;;  %v3714_v36 = vadd.f32 %v6788_v20, %v3263_v50 }
 0x576   : > { %v3371_v27 = vsel %vm3361_vm0, %v3358_v18, -inf  ;;  %v3709_v34 = vadd.f32 %v3708_v22, %v3262_v15 }
 0x577   : > { %3372 = vmax.xlane.f32.xlu1 %v3371_v27  ;;  %v3368_v52 = vsel %vm3361_vm0, %v3353_v21, -inf  ;;  %v3726_v38 = vsel %vm3361_vm0, %v3714_v36, -inf }
 0x578   : > { %3369 = vmax.xlane.f32.xlu0 %v3368_v52  ;;  %v3723_v37 = vsel %vm3361_vm0, %v3709_v34, -inf }
 0x57b   : > { %3721 = vmax.xlane.f32.xlu1 %v3720_v31 }
 0x57c   : > { %3718 = vmax.xlane.f32.xlu0 %v3717_v35  ;;  %v3505_v35 = vld [vmem:[%s10337_s0 + $0x10] sm:$0xff] }
 0x580   : > { %3724 = vmax.xlane.f32.xlu0 %v3723_v37  ;;  %v3510_v37 = vld [vmem:[%s10337_s0 + $0x38] sm:$0xff] }
 0x584   : > { %3727 = vmax.xlane.f32.xlu0 %v3726_v38 }
 0x600   : > { %v3367_v40 = vpop.xlane.xlu1 %3366 }
 0x601   : > { %v3375_v41 = vsub.f32 %v3348_v6, %v3367_v40  ;;  %v3364_v42 = vpop.xlane.xlu0 %3363 }
 0x602   : > { %v3374_v62 = vsub.f32 %v3343_v9, %v3364_v42 }
 0x603   : > { %v3380_v61 = vmul.f32 1.442695, %v3375_v41 }
 0x604   : > { %v3378_v44 = vmul.f32 1.442695, %v3374_v62  ;;  %v3373_v45 = vpop.xlane.xlu1 %3372 }
 0x605   : > { %v3377_v49 = vsub.f32 %v3358_v18, %v3373_v45  ;;  %v3370_v54 = vpop.xlane.xlu0 %3369  ;;  %v7011_v18 = vpack.c.bf16 %v3506_v17, %v3504_v16  ;;  %v3509_v45 = vld [vmem:[%s10337_s0 + $0x30] sm:$0xff]  ;;  %v3523_v17 = vld [vmem:[%s10337_s0 + $0xa0] sm:$0xff] }
 0x606   : > { %7736 = vpow2.f32 %v3378_v44  ;;  %v3376_v57 = vsub.f32 %v3353_v21, %v3370_v54  ;;  %v3507_v44 = vld [vmem:[%s10337_s0 + $0x20] sm:$0xff]  ;;  %v3512_v54 = vld [vmem:[%s10337_s0 + $0x48] sm:$0xff] }
 0x607   : > { %7738 = vpow2.f32 %v3380_v61  ;;  %v3384_v58 = vmul.f32 1.442695, %v3377_v49  ;;  %7012 = vmatprep.subr.bf16.mxu1 %v7011_v18  ;;  %v3525_v18 = vld [vmem:[%s10337_s0 + $0xb0] sm:$0xff] }
 0x608   : > { %v3382_v24 = vmul.f32 1.442695, %v3376_v57  ;;  %v3722_v60 = vpop.xlane.xlu1 %3721  ;;  %v3514_v57 = vld [vmem:[%s10337_s0 + $0x58] sm:$0xff] }
 0x609   : > { %v3730_v63 = vsub.f32 %v3704_v23, %v3722_v60  ;;  %v3719_v51 = vpop.xlane.xlu0 %3718 }
 0x60a   : > { %7740 = vpow2.f32 %v3382_v24  ;;  %v3729_v0 = vsub.f32 %v3699_v59, %v3719_v51  ;;  %v7017_v24 = vpack.c.bf16 %v3509_v45, %v3507_v44  ;;  %v7019_v51 = vpack.c.bf16 %v3514_v57, %v3512_v54  ;;  %v3865_v44 = vld [vmem:[%s10337_s0 + $0x138] sm:$0xff]  ;;  %v3862_v57 = vld [vmem:[%s10337_s0 + $0x120] sm:$0xff] }
 0x60b   : > { %7742 = vpow2.f32 %v3384_v58  ;;  %v3735_v13 = vmul.f32 1.442695, %v3730_v63 }
 0x60c   : > { %v3733_v30 = vmul.f32 1.442695, %v3729_v0  ;;  %v3511_v0 = vld [vmem:[%s10337_s0 + $0x40] sm:$0xff] }
 0x60d   : > { %v3725_v28 = vpop.xlane.xlu0 %3724 }
 0x60e   : > { %7744 = vpow2.f32 %v3733_v30  ;;  %v3731_v32 = vsub.f32 %v3709_v34, %v3725_v28  ;;  %v3503_v34 = vld [vmem:[%s10337_s0] sm:$0xff]  ;;  %v3516_v28 = vld [vmem:[%s10337_s0 + $0x68] sm:$0xff] }
 0x60f   : > { %7746 = vpow2.f32 %v3735_v13  ;;  %v7013_v40 = vpack.c.bf16 %v3505_v35, %v3503_v34  ;;  %v3513_v13 = vld [vmem:[%s10337_s0 + $0x50] sm:$0xff]  ;;  %v3531_v34 = vld [vmem:[%s10337_s0 + $0xe0] sm:$0xff] }
 0x610   : > { %v7737_v53 = vpop.eup %7736  ;;  %v3737_v1 = vmul.f32 1.442695, %v3731_v32  ;;  %v3518_v32 = vld [vmem:[%s10337_s0 + $0x78] sm:$0xff]  ;;  %v3533_v35 = vld [vmem:[%s10337_s0 + $0xf0] sm:$0xff] }
 0x611   : > { %v3728_v39 = vpop.xlane.xlu0 %3727  ;;  %v3386_v33 = vsel %vm3361_vm0, %v7737_v53, 0.0  ;;  %v7739_v43 = vpop.eup %7738 }
 0x612   : > { %7748 = vpow2.f32 %v3737_v1  ;;  %v3732_v2 = vsub.f32 %v3714_v36, %v3728_v39  ;;  %3387 = vadd.xlane.f32.xlu1 %v3386_v33  ;;  %v3389_v56 = vsel %vm3361_vm0, %v7739_v43, 0.0  ;;  %v3508_v36 = vld [vmem:[%s10337_s0 + $0x28] sm:$0xff]  ;;  %v7021_v1 = vpack.c.bf16 %v3513_v13, %v3511_v0 }
 0x613   : > { %v7015_v61 = vpack.c.bf16 %v3510_v37, %v3508_v36  ;;  %v7041_v36 = vpack.c.bf16 %v3533_v35, %v3531_v34  ;;  %v3859_v37 = vld [vmem:[%s10337_s0 + $0x108] sm:$0xff]  ;;  %v3886_v34 = vld [vmem:[%s10337_s0 + $0x1e0] sm:$0xff]  ;;  %v3888_v35 = vld [vmem:[%s10337_s0 + $0x1f0] sm:$0xff] }
 0x614   : > { %v7741_v29 = vpop.eup %7740  ;;  %v3739_v47 = vmul.f32 1.442695, %v3732_v2  ;;  %v3515_v2 = vld [vmem:[%s10337_s0 + $0x60] sm:$0xff] }
 0x615   : > { %v3392_v3 = vsel %vm3361_vm0, %v7741_v29, 0.0  ;;  %v7743_v4 = vpop.eup %7742 }
 0x616   : > { %7750 = vpow2.f32 %v3739_v47  ;;  %3390 = vadd.xlane.f32.xlu1 %v3389_v56  ;;  %3393 = vadd.xlane.f32.xlu0 %v3392_v3  ;;  %v3395_v6 = vsel %vm3361_vm0, %v7743_v4, 0.0  ;;  %v3520_v56 = vld [vmem:[%s10337_s0 + $0x88] sm:$0xff]  ;;  %v3522_v3 = vld [vmem:[%s10337_s0 + $0x98] sm:$0xff] }
 0x618   : > { %v7745_v5 = vpop.eup %7744 }
 0x619   : > { %v3741_v7 = vsel %vm3361_vm0, %v7745_v5, 0.0  ;;  %v9110_v8 = vpop.eup %7746 }
 0x61a   : > { %3396 = vadd.xlane.f32.xlu1 %v3395_v6  ;;  %3742 = vadd.xlane.f32.xlu0 %v3741_v7  ;;  %v3744_v12 = vsel %vm3361_vm0, %v9110_v8, 0.0  ;;  %v7027_v7 = vpack.c.bf16 %v3522_v3, %v3520_v56  ;;  %v3875_v56 = vld [vmem:[%s10337_s0 + $0x188] sm:$0xff]  ;;  %v3877_v3 = vld [vmem:[%s10337_s0 + $0x198] sm:$0xff] }
 0x61c   : > { %v9112_v9 = vpop.eup %7748 }
 0x61d   : > { %v3747_v50 = vsel %vm3361_vm0, %v9112_v9, 0.0 }
 0x61e   : > { %3745 = vadd.xlane.f32.xlu1 %v3744_v12  ;;  %3748 = vadd.xlane.f32.xlu0 %v3747_v50  ;;  %v3521_v12 = vld [vmem:[%s10337_s0 + $0x90] sm:$0xff]  ;;  %v3526_v50 = vld [vmem:[%s10337_s0 + $0xb8] sm:$0xff] }
 0x620   : > { %v9118_v14 = vpop.eup %7750 }
 0x621   : > { %v3750_v15 = vsel %vm3361_vm0, %v9118_v14, 0.0 }
 0x622   : > { %3751 = vadd.xlane.f32.xlu1 %v3750_v15 }
 0x69f   : > { %v3388_v19 = vpop.xlane.xlu1 %3387 }
 0x6a0   : > { %7752 = vrcp.f32 %v3388_v19  ;;  %v3530_v19 = vld [vmem:[%s10337_s0 + $0xd8] sm:$0xff] }
 0x6a3   : > { %v3391_v20 = vpop.xlane.xlu1 %3390  ;;  %v3394_v21 = vpop.xlane.xlu0 %3393 }
 0x6a4   : > { %7754 = vrcp.f32 %v3391_v20  ;;  %v7033_v20 = vpack.c.bf16 %v3525_v18, %v3523_v17  ;;  %v3878_v17 = vld [vmem:[%s10337_s0 + $0x1a0] sm:$0xff]  ;;  %v3880_v18 = vld [vmem:[%s10337_s0 + $0x1b0] sm:$0xff] }
 0x6a5   : > { %7756 = vrcp.f32 %v3394_v21 }
 0x6a7   : > { %v3397_v22 = vpop.xlane.xlu1 %3396  ;;  %v3743_v23 = vpop.xlane.xlu0 %3742 }
 0x6a8   : > { %7758 = vrcp.f32 %v3397_v22  ;;  %v3527_v22 = vld [vmem:[%s10337_s0 + $0xc0] sm:$0xff] }
 0x6a9   : > { %7760 = vrcp.f32 %v3743_v23  ;;  %v3529_v23 = vld [vmem:[%s10337_s0 + $0xd0] sm:$0xff] }
 0x6aa   : > { %v7753_v27 = vpop.eup %7752 }
 0x6ab   : > { %v3746_v59 = vpop.xlane.xlu1 %3745  ;;  %v3749_v52 = vpop.xlane.xlu0 %3748  ;;  %v3402_v31 = vmul.f32 %v7753_v27, %v7737_v53  ;;  %v3532_v27 = vld [vmem:[%s10337_s0 + $0xe8] sm:$0xff] }
 0x6ac   : > { %7762 = vrcp.f32 %v3746_v59  ;;  %v3534_v59 = vld [vmem:[%s10337_s0 + $0xf8] sm:$0xff] }
 0x6ad   : > { %7764 = vrcp.f32 %v3749_v52  ;;  %6769 = vmatprep.mubr.msk.f32.mxu1 %vm3361_vm0, %v3402_v31  ;;  %v7037_v52 = vpack.c.bf16 %v3529_v23, %v3527_v22  ;;  %v7039_v31 = vpack.c.bf16 %v3534_v59, %v3532_v27  ;;  %v3882_v22 = vld [vmem:[%s10337_s0 + $0x1c0] sm:$0xff]  ;;  %v3884_v23 = vld [vmem:[%s10337_s0 + $0x1d0] sm:$0xff]  ;;  %v3887_v27 = vld [vmem:[%s10337_s0 + $0x1e8] sm:$0xff] }
 0x6ae   : > { %v7755_v38 = vpop.eup %7754  ;;  %v3889_v59 = vld [vmem:[%s10337_s0 + $0x1f8] sm:$0xff] }
 0x6af   : > { %v7757_v41 = vpop.eup %7756  ;;  %v3403_v42 = vmul.f32 %v7755_v38, %v7739_v43  ;;  %v3752_v62 = vpop.xlane.xlu1 %3751  ;;  %v7023_v43 = vpack.c.bf16 %v3518_v32, %v3516_v28  ;;  %v3861_v38 = vld [vmem:[%s10337_s0 + $0x118] sm:$0xff]  ;;  %v3868_v28 = vld [vmem:[%s10337_s0 + $0x150] sm:$0xff] }
 0x6b0   : > { %7766 = vrcp.f32 %v3752_v62  ;;  %v3404_v49 = vmul.f32 %v7757_v41, %v7741_v29  ;;  %v3517_v29 = vld [vmem:[%s10337_s0 + $0x70] sm:$0xff]  ;;  %v8161_v41 = vmov 0.0  }
 0x6b1   : > { %6770 = vmatmul.mubr.msk.f32.vlgmr.msra.gmra.mrb[28].mxu1 %vm3361_vm0, %v3403_v42  ;;  %v3858_v42 = vld [vmem:[%s10337_s0 + $0x100] sm:$0xff]  ;;  %v3860_v62 = vld [vmem:[%s10337_s0 + $0x110] sm:$0xff] }
 0x6b2   : > { %v7759_v58 = vpop.eup %7758  ;;  %6772 = vmatprep.mubr.msk.f32.mxu1 %vm3361_vm0, %v3404_v49  ;;  %7014 = vmatpush1.bf16.msra.mxu1 %v7013_v40  ;;  %v7059_v40 = vpack.c.bf16 %v3861_v38, %v3859_v37  ;;  %v7061_v45 = vpack.c.bf16 %v3860_v62, %v3858_v42  ;;  %v3264_v37 = vld [vmem:[%s10339_s9] sm:$0x3] }
 0x6b3   : > { %v7761_v60 = vpop.eup %7760  ;;  %v3405_v63 = vmul.f32 %v7759_v58, %v7743_v4  ;;  %7016 = vmatprep.subr.bf16.mxu1 %v7015_v61  ;;  %v3863_v61 = vld [vmem:[%s10337_s0 + $0x128] sm:$0xff]  ;;  %v3864_v58 = vld [vmem:[%s10337_s0 + $0x130] sm:$0xff]  ;;  %v3269_v38 = vrot.slane %v3264_v37, %v8872_v26 }
 0x6b4   : > { %v3757_v30 = vmul.f32 %v7761_v60, %v7745_v5  ;;  %v7025_v5 = vpack.c.bf16 %v3517_v29, %v3515_v2  ;;  %v7063_v54 = vpack.c.bf16 %v3865_v44, %v3863_v61  ;;  %v3867_v60 = vld [vmem:[%s10337_s0 + $0x148] sm:$0xff]  ;;  %v3870_v2 = vld [vmem:[%s10337_s0 + $0x160] sm:$0xff]  ;;  %v3872_v29 = vld [vmem:[%s10337_s0 + $0x170] sm:$0xff] }
 0x6b5   : > { %6773 = vmatmul.mubr.msk.f32.gmra.mrb[30].mxu1 %vm3361_vm0, %v3405_v63  ;;  %v3869_v63 = vld [vmem:[%s10337_s0 + $0x158] sm:$0xff] }
 0x6b6   : > { %v7763_v53 = vpop.eup %7762  ;;  %6797 = vmatprep.mubr.msk.f32.mxu0 %vm3361_vm0, %v3757_v30  ;;  %7018 = vmatpush1.bf16.msra.mxu1 %v7017_v24  ;;  %v7067_v13 = vpack.c.bf16 %v3869_v63, %v3867_v60  ;;  %v3866_v30 = vld [vmem:[%s10337_s0 + $0x140] sm:$0xff] }
 0x6b7   : > { %v7765_v39 = vpop.eup %7764  ;;  %v3758_v33 = vmul.f32 %v7763_v53, %v9110_v8  ;;  %7020 = vmatprep.subr.bf16.mxu1 %v7019_v51  ;;  %v3519_v8 = vld [vmem:[%s10337_s0 + $0x80] sm:$0xff]  ;;  %3599 = vmatprep.mubr.f32.mxu1 %v8161_v41  ;;  %v7065_v51 = vpack.c.bf16 %v3864_v58, %v3862_v57  ;;  %v3871_v53 = vld [vmem:[%s10337_s0 + $0x168] sm:$0xff] }
 0x6b8   : > { %v3759_v47 = vmul.f32 %v7765_v39, %v9112_v9  ;;  %v3524_v9 = vld [vmem:[%s10337_s0 + $0xa8] sm:$0xff]  ;;  %v7029_v15 = vpack.c.bf16 %v3521_v12, %v3519_v8  ;;  %v7069_v39 = vpack.c.bf16 %v3868_v28, %v3866_v30  ;;  %v3876_v8 = vld [vmem:[%s10337_s0 + $0x190] sm:$0xff] }
 0x6b9   : > { %6798 = vmatmul.mubr.msk.f32.vlgmr.msra.gmra.mrb[4].mxu0 %vm3361_vm0, %v3758_v33  ;;  %v7031_v16 = vpack.c.bf16 %v3526_v50, %v3524_v9  ;;  %v3879_v9 = vld [vmem:[%s10337_s0 + $0x1a8] sm:$0xff]  ;;  %v3881_v50 = vld [vmem:[%s10337_s0 + $0x1b8] sm:$0xff] }
 0x6ba   : > { %v7767_v4 = vpop.eup %7766  ;;  %6800 = vmatprep.mubr.msk.f32.mxu0 %vm3361_vm0, %v3759_v47  ;;  %7022 = vmatpush1.bf16.msra.mxu1 %v7021_v1  ;;  %v3873_v1 = vld [vmem:[%s10337_s0 + $0x178] sm:$0xff] }
 0x6bb   : > { %v3760_v6 = vmul.f32 %v7767_v4, %v9118_v14  ;;  %7024 = vmatprep.subr.bf16.mxu1 %v7023_v43  ;;  %v3528_v14 = vld [vmem:[%s10337_s0 + $0xc8] sm:$0xff]  ;;  %v7071_v43 = vpack.c.bf16 %v3873_v1, %v3871_v53  ;;  %v7073_v4 = vpack.c.bf16 %v3872_v29, %v3870_v2 }
 0x6bc   : > { %v7035_v21 = vpack.c.bf16 %v3530_v19, %v3528_v14  ;;  %v3883_v14 = vld [vmem:[%s10337_s0 + $0x1c8] sm:$0xff]  ;;  %v3885_v19 = vld [vmem:[%s10337_s0 + $0x1d8] sm:$0xff] }
 0x6bd   : > { %6801 = vmatmul.mubr.msk.f32.gmra.mrb[6].mxu0 %vm3361_vm0, %v3760_v6  ;;  %v7075_v6 = vpack.c.bf16 %v3877_v3, %v3875_v56  ;;  %v7909_v2 = vld [vmem:[#allocation2 + $0x28] sm:$0xff] }
 0x6be   : > { %7026 = vmatpush1.bf16.msra.mxu1 %v7025_v5 }
 0x6bf   : > { %7028 = vmatprep.subr.bf16.mxu1 %v7027_v7  ;;  %v3874_v7 = vld [vmem:[%s10337_s0 + $0x180] sm:$0xff] }
 0x6c2   : > { %7030 = vmatpush1.bf16.msra.mxu1 %v7029_v15  ;;  %v7077_v15 = vpack.c.bf16 %v3876_v8, %v3874_v7  ;;  %v7911_v8 = vld [vmem:[#allocation2 + $0x38] sm:$0xff] }
 0x6c3   : > { %7032 = vmatprep.subr.bf16.mxu1 %v7031_v16  ;;  %v7079_v16 = vpack.c.bf16 %v3881_v50, %v3879_v9  ;;  %v4100_v50 = vld [vmem:[%s10340_s17 + $0x8] sm:$0xff] }
 0x6c6   : > { %7034 = vmatpush1.bf16.msra.mxu1 %v7033_v20  ;;  %v7081_v20 = vpack.c.bf16 %v3880_v18, %v3878_v17  ;;  %v4110_v18 = vld [vmem:[%s10340_s17 + $0x58] sm:$0xff] }
 0x6c7   : > { %7036 = vmatprep.subr.bf16.mxu1 %v7035_v21  ;;  %v7083_v21 = vpack.c.bf16 %v3885_v19, %v3883_v14  ;;  %v4099_v14 = vld [vmem:[%s10340_s17] sm:$0xff] }
 0x6c8   : > { %v4107_v19 = vld [vmem:[%s10340_s17 + $0x40] sm:$0xff] }
 0x6ca   : > { %7038 = vmatpush1.bf16.msra.mxu1 %v7037_v52  ;;  %v7085_v52 = vpack.c.bf16 %v3884_v23, %v3882_v22  ;;  %v4101_v22 = vld [vmem:[%s10340_s17 + $0x10] sm:$0xff] }
 0x6cb   : > { %7040 = vmatprep.subr.bf16.mxu1 %v7039_v31  ;;  %v7087_v31 = vpack.c.bf16 %v3889_v59, %v3887_v27  ;;  %v4109_v23 = vld [vmem:[%s10340_s17 + $0x50] sm:$0xff]  ;;  %v4116_v27 = vld [vmem:[%s10340_s17 + $0x88] sm:$0xff] }
 0x6cc   : > { %v7157_v59 = vpack.c.bf16 %v4109_v23, %v4101_v22  ;;  %v4180_v22 = vld [vmem:[%s10340_s17 + $0x288] sm:$0xff] }
 0x6cd   : > { %v4188_v23 = vld [vmem:[%s10340_s17 + $0x2c8] sm:$0xff] }
 0x6ce   : > { %7042 = vmatpush1.bf16.msra.mxu1 %v7041_v36  ;;  %v7089_v36 = vpack.c.bf16 %v3888_v35, %v3886_v34  ;;  %v4126_v34 = vld [vmem:[%s10340_s17 + $0xd8] sm:$0xff] }
 0x6cf   : > { %7060 = vmatprep.subr.bf16.mxu1 %v7059_v40  ;;  %v3273_v40 = vrot.slane %v3264_v37, %v8869_v25  ;;  %v4115_v37 = vld [vmem:[%s10340_s17 + $0x80] sm:$0xff] }
 0x784   : > { %v6771_v49 = vpop.f32.mrb[28].mxu1 }
 0x785   : > { %v3484_v24 = vpop.f32.mrb[29].mxu1 }
 0x786   : > { %3600 = vmatmul.mubr.f32.vlgmr.msra.gmra.mrb[32].mxu1 %v3484_v24 }
 0x787   : > { %7062 = vmatpush1.bf16.msra.mxu1 %v7061_v45  ;;  %3605 = vmatprep.mubr.f32.mxu1 %v8161_v41  ;;  %v7904_v45 = vld [vmem:[#allocation2] sm:$0xff] }
 0x788   : > { %v6774_v0 = vpop.f32.mrb[30].mxu1  ;;  %7064 = vmatprep.subr.bf16.mxu1 %v7063_v54  ;;  %v7905_v54 = vld [vmem:[#allocation2 + $0x8] sm:$0xff] }
 0x789   : > { %v3494_v32 = vpop.f32.mrb[31].mxu1 }
 0x78a   : > { %3606 = vmatmul.mubr.f32.gmra.mrb[34].mxu1 %v6771_v49 }
 0x78b   : > { %7066 = vmatpush1.bf16.msra.mxu1 %v7065_v51  ;;  %3611 = vmatprep.mubr.f32.mxu1 %v8161_v41  ;;  %v7906_v51 = vld [vmem:[#allocation2 + $0x10] sm:$0xff] }
 0x78c   : > { %v6799_v33 = vpop.f32.mrb[4].mxu0  ;;  %7068 = vmatprep.subr.bf16.mxu1 %v7067_v13  ;;  %v7907_v13 = vld [vmem:[#allocation2 + $0x18] sm:$0xff] }
 0x78d   : > { %v3839_v47 = vpop.f32.mrb[5].mxu0 }
 0x78e   : > { %3612 = vmatmul.mubr.f32.gmra.mrb[36].mxu1 %v3494_v32 }
 0x78f   : > { %7070 = vmatpush1.bf16.msra.mxu1 %v7069_v39  ;;  %3617 = vmatprep.mubr.f32.mxu1 %v8161_v41 }
 0x790   : > { %v6802_v5 = vpop.f32.mrb[6].mxu0  ;;  %7072 = vmatprep.subr.bf16.mxu1 %v7071_v43 }
 0x791   : > { %v3849_v12 = vpop.f32.mrb[7].mxu0 }
 0x792   : > { %3618 = vmatmul.mubr.f32.gmra.mrb[38].mxu1 %v6774_v0 }
 0x793   : > { %7074 = vmatpush1.bf16.msra.mxu1 %v7073_v4  ;;  %3954 = vmatprep.mubr.f32.mxu1 %v8161_v41 }
 0x794   : > { %7076 = vmatprep.subr.bf16.mxu1 %v7075_v6  ;;  %v7910_v6 = vld [vmem:[#allocation2 + $0x30] sm:$0xff] }
 0x797   : > { %7078 = vmatpush1.bf16.msra.mxu1 %v7077_v15  ;;  %v4108_v15 = vld [vmem:[%s10340_s17 + $0x48] sm:$0xff] }
 0x798   : > { %7080 = vmatprep.subr.bf16.mxu1 %v7079_v16  ;;  %v4102_v16 = vld [vmem:[%s10340_s17 + $0x18] sm:$0xff]  ;;  %v7091_v17 = vpack.c.bf16 %v4108_v15, %v4100_v50 }
 0x799   : > { %v4174_v50 = vld [vmem:[%s10340_s17 + $0x258] sm:$0xff] }
 0x79a   : > { %7092 = vmatprep.subr.bf16.mxu0 %v7091_v17 }
 0x79b   : > { %7082 = vmatpush1.bf16.msra.mxu1 %v7081_v20  ;;  %v7155_v20 = vpack.c.bf16 %v4110_v18, %v4102_v16  ;;  %v4163_v18 = vld [vmem:[%s10340_s17 + $0x200] sm:$0xff] }
 0x79c   : > { %7084 = vmatprep.subr.bf16.mxu1 %v7083_v21  ;;  %v7093_v21 = vpack.c.bf16 %v4107_v19, %v4099_v14  ;;  %v4171_v14 = vld [vmem:[%s10340_s17 + $0x240] sm:$0xff]  ;;  %v4165_v19 = vld [vmem:[%s10340_s17 + $0x210] sm:$0xff] }
 0x79e   : > { %7094 = vmatpush1.bf16.msra.mxu0 %v7093_v21  ;;  %v4173_v21 = vld [vmem:[%s10340_s17 + $0x250] sm:$0xff] }
 0x79f   : > { %7086 = vmatpush1.bf16.msra.mxu1 %v7085_v52  ;;  %v4124_v52 = vld [vmem:[%s10340_s17 + $0xc8] sm:$0xff] }
 0x7a0   : > { %7088 = vmatprep.subr.bf16.mxu1 %v7087_v31  ;;  %v4118_v31 = vld [vmem:[%s10340_s17 + $0x98] sm:$0xff]  ;;  %v7095_v35 = vpack.c.bf16 %v4124_v52, %v4116_v27  ;;  %v7109_v52 = vpack.c.bf16 %v4171_v14, %v4163_v18  ;;  %v4235_v18 = vld [vmem:[%s10340_s17 + $0x440] sm:$0xff]  ;;  %v4229_v14 = vld [vmem:[%s10340_s17 + $0x410] sm:$0xff] }
 0x7a1   : > { %v4182_v27 = vld [vmem:[%s10340_s17 + $0x298] sm:$0xff] }
 0x7a2   : > { %7096 = vmatprep.subr.bf16.mxu0 %v7095_v35  ;;  %v4179_v35 = vld [vmem:[%s10340_s17 + $0x280] sm:$0xff] }
 0x7a3   : > { %7090 = vmatpush1.bf16.msra.mxu1 %v7089_v36  ;;  %v7159_v36 = vpack.c.bf16 %v4126_v34, %v4118_v31  ;;  %v7173_v31 = vpack.c.bf16 %v4173_v21, %v4165_v19  ;;  %v7111_v34 = vpack.c.bf16 %v4188_v23, %v4180_v22  ;;  %v4244_v21 = vld [vmem:[%s10340_s17 + $0x488] sm:$0xff]  ;;  %v4246_v23 = vld [vmem:[%s10340_s17 + $0x498] sm:$0xff] }
 0x7a4   : > { %7156 = vmatprep.subr.bf16.mxu1 %v7155_v20  ;;  %v4252_v22 = vld [vmem:[%s10340_s17 + $0x4c8] sm:$0xff] }
 0x7a6   : > { %3955 = vmatmul.mubr.f32.vlgmr.msra.gmra.mrb[32].mxu1 %v3839_v47 }
 0x7a7   : > { %3960 = vmatprep.mubr.f32.mxu1 %v8161_v41  ;;  %7158 = vmatpush1.bf16.msra.mxu1 %v7157_v59  ;;  %v4190_v59 = vld [vmem:[%s10340_s17 + $0x2d8] sm:$0xff] }
 0x7a8   : > { %7160 = vmatprep.subr.bf16.mxu1 %v7159_v36  ;;  %v4187_v36 = vld [vmem:[%s10340_s17 + $0x2c0] sm:$0xff] }
 0x7aa   : > { %3961 = vmatmul.mubr.f32.gmra.mrb[34].mxu1 %v6799_v33  ;;  %v7908_v33 = vld [vmem:[#allocation2 + $0x20] sm:$0xff] }
 0x7ab   : > { %3966 = vmatprep.mubr.f32.mxu1 %v8161_v41 }
 0x7ae   : > { %3967 = vmatmul.mubr.f32.gmra.mrb[36].mxu1 %v3849_v12 }
 0x7af   : > { %3972 = vmatprep.mubr.f32.mxu1 %v8161_v41 }
 0x7b2   : > { %3973 = vmatmul.mubr.f32.gmra.mrb[38].mxu1 %v6802_v5 }
 0x879   : > { %v3956_v42 = vpop.f32.mrb[32].mxu1 }
 0x87a   : > { %v7603_v62 = vadd.f32 %v3956_v42, %v3269_v38  ;;  %v3958_v61 = vpop.f32.mrb[33].mxu1 }
 0x87b   : > { %v7604_v44 = vadd.f32 %v3958_v61, %v3273_v40  ;;  %v4132_v61 = vld [vmem:[%s10340_s17 + $0x108] sm:$0xff] }
 0x87c   : > { %v9212_v49 = vadd.f32 %v7904_v45, %v7603_v62  ;;  %v4125_v62 = vld [vmem:[%s10340_s17 + $0xd0] sm:$0xff] }
 0x87d   : > { %v9214_v57 = vadd.f32 %v7905_v54, %v7604_v44  ;;  %v3962_v41 = vpop.f32.mrb[34].mxu1  ;;  %v4140_v44 = vld [vmem:[%s10340_s17 + $0x148] sm:$0xff] }
 0x87e   : > { %v7605_v58 = vadd.f32 %v3962_v41, %v3269_v38  ;;  %v3964_v24 = vpop.f32.mrb[35].mxu1  ;;  %v7099_v54 = vpack.c.bf16 %v4140_v44, %v4132_v61  ;;  %v4134_v41 = vld [vmem:[%s10340_s17 + $0x118] sm:$0xff] }
 0x87f   : > { %v7606_v60 = vadd.f32 %v3964_v24, %v3273_v40  ;;  %v3997_v63 = vadd.f32 %v9214_v57, %v9212_v49  ;;  %v4131_v24 = vld [vmem:[%s10340_s17 + $0x100] sm:$0xff]  ;;  %v4198_v61 = vld [vmem:[%s10340_s17 + $0x318] sm:$0xff] }
 0x880   : > { %v9218_v0 = vadd.f32 %v7906_v51, %v7605_v58  ;;  %v4142_v58 = vld [vmem:[%s10340_s17 + $0x158] sm:$0xff]  ;;  %v4133_v51 = vld [vmem:[%s10340_s17 + $0x110] sm:$0xff] }
 0x881   : > { %v9220_v30 = vadd.f32 %v7907_v13, %v7606_v60  ;;  %3998 = vadd.xlane.f32.xlu0 %v3997_v63  ;;  %v3968_v28 = vpop.f32.mrb[36].mxu1  ;;  %v7163_v60 = vpack.c.bf16 %v4142_v58, %v4134_v41  ;;  %v4139_v63 = vld [vmem:[%s10340_s17 + $0x140] sm:$0xff]  ;;  %v4141_v13 = vld [vmem:[%s10340_s17 + $0x150] sm:$0xff]  ;;  %v4206_v44 = vld [vmem:[%s10340_s17 + $0x358] sm:$0xff] }
 0x882   : > { %v7607_v32 = vadd.f32 %v3968_v28, %v3269_v38  ;;  %v3970_v53 = vpop.f32.mrb[37].mxu1  ;;  %v7101_v28 = vpack.c.bf16 %v4139_v63, %v4131_v24  ;;  %v4195_v58 = vld [vmem:[%s10340_s17 + $0x300] sm:$0xff]  ;;  %v7179_v63 = vpack.c.bf16 %v4206_v44, %v4198_v61  ;;  %v4270_v61 = vld [vmem:[%s10340_s17 + $0x558] sm:$0xff] }
 0x883   : > { %v7608_v1 = vadd.f32 %v3970_v53, %v3273_v40  ;;  %v4000_v39 = vadd.f32 %v9220_v30, %v9218_v0  ;;  %v4156_v53 = vld [vmem:[%s10340_s17 + $0x1c8] sm:$0xff]  ;;  %v4203_v24 = vld [vmem:[%s10340_s17 + $0x340] sm:$0xff] }
 0x884   : > { %v9224_v43 = vadd.f32 %v7908_v33, %v7607_v32  ;;  %v4148_v32 = vld [vmem:[%s10340_s17 + $0x188] sm:$0xff] }
 0x885   : > { %v9226_v29 = vadd.f32 %v7909_v2, %v7608_v1  ;;  %4001 = vadd.xlane.f32.xlu1 %v4000_v39  ;;  %v3974_v47 = vpop.f32.mrb[38].mxu1  ;;  %v4150_v1 = vld [vmem:[%s10340_s17 + $0x198] sm:$0xff]  ;;  %v7165_v39 = vpack.c.bf16 %v4141_v13, %v4133_v51  ;;  %v7103_v33 = vpack.c.bf16 %v4156_v53, %v4148_v32  ;;  %v4205_v51 = vld [vmem:[%s10340_s17 + $0x350] sm:$0xff]  ;;  %v4212_v13 = vld [vmem:[%s10340_s17 + $0x388] sm:$0xff] }
 0x886   : > { %v7609_v56 = vadd.f32 %v3974_v47, %v3269_v38  ;;  %v3976_v3 = vpop.f32.mrb[39].mxu1  ;;  %v4123_v38 = vld [vmem:[%s10340_s17 + $0xc0] sm:$0xff]  ;;  %v4158_v2 = vld [vmem:[%s10340_s17 + $0x1d8] sm:$0xff] }
 0x887   : > { %v7610_v4 = vadd.f32 %v3976_v3, %v3273_v40  ;;  %v4003_v5 = vadd.f32 %v9226_v29, %v9224_v43  ;;  %v4117_v40 = vld [vmem:[%s10340_s17 + $0x90] sm:$0xff]  ;;  %v7097_v42 = vpack.c.bf16 %v4123_v38, %v4115_v37  ;;  %v4147_v47 = vld [vmem:[%s10340_s17 + $0x180] sm:$0xff]  ;;  %v7167_v3 = vpack.c.bf16 %v4158_v2, %v4150_v1  ;;  %v4214_v32 = vld [vmem:[%s10340_s17 + $0x398] sm:$0xff] }
 0x888   : > { %v9230_v7 = vadd.f32 %v7910_v6, %v7609_v56  ;;  %v7161_v45 = vpack.c.bf16 %v4125_v62, %v4117_v40  ;;  %v4155_v56 = vld [vmem:[%s10340_s17 + $0x1c0] sm:$0xff]  ;;  %v4164_v6 = vld [vmem:[%s10340_s17 + $0x208] sm:$0xff]  ;;  %v4181_v37 = vld [vmem:[%s10340_s17 + $0x290] sm:$0xff]  ;;  %v7175_v38 = vpack.c.bf16 %v4190_v59, %v4182_v27  ;;  %v7117_v1 = vpack.c.bf16 %v4203_v24, %v4195_v58 }
 0x889   : > { %v9232_v12 = vadd.f32 %v7911_v8, %v7610_v4  ;;  %4004 = vadd.xlane.f32.xlu0 %v4003_v5  ;;  %7098 = vmatpush1.bf16.msra.mxu0 %v7097_v42  ;;  %v4149_v4 = vld [vmem:[%s10340_s17 + $0x190] sm:$0xff]  ;;  %v4172_v8 = vld [vmem:[%s10340_s17 + $0x248] sm:$0xff]  ;;  %v7105_v15 = vpack.c.bf16 %v4155_v56, %v4147_v47  ;;  %v4222_v53 = vld [vmem:[%s10340_s17 + $0x3d8] sm:$0xff] }
 0x88a   : > { %7162 = vmatpush1.bf16.msra.mxu1 %v7161_v45  ;;  %7100 = vmatprep.subr.bf16.mxu0 %v7099_v54  ;;  %v4157_v5 = vld [vmem:[%s10340_s17 + $0x1d0] sm:$0xff]  ;;  %v7107_v17 = vpack.c.bf16 %v4172_v8, %v4164_v6  ;;  %v4196_v42 = vld [vmem:[%s10340_s17 + $0x308] sm:$0xff]  ;;  %v7113_v45 = vpack.c.bf16 %v4187_v36, %v4179_v35  ;;  %v4211_v2 = vld [vmem:[%s10340_s17 + $0x380] sm:$0xff] }
 0x88b   : > { %v4006_v9 = vadd.f32 %v9232_v12, %v9230_v7  ;;  %7164 = vmatprep.subr.bf16.mxu1 %v7163_v60  ;;  %v7169_v16 = vpack.c.bf16 %v4157_v5, %v4149_v4  ;;  %v4189_v40 = vld [vmem:[%s10340_s17 + $0x2d0] sm:$0xff]  ;;  %v4204_v62 = vld [vmem:[%s10340_s17 + $0x348] sm:$0xff]  ;;  %v4219_v47 = vld [vmem:[%s10340_s17 + $0x3c0] sm:$0xff] }
 0x88c   : > { %v7177_v54 = vpack.c.bf16 %v4189_v40, %v4181_v37  ;;  %v7115_v41 = vpack.c.bf16 %v4204_v62, %v4196_v42  ;;  %v4197_v60 = vld [vmem:[%s10340_s17 + $0x310] sm:$0xff]  ;;  %v4228_v5 = vld [vmem:[%s10340_s17 + $0x408] sm:$0xff]  ;;  %v4230_v8 = vld [vmem:[%s10340_s17 + $0x418] sm:$0xff] }
 0x88d   : > { %4007 = vadd.xlane.f32.xlu1 %v4006_v9  ;;  %v4166_v9 = vld [vmem:[%s10340_s17 + $0x218] sm:$0xff]  ;;  %7102 = vmatpush1.bf16.msra.mxu0 %v7101_v28  ;;  %v4220_v28 = vld [vmem:[%s10340_s17 + $0x3c8] sm:$0xff]  ;;  %v4213_v56 = vld [vmem:[%s10340_s17 + $0x390] sm:$0xff] }
 0x88e   : > { %7166 = vmatpush1.bf16.msra.mxu1 %v7165_v39  ;;  %7104 = vmatprep.subr.bf16.mxu0 %v7103_v33  ;;  %v7171_v20 = vpack.c.bf16 %v4174_v50, %v4166_v9  ;;  %v7181_v39 = vpack.c.bf16 %v4205_v51, %v4197_v60  ;;  %v7119_v33 = vpack.c.bf16 %v4220_v28, %v4212_v13  ;;  %v4221_v4 = vld [vmem:[%s10340_s17 + $0x3d0] sm:$0xff]  ;;  %v4236_v6 = vld [vmem:[%s10340_s17 + $0x448] sm:$0xff]  ;;  %v4238_v9 = vld [vmem:[%s10340_s17 + $0x458] sm:$0xff] }
 0x88f   : > { %7168 = vmatprep.subr.bf16.mxu1 %v7167_v3  ;;  %v7183_v3 = vpack.c.bf16 %v4222_v53, %v4214_v32  ;;  %v7121_v50 = vpack.c.bf16 %v4219_v47, %v4211_v2  ;;  %v7187_v19 = vpack.c.bf16 %v4238_v9, %v4230_v8  ;;  %v4254_v27 = vld [vmem:[%s10340_s17 + $0x4d8] sm:$0xff]  ;;  %v4251_v35 = vld [vmem:[%s10340_s17 + $0x4c0] sm:$0xff]  ;;  %v4245_v36 = vld [vmem:[%s10340_s17 + $0x490] sm:$0xff] }
 0x890   : > { %v7191_v37 = vpack.c.bf16 %v4254_v27, %v4246_v23  ;;  %v4260_v40 = vld [vmem:[%s10340_s17 + $0x508] sm:$0xff]  ;;  %v4262_v62 = vld [vmem:[%s10340_s17 + $0x518] sm:$0xff]  ;;  %v4267_v58 = vld [vmem:[%s10340_s17 + $0x540] sm:$0xff] }
 0x891   : > { %7106 = vmatpush1.bf16.msra.mxu0 %v7105_v15  ;;  %v7185_v15 = vpack.c.bf16 %v4221_v4, %v4213_v56  ;;  %v4268_v42 = vld [vmem:[%s10340_s17 + $0x548] sm:$0xff]  ;;  %v7195_v24 = vpack.c.bf16 %v4270_v61, %v4262_v62  ;;  %v4261_v60 = vld [vmem:[%s10340_s17 + $0x510] sm:$0xff] }
 0x892   : > { %7170 = vmatpush1.bf16.msra.mxu1 %v7169_v16  ;;  %7108 = vmatprep.subr.bf16.mxu0 %v7107_v17  ;;  %v7123_v16 = vpack.c.bf16 %v4236_v6, %v4228_v5  ;;  %v4227_v17 = vld [vmem:[%s10340_s17 + $0x400] sm:$0xff]  ;;  %v4277_v62 = vld [vmem:[%s10340_s17 + $0x590] sm:$0xff] }
 0x893   : > { %7172 = vmatprep.subr.bf16.mxu1 %v7171_v20  ;;  %v4237_v20 = vld [vmem:[%s10340_s17 + $0x450] sm:$0xff]  ;;  %v7125_v59 = vpack.c.bf16 %v4235_v18, %v4227_v17 }
 0x894   : > { %v4285_v61 = vld [vmem:[%s10340_s17 + $0x5d0] sm:$0xff] }
 0x895   : > { %7110 = vmatpush1.bf16.msra.mxu0 %v7109_v52  ;;  %v7189_v52 = vpack.c.bf16 %v4237_v20, %v4229_v14 }
 0x896   : > { %7174 = vmatpush1.bf16.msra.mxu1 %v7173_v31  ;;  %7112 = vmatprep.subr.bf16.mxu0 %v7111_v34  ;;  %v7127_v31 = vpack.c.bf16 %v4252_v22, %v4244_v21  ;;  %v4243_v34 = vld [vmem:[%s10340_s17 + $0x480] sm:$0xff] }
 0x897   : > { %7176 = vmatprep.subr.bf16.mxu1 %v7175_v38  ;;  %v4253_v38 = vld [vmem:[%s10340_s17 + $0x4d0] sm:$0xff]  ;;  %v7129_v44 = vpack.c.bf16 %v4251_v35, %v4243_v34  ;;  %v4278_v34 = vld [vmem:[%s10340_s17 + $0x598] sm:$0xff] }
 0x899   : > { %7114 = vmatpush1.bf16.msra.mxu0 %v7113_v45  ;;  %v7193_v45 = vpack.c.bf16 %v4253_v38, %v4245_v36  ;;  %v4286_v36 = vld [vmem:[%s10340_s17 + $0x5d8] sm:$0xff]  ;;  %v4283_v38 = vld [vmem:[%s10340_s17 + $0x5c0] sm:$0xff] }
 0x89a   : > { %7178 = vmatpush1.bf16.msra.mxu1 %v7177_v54  ;;  %7116 = vmatprep.subr.bf16.mxu0 %v7115_v41  ;;  %v7131_v54 = vpack.c.bf16 %v4268_v42, %v4260_v40  ;;  %v4259_v41 = vld [vmem:[%s10340_s17 + $0x500] sm:$0xff]  ;;  %v7199_v40 = vpack.c.bf16 %v4286_v36, %v4278_v34  ;;  %v4325_v36 = vld [vmem:[%s10340_s17 + $0x710] sm:$0xff] }
 0x89b   : > { %7180 = vmatprep.subr.bf16.mxu1 %v7179_v63  ;;  %v4269_v63 = vld [vmem:[%s10340_s17 + $0x550] sm:$0xff]  ;;  %v7133_v51 = vpack.c.bf16 %v4267_v58, %v4259_v41  ;;  %v4294_v41 = vld [vmem:[%s10340_s17 + $0x618] sm:$0xff] }
 0x89c   : > { %v7197_v13 = vpack.c.bf16 %v4269_v63, %v4261_v60  ;;  %v4291_v60 = vld [vmem:[%s10340_s17 + $0x600] sm:$0xff] }
 0x89d   : > { %7118 = vmatpush1.bf16.msra.mxu0 %v7117_v1  ;;  %v4299_v63 = vld [vmem:[%s10340_s17 + $0x640] sm:$0xff] }
 0x89e   : > { %7182 = vmatpush1.bf16.msra.mxu1 %v7181_v39  ;;  %7120 = vmatprep.subr.bf16.mxu0 %v7119_v33 }
 0x89f   : > { %7184 = vmatprep.subr.bf16.mxu1 %v7183_v3 }
 0x8a1   : > { %7122 = vmatpush1.bf16.msra.mxu0 %v7121_v50 }
 0x8a2   : > { %7186 = vmatpush1.bf16.msra.mxu1 %v7185_v15  ;;  %7124 = vmatprep.subr.bf16.mxu0 %v7123_v16 }
 0x8a3   : > { %7188 = vmatprep.subr.bf16.mxu1 %v7187_v19 }
 0x8a5   : > { %7126 = vmatpush1.bf16.msra.mxu0 %v7125_v59 }
 0x8a6   : > { %7190 = vmatpush1.bf16.msra.mxu1 %v7189_v52  ;;  %7128 = vmatprep.subr.bf16.mxu0 %v7127_v31  ;;  %v4276_v52 = vld [vmem:[%s10340_s17 + $0x588] sm:$0xff] }
 0x8a7   : > { %7192 = vmatprep.subr.bf16.mxu1 %v7191_v37  ;;  %v4284_v31 = vld [vmem:[%s10340_s17 + $0x5c8] sm:$0xff]  ;;  %v4275_v37 = vld [vmem:[%s10340_s17 + $0x580] sm:$0xff] }
 0x8a8   : > { %v7135_v35 = vpack.c.bf16 %v4284_v31, %v4276_v52  ;;  %v7137_v42 = vpack.c.bf16 %v4283_v38, %v4275_v37  ;;  %v4323_v52 = vld [vmem:[%s10340_s17 + $0x700] sm:$0xff]  ;;  %v4333_v37 = vld [vmem:[%s10340_s17 + $0x750] sm:$0xff] }
 0x8a9   : > { %7130 = vmatpush1.bf16.msra.mxu0 %v7129_v44  ;;  %v7201_v44 = vpack.c.bf16 %v4285_v61, %v4277_v62  ;;  %v4331_v31 = vld [vmem:[%s10340_s17 + $0x740] sm:$0xff]  ;;  %v7213_v38 = vpack.c.bf16 %v4333_v37, %v4325_v36  ;;  %v4342_v62 = vld [vmem:[%s10340_s17 + $0x798] sm:$0xff] }
 0x8aa   : > { %7194 = vmatpush1.bf16.msra.mxu1 %v7193_v45  ;;  %7132 = vmatprep.subr.bf16.mxu0 %v7131_v54  ;;  %v4292_v45 = vld [vmem:[%s10340_s17 + $0x608] sm:$0xff] }
 0x8ab   : > { %7196 = vmatprep.subr.bf16.mxu1 %v7195_v24  ;;  %v4300_v54 = vld [vmem:[%s10340_s17 + $0x648] sm:$0xff]  ;;  %v4302_v24 = vld [vmem:[%s10340_s17 + $0x658] sm:$0xff] }
 0x8ac   : > { %v7139_v58 = vpack.c.bf16 %v4300_v54, %v4292_v45  ;;  %v4339_v45 = vld [vmem:[%s10340_s17 + $0x780] sm:$0xff] }
 0x8ad   : > { %7134 = vmatpush1.bf16.msra.mxu0 %v7133_v51  ;;  %v7203_v51 = vpack.c.bf16 %v4302_v24, %v4294_v41  ;;  %v4347_v54 = vld [vmem:[%s10340_s17 + $0x7c0] sm:$0xff]  ;;  %v4341_v24 = vld [vmem:[%s10340_s17 + $0x790] sm:$0xff] }
 0x8ae   : > { %7198 = vmatpush1.bf16.msra.mxu1 %v7197_v13  ;;  %7136 = vmatprep.subr.bf16.mxu0 %v7135_v35  ;;  %v7141_v13 = vpack.c.bf16 %v4299_v63, %v4291_v60  ;;  %v7149_v35 = vpack.c.bf16 %v4331_v31, %v4323_v52  ;;  %v4349_v60 = vld [vmem:[%s10340_s17 + $0x7d0] sm:$0xff]  ;;  %v4103_v31 = vld [vmem:[%s10340_s17 + $0x20] sm:$0xff] }
 0x8af   : > { %7200 = vmatprep.subr.bf16.mxu1 %v7199_v40  ;;  %v4340_v40 = vld [vmem:[%s10340_s17 + $0x788] sm:$0xff]  ;;  %v7217_v63 = vpack.c.bf16 %v4349_v60, %v4341_v24  ;;  %v4119_v24 = vld [vmem:[%s10340_s17 + $0xa0] sm:$0xff] }
 0x8b1   : > { %7138 = vmatpush1.bf16.msra.mxu0 %v7137_v42  ;;  %v4348_v42 = vld [vmem:[%s10340_s17 + $0x7c8] sm:$0xff] }
 0x8b2   : > { %7202 = vmatpush1.bf16.msra.mxu1 %v7201_v44  ;;  %7140 = vmatprep.subr.bf16.mxu0 %v7139_v58  ;;  %v7151_v61 = vpack.c.bf16 %v4348_v42, %v4340_v40  ;;  %v4350_v44 = vld [vmem:[%s10340_s17 + $0x7d8] sm:$0xff]  ;;  %v7153_v58 = vpack.c.bf16 %v4347_v54, %v4339_v45  ;;  %v4105_v40 = vld [vmem:[%s10340_s17 + $0x30] sm:$0xff] }
 0x8b3   : > { %7204 = vmatprep.subr.bf16.mxu1 %v7203_v51  ;;  %v7215_v41 = vpack.c.bf16 %v4350_v44, %v4342_v62  ;;  %v4104_v51 = vld [vmem:[%s10340_s17 + $0x28] sm:$0xff]  ;;  %v4113_v42 = vld [vmem:[%s10340_s17 + $0x70] sm:$0xff]  ;;  %v4122_v44 = vld [vmem:[%s10340_s17 + $0xb8] sm:$0xff] }
 0x8b4   : > { %v4120_v62 = vld [vmem:[%s10340_s17 + $0xa8] sm:$0xff]  ;;  %v4130_v45 = vld [vmem:[%s10340_s17 + $0xf8] sm:$0xff] }
 0x8b5   : > { %7142 = vmatpush1.bf16.msra.mxu0 %v7141_v13  ;;  %v4112_v13 = vld [vmem:[%s10340_s17 + $0x68] sm:$0xff] }
 0x90e   : > { %v3999_v28 = vpop.xlane.xlu0 %3998 }
 0x90f   : > { %v4009_v32 = vmul.f32 0.00390625, %v3999_v28  ;;  %v4293_v28 = vld [vmem:[%s10340_s17 + $0x610] sm:$0xff] }
 0x911   : > { %v9325_v53 = vsub.f32 %v9212_v49, %v4009_v32  ;;  %v9328_v1 = vsub.f32 %v9214_v57, %v4009_v32  ;;  %v4301_v32 = vld [vmem:[%s10340_s17 + $0x650] sm:$0xff] }
 0x912   : > { %v4002_v39 = vpop.xlane.xlu1 %4001 }
 0x913   : > { %v4010_v33 = vmul.f32 0.00390625, %v4002_v39  ;;  %v4021_v2 = vmul.f32 %v9325_v53, %v9325_v53  ;;  %v4022_v47 = vmul.f32 %v9328_v1, %v9328_v1  ;;  %v7205_v39 = vpack.c.bf16 %v4301_v32, %v4293_v28  ;;  %v4106_v28 = vld [vmem:[%s10340_s17 + $0x38] sm:$0xff] }
 0x914   : > { %v7219_v32 = vpack.c.bf16 %v4112_v13, %v4104_v51 }
 0x915   : > { %v9335_v56 = vsub.f32 %v9218_v0, %v4010_v33  ;;  %v9338_v3 = vsub.f32 %v9220_v30, %v4010_v33  ;;  %v4029_v4 = vadd.f32 %v4022_v47, %v4021_v2  ;;  %v4308_v33 = vld [vmem:[%s10340_s17 + $0x688] sm:$0xff]  ;;  %v4310_v47 = vld [vmem:[%s10340_s17 + $0x698] sm:$0xff]  ;;  %7206 = vmatpush1.bf16.msra.mxu1 %v7205_v39 }
 0x916   : > { %v4005_v5 = vpop.xlane.xlu0 %4004  ;;  %v4316_v2 = vld [vmem:[%s10340_s17 + $0x6c8] sm:$0xff]  ;;  %v4114_v39 = vld [vmem:[%s10340_s17 + $0x78] sm:$0xff] }
 0x917   : > { %v4011_v6 = vmul.f32 0.00390625, %v4005_v5  ;;  %4030 = vadd.xlane.f32.xlu0 %v4029_v4  ;;  %v4023_v8 = vmul.f32 %v9335_v56, %v9335_v56  ;;  %v4024_v9 = vmul.f32 %v9338_v3, %v9338_v3  ;;  %v7143_v4 = vpack.c.bf16 %v4316_v2, %v4308_v33  ;;  %v4318_v5 = vld [vmem:[%s10340_s17 + $0x6d8] sm:$0xff] }
 0x918   : > { %v7283_v33 = vpack.c.bf16 %v4114_v39, %v4106_v28  ;;  %v4127_v28 = vld [vmem:[%s10340_s17 + $0xe0] sm:$0xff]  ;;  %v4129_v39 = vld [vmem:[%s10340_s17 + $0xf0] sm:$0xff] }
 0x919   : > { %v9345_v50 = vsub.f32 %v9224_v43, %v4011_v6  ;;  %v9348_v15 = vsub.f32 %v9226_v29, %v4011_v6  ;;  %v4032_v16 = vadd.f32 %v4024_v9, %v4023_v8  ;;  %v4307_v6 = vld [vmem:[%s10340_s17 + $0x680] sm:$0xff]  ;;  %v7207_v9 = vpack.c.bf16 %v4318_v5, %v4310_v47  ;;  %7144 = vmatprep.subr.bf16.mxu0 %v7143_v4 }
 0x91a   : > { %v4008_v17 = vpop.xlane.xlu1 %4007  ;;  %v4315_v8 = vld [vmem:[%s10340_s17 + $0x6c0] sm:$0xff] }
 0x91b   : > { %v4012_v18 = vmul.f32 0.00390625, %v4008_v17  ;;  %4033 = vadd.xlane.f32.xlu1 %v4032_v16  ;;  %v4025_v14 = vmul.f32 %v9345_v50, %v9345_v50  ;;  %v4026_v19 = vmul.f32 %v9348_v15, %v9348_v15  ;;  %v7145_v16 = vpack.c.bf16 %v4315_v8, %v4307_v6  ;;  %v4309_v17 = vld [vmem:[%s10340_s17 + $0x690] sm:$0xff]  ;;  %7208 = vmatprep.subr.bf16.mxu1 %v7207_v9 }
 0x91d   : > { %v9355_v20 = vsub.f32 %v9230_v7, %v4012_v18  ;;  %v9358_v21 = vsub.f32 %v9232_v12, %v4012_v18  ;;  %v4035_v22 = vadd.f32 %v4026_v19, %v4025_v14  ;;  %v4317_v18 = vld [vmem:[%s10340_s17 + $0x6d0] sm:$0xff]  ;;  %7146 = vmatpush1.bf16.msra.mxu0 %v7145_v16  ;;  %v4324_v19 = vld [vmem:[%s10340_s17 + $0x708] sm:$0xff] }
 0x91e   : > { %v7209_v14 = vpack.c.bf16 %v4317_v18, %v4309_v17  ;;  %v3995_v18 = vld [vmem:[%s10342_s26] sm:$0x3] }
 0x91f   : > { %4036 = vadd.xlane.f32.xlu0 %v4035_v22  ;;  %v4027_v23 = vmul.f32 %v9355_v20, %v9355_v20  ;;  %v4028_v27 = vmul.f32 %v9358_v21, %v9358_v21  ;;  %v4332_v22 = vld [vmem:[%s10340_s17 + $0x748] sm:$0xff] }
 0x920   : > { %7210 = vmatpush1.bf16.msra.mxu1 %v7209_v14 }
 0x921   : > { %v4038_v59 = vadd.f32 %v4028_v27, %v4027_v23  ;;  %v4326_v23 = vld [vmem:[%s10340_s17 + $0x718] sm:$0xff]  ;;  %v7147_v27 = vpack.c.bf16 %v4332_v22, %v4324_v19  ;;  %v3996_v22 = vld [vmem:[%s10344_s14] sm:$0x3] }
 0x922   : > { %v9428_v36 = vrot.slane %v3996_v22, %v8872_v26  ;;  %v9431_v37 = vrot.slane %v3996_v22, %v8869_v25  ;;  %v4143_v22 = vld [vmem:[%s10340_s17 + $0x160] sm:$0xff] }
 0x923   : > { %4039 = vadd.xlane.f32.xlu1 %v4038_v59  ;;  %v4334_v59 = vld [vmem:[%s10340_s17 + $0x758] sm:$0xff]  ;;  %7148 = vmatprep.subr.bf16.mxu0 %v7147_v27  ;;  %v9422_v27 = vrot.slane %v3995_v18, %v8869_v25 }
 0x924   : > { %v7211_v34 = vpack.c.bf16 %v4334_v59, %v4326_v23  ;;  %7150 = vmatpush1.bf16.msra.mxu0 %v7149_v35  ;;  %v9419_v23 = vrot.slane %v3995_v18, %v8872_v26 }
 0x925   : > { %7152 = vmatprep.subr.bf16.mxu0 %v7151_v61 }
 0x926   : > { %7212 = vmatprep.subr.bf16.mxu1 %v7211_v34 }
 0x927   : > { %7214 = vmatpush1.bf16.msra.mxu1 %v7213_v38  ;;  %v4111_v38 = vld [vmem:[%s10340_s17 + $0x60] sm:$0xff] }
 0x928   : > { %7216 = vmatprep.subr.bf16.mxu1 %v7215_v41  ;;  %7154 = vmatpush1.bf16.msra.mxu0 %v7153_v58  ;;  %v7221_v41 = vpack.c.bf16 %v4111_v38, %v4103_v31  ;;  %v7285_v58 = vpack.c.bf16 %v4113_v42, %v4105_v40  ;;  %v4152_v38 = vld [vmem:[%s10340_s17 + $0x1a8] sm:$0xff] }
 0x929   : > { %7220 = vmatprep.subr.bf16.mxu0 %v7219_v32  ;;  %v4121_v32 = vld [vmem:[%s10340_s17 + $0xb0] sm:$0xff]  ;;  %v4160_v42 = vld [vmem:[%s10340_s17 + $0x1e8] sm:$0xff] }
 0x92b   : > { %7218 = vmatpush1.bf16.msra.mxu1 %v7217_v63 }
 0x92c   : > { %7284 = vmatprep.subr.bf16.mxu1 %v7283_v33 }
 0x9a4   : > { %v4031_v2 = vpop.xlane.xlu0 %4030 }
 0x9a5   : > { %v4041_v47 = vmul.f32 0.00390625, %v4031_v2  ;;  %v7287_v2 = vpack.c.bf16 %v4130_v45, %v4122_v44 }
 0x9a7   : > { %v4045_v4 = vadd.f32 1e-05, %v4041_v47  ;;  %v4136_v47 = vld [vmem:[%s10340_s17 + $0x128] sm:$0xff] }
 0x9a8   : > { %v4034_v5 = vpop.xlane.xlu1 %4033 }
 0x9a9   : > { %7768 = vrsqrt.f32 %v4045_v4  ;;  %v4042_v6 = vmul.f32 0.00390625, %v4034_v5 }
 0x9ab   : > { %v4046_v8 = vadd.f32 1e-05, %v4042_v6  ;;  %v4146_v6 = vld [vmem:[%s10340_s17 + $0x178] sm:$0xff] }
 0x9ac   : > { %v4037_v9 = vpop.xlane.xlu0 %4036 }
 0x9ad   : > { %7770 = vrsqrt.f32 %v4046_v8  ;;  %v4043_v16 = vmul.f32 0.00390625, %v4037_v9  ;;  %v7225_v9 = vpack.c.bf16 %v4127_v28, %v4119_v24  ;;  %v4153_v28 = vld [vmem:[%s10340_s17 + $0x1b0] sm:$0xff] }
 0x9af   : > { %v4047_v17 = vadd.f32 1e-05, %v4043_v16  ;;  %v7289_v16 = vpack.c.bf16 %v4129_v39, %v4121_v32  ;;  %v4161_v32 = vld [vmem:[%s10340_s17 + $0x1f0] sm:$0xff]  ;;  %v4168_v39 = vld [vmem:[%s10340_s17 + $0x228] sm:$0xff] }
 0x9b0   : > { %v4040_v14 = vpop.xlane.xlu1 %4039 }
 0x9b1   : > { %7772 = vrsqrt.f32 %v4047_v17  ;;  %v4044_v19 = vmul.f32 0.00390625, %v4040_v14  ;;  %v4135_v17 = vld [vmem:[%s10340_s17 + $0x120] sm:$0xff] }
 0x9b3   : > { %v7769_v59 = vpop.eup %7768  ;;  %v4048_v52 = vadd.f32 1e-05, %v4044_v19 }
 0x9b4   : > { %v4053_v34 = vmul.f32 %v7769_v59, %v9325_v53  ;;  %v4054_v35 = vmul.f32 %v7769_v59, %v9328_v1  ;;  %v4128_v1 = vld [vmem:[%s10340_s17 + $0xe8] sm:$0xff]  ;;  %v4137_v59 = vld [vmem:[%s10340_s17 + $0x130] sm:$0xff] }
 0x9b5   : > { %7774 = vrsqrt.f32 %v4048_v52  ;;  %v7223_v33 = vpack.c.bf16 %v4128_v1, %v4120_v62  ;;  %v4145_v52 = vld [vmem:[%s10340_s17 + $0x170] sm:$0xff]  ;;  %v4162_v62 = vld [vmem:[%s10340_s17 + $0x1f8] sm:$0xff] }
 0x9b6   : > { %v4073_v61 = vmul.f32 %v9422_v27, %v4054_v35  ;;  %v4072_v53 = vmul.f32 %v9419_v23, %v4053_v34  ;;  %v7293_v1 = vpack.c.bf16 %v4145_v52, %v4137_v59  ;;  %v4183_v52 = vld [vmem:[%s10340_s17 + $0x2a0] sm:$0xff] }
 0x9b7   : > { %v7771_v54 = vpop.eup %7770 }
 0x9b8   : > { %v9444_v60 = vadd.f32 %v9431_v37, %v4073_v61  ;;  %v9447_v63 = vadd.f32 %v9428_v36, %v4072_v53  ;;  %v4056_v51 = vmul.f32 %v7771_v54, %v9338_v3  ;;  %v4055_v13 = vmul.f32 %v7771_v54, %v9335_v56  ;;  %v4144_v3 = vld [vmem:[%s10340_s17 + $0x168] sm:$0xff]  ;;  %v4138_v56 = vld [vmem:[%s10340_s17 + $0x138] sm:$0xff] }
 0x9b9   : > { %v7227_v31 = vpack.c.bf16 %v4144_v3, %v4136_v47  ;;  %v7291_v34 = vpack.c.bf16 %v4146_v6, %v4138_v56  ;;  %v7229_v53 = vpack.c.bf16 %v4143_v22, %v4135_v17  ;;  %v4170_v47 = vld [vmem:[%s10340_s17 + $0x238] sm:$0xff]  ;;  %v4167_v3 = vld [vmem:[%s10340_s17 + $0x220] sm:$0xff]  ;;  %v4169_v6 = vld [vmem:[%s10340_s17 + $0x230] sm:$0xff] }
 0x9ba   : > { %4461 = vmatprep.mubr.f32.mxu0 %v9444_v60  ;;  %4550 = vmatprep.mubr.f32.mxu1 %v9444_v60  ;;  %v4075_v4 = vmul.f32 %v9422_v27, %v4056_v51  ;;  %v4074_v5 = vmul.f32 %v9419_v23, %v4055_v13  ;;  %v7231_v51 = vpack.c.bf16 %v4160_v42, %v4152_v38  ;;  %v4175_v56 = vld [vmem:[%s10340_s17 + $0x260] sm:$0xff]  ;;  %v4192_v17 = vld [vmem:[%s10340_s17 + $0x2e8] sm:$0xff]  ;;  %v4185_v38 = vld [vmem:[%s10340_s17 + $0x2b0] sm:$0xff] }
 0x9bb   : > { %v7773_v8 = vpop.eup %7772  ;;  %4462 = vmatmul.mubr.f32.vlgmr.msra.gmra.mrb[8].mxu0 %v9447_v63  ;;  %4551 = vmatmul.mubr.f32.vlgmr.msra.gmra.mrb[40].mxu1 %v9447_v63  ;;  %v7237_v22 = vpack.c.bf16 %v4175_v56, %v4167_v3  ;;  %v4200_v42 = vld [vmem:[%s10340_s17 + $0x328] sm:$0xff] }
 0x9bc   : > { %7222 = vmatpush1.bf16.msra.mxu0 %v7221_v41  ;;  %7286 = vmatpush1.bf16.msra.mxu1 %v7285_v58  ;;  %v9466_v18 = vadd.f32 %v9431_v37, %v4075_v4  ;;  %v9469_v14 = vadd.f32 %v9428_v36, %v4074_v5  ;;  %v4058_v19 = vmul.f32 %v7773_v8, %v9348_v15  ;;  %v4154_v15 = vld [vmem:[%s10340_s17 + $0x1b8] sm:$0xff]  ;;  %v4151_v41 = vld [vmem:[%s10340_s17 + $0x1a0] sm:$0xff]  ;;  %v4232_v3 = vld [vmem:[%s10340_s17 + $0x428] sm:$0xff] }
 0x9bd   : > { %7224 = vmatprep.subr.bf16.mxu0 %v7223_v33  ;;  %7288 = vmatprep.subr.bf16.mxu1 %v7287_v2  ;;  %v4057_v35 = vmul.f32 %v7773_v8, %v9345_v50  ;;  %v4159_v58 = vld [vmem:[%s10340_s17 + $0x1e0] sm:$0xff]  ;;  %v7295_v13 = vpack.c.bf16 %v4162_v62, %v4154_v15  ;;  %v4176_v2 = vld [vmem:[%s10340_s17 + $0x268] sm:$0xff]  ;;  %v4178_v4 = vld [vmem:[%s10340_s17 + $0x278] sm:$0xff]  ;;  %v7297_v5 = vpack.c.bf16 %v4161_v32, %v4153_v28 }
 0x9be   : > { %4467 = vmatprep.mubr.f32.mxu0 %v9466_v18  ;;  %4556 = vmatprep.mubr.f32.mxu1 %v9466_v18  ;;  %v4077_v40 = vmul.f32 %v9422_v27, %v4058_v19  ;;  %v7233_v33 = vpack.c.bf16 %v4159_v58, %v4151_v41  ;;  %v4177_v8 = vld [vmem:[%s10340_s17 + $0x270] sm:$0xff]  ;;  %v4194_v19 = vld [vmem:[%s10340_s17 + $0x2f8] sm:$0xff]  ;;  %v4208_v15 = vld [vmem:[%s10340_s17 + $0x368] sm:$0xff] }
 0x9bf   : > { %v7775_v61 = vpop.eup %7774  ;;  %4468 = vmatmul.mubr.f32.gmra.mrb[10].mxu0 %v9469_v14  ;;  %4557 = vmatmul.mubr.f32.gmra.mrb[42].mxu1 %v9469_v14  ;;  %v4076_v50 = vmul.f32 %v9419_v23, %v4057_v35  ;;  %v7301_v59 = vpack.c.bf16 %v4177_v8, %v4169_v6  ;;  %v4202_v62 = vld [vmem:[%s10340_s17 + $0x338] sm:$0xff]  ;;  %v4201_v41 = vld [vmem:[%s10340_s17 + $0x330] sm:$0xff]  ;;  %v4240_v56 = vld [vmem:[%s10340_s17 + $0x468] sm:$0xff] }
 0x9c0   : > { %7226 = vmatpush1.bf16.msra.mxu0 %v7225_v9  ;;  %7290 = vmatpush1.bf16.msra.mxu1 %v7289_v16  ;;  %v9487_v44 = vadd.f32 %v9431_v37, %v4077_v40  ;;  %v4060_v45 = vmul.f32 %v7775_v61, %v9358_v21  ;;  %v4059_v54 = vmul.f32 %v7775_v61, %v9355_v20  ;;  %v4184_v9 = vld [vmem:[%s10340_s17 + $0x2a8] sm:$0xff]  ;;  %v4193_v40 = vld [vmem:[%s10340_s17 + $0x2f0] sm:$0xff]  ;;  %v4210_v61 = vld [vmem:[%s10340_s17 + $0x378] sm:$0xff] }
 0x9c1   : > { %7228 = vmatprep.subr.bf16.mxu0 %v7227_v31  ;;  %7292 = vmatprep.subr.bf16.mxu1 %v7291_v34  ;;  %v9494_v24 = vadd.f32 %v9428_v36, %v4076_v50  ;;  %v7299_v16 = vpack.c.bf16 %v4178_v4, %v4170_v47  ;;  %v4191_v31 = vld [vmem:[%s10340_s17 + $0x2e0] sm:$0xff]  ;;  %v7239_v34 = vpack.c.bf16 %v4192_v17, %v4184_v9  ;;  %v4209_v58 = vld [vmem:[%s10340_s17 + $0x370] sm:$0xff]  ;;  %v4218_v28 = vld [vmem:[%s10340_s17 + $0x3b8] sm:$0xff] }
 0x9c2   : > { %4473 = vmatprep.mubr.f32.mxu0 %v9487_v44  ;;  %4562 = vmatprep.mubr.f32.mxu1 %v9487_v44  ;;  %v4079_v20 = vmul.f32 %v9422_v27, %v4060_v45  ;;  %v4078_v21 = vmul.f32 %v9419_v23, %v4059_v54  ;;  %v7305_v50 = vpack.c.bf16 %v4193_v40, %v4185_v38  ;;  %v4226_v32 = vld [vmem:[%s10340_s17 + $0x3f8] sm:$0xff]  ;;  %v4217_v4 = vld [vmem:[%s10340_s17 + $0x3b0] sm:$0xff]  ;;  %v4239_v17 = vld [vmem:[%s10340_s17 + $0x460] sm:$0xff] }
 0x9c3   : > { %4474 = vmatmul.mubr.f32.gmra.mrb[12].mxu0 %v9494_v24  ;;  %4563 = vmatmul.mubr.f32.gmra.mrb[44].mxu1 %v9494_v24  ;;  %v7243_v45 = vpack.c.bf16 %v4208_v15, %v4200_v42  ;;  %v7307_v54 = vpack.c.bf16 %v4210_v61, %v4202_v62  ;;  %v7311_v47 = vpack.c.bf16 %v4226_v32, %v4218_v28  ;;  %v4234_v6 = vld [vmem:[%s10340_s17 + $0x438] sm:$0xff]  ;;  %v4247_v42 = vld [vmem:[%s10340_s17 + $0x4a0] sm:$0xff] }
 0x9c4   : > { %7230 = vmatpush1.bf16.msra.mxu0 %v7229_v53  ;;  %7294 = vmatpush1.bf16.msra.mxu1 %v7293_v1  ;;  %v9509_v27 = vadd.f32 %v9431_v37, %v4079_v20  ;;  %v9512_v23 = vadd.f32 %v9428_v36, %v4078_v21  ;;  %v7235_v37 = vpack.c.bf16 %v4176_v2, %v4168_v39  ;;  %v4186_v36 = vld [vmem:[%s10340_s17 + $0x2b8] sm:$0xff]  ;;  %v4199_v53 = vld [vmem:[%s10340_s17 + $0x320] sm:$0xff] }
 0x9c5   : > { %7232 = vmatprep.subr.bf16.mxu0 %v7231_v51  ;;  %7296 = vmatprep.subr.bf16.mxu1 %v7295_v13  ;;  %v7303_v35 = vpack.c.bf16 %v4194_v19, %v4186_v36  ;;  %v4207_v1 = vld [vmem:[%s10340_s17 + $0x360] sm:$0xff]  ;;  %v4216_v51 = vld [vmem:[%s10340_s17 + $0x3a8] sm:$0xff]  ;;  %v7309_v21 = vpack.c.bf16 %v4209_v58, %v4201_v41  ;;  %v4242_v8 = vld [vmem:[%s10340_s17 + $0x478] sm:$0xff]  ;;  %v7251_v36 = vpack.c.bf16 %v4240_v56, %v4232_v3 }
 0x9c6   : > { %4479 = vmatprep.mubr.f32.mxu0 %v9509_v27  ;;  %4568 = vmatprep.mubr.f32.mxu1 %v9509_v27  ;;  %v4224_v13 = vld [vmem:[%s10340_s17 + $0x3e8] sm:$0xff]  ;;  %v7245_v20 = vpack.c.bf16 %v4207_v1, %v4199_v53  ;;  %v4215_v39 = vld [vmem:[%s10340_s17 + $0x3a0] sm:$0xff]  ;;  %v7315_v19 = vpack.c.bf16 %v4242_v8, %v4234_v6 }
 0x9c7   : > { %4480 = vmatmul.mubr.f32.gmra.mrb[14].mxu0 %v9512_v23  ;;  %4569 = vmatmul.mubr.f32.gmra.mrb[46].mxu1 %v9512_v23  ;;  %v7247_v2 = vpack.c.bf16 %v4224_v13, %v4216_v51  ;;  %v4255_v15 = vld [vmem:[%s10340_s17 + $0x4e0] sm:$0xff]  ;;  %v4264_v53 = vld [vmem:[%s10340_s17 + $0x528] sm:$0xff] }
 0x9c8   : > { %7234 = vmatpush1.bf16.msra.mxu0 %v7233_v33  ;;  %7298 = vmatpush1.bf16.msra.mxu1 %v7297_v5  ;;  %v4223_v33 = vld [vmem:[%s10340_s17 + $0x3e0] sm:$0xff]  ;;  %v4225_v5 = vld [vmem:[%s10340_s17 + $0x3f0] sm:$0xff]  ;;  %v4272_v1 = vld [vmem:[%s10340_s17 + $0x568] sm:$0xff]  ;;  %v7257_v41 = vpack.c.bf16 %v4255_v15, %v4247_v42 }
 0x9c9   : > { %4639 = vmatprep.mubr.f32.mxu0 %v9444_v60  ;;  %4728 = vmatprep.mubr.f32.mxu1 %v9444_v60  ;;  %v7241_v60 = vpack.c.bf16 %v4191_v31, %v4183_v52  ;;  %v7249_v9 = vpack.c.bf16 %v4223_v33, %v4215_v39  ;;  %v4248_v52 = vld [vmem:[%s10340_s17 + $0x4a8] sm:$0xff]  ;;  %v4263_v51 = vld [vmem:[%s10340_s17 + $0x520] sm:$0xff]  ;;  %v7259_v28 = vpack.c.bf16 %v4272_v1, %v4264_v53 }
 0x9ca   : > { %7236 = vmatprep.subr.bf16.mxu0 %v7235_v37  ;;  %7300 = vmatprep.subr.bf16.mxu1 %v7299_v16  ;;  %v7313_v37 = vpack.c.bf16 %v4225_v5, %v4217_v4  ;;  %v4231_v16 = vld [vmem:[%s10340_s17 + $0x420] sm:$0xff]  ;;  %v4256_v31 = vld [vmem:[%s10340_s17 + $0x4e8] sm:$0xff] }
 0x9cb   : > { %v7253_v38 = vpack.c.bf16 %v4239_v17, %v4231_v16  ;;  %v7255_v62 = vpack.c.bf16 %v4256_v31, %v4248_v52  ;;  %v4271_v13 = vld [vmem:[%s10340_s17 + $0x560] sm:$0xff]  ;;  %v4280_v39 = vld [vmem:[%s10340_s17 + $0x5a8] sm:$0xff] }
 0x9cc   : > { %7238 = vmatpush1.bf16.msra.mxu0 %v7237_v22  ;;  %7302 = vmatpush1.bf16.msra.mxu1 %v7301_v59  ;;  %v4233_v22 = vld [vmem:[%s10340_s17 + $0x430] sm:$0xff]  ;;  %v4288_v33 = vld [vmem:[%s10340_s17 + $0x5e8] sm:$0xff]  ;;  %v7261_v4 = vpack.c.bf16 %v4271_v13, %v4263_v51  ;;  %v4279_v3 = vld [vmem:[%s10340_s17 + $0x5a0] sm:$0xff] }
 0x9cd   : > { %7240 = vmatprep.subr.bf16.mxu0 %v7239_v34  ;;  %7304 = vmatprep.subr.bf16.mxu1 %v7303_v35  ;;  %v4241_v59 = vld [vmem:[%s10340_s17 + $0x470] sm:$0xff]  ;;  %v4250_v34 = vld [vmem:[%s10340_s17 + $0x4b8] sm:$0xff]  ;;  %v4287_v56 = vld [vmem:[%s10340_s17 + $0x5e0] sm:$0xff]  ;;  %v7263_v6 = vpack.c.bf16 %v4288_v33, %v4280_v39 }
 0x9ce   : > { %v4258_v35 = vld [vmem:[%s10340_s17 + $0x4f8] sm:$0xff]  ;;  %v7317_v40 = vpack.c.bf16 %v4241_v59, %v4233_v22  ;;  %v4296_v16 = vld [vmem:[%s10340_s17 + $0x628] sm:$0xff]  ;;  %v7265_v22 = vpack.c.bf16 %v4287_v56, %v4279_v3  ;;  %v4295_v52 = vld [vmem:[%s10340_s17 + $0x620] sm:$0xff] }
 0x9cf   : > { %v7319_v61 = vpack.c.bf16 %v4258_v35, %v4250_v34  ;;  %v4304_v17 = vld [vmem:[%s10340_s17 + $0x668] sm:$0xff]  ;;  %v4303_v31 = vld [vmem:[%s10340_s17 + $0x660] sm:$0xff] }
 0x9d0   : > { %7242 = vmatpush1.bf16.msra.mxu0 %v7241_v60  ;;  %7306 = vmatpush1.bf16.msra.mxu1 %v7305_v50  ;;  %v4249_v60 = vld [vmem:[%s10340_s17 + $0x4b0] sm:$0xff]  ;;  %v7267_v34 = vpack.c.bf16 %v4304_v17, %v4296_v16  ;;  %v4312_v42 = vld [vmem:[%s10340_s17 + $0x6a8] sm:$0xff]  ;;  %v4311_v53 = vld [vmem:[%s10340_s17 + $0x6a0] sm:$0xff] }
 0x9d1   : > { %7244 = vmatprep.subr.bf16.mxu0 %v7243_v45  ;;  %7308 = vmatprep.subr.bf16.mxu1 %v7307_v54  ;;  %v4257_v50 = vld [vmem:[%s10340_s17 + $0x4f0] sm:$0xff]  ;;  %v4266_v45 = vld [vmem:[%s10340_s17 + $0x538] sm:$0xff]  ;;  %v4320_v15 = vld [vmem:[%s10340_s17 + $0x6e8] sm:$0xff] }
 0x9d2   : > { %v4274_v54 = vld [vmem:[%s10340_s17 + $0x578] sm:$0xff]  ;;  %v7321_v58 = vpack.c.bf16 %v4257_v50, %v4249_v60  ;;  %v7269_v60 = vpack.c.bf16 %v4303_v31, %v4295_v52  ;;  %v4319_v1 = vld [vmem:[%s10340_s17 + $0x6e0] sm:$0xff]  ;;  %v4328_v51 = vld [vmem:[%s10340_s17 + $0x728] sm:$0xff] }
 0x9d3   : > { %v7323_v32 = vpack.c.bf16 %v4274_v54, %v4266_v45  ;;  %v7271_v45 = vpack.c.bf16 %v4320_v15, %v4312_v42  ;;  %v4336_v13 = vld [vmem:[%s10340_s17 + $0x768] sm:$0xff]  ;;  %v4327_v39 = vld [vmem:[%s10340_s17 + $0x720] sm:$0xff]  ;;  %v4948_v31 = vld [vmem:[%s10345_s2 + $0x18] sm:$0xff] }
 0x9d4   : > { %7246 = vmatpush1.bf16.msra.mxu0 %v7245_v20  ;;  %7310 = vmatpush1.bf16.msra.mxu1 %v7309_v21  ;;  %v4265_v20 = vld [vmem:[%s10340_s17 + $0x530] sm:$0xff]  ;;  %v4335_v33 = vld [vmem:[%s10340_s17 + $0x760] sm:$0xff]  ;;  %v4344_v3 = vld [vmem:[%s10340_s17 + $0x7a8] sm:$0xff] }
 0x9d5   : > { %7248 = vmatprep.subr.bf16.mxu0 %v7247_v2  ;;  %7312 = vmatprep.subr.bf16.mxu1 %v7311_v47  ;;  %v4273_v21 = vld [vmem:[%s10340_s17 + $0x570] sm:$0xff]  ;;  %v4282_v2 = vld [vmem:[%s10340_s17 + $0x5b8] sm:$0xff]  ;;  %v4352_v56 = vld [vmem:[%s10340_s17 + $0x7e8] sm:$0xff] }
 0x9d6   : > { %v4290_v47 = vld [vmem:[%s10340_s17 + $0x5f8] sm:$0xff]  ;;  %v7325_v5 = vpack.c.bf16 %v4273_v21, %v4265_v20  ;;  %v7273_v20 = vpack.c.bf16 %v4319_v1, %v4311_v53  ;;  %v4343_v16 = vld [vmem:[%s10340_s17 + $0x7a0] sm:$0xff]  ;;  %v7279_v17 = vpack.c.bf16 %v4352_v56, %v4344_v3  ;;  %v4946_v52 = vld [vmem:[%s10345_s2 + $0x8] sm:$0xff] }
 0x9d7   : > { %v7327_v8 = vpack.c.bf16 %v4290_v47, %v4282_v2  ;;  %v7275_v2 = vpack.c.bf16 %v4336_v13, %v4328_v51  ;;  %v4947_v42 = vld [vmem:[%s10345_s2 + $0x10] sm:$0xff]  ;;  %v4950_v15 = vld [vmem:[%s10345_s2 + $0x28] sm:$0xff]  ;;  %v4960_v13 = vld [vmem:[%s10345_s2 + $0x78] sm:$0xff] }
 0x9d8   : > { %7250 = vmatpush1.bf16.msra.mxu0 %v7249_v9  ;;  %7314 = vmatpush1.bf16.msra.mxu1 %v7313_v37  ;;  %v4281_v9 = vld [vmem:[%s10340_s17 + $0x5b0] sm:$0xff]  ;;  %v4954_v1 = vld [vmem:[%s10345_s2 + $0x48] sm:$0xff] }
 0x9d9   : > { %7252 = vmatprep.subr.bf16.mxu0 %v7251_v36  ;;  %7316 = vmatprep.subr.bf16.mxu1 %v7315_v19  ;;  %v4289_v37 = vld [vmem:[%s10340_s17 + $0x5f0] sm:$0xff]  ;;  %v4298_v36 = vld [vmem:[%s10340_s17 + $0x638] sm:$0xff]  ;;  %v4970_v56 = vld [vmem:[%s10345_s2 + $0xc8] sm:$0xff] }
 0x9da   : > { %v4306_v19 = vld [vmem:[%s10340_s17 + $0x678] sm:$0xff]  ;;  %v7329_v59 = vpack.c.bf16 %v4289_v37, %v4281_v9  ;;  %v7277_v9 = vpack.c.bf16 %v4335_v33, %v4327_v39  ;;  %v4951_v53 = vld [vmem:[%s10345_s2 + $0x30] sm:$0xff]  ;;  %v4961_v33 = vld [vmem:[%s10345_s2 + $0x80] sm:$0xff] }
 0x9db   : > { %v7331_v35 = vpack.c.bf16 %v4306_v19, %v4298_v36  ;;  %v4351_v19 = vld [vmem:[%s10340_s17 + $0x7e0] sm:$0xff]  ;;  %v4955_v51 = vld [vmem:[%s10345_s2 + $0x50] sm:$0xff] }
 0x9dc   : > { %7254 = vmatpush1.bf16.msra.mxu0 %v7253_v38  ;;  %7318 = vmatpush1.bf16.msra.mxu1 %v7317_v40  ;;  %v4297_v38 = vld [vmem:[%s10340_s17 + $0x630] sm:$0xff] }
 0x9dd   : > { %7256 = vmatprep.subr.bf16.mxu0 %v7255_v62  ;;  %7320 = vmatprep.subr.bf16.mxu1 %v7319_v61  ;;  %v4305_v40 = vld [vmem:[%s10340_s17 + $0x670] sm:$0xff]  ;;  %v4314_v62 = vld [vmem:[%s10340_s17 + $0x6b8] sm:$0xff] }
 0x9de   : > { %v4322_v61 = vld [vmem:[%s10340_s17 + $0x6f8] sm:$0xff]  ;;  %v7333_v50 = vpack.c.bf16 %v4305_v40, %v4297_v38  ;;  %v7347_v38 = vpack.c.bf16 %v4948_v31, %v4946_v52  ;;  %v4945_v40 = vld [vmem:[%s10345_s2] sm:$0xff]  ;;  %v4967_v3 = vld [vmem:[%s10345_s2 + $0xb0] sm:$0xff] }
 0x9df   : > { %v7335_v54 = vpack.c.bf16 %v4322_v61, %v4314_v62  ;;  %v4952_v62 = vld [vmem:[%s10345_s2 + $0x38] sm:$0xff]  ;;  %v7349_v61 = vpack.c.bf16 %v4947_v42, %v4945_v40  ;;  %v4978_v52 = vld [vmem:[%s10345_s2 + $0x108] sm:$0xff]  ;;  %v4979_v40 = vld [vmem:[%s10345_s2 + $0x110] sm:$0xff] }
 0x9e0   : > { %7258 = vmatpush1.bf16.msra.mxu0 %v7257_v41  ;;  %7322 = vmatpush1.bf16.msra.mxu1 %v7321_v58  ;;  %v4313_v41 = vld [vmem:[%s10340_s17 + $0x6b0] sm:$0xff]  ;;  %v4980_v31 = vld [vmem:[%s10345_s2 + $0x118] sm:$0xff]  ;;  %v4982_v42 = vld [vmem:[%s10345_s2 + $0x128] sm:$0xff] }
 0x9e1   : > { %7260 = vmatprep.subr.bf16.mxu0 %v7259_v28  ;;  %7324 = vmatprep.subr.bf16.mxu1 %v7323_v32  ;;  %v4321_v58 = vld [vmem:[%s10340_s17 + $0x6f0] sm:$0xff]  ;;  %v4330_v28 = vld [vmem:[%s10340_s17 + $0x738] sm:$0xff] }
 0x9e2   : > { %v4338_v32 = vld [vmem:[%s10340_s17 + $0x778] sm:$0xff]  ;;  %v7337_v21 = vpack.c.bf16 %v4321_v58, %v4313_v41  ;;  %v4953_v58 = vld [vmem:[%s10345_s2 + $0x40] sm:$0xff] }
 0x9e3   : > { %v7339_v47 = vpack.c.bf16 %v4338_v32, %v4330_v28  ;;  %v4957_v32 = vld [vmem:[%s10345_s2 + $0x60] sm:$0xff] }
 0x9e4   : > { %7262 = vmatpush1.bf16.msra.mxu0 %v7261_v4  ;;  %7326 = vmatpush1.bf16.msra.mxu1 %v7325_v5  ;;  %v4329_v4 = vld [vmem:[%s10340_s17 + $0x730] sm:$0xff] }
 0x9e5   : > { %7264 = vmatprep.subr.bf16.mxu0 %v7263_v6  ;;  %7328 = vmatprep.subr.bf16.mxu1 %v7327_v8  ;;  %v4337_v5 = vld [vmem:[%s10340_s17 + $0x770] sm:$0xff]  ;;  %v4346_v6 = vld [vmem:[%s10340_s17 + $0x7b8] sm:$0xff] }
 0x9e6   : > { %v4354_v8 = vld [vmem:[%s10340_s17 + $0x7f8] sm:$0xff]  ;;  %v7341_v37 = vpack.c.bf16 %v4337_v5, %v4329_v4  ;;  %v4965_v5 = vld [vmem:[%s10345_s2 + $0xa0] sm:$0xff] }
 0x9e7   : > { %v7343_v36 = vpack.c.bf16 %v4354_v8, %v4346_v6  ;;  %v4972_v6 = vld [vmem:[%s10345_s2 + $0xd8] sm:$0xff]  ;;  %v7369_v8 = vpack.c.bf16 %v4967_v3, %v4965_v5  ;;  %v4999_v5 = vld [vmem:[%s10345_s2 + $0x1b0] sm:$0xff] }
 0x9e8   : > { %7266 = vmatpush1.bf16.msra.mxu0 %v7265_v22  ;;  %7330 = vmatpush1.bf16.msra.mxu1 %v7329_v59  ;;  %v4345_v22 = vld [vmem:[%s10340_s17 + $0x7b0] sm:$0xff] }
 0x9e9   : > { %7268 = vmatprep.subr.bf16.mxu0 %v7267_v34  ;;  %7332 = vmatprep.subr.bf16.mxu1 %v7331_v35  ;;  %v4353_v59 = vld [vmem:[%s10340_s17 + $0x7f0] sm:$0xff]  ;;  %v7281_v34 = vpack.c.bf16 %v4351_v19, %v4343_v16  ;;  %v4974_v16 = vld [vmem:[%s10345_s2 + $0xe8] sm:$0xff] }
 0x9ea   : > { %v7345_v35 = vpack.c.bf16 %v4353_v59, %v4345_v22  ;;  %v4973_v22 = vld [vmem:[%s10345_s2 + $0xe0] sm:$0xff]  ;;  %v4975_v59 = vld [vmem:[%s10345_s2 + $0xf0] sm:$0xff] }
 0x9ec   : > { %7270 = vmatpush1.bf16.msra.mxu0 %v7269_v60  ;;  %7334 = vmatpush1.bf16.msra.mxu1 %v7333_v50  ;;  %v7351_v60 = vpack.c.bf16 %v4952_v62, %v4950_v15  ;;  %v4949_v50 = vld [vmem:[%s10345_s2 + $0x20] sm:$0xff]  ;;  %v4984_v15 = vld [vmem:[%s10345_s2 + $0x138] sm:$0xff] }
 0x9ed   : > { %7272 = vmatprep.subr.bf16.mxu0 %v7271_v45  ;;  %7336 = vmatprep.subr.bf16.mxu1 %v7335_v54  ;;  %v4956_v45 = vld [vmem:[%s10345_s2 + $0x58] sm:$0xff]  ;;  %v7353_v54 = vpack.c.bf16 %v4951_v53, %v4949_v50  ;;  %v4983_v50 = vld [vmem:[%s10345_s2 + $0x130] sm:$0xff]  ;;  %v4986_v53 = vld [vmem:[%s10345_s2 + $0x148] sm:$0xff] }
 0x9ee   : > { %v7355_v41 = vpack.c.bf16 %v4956_v45, %v4954_v1  ;;  %v4988_v1 = vld [vmem:[%s10345_s2 + $0x158] sm:$0xff] }
 0x9f0   : > { %7274 = vmatpush1.bf16.msra.mxu0 %v7273_v20  ;;  %7338 = vmatpush1.bf16.msra.mxu1 %v7337_v21  ;;  %v4959_v20 = vld [vmem:[%s10345_s2 + $0x70] sm:$0xff]  ;;  %v4964_v21 = vld [vmem:[%s10345_s2 + $0x98] sm:$0xff] }
 0x9f1   : > { %7276 = vmatprep.subr.bf16.mxu0 %v7275_v2  ;;  %7340 = vmatprep.subr.bf16.mxu1 %v7339_v47  ;;  %v4963_v2 = vld [vmem:[%s10345_s2 + $0x90] sm:$0xff]  ;;  %v4968_v47 = vld [vmem:[%s10345_s2 + $0xb8] sm:$0xff] }
 0x9f4   : > { %7278 = vmatpush1.bf16.msra.mxu0 %v7277_v9  ;;  %7342 = vmatpush1.bf16.msra.mxu1 %v7341_v37  ;;  %v4969_v9 = vld [vmem:[%s10345_s2 + $0xc0] sm:$0xff]  ;;  %v4971_v37 = vld [vmem:[%s10345_s2 + $0xd0] sm:$0xff] }
 0x9f5   : > { %7280 = vmatprep.subr.bf16.mxu0 %v7279_v17  ;;  %7344 = vmatprep.subr.bf16.mxu1 %v7343_v36  ;;  %v4976_v17 = vld [vmem:[%s10345_s2 + $0xf8] sm:$0xff]  ;;  %v7373_v36 = vpack.c.bf16 %v4971_v37, %v4969_v9  ;;  %v5003_v9 = vld [vmem:[%s10345_s2 + $0x1d0] sm:$0xff] }
 0x9f6   : > { %v7375_v19 = vpack.c.bf16 %v4976_v17, %v4974_v16  ;;  %v5006_v16 = vld [vmem:[%s10345_s2 + $0x1e8] sm:$0xff]  ;;  %v5008_v17 = vld [vmem:[%s10345_s2 + $0x1f8] sm:$0xff] }
 0x9f8   : > { %7282 = vmatpush1.bf16.msra.mxu0 %v7281_v34  ;;  %7346 = vmatpush1.bf16.msra.mxu1 %v7345_v35  ;;  %v7377_v34 = vpack.c.bf16 %v4975_v59, %v4973_v22  ;;  %v7379_v35 = vpack.c.bf16 %v4980_v31, %v4978_v52  ;;  %v5007_v22 = vld [vmem:[%s10345_s2 + $0x1f0] sm:$0xff]  ;;  %v5010_v52 = vld [vmem:[%s10345_s2 + $0x208] sm:$0xff]  ;;  %v5012_v31 = vld [vmem:[%s10345_s2 + $0x218] sm:$0xff] }
 0x9f9   : > { %7348 = vmatprep.subr.bf16.mxu0 %v7347_v38  ;;  %v4977_v38 = vld [vmem:[%s10345_s2 + $0x100] sm:$0xff] }
 0x9fa   : > { %v7381_v62 = vpack.c.bf16 %v4979_v40, %v4977_v38 }
 0x9fb   : > { %4640 = vmatmul.mubr.f32.vlgmr.msra.gmra.mrb[16].mxu0 %v9447_v63  ;;  %4729 = vmatmul.mubr.f32.vlgmr.msra.gmra.mrb[48].mxu1 %v9447_v63  ;;  %v4958_v63 = vld [vmem:[%s10345_s2 + $0x68] sm:$0xff] }
 0x9fc   : > { %4645 = vmatprep.mubr.f32.mxu0 %v9466_v18  ;;  %4734 = vmatprep.mubr.f32.mxu1 %v9466_v18  ;;  %v7357_v18 = vpack.c.bf16 %v4955_v51, %v4953_v58  ;;  %v7359_v28 = vpack.c.bf16 %v4960_v13, %v4958_v63  ;;  %v4987_v58 = vld [vmem:[%s10345_s2 + $0x150] sm:$0xff]  ;;  %v4990_v63 = vld [vmem:[%s10345_s2 + $0x168] sm:$0xff]  ;;  %v4992_v13 = vld [vmem:[%s10345_s2 + $0x178] sm:$0xff] }
 0x9fd   : > { %7350 = vmatpush1.bf16.msra.mxu0 %v7349_v61  ;;  %v7383_v61 = vpack.c.bf16 %v4984_v15, %v4982_v42 }
 0x9fe   : > { %7352 = vmatprep.subr.bf16.mxu0 %v7351_v60  ;;  %v4981_v60 = vld [vmem:[%s10345_s2 + $0x120] sm:$0xff] }
 0x9ff   : > { %4646 = vmatmul.mubr.f32.gmra.mrb[18].mxu0 %v9469_v14  ;;  %4735 = vmatmul.mubr.f32.gmra.mrb[50].mxu1 %v9469_v14  ;;  %v4962_v14 = vld [vmem:[%s10345_s2 + $0x88] sm:$0xff]  ;;  %v7385_v45 = vpack.c.bf16 %v4983_v50, %v4981_v60 }
 0xa00   : > { %4651 = vmatprep.mubr.f32.mxu0 %v9487_v44  ;;  %4740 = vmatprep.mubr.f32.mxu1 %v9487_v44  ;;  %v7361_v44 = vpack.c.bf16 %v4959_v20, %v4957_v32  ;;  %v7363_v39 = vpack.c.bf16 %v4964_v21, %v4962_v14  ;;  %v4991_v32 = vld [vmem:[%s10345_s2 + $0x170] sm:$0xff]  ;;  %v4994_v14 = vld [vmem:[%s10345_s2 + $0x188] sm:$0xff]  ;;  %v4996_v21 = vld [vmem:[%s10345_s2 + $0x198] sm:$0xff] }
 0xa01   : > { %7354 = vmatpush1.bf16.msra.mxu0 %v7353_v54  ;;  %v7387_v54 = vpack.c.bf16 %v4988_v1, %v4986_v53 }
 0xa02   : > { %7356 = vmatprep.subr.bf16.mxu0 %v7355_v41  ;;  %v4985_v41 = vld [vmem:[%s10345_s2 + $0x140] sm:$0xff] }
 0xa03   : > { %4652 = vmatmul.mubr.f32.gmra.mrb[20].mxu0 %v9494_v24  ;;  %4741 = vmatmul.mubr.f32.gmra.mrb[52].mxu1 %v9494_v24  ;;  %v4966_v24 = vld [vmem:[%s10345_s2 + $0xa8] sm:$0xff]  ;;  %v7389_v51 = vpack.c.bf16 %v4987_v58, %v4985_v41 }
 0xa04   : > { %4657 = vmatprep.mubr.f32.mxu0 %v9509_v27  ;;  %4746 = vmatprep.mubr.f32.mxu1 %v9509_v27  ;;  %v7365_v27 = vpack.c.bf16 %v4963_v2, %v4961_v33  ;;  %v7367_v4 = vpack.c.bf16 %v4968_v47, %v4966_v24  ;;  %v4995_v33 = vld [vmem:[%s10345_s2 + $0x190] sm:$0xff]  ;;  %v4998_v24 = vld [vmem:[%s10345_s2 + $0x1a8] sm:$0xff]  ;;  %v5000_v47 = vld [vmem:[%s10345_s2 + $0x1b8] sm:$0xff] }
 0xa05   : > { %7358 = vmatpush1.bf16.msra.mxu0 %v7357_v18  ;;  %v7391_v18 = vpack.c.bf16 %v4992_v13, %v4990_v63 }
 0xa06   : > { %7360 = vmatprep.subr.bf16.mxu0 %v7359_v28  ;;  %v4989_v28 = vld [vmem:[%s10345_s2 + $0x160] sm:$0xff] }
 0xa07   : > { %4658 = vmatmul.mubr.f32.gmra.mrb[22].mxu0 %v9512_v23  ;;  %4747 = vmatmul.mubr.f32.gmra.mrb[54].mxu1 %v9512_v23  ;;  %v7371_v23 = vpack.c.bf16 %v4972_v6, %v4970_v56  ;;  %v7393_v20 = vpack.c.bf16 %v4991_v32, %v4989_v28  ;;  %v5002_v56 = vld [vmem:[%s10345_s2 + $0x1c8] sm:$0xff]  ;;  %v5004_v6 = vld [vmem:[%s10345_s2 + $0x1d8] sm:$0xff] }
 0xa09   : > { %7362 = vmatpush1.bf16.msra.mxu0 %v7361_v44  ;;  %v7395_v44 = vpack.c.bf16 %v4996_v21, %v4994_v14 }
 0xa0a   : > { %7364 = vmatprep.subr.bf16.mxu0 %v7363_v39  ;;  %v4993_v39 = vld [vmem:[%s10345_s2 + $0x180] sm:$0xff] }
 0xa0b   : > { %v7397_v2 = vpack.c.bf16 %v4995_v33, %v4993_v39 }
 0xa0d   : > { %7366 = vmatpush1.bf16.msra.mxu0 %v7365_v27  ;;  %v7399_v27 = vpack.c.bf16 %v5000_v47, %v4998_v24 }
 0xa0e   : > { %7368 = vmatprep.subr.bf16.mxu0 %v7367_v4  ;;  %v4997_v4 = vld [vmem:[%s10345_s2 + $0x1a0] sm:$0xff] }
 0xa0f   : > { %v7401_v3 = vpack.c.bf16 %v4999_v5, %v4997_v4 }
 0xa11   : > { %7370 = vmatpush1.bf16.msra.mxu0 %v7369_v8  ;;  %v7403_v8 = vpack.c.bf16 %v5004_v6, %v5002_v56 }
 0xa12   : > { %7372 = vmatprep.subr.bf16.mxu0 %v7371_v23  ;;  %v5001_v23 = vld [vmem:[%s10345_s2 + $0x1c0] sm:$0xff] }
 0xa13   : > { %v7405_v37 = vpack.c.bf16 %v5003_v9, %v5001_v23 }
 0xa15   : > { %7374 = vmatpush1.bf16.msra.mxu0 %v7373_v36  ;;  %v7407_v36 = vpack.c.bf16 %v5008_v17, %v5006_v16 }
 0xa16   : > { %7376 = vmatprep.subr.bf16.mxu0 %v7375_v19  ;;  %v5005_v19 = vld [vmem:[%s10345_s2 + $0x1e0] sm:$0xff] }
 0xa17   : > { %v7409_v59 = vpack.c.bf16 %v5007_v22, %v5005_v19 }
 0xa19   : > { %7378 = vmatpush1.bf16.msra.mxu0 %v7377_v34  ;;  %v7411_v34 = vpack.c.bf16 %v5012_v31, %v5010_v52 }
 0xa1a   : > { %7380 = vmatprep.subr.bf16.mxu0 %v7379_v35  ;;  %v9693_v35 = vld [vmem:[%s10346_s4] sm:$0xff] }
 0xa1b   : > { %v4360_v38 = vrot.slane %v9693_v35, %v8872_v26  ;;  %v4364_v40 = vrot.slane %v9693_v35, %v8869_v25 }
 0xa1d   : > { %7382 = vmatpush1.bf16.msra.mxu0 %v7381_v62 }
 0xa1e   : > { %7384 = vmatprep.subr.bf16.mxu0 %v7383_v61 }
 0xa21   : > { %7386 = vmatpush1.bf16.msra.mxu0 %v7385_v45 }
 0xa22   : > { %7388 = vmatprep.subr.bf16.mxu0 %v7387_v54 }
 0xa25   : > { %7390 = vmatpush1.bf16.msra.mxu0 %v7389_v51 }
 0xa26   : > { %7392 = vmatprep.subr.bf16.mxu0 %v7391_v18 }
 0xa29   : > { %7394 = vmatpush1.bf16.msra.mxu0 %v7393_v20 }
 0xa2a   : > { %7396 = vmatprep.subr.bf16.mxu0 %v7395_v44 }
 0xa2d   : > { %7398 = vmatpush1.bf16.msra.mxu0 %v7397_v2 }
 0xa2e   : > { %7400 = vmatprep.subr.bf16.mxu0 %v7399_v27  ;;  %v9729_v27 = vrot.slane %v9693_v35, %v2969_v11 }
 0xa31   : > { %7402 = vmatpush1.bf16.msra.mxu0 %v7401_v3 }
 0xa32   : > { %7404 = vmatprep.subr.bf16.mxu0 %v7403_v8 }
 0xa35   : > { %7406 = vmatpush1.bf16.msra.mxu0 %v7405_v37 }
 0xa36   : > { %7408 = vmatprep.subr.bf16.mxu0 %v7407_v36 }
 0xa39   : > { %7410 = vmatpush1.bf16.msra.mxu0 %v7409_v59 }
 0xa3a   : > { %7412 = vmatprep.subr.bf16.mxu0 %v7411_v34 }
 0xa8e   : > { %v4463_v42 = vpop.f32.mrb[8].mxu0  ;;  %v9699_v15 = vpop.f32.mrb[40].mxu1 }
 0xa8f   : > { %v9701_v62 = vadd.f32 %v4463_v42, %v4360_v38  ;;  %v4465_v61 = vpop.f32.mrb[9].mxu0  ;;  %v4554_v60 = vpop.f32.mrb[41].mxu1 }
 0xa90   : > { %v9703_v50 = vadd.f32 %v4465_v61, %v4364_v40  ;;  %v9737_v9 = vadd.f32 %v4554_v60, %v9729_v27 }
 0xa91   : > { %v4753_v53 = vmul.f32 -1.702, %v9701_v62 }
 0xa92   : > { %v4754_v1 = vmul.f32 -1.702, %v9703_v50  ;;  %v4469_v45 = vpop.f32.mrb[10].mxu0  ;;  %v9707_v54 = vpop.f32.mrb[42].mxu1  ;;  %v4756_v36 = vmul.f32 -1.702, %v9737_v9 }
 0xa93   : > { %v4785_v41 = vmul.f32 1.442695, %v4753_v53  ;;  %v9709_v58 = vadd.f32 %v4469_v45, %v4360_v38  ;;  %v4471_v51 = vpop.f32.mrb[11].mxu0  ;;  %v9711_v63 = vpop.f32.mrb[43].mxu1 }
 0xa94   : > { %v4787_v13 = vmul.f32 1.442695, %v4754_v1  ;;  %v9713_v18 = vadd.f32 %v4471_v51, %v4364_v40  ;;  %v4791_v34 = vmul.f32 1.442695, %v4756_v36  ;;  %v5009_v51 = vld [vmem:[%s10345_s2 + $0x200] sm:$0xff] }
 0xa95   : > { %7776 = vpow2.f32 %v4785_v41  ;;  %v4761_v28 = vmul.f32 -1.702, %v9709_v58 }
 0xa96   : > { %v4762_v32 = vmul.f32 -1.702, %v9713_v18  ;;  %v4475_v20 = vpop.f32.mrb[12].mxu0  ;;  %v9717_v14 = vpop.f32.mrb[44].mxu1  ;;  %7778 = vpow2.f32 %v4787_v13  ;;  %v5011_v13 = vld [vmem:[%s10345_s2 + $0x210] sm:$0xff] }
 0xa97   : > { %v4801_v21 = vmul.f32 1.442695, %v4761_v28  ;;  %v9719_v44 = vadd.f32 %v4475_v20, %v4360_v38  ;;  %v4477_v39 = vpop.f32.mrb[13].mxu0  ;;  %v9721_v33 = vpop.f32.mrb[45].mxu1  ;;  %v5016_v20 = vld [vmem:[%s10345_s2 + $0x238] sm:$0xff] }
 0xa98   : > { %v4803_v2 = vmul.f32 1.442695, %v4762_v32  ;;  %v9724_v47 = vadd.f32 %v4477_v39, %v4364_v40  ;;  %v5014_v32 = vld [vmem:[%s10345_s2 + $0x228] sm:$0xff] }
 0xa99   : > { %7780 = vpow2.f32 %v4801_v21  ;;  %v4769_v24 = vmul.f32 -1.702, %v9719_v44 }
 0xa9a   : > { %v4481_v4 = vpop.f32.mrb[14].mxu0  ;;  %v9731_v5 = vpop.f32.mrb[46].mxu1  ;;  %7782 = vpow2.f32 %v4803_v2  ;;  %v4770_v56 = vmul.f32 -1.702, %v9724_v47  ;;  %v7413_v2 = vpack.c.bf16 %v5011_v13, %v5009_v51  ;;  %v5026_v51 = vld [vmem:[%s10345_s2 + $0x288] sm:$0xff]  ;;  %v5028_v13 = vld [vmem:[%s10345_s2 + $0x298] sm:$0xff] }
 0xa9b   : > { %v4817_v3 = vmul.f32 1.442695, %v4769_v24  ;;  %v4483_v6 = vpop.f32.mrb[15].mxu0  ;;  %v9734_v8 = vpop.f32.mrb[47].mxu1  ;;  %v9740_v19 = vadd.f32 %v4481_v4, %v4360_v38  ;;  %v7415_v4 = vpack.c.bf16 %v5016_v20, %v5014_v32  ;;  %v7427_v32 = vpack.c.bf16 %v5028_v13, %v5026_v51  ;;  %v5025_v20 = vld [vmem:[%s10345_s2 + $0x280] sm:$0xff]  ;;  %v5043_v51 = vld [vmem:[%s10345_s2 + $0x310] sm:$0xff] }
 0xa9c   : > { %v4819_v23 = vmul.f32 1.442695, %v4770_v56  ;;  %v9742_v52 = vadd.f32 %v4483_v6, %v4364_v40  ;;  %v5015_v56 = vld [vmem:[%s10345_s2 + $0x230] sm:$0xff]  ;;  %v5046_v13 = vld [vmem:[%s10345_s2 + $0x328] sm:$0xff] }
 0xa9d   : > { %7784 = vpow2.f32 %v4817_v3  ;;  %v4777_v61 = vmul.f32 -1.702, %v9740_v19  ;;  %v5013_v3 = vld [vmem:[%s10345_s2 + $0x220] sm:$0xff] }
 0xa9e   : > { %7786 = vpow2.f32 %v4819_v23  ;;  %v4778_v53 = vmul.f32 -1.702, %v9742_v52  ;;  %v5018_v23 = vld [vmem:[%s10345_s2 + $0x248] sm:$0xff] }
 0xa9f   : > { %v7777_v37 = vpop.eup %7776  ;;  %v4833_v40 = vmul.f32 1.442695, %v4777_v61 }
 0xaa0   : > { %v4849_v16 = vadd.f32 1.0, %v7777_v37  ;;  %v7779_v11 = vpop.eup %7778  ;;  %v4835_v41 = vmul.f32 1.442695, %v4778_v53  ;;  %v5020_v37 = vld [vmem:[%s10345_s2 + $0x258] sm:$0xff] }
 0xaa1   : > { %v4850_v17 = vadd.f32 1.0, %v7779_v11  ;;  %v7419_v36 = vpack.c.bf16 %v5020_v37, %v5018_v23  ;;  %v5036_v23 = vld [vmem:[%s10345_s2 + $0x2d8] sm:$0xff]  ;;  %v9779_v37 = vrot.slane %v9693_v35, %v2965_v10  ;;  %v9791_v10 = vadd.f32 %v9711_v63, %v9729_v27 }
 0xaa2   : > { %7788 = vrcp.f32 %v4849_v16 }
 0xaa3   : > { %v7781_v22 = vpop.eup %7780  ;;  %7790 = vrcp.f32 %v4850_v17 }
 0xaa4   : > { %v4857_v59 = vadd.f32 1.0, %v7781_v22  ;;  %v7783_v31 = vpop.eup %7782  ;;  %v5017_v22 = vld [vmem:[%s10345_s2 + $0x240] sm:$0xff] }
 0xaa5   : > { %v4858_v42 = vadd.f32 1.0, %v7783_v31 }
 0xaa6   : > { %7792 = vrcp.f32 %v4857_v59  ;;  %v5019_v59 = vld [vmem:[%s10345_s2 + $0x250] sm:$0xff] }
 0xaa7   : > { %v7785_v60 = vpop.eup %7784  ;;  %7794 = vrcp.f32 %v4858_v42  ;;  %v5024_v42 = vld [vmem:[%s10345_s2 + $0x278] sm:$0xff] }
 0xaa8   : > { %v4865_v38 = vadd.f32 1.0, %v7785_v60  ;;  %v7787_v1 = vpop.eup %7786  ;;  %7796 = vpow2.f32 %v4791_v34  ;;  %v5022_v34 = vld [vmem:[%s10345_s2 + $0x268] sm:$0xff] }
 0xaa9   : > { %v4866_v45 = vadd.f32 1.0, %v7787_v1  ;;  %v7423_v1 = vpack.c.bf16 %v5024_v42, %v5022_v34  ;;  %v9787_v34 = vadd.f32 %v9699_v15, %v9779_v37  ;;  %v5042_v15 = vld [vmem:[%s10345_s2 + $0x308] sm:$0xff] }
 0xaaa   : > { %7798 = vrcp.f32 %v4865_v38  ;;  %v7421_v38 = vpack.c.bf16 %v5019_v59, %v5017_v22  ;;  %v5038_v22 = vld [vmem:[%s10345_s2 + $0x2e8] sm:$0xff]  ;;  %v5040_v59 = vld [vmem:[%s10345_s2 + $0x2f8] sm:$0xff] }
 0xaab   : > { %7800 = vrcp.f32 %v4866_v45  ;;  %v5021_v45 = vld [vmem:[%s10345_s2 + $0x260] sm:$0xff]  ;;  %v4755_v63 = vmul.f32 -1.702, %v9787_v34 }
 0xaac   : > { %v7789_v28 = vpop.eup %7788  ;;  %7802 = vpow2.f32 %v4833_v40  ;;  %v5023_v40 = vld [vmem:[%s10345_s2 + $0x270] sm:$0xff] }
 0xaad   : > { %v7791_v21 = vpop.eup %7790  ;;  %v4913_v24 = vmul.f32 %v7789_v28, %v9701_v62  ;;  %7804 = vpow2.f32 %v4835_v41 }
 0xaae   : > { %v4914_v39 = vmul.f32 %v7791_v21, %v9703_v50  ;;  %v7417_v50 = vpack.c.bf16 %v5015_v56, %v5013_v3  ;;  %v5027_v21 = vld [vmem:[%s10345_s2 + $0x290] sm:$0xff]  ;;  %v5029_v3 = vld [vmem:[%s10345_s2 + $0x2a0] sm:$0xff] }
 0xaaf   : > { %v5031_v56 = vld [vmem:[%s10345_s2 + $0x2b0] sm:$0xff] }
 0xab0   : > { %v7793_v6 = vpop.eup %7792  ;;  %5277 = vmatprep.mubr.f32.mxu0 %v4914_v39  ;;  %v5030_v39 = vld [vmem:[%s10345_s2 + $0x2a8] sm:$0xff] }
 0xab1   : > { %v7795_v16 = vpop.eup %7794  ;;  %5278 = vmatmul.mubr.f32.vlgmr.msra.gmra.mrb[24].mxu0 %v4913_v24  ;;  %v4921_v62 = vmul.f32 %v7793_v6, %v9709_v58  ;;  %v7429_v24 = vpack.c.bf16 %v5027_v21, %v5025_v20  ;;  %v5034_v6 = vld [vmem:[%s10345_s2 + $0x2c8] sm:$0xff]  ;;  %v4789_v20 = vmul.f32 1.442695, %v4755_v63  ;;  %v9823_v21 = vadd.f32 %v9717_v14, %v9779_v37 }
 0xab2   : > { %v4922_v11 = vmul.f32 %v7795_v16, %v9713_v18  ;;  %7414 = vmatpush1.bf16.msra.mxu0 %v7413_v2  ;;  %v7797_v17 = vpop.eup %7796  ;;  %v5032_v2 = vld [vmem:[%s10345_s2 + $0x2b8] sm:$0xff]  ;;  %v7433_v16 = vpack.c.bf16 %v5031_v56, %v5029_v3  ;;  %v9835_v56 = vadd.f32 %v9734_v8, %v9729_v27 }
 0xab3   : > { %7416 = vmatprep.subr.bf16.mxu0 %v7415_v4  ;;  %v4852_v18 = vadd.f32 1.0, %v7797_v17  ;;  %v7431_v4 = vpack.c.bf16 %v5032_v2, %v5030_v39  ;;  %v5033_v17 = vld [vmem:[%s10345_s2 + $0x2c0] sm:$0xff]  ;;  %v9828_v39 = vrot.slane %v9693_v35, %v2977_v48 }
 0xab4   : > { %v7799_v31 = vpop.eup %7798  ;;  %5283 = vmatprep.mubr.f32.mxu0 %v4922_v11  ;;  %v7435_v11 = vpack.c.bf16 %v5036_v23, %v5034_v6 }
 0xab5   : > { %v7801_v61 = vpop.eup %7800  ;;  %5284 = vmatmul.mubr.f32.gmra.mrb[26].mxu0 %v4921_v62  ;;  %v4929_v53 = vmul.f32 %v7799_v31, %v9719_v44  ;;  %7806 = vrcp.f32 %v4852_v18  ;;  %v7425_v44 = vpack.c.bf16 %v5023_v40, %v5021_v45  ;;  %v5035_v62 = vld [vmem:[%s10345_s2 + $0x2d0] sm:$0xff]  ;;  %v9808_v45 = vadd.f32 %v9721_v33, %v9729_v27 }
 0xab6   : > { %v4930_v60 = vmul.f32 %v7801_v61, %v9724_v47  ;;  %7418 = vmatpush1.bf16.msra.mxu0 %v7417_v50  ;;  %v7803_v58 = vpop.eup %7802  ;;  %v7437_v61 = vpack.c.bf16 %v5035_v62, %v5033_v17  ;;  %v4771_v62 = vmul.f32 -1.702, %v9823_v21  ;;  %v9846_v27 = vadd.f32 %v9731_v5, %v9779_v37 }
 0xab7   : > { %7420 = vmatprep.subr.bf16.mxu0 %v7419_v36  ;;  %v4873_v41 = vadd.f32 1.0, %v7803_v58  ;;  %v7805_v28 = vpop.eup %7804  ;;  %v5039_v58 = vld [vmem:[%s10345_s2 + $0x2f0] sm:$0xff]  ;;  %v4772_v3 = vmul.f32 -1.702, %v9808_v45 }
 0xab8   : > { %5289 = vmatprep.mubr.f32.mxu0 %v4930_v60  ;;  %v4874_v47 = vadd.f32 1.0, %v7805_v28  ;;  %v7439_v60 = vpack.c.bf16 %v5040_v59, %v5038_v22  ;;  %v4780_v59 = vmul.f32 -1.702, %v9835_v56 }
 0xab9   : > { %5290 = vmatmul.mubr.f32.gmra.mrb[28].mxu0 %v4929_v53  ;;  %7808 = vrcp.f32 %v4873_v41  ;;  %v5041_v41 = vld [vmem:[%s10345_s2 + $0x300] sm:$0xff]  ;;  %v4823_v22 = vmul.f32 1.442695, %v4772_v3 }
 0xaba   : > { %7422 = vmatpush1.bf16.msra.mxu0 %v7421_v38  ;;  %7810 = vrcp.f32 %v4874_v47  ;;  %v5037_v38 = vld [vmem:[%s10345_s2 + $0x2e0] sm:$0xff]  ;;  %v5048_v47 = vld [vmem:[%s10345_s2 + $0x338] sm:$0xff]  ;;  %v7445_v6 = vpack.c.bf16 %v5043_v51, %v5041_v41  ;;  %v4839_v63 = vmul.f32 1.442695, %v4780_v59  ;;  %v5055_v51 = vld [vmem:[%s10345_s2 + $0x370] sm:$0xff] }
 0xabb   : > { %7424 = vmatprep.subr.bf16.mxu0 %v7423_v1  ;;  %v5044_v1 = vld [vmem:[%s10345_s2 + $0x318] sm:$0xff]  ;;  %v7447_v14 = vpack.c.bf16 %v5048_v47, %v5046_v13  ;;  %7812 = vpow2.f32 %v4789_v20  ;;  %v5053_v41 = vld [vmem:[%s10345_s2 + $0x360] sm:$0xff] }
 0xabc   : > { %v7443_v40 = vpack.c.bf16 %v5044_v1, %v5042_v15  ;;  %v7457_v3 = vpack.c.bf16 %v5055_v51, %v5053_v41 }
 0xabe   : > { %7426 = vmatpush1.bf16.msra.mxu0 %v7425_v44  ;;  %v5045_v44 = vld [vmem:[%s10345_s2 + $0x320] sm:$0xff] }
 0xabf   : > { %7428 = vmatprep.subr.bf16.mxu0 %v7427_v32  ;;  %v7807_v50 = vpop.eup %7806  ;;  %v5047_v32 = vld [vmem:[%s10345_s2 + $0x330] sm:$0xff] }
 0xac0   : > { %v4916_v53 = vmul.f32 %v7807_v50, %v9737_v9  ;;  %v7441_v9 = vpack.c.bf16 %v5039_v58, %v5037_v38  ;;  %v7449_v48 = vpack.c.bf16 %v5047_v32, %v5045_v44  ;;  %v5052_v50 = vld [vmem:[%s10345_s2 + $0x358] sm:$0xff]  ;;  %v4821_v58 = vmul.f32 1.442695, %v4771_v62  ;;  %v5058_v44 = vld [vmem:[%s10345_s2 + $0x388] sm:$0xff] }
 0xac1   : > { %v5056_v38 = vld [vmem:[%s10345_s2 + $0x378] sm:$0xff] }
 0xac2   : > { %7430 = vmatpush1.bf16.msra.mxu0 %v7429_v24  ;;  %v5060_v32 = vld [vmem:[%s10345_s2 + $0x398] sm:$0xff] }
 0xac3   : > { %7432 = vmatprep.subr.bf16.mxu0 %v7431_v4  ;;  %v7809_v36 = vpop.eup %7808  ;;  %v5064_v62 = vld [vmem:[%s10345_s2 + $0x3b8] sm:$0xff] }
 0xac4   : > { %v7811_v31 = vpop.eup %7810  ;;  %v4937_v18 = vmul.f32 %v7809_v36, %v9740_v19  ;;  %v4764_v19 = vmul.f32 -1.702, %v9791_v10 }
 0xac5   : > { %v4938_v42 = vmul.f32 %v7811_v31, %v9742_v52  ;;  %v9803_v52 = vadd.f32 %v9707_v54, %v9779_v37  ;;  %v5054_v37 = vld [vmem:[%s10345_s2 + $0x368] sm:$0xff] }
 0xac6   : > { %7434 = vmatpush1.bf16.msra.mxu0 %v7433_v16  ;;  %v4807_v4 = vmul.f32 1.442695, %v4764_v19 }
 0xac7   : > { %7436 = vmatprep.subr.bf16.mxu0 %v7435_v11  ;;  %5295 = vmatprep.mubr.f32.mxu0 %v4938_v42  ;;  %v4763_v33 = vmul.f32 -1.702, %v9803_v52  ;;  %v5050_v11 = vld [vmem:[%s10345_s2 + $0x348] sm:$0xff] }
 0xac8   : > { %5296 = vmatmul.mubr.f32.gmra.mrb[30].mxu0 %v4937_v18  ;;  %7814 = vpow2.f32 %v4807_v4  ;;  %v7451_v42 = vpack.c.bf16 %v5052_v50, %v5050_v11  ;;  %v5051_v18 = vld [vmem:[%s10345_s2 + $0x350] sm:$0xff] }
 0xac9   : > { %5366 = vmatprep.mubr.f32.mxu0 %v4916_v53  ;;  %v4805_v17 = vmul.f32 1.442695, %v4763_v33  ;;  %v4779_v53 = vmul.f32 -1.702, %v9846_v27  ;;  %v5059_v11 = vld [vmem:[%s10345_s2 + $0x390] sm:$0xff] }
 0xaca   : > { %7438 = vmatpush1.bf16.msra.mxu0 %v7437_v61  ;;  %v5049_v61 = vld [vmem:[%s10345_s2 + $0x340] sm:$0xff] }
 0xacb   : > { %7440 = vmatprep.subr.bf16.mxu0 %v7439_v60  ;;  %7816 = vpow2.f32 %v4805_v17  ;;  %v4837_v20 = vmul.f32 1.442695, %v4779_v53  ;;  %v5062_v17 = vld [vmem:[%s10345_s2 + $0x3a8] sm:$0xff] }
 0xacc   : > { %7818 = vpow2.f32 %v4823_v22  ;;  %v5066_v53 = vld [vmem:[%s10345_s2 + $0x3c8] sm:$0xff] }
 0xacd   : > { %7820 = vpow2.f32 %v4821_v58 }
 0xace   : > { %v9813_v28 = vpop.f32.mrb[16].mxu0  ;;  %v9815_v54 = vpop.f32.mrb[48].mxu1  ;;  %7442 = vmatpush1.bf16.msra.mxu0 %v7441_v9  ;;  %v7453_v9 = vpack.c.bf16 %v5051_v18, %v5049_v61  ;;  %7822 = vpow2.f32 %v4839_v63  ;;  %v7463_v18 = vpack.c.bf16 %v5064_v62, %v5062_v17  ;;  %v5068_v63 = vld [vmem:[%s10345_s2 + $0x3d8] sm:$0xff]  ;;  %v5069_v17 = vld [vmem:[%s10345_s2 + $0x3e0] sm:$0xff]  ;;  %v5071_v62 = vld [vmem:[%s10345_s2 + $0x3f0] sm:$0xff] }
 0xacf   : > { %v4643_v2 = vpop.f32.mrb[17].mxu0  ;;  %v9830_v24 = vpop.f32.mrb[49].mxu1  ;;  %7444 = vmatprep.subr.bf16.mxu0 %v7443_v40  ;;  %v7455_v40 = vpack.c.bf16 %v5056_v38, %v5054_v37  ;;  %7824 = vpow2.f32 %v4837_v20  ;;  %v5061_v37 = vld [vmem:[%s10345_s2 + $0x3a0] sm:$0xff]  ;;  %v5063_v38 = vld [vmem:[%s10345_s2 + $0x3b0] sm:$0xff]  ;;  %v7467_v51 = vpack.c.bf16 %v5068_v63, %v5066_v53 }
 0xad0   : > { %v9854_v31 = vadd.f32 %v4643_v2, %v9828_v39  ;;  %v5075_v53 = vld [vmem:[%s10345_s2 + $0x410] sm:$0xff] }
 0xad2   : > { %v9837_v23 = vpop.f32.mrb[18].mxu0  ;;  %v9839_v16 = vpop.f32.mrb[50].mxu1  ;;  %7446 = vmatpush1.bf16.msra.mxu0 %v7445_v6  ;;  %v4758_v19 = vmul.f32 -1.702, %v9854_v31 }
 0xad3   : > { %v9848_v8 = vpop.f32.mrb[19].mxu0  ;;  %v9850_v36 = vpop.f32.mrb[51].mxu1  ;;  %7448 = vmatprep.subr.bf16.mxu0 %v7447_v14  ;;  %v7459_v14 = vpack.c.bf16 %v5060_v32, %v5058_v44  ;;  %v5065_v44 = vld [vmem:[%s10345_s2 + $0x3c0] sm:$0xff]  ;;  %v5067_v32 = vld [vmem:[%s10345_s2 + $0x3d0] sm:$0xff] }
 0xad4   : > { %v4795_v33 = vmul.f32 1.442695, %v4758_v19  ;;  %v7813_v6 = vpop.eup %7812 }
 0xad5   : > { %v7815_v50 = vpop.eup %7814  ;;  %v4851_v22 = vadd.f32 1.0, %v7813_v6 }
 0xad6   : > { %v9858_v60 = vpop.f32.mrb[20].mxu0  ;;  %v9860_v5 = vpop.f32.mrb[52].mxu1  ;;  %7450 = vmatpush1.bf16.msra.mxu0 %v7449_v48  ;;  %v5057_v48 = vld [vmem:[%s10345_s2 + $0x380] sm:$0xff]  ;;  %7826 = vpow2.f32 %v4795_v33  ;;  %v4860_v61 = vadd.f32 1.0, %v7815_v50  ;;  %v5070_v33 = vld [vmem:[%s10345_s2 + $0x3e8] sm:$0xff] }
 0xad7   : > { %v9865_v15 = vpop.f32.mrb[21].mxu0  ;;  %v9867_v1 = vpop.f32.mrb[53].mxu1  ;;  %7452 = vmatprep.subr.bf16.mxu0 %v7451_v42  ;;  %v7461_v59 = vpack.c.bf16 %v5059_v11, %v5057_v48  ;;  %7828 = vrcp.f32 %v4851_v22 }
 0xad8   : > { %v7817_v42 = vpop.eup %7816  ;;  %7830 = vrcp.f32 %v4860_v61 }
 0xad9   : > { %v7819_v58 = vpop.eup %7818  ;;  %v4859_v19 = vadd.f32 1.0, %v7817_v42  ;;  %v5076_v42 = vld [vmem:[%s10345_s2 + $0x418] sm:$0xff] }
 0xada   : > { %v9872_v13 = vpop.f32.mrb[22].mxu0  ;;  %v9874_v47 = vpop.f32.mrb[54].mxu1  ;;  %7454 = vmatpush1.bf16.msra.mxu0 %v7453_v9  ;;  %v7465_v9 = vpack.c.bf16 %v5063_v38, %v5061_v37  ;;  %v4868_v41 = vadd.f32 1.0, %v7819_v58  ;;  %v5073_v58 = vld [vmem:[%s10345_s2 + $0x400] sm:$0xff] }
 0xadb   : > { %v9878_v2 = vpop.f32.mrb[23].mxu0  ;;  %v9880_v4 = vpop.f32.mrb[55].mxu1  ;;  %7456 = vmatprep.subr.bf16.mxu0 %v7455_v40  ;;  %7832 = vrcp.f32 %v4859_v19  ;;  %v5078_v19 = vld [vmem:[%s10345_s2 + $0x428] sm:$0xff] }
 0xadc   : > { %v7821_v40 = vpop.eup %7820  ;;  %7834 = vrcp.f32 %v4868_v41  ;;  %v7477_v41 = vpack.c.bf16 %v5075_v53, %v5073_v58  ;;  %v5087_v58 = vld [vmem:[%s10345_s2 + $0x470] sm:$0xff] }
 0xadd   : > { %v7823_v20 = vpop.eup %7822  ;;  %v4867_v6 = vadd.f32 1.0, %v7821_v40 }
 0xade   : > { %7458 = vmatpush1.bf16.msra.mxu0 %v7457_v3  ;;  %v5072_v3 = vld [vmem:[%s10345_s2 + $0x3f8] sm:$0xff]  ;;  %v7825_v48 = vpop.eup %7824  ;;  %v4876_v11 = vadd.f32 1.0, %v7823_v20  ;;  %v5079_v20 = vld [vmem:[%s10345_s2 + $0x430] sm:$0xff] }
 0xadf   : > { %7460 = vmatprep.subr.bf16.mxu0 %v7459_v14  ;;  %v7469_v14 = vpack.c.bf16 %v5067_v32, %v5065_v44  ;;  %v7471_v50 = vpack.c.bf16 %v5072_v3, %v5070_v33  ;;  %7836 = vrcp.f32 %v4867_v6  ;;  %v4875_v61 = vadd.f32 1.0, %v7825_v48  ;;  %v5077_v32 = vld [vmem:[%s10345_s2 + $0x420] sm:$0xff]  ;;  %v5082_v6 = vld [vmem:[%s10345_s2 + $0x448] sm:$0xff] }
 0xae0   : > { %v7827_v22 = vpop.eup %7826  ;;  %7838 = vrcp.f32 %v4876_v11  ;;  %v7481_v11 = vpack.c.bf16 %v5079_v20, %v5077_v32  ;;  %v5096_v20 = vld [vmem:[%s10345_s2 + $0x4b8] sm:$0xff] }
 0xae1   : > { %v4854_v37 = vadd.f32 1.0, %v7827_v22  ;;  %v7829_v63 = vpop.eup %7828  ;;  %7840 = vrcp.f32 %v4875_v61 }
 0xae2   : > { %7462 = vmatpush1.bf16.msra.mxu0 %v7461_v59  ;;  %v5074_v59 = vld [vmem:[%s10345_s2 + $0x408] sm:$0xff]  ;;  %v7831_v40 = vpop.eup %7830 }
 0xae3   : > { %7464 = vmatprep.subr.bf16.mxu0 %v7463_v18  ;;  %v7473_v18 = vpack.c.bf16 %v5071_v62, %v5069_v17  ;;  %v7475_v38 = vpack.c.bf16 %v5076_v42, %v5074_v59  ;;  %7842 = vrcp.f32 %v4854_v37  ;;  %v4924_v3 = vmul.f32 %v7831_v40, %v9791_v10  ;;  %v5081_v17 = vld [vmem:[%s10345_s2 + $0x440] sm:$0xff]  ;;  %v5083_v62 = vld [vmem:[%s10345_s2 + $0x450] sm:$0xff]  ;;  %v5086_v59 = vld [vmem:[%s10345_s2 + $0x468] sm:$0xff] }
 0xae4   : > { %v5088_v42 = vld [vmem:[%s10345_s2 + $0x478] sm:$0xff] }
 0xae5   : > { %v7833_v33 = vpop.eup %7832  ;;  %v7487_v37 = vpack.c.bf16 %v5088_v42, %v5086_v59  ;;  %v9942_v59 = vadd.f32 %v9848_v8, %v9828_v39 }
 0xae6   : > { %7466 = vmatpush1.bf16.msra.mxu0 %v7465_v9  ;;  %v5080_v9 = vld [vmem:[%s10345_s2 + $0x438] sm:$0xff]  ;;  %v7835_v48 = vpop.eup %7834 }
 0xae7   : > { %7468 = vmatprep.subr.bf16.mxu0 %v7467_v51  ;;  %v4915_v51 = vmul.f32 %v7829_v63, %v9787_v34  ;;  %v7479_v44 = vpack.c.bf16 %v5080_v9, %v5078_v19  ;;  %v4923_v34 = vmul.f32 %v7833_v33, %v9803_v52  ;;  %v4932_v10 = vmul.f32 %v7835_v48, %v9808_v45  ;;  %v5090_v63 = vld [vmem:[%s10345_s2 + $0x488] sm:$0xff]  ;;  %v5092_v19 = vld [vmem:[%s10345_s2 + $0x498] sm:$0xff] }
 0xae8   : > { %v5100_v48 = vld [vmem:[%s10345_s2 + $0x4d8] sm:$0xff] }
 0xae9   : > { %v7837_v22 = vpop.eup %7836 }
 0xaea   : > { %7470 = vmatpush1.bf16.msra.mxu0 %v7469_v14  ;;  %v5084_v14 = vld [vmem:[%s10345_s2 + $0x458] sm:$0xff]  ;;  %v7839_v61 = vpop.eup %7838  ;;  %v4931_v52 = vmul.f32 %v7837_v22, %v9823_v21 }
 0xaeb   : > { %7472 = vmatprep.subr.bf16.mxu0 %v7471_v50  ;;  %v7483_v50 = vpack.c.bf16 %v5084_v14, %v5082_v6  ;;  %v7841_v53 = vpop.eup %7840  ;;  %v4940_v45 = vmul.f32 %v7839_v61, %v9835_v56  ;;  %v5094_v56 = vld [vmem:[%s10345_s2 + $0x4a8] sm:$0xff]  ;;  %v5095_v6 = vld [vmem:[%s10345_s2 + $0x4b0] sm:$0xff]  ;;  %v5104_v22 = vld [vmem:[%s10345_s2 + $0x4f8] sm:$0xff] }
 0xaec   : > { %v4939_v21 = vmul.f32 %v7841_v53, %v9846_v27  ;;  %v7495_v27 = vpack.c.bf16 %v5096_v20, %v5094_v56  ;;  %v5098_v14 = vld [vmem:[%s10345_s2 + $0x4c8] sm:$0xff]  ;;  %v5101_v61 = vld [vmem:[%s10345_s2 + $0x4e0] sm:$0xff]  ;;  %v9956_v53 = vadd.f32 %v9865_v15, %v9828_v39 }
 0xaed   : > { %v7843_v9 = vpop.eup %7842  ;;  %v5109_v15 = vld [vmem:[%s10345_s2 + $0x520] sm:$0xff] }
 0xaee   : > { %7474 = vmatpush1.bf16.msra.mxu0 %v7473_v18  ;;  %v7485_v18 = vpack.c.bf16 %v5083_v62, %v5081_v17  ;;  %v4918_v32 = vmul.f32 %v7843_v9, %v9854_v31  ;;  %v4376_v31 = vrot.slane %v9693_v35, %v2973_v46  ;;  %v5099_v17 = vld [vmem:[%s10345_s2 + $0x4d0] sm:$0xff]  ;;  %v5102_v62 = vld [vmem:[%s10345_s2 + $0x4e8] sm:$0xff]  ;;  %v4774_v20 = vmul.f32 -1.702, %v9956_v53 }
 0xaef   : > { %7476 = vmatprep.subr.bf16.mxu0 %v7475_v38  ;;  %v5085_v38 = vld [vmem:[%s10345_s2 + $0x460] sm:$0xff]  ;;  %v7503_v42 = vpack.c.bf16 %v5104_v22, %v5102_v62  ;;  %v5107_v9 = vld [vmem:[%s10345_s2 + $0x510] sm:$0xff]  ;;  %v5118_v22 = vld [vmem:[%s10345_s2 + $0x568] sm:$0xff] }
 0xaf0   : > { %v7489_v40 = vpack.c.bf16 %v5087_v58, %v5085_v38  ;;  %v9951_v8 = vadd.f32 %v9837_v23, %v4376_v31  ;;  %v4766_v58 = vmul.f32 -1.702, %v9942_v59  ;;  %v5115_v62 = vld [vmem:[%s10345_s2 + $0x550] sm:$0xff] }
 0xaf1   : > { %5367 = vmatmul.mubr.f32.vlgmr.msra.gmra.mrb[24].mxu0 %v4915_v51  ;;  %v5089_v51 = vld [vmem:[%s10345_s2 + $0x480] sm:$0xff] }
 0xaf2   : > { %5372 = vmatprep.mubr.f32.mxu0 %v4924_v3  ;;  %7478 = vmatpush1.bf16.msra.mxu0 %v7477_v41  ;;  %v7491_v41 = vpack.c.bf16 %v5092_v19, %v5090_v63  ;;  %v5093_v3 = vld [vmem:[%s10345_s2 + $0x4a0] sm:$0xff]  ;;  %v4811_v56 = vmul.f32 1.442695, %v4766_v58 }
 0xaf3   : > { %7480 = vmatprep.subr.bf16.mxu0 %v7479_v44  ;;  %v5091_v44 = vld [vmem:[%s10345_s2 + $0x490] sm:$0xff]  ;;  %v5105_v19 = vld [vmem:[%s10345_s2 + $0x500] sm:$0xff] }
 0xaf4   : > { %v7493_v33 = vpack.c.bf16 %v5091_v44, %v5089_v51  ;;  %v4765_v51 = vmul.f32 -1.702, %v9951_v8  ;;  %v9967_v44 = vadd.f32 %v9858_v60, %v4376_v31  ;;  %v5116_v60 = vld [vmem:[%s10345_s2 + $0x558] sm:$0xff] }
 0xaf5   : > { %5373 = vmatmul.mubr.f32.gmra.mrb[26].mxu0 %v4923_v34  ;;  %v7499_v34 = vpack.c.bf16 %v5100_v48, %v5098_v14 }
 0xaf6   : > { %5378 = vmatprep.mubr.f32.mxu0 %v4932_v10  ;;  %7482 = vmatpush1.bf16.msra.mxu0 %v7481_v11  ;;  %v7497_v11 = vpack.c.bf16 %v5095_v6, %v5093_v3  ;;  %v9938_v10 = vadd.f32 %v9813_v28, %v4376_v31  ;;  %v4387_v28 = vsub.s32 7, %v8866_v55  ;;  %v5114_v6 = vld [vmem:[%s10345_s2 + $0x548] sm:$0xff]  ;;  %v4809_v14 = vmul.f32 1.442695, %v4765_v51 }
 0xaf7   : > { %7484 = vmatprep.subr.bf16.mxu0 %v7483_v50  ;;  %v5097_v50 = vld [vmem:[%s10345_s2 + $0x4c0] sm:$0xff]  ;;  %v4773_v48 = vmul.f32 -1.702, %v9967_v44  ;;  %v5126_v51 = vld [vmem:[%s10345_s2 + $0x5a8] sm:$0xff] }
 0xaf8   : > { %v7501_v46 = vpack.c.bf16 %v5099_v17, %v5097_v50  ;;  %v4757_v38 = vmul.f32 -1.702, %v9938_v10  ;;  %v9963_v23 = vrot.slane %v9693_v35, %v4387_v28  ;;  %v7515_v50 = vpack.c.bf16 %v5116_v60, %v5114_v6  ;;  %v5113_v17 = vld [vmem:[%s10345_s2 + $0x540] sm:$0xff]  ;;  %v5124_v28 = vld [vmem:[%s10345_s2 + $0x598] sm:$0xff]  ;;  %v5127_v6 = vld [vmem:[%s10345_s2 + $0x5b0] sm:$0xff] }
 0xaf9   : > { %5379 = vmatmul.mubr.f32.gmra.mrb[28].mxu0 %v4931_v52  ;;  %v5106_v52 = vld [vmem:[%s10345_s2 + $0x508] sm:$0xff] }
 0xafa   : > { %5384 = vmatprep.mubr.f32.mxu0 %v4940_v45  ;;  %7486 = vmatpush1.bf16.msra.mxu0 %v7485_v18  ;;  %v5103_v18 = vld [vmem:[%s10345_s2 + $0x4f0] sm:$0xff] }
 0xafb   : > { %7488 = vmatprep.subr.bf16.mxu0 %v7487_v37  ;;  %v5108_v37 = vld [vmem:[%s10345_s2 + $0x518] sm:$0xff]  ;;  %v7505_v45 = vpack.c.bf16 %v5103_v18, %v5101_v61  ;;  %v7517_v61 = vpack.c.bf16 %v5115_v62, %v5113_v17 }
 0xafc   : > { %v7507_v63 = vpack.c.bf16 %v5108_v37, %v5106_v52  ;;  %v5117_v52 = vld [vmem:[%s10345_s2 + $0x560] sm:$0xff]  ;;  %v5119_v37 = vld [vmem:[%s10345_s2 + $0x570] sm:$0xff] }
 0xafd   : > { %5385 = vmatmul.mubr.f32.gmra.mrb[30].mxu0 %v4939_v21  ;;  %v5112_v21 = vld [vmem:[%s10345_s2 + $0x538] sm:$0xff] }
 0xafe   : > { %7490 = vmatpush1.bf16.msra.mxu0 %v7489_v40  ;;  %5455 = vmatprep.mubr.f32.mxu0 %v4918_v32  ;;  %v5110_v40 = vld [vmem:[%s10345_s2 + $0x528] sm:$0xff]  ;;  %v5111_v32 = vld [vmem:[%s10345_s2 + $0x530] sm:$0xff] }
 0xaff   : > { %7492 = vmatprep.subr.bf16.mxu0 %v7491_v41  ;;  %v4793_v41 = vmul.f32 1.442695, %v4757_v38  ;;  %v7511_v35 = vpack.c.bf16 %v5112_v21, %v5110_v40  ;;  %v7513_v3 = vpack.c.bf16 %v5111_v32, %v5109_v15  ;;  %v5122_v38 = vld [vmem:[%s10345_s2 + $0x588] sm:$0xff]  ;;  %v5121_v40 = vld [vmem:[%s10345_s2 + $0x580] sm:$0xff]  ;;  %v5123_v21 = vld [vmem:[%s10345_s2 + $0x590] sm:$0xff] }
 0xb00   : > { %v5128_v15 = vld [vmem:[%s10345_s2 + $0x5b8] sm:$0xff] }
 0xb01   : > { %7844 = vpow2.f32 %v4793_v41 }
 0xb02   : > { %7494 = vmatpush1.bf16.msra.mxu0 %v7493_v33  ;;  %v9974_v33 = vadd.f32 %v9878_v2, %v9828_v39  ;;  %v9984_v39 = vadd.f32 %v9830_v24, %v9963_v23  ;;  %7846 = vpow2.f32 %v4811_v56  ;;  %v4827_v2 = vmul.f32 1.442695, %v4774_v20 }
 0xb03   : > { %7496 = vmatprep.subr.bf16.mxu0 %v7495_v27  ;;  %v7509_v27 = vpack.c.bf16 %v5107_v9, %v5105_v19  ;;  %7848 = vpow2.f32 %v4809_v14  ;;  %v7523_v9 = vpack.c.bf16 %v5124_v28, %v5122_v38  ;;  %v7525_v56 = vpack.c.bf16 %v5123_v21, %v5121_v40  ;;  %v5130_v14 = vld [vmem:[%s10345_s2 + $0x5c8] sm:$0xff]  ;;  %v5133_v38 = vld [vmem:[%s10345_s2 + $0x5e0] sm:$0xff]  ;;  %v5135_v28 = vld [vmem:[%s10345_s2 + $0x5f0] sm:$0xff] }
 0xb04   : > { %7850 = vpow2.f32 %v4827_v2 }
 0xb06   : > { %7498 = vmatpush1.bf16.msra.mxu0 %v7497_v11  ;;  %v9980_v11 = vadd.f32 %v9872_v13, %v4376_v31  ;;  %v5120_v13 = vld [vmem:[%s10345_s2 + $0x578] sm:$0xff]  ;;  %v4825_v31 = vmul.f32 1.442695, %v4773_v48 }
 0xb07   : > { %7500 = vmatprep.subr.bf16.mxu0 %v7499_v34  ;;  %v4782_v34 = vmul.f32 -1.702, %v9974_v33  ;;  %v7519_v18 = vpack.c.bf16 %v5120_v13, %v5118_v22  ;;  %v5132_v48 = vld [vmem:[%s10345_s2 + $0x5d8] sm:$0xff]  ;;  %v5129_v22 = vld [vmem:[%s10345_s2 + $0x5c0] sm:$0xff]  ;;  %v5131_v13 = vld [vmem:[%s10345_s2 + $0x5d0] sm:$0xff] }
 0xb08   : > { %v4781_v24 = vmul.f32 -1.702, %v9980_v11  ;;  %7852 = vpow2.f32 %v4825_v31  ;;  %v7531_v62 = vpack.c.bf16 %v5132_v48, %v5130_v14 }
 0xb0a   : > { %7502 = vmatpush1.bf16.msra.mxu0 %v7501_v46  ;;  %v4760_v46 = vmul.f32 -1.702, %v9984_v39  ;;  %v4841_v58 = vmul.f32 1.442695, %v4781_v24  ;;  %v5134_v24 = vld [vmem:[%s10345_s2 + $0x5e8] sm:$0xff] }
 0xb0b   : > { %7504 = vmatprep.subr.bf16.mxu0 %v7503_v42  ;;  %v4843_v42 = vmul.f32 1.442695, %v4782_v34  ;;  %v7845_v19 = vpop.eup %7844 }
 0xb0c   : > { %v7847_v41 = vpop.eup %7846  ;;  %v4853_v32 = vadd.f32 1.0, %v7845_v19 }
 0xb0d   : > { %7854 = vpow2.f32 %v4843_v42  ;;  %v7849_v20 = vpop.eup %7848 }
 0xb0e   : > { %7506 = vmatpush1.bf16.msra.mxu0 %v7505_v45  ;;  %v4799_v45 = vmul.f32 1.442695, %v4760_v46  ;;  %7856 = vpow2.f32 %v4841_v58  ;;  %v7851_v60 = vpop.eup %7850  ;;  %v4861_v2 = vadd.f32 1.0, %v7849_v20  ;;  %v5136_v46 = vld [vmem:[%s10345_s2 + $0x5f8] sm:$0xff] }
 0xb0f   : > { %7508 = vmatprep.subr.bf16.mxu0 %v7507_v63  ;;  %v7521_v63 = vpack.c.bf16 %v5119_v37, %v5117_v52  ;;  %v4870_v17 = vadd.f32 1.0, %v7851_v60  ;;  %v7535_v37 = vpack.c.bf16 %v5136_v46, %v5134_v24  ;;  %v5143_v60 = vld [vmem:[%s10345_s2 + $0x630] sm:$0xff]  ;;  %v5150_v24 = vld [vmem:[%s10345_s2 + $0x668] sm:$0xff]  ;;  %v5152_v46 = vld [vmem:[%s10345_s2 + $0x678] sm:$0xff] }
 0xb10   : > { %7858 = vpow2.f32 %v4799_v45  ;;  %v5138_v45 = vld [vmem:[%s10345_s2 + $0x608] sm:$0xff] }
 0xb11   : > { %7860 = vrcp.f32 %v4853_v32  ;;  %v5142_v32 = vld [vmem:[%s10345_s2 + $0x628] sm:$0xff] }
 0xb12   : > { %7510 = vmatpush1.bf16.msra.mxu0 %v7509_v27  ;;  %v4862_v27 = vadd.f32 1.0, %v7847_v41  ;;  %v5137_v41 = vld [vmem:[%s10345_s2 + $0x600] sm:$0xff] }
 0xb13   : > { %7512 = vmatprep.subr.bf16.mxu0 %v7511_v35  ;;  %v7527_v35 = vpack.c.bf16 %v5128_v15, %v5126_v51  ;;  %v5139_v51 = vld [vmem:[%s10345_s2 + $0x610] sm:$0xff] }
 0xb14   : > { %7862 = vrcp.f32 %v4862_v27  ;;  %v7541_v27 = vpack.c.bf16 %v5139_v51, %v5137_v41  ;;  %v5160_v41 = vld [vmem:[%s10345_s2 + $0x6b8] sm:$0xff]  ;;  %v4383_v51 = vsub.s32 6, %v8866_v55 }
 0xb15   : > { %7864 = vrcp.f32 %v4861_v2  ;;  %v5146_v2 = vld [vmem:[%s10345_s2 + $0x648] sm:$0xff] }
 0xb16   : > { %7514 = vmatpush1.bf16.msra.mxu0 %v7513_v3  ;;  %v5125_v3 = vld [vmem:[%s10345_s2 + $0x5a0] sm:$0xff]  ;;  %7866 = vrcp.f32 %v4870_v17 }
 0xb17   : > { %7516 = vmatprep.subr.bf16.mxu0 %v7515_v50  ;;  %v7529_v34 = vpack.c.bf16 %v5127_v6, %v5125_v3  ;;  %v7853_v50 = vpop.eup %7852  ;;  %v5141_v6 = vld [vmem:[%s10345_s2 + $0x620] sm:$0xff] }
 0xb18   : > { %v7855_v31 = vpop.eup %7854  ;;  %v4869_v42 = vadd.f32 1.0, %v7853_v50  ;;  %v7545_v17 = vpack.c.bf16 %v5143_v60, %v5141_v6  ;;  %v5161_v6 = vld [vmem:[%s10345_s2 + $0x6c0] sm:$0xff]  ;;  %v5163_v60 = vld [vmem:[%s10345_s2 + $0x6d0] sm:$0xff] }
 0xb19   : > { %v4878_v52 = vadd.f32 1.0, %v7855_v31 }
 0xb1a   : > { %7518 = vmatpush1.bf16.msra.mxu0 %v7517_v61  ;;  %v7533_v61 = vpack.c.bf16 %v5131_v13, %v5129_v22  ;;  %7868 = vrcp.f32 %v4869_v42  ;;  %v5145_v22 = vld [vmem:[%s10345_s2 + $0x640] sm:$0xff]  ;;  %v5147_v13 = vld [vmem:[%s10345_s2 + $0x650] sm:$0xff] }
 0xb1b   : > { %7520 = vmatprep.subr.bf16.mxu0 %v7519_v18  ;;  %v7857_v18 = vpop.eup %7856  ;;  %7870 = vrcp.f32 %v4878_v52  ;;  %v5149_v52 = vld [vmem:[%s10345_s2 + $0x660] sm:$0xff] }
 0xb1c   : > { %v7859_v58 = vpop.eup %7858  ;;  %v4877_v19 = vadd.f32 1.0, %v7857_v18  ;;  %v7551_v18 = vpack.c.bf16 %v5152_v46, %v5150_v24 }
 0xb1d   : > { %v4856_v40 = vadd.f32 1.0, %v7859_v58  ;;  %v7861_v15 = vpop.eup %7860  ;;  %v5156_v58 = vld [vmem:[%s10345_s2 + $0x698] sm:$0xff] }
 0xb1e   : > { %7522 = vmatpush1.bf16.msra.mxu0 %v7521_v63  ;;  %v5140_v63 = vld [vmem:[%s10345_s2 + $0x618] sm:$0xff]  ;;  %v7863_v20 = vpop.eup %7862  ;;  %7872 = vrcp.f32 %v4877_v19 }
 0xb1f   : > { %7524 = vmatprep.subr.bf16.mxu0 %v7523_v9  ;;  %v7537_v9 = vpack.c.bf16 %v5135_v28, %v5133_v38  ;;  %v7539_v21 = vpack.c.bf16 %v5140_v63, %v5138_v45  ;;  %7874 = vrcp.f32 %v4856_v40  ;;  %v7865_v14 = vpop.eup %7864  ;;  %v4926_v48 = vmul.f32 %v7863_v20, %v9942_v59  ;;  %v5154_v28 = vld [vmem:[%s10345_s2 + $0x688] sm:$0xff]  ;;  %v5155_v40 = vld [vmem:[%s10345_s2 + $0x690] sm:$0xff] }
 0xb20   : > { %v7867_v50 = vpop.eup %7866  ;;  %v7555_v19 = vpack.c.bf16 %v5156_v58, %v5154_v28  ;;  %v5162_v20 = vld [vmem:[%s10345_s2 + $0x6c8] sm:$0xff] }
 0xb21   : > { %v4934_v59 = vmul.f32 %v7867_v50, %v9956_v53  ;;  %v7565_v50 = vpack.c.bf16 %v5163_v60, %v5161_v6 }
 0xb22   : > { %7526 = vmatpush1.bf16.msra.mxu0 %v7525_v56  ;;  %v5144_v56 = vld [vmem:[%s10345_s2 + $0x638] sm:$0xff] }
 0xb23   : > { %7528 = vmatprep.subr.bf16.mxu0 %v7527_v35  ;;  %v4917_v35 = vmul.f32 %v7861_v15, %v9938_v10  ;;  %v7543_v3 = vpack.c.bf16 %v5144_v56, %v5142_v32  ;;  %v4925_v10 = vmul.f32 %v7865_v14, %v9951_v8  ;;  %v5157_v32 = vld [vmem:[%s10345_s2 + $0x6a0] sm:$0xff]  ;;  %v5159_v56 = vld [vmem:[%s10345_s2 + $0x6b0] sm:$0xff]  ;;  %v5166_v14 = vld [vmem:[%s10345_s2 + $0x6e8] sm:$0xff] }
 0xb24   : > { %v7869_v31 = vpop.eup %7868  ;;  %v7561_v55 = vpack.c.bf16 %v5159_v56, %v5157_v32 }
 0xb25   : > { %v7871_v42 = vpop.eup %7870  ;;  %v4933_v8 = vmul.f32 %v7869_v31, %v9967_v44 }
 0xb26   : > { %7530 = vmatpush1.bf16.msra.mxu0 %v7529_v34  ;;  %v5148_v34 = vld [vmem:[%s10345_s2 + $0x658] sm:$0xff]  ;;  %v4942_v53 = vmul.f32 %v7871_v42, %v9974_v33  ;;  %v5169_v42 = vld [vmem:[%s10345_s2 + $0x700] sm:$0xff] }
 0xb27   : > { %7532 = vmatprep.subr.bf16.mxu0 %v7531_v62  ;;  %v7547_v62 = vpack.c.bf16 %v5148_v34, %v5146_v2  ;;  %v10056_v34 = vadd.f32 %v9850_v36, %v9963_v23 }
 0xb28   : > { %v7873_v38 = vpop.eup %7872 }
 0xb29   : > { %v7875_v45 = vpop.eup %7874  ;;  %v4941_v44 = vmul.f32 %v7873_v38, %v9980_v11  ;;  %v4768_v36 = vmul.f32 -1.702, %v10056_v34 }
 0xb2a   : > { %7534 = vmatpush1.bf16.msra.mxu0 %v7533_v61  ;;  %v7549_v61 = vpack.c.bf16 %v5147_v13, %v5145_v22  ;;  %v4920_v33 = vmul.f32 %v7875_v45, %v9984_v39  ;;  %v5170_v22 = vld [vmem:[%s10345_s2 + $0x708] sm:$0xff]  ;;  %v5172_v13 = vld [vmem:[%s10345_s2 + $0x718] sm:$0xff]  ;;  %v5173_v45 = vld [vmem:[%s10345_s2 + $0x720] sm:$0xff] }
 0xb2b   : > { %7536 = vmatprep.subr.bf16.mxu0 %v7535_v37  ;;  %v5151_v37 = vld [vmem:[%s10345_s2 + $0x670] sm:$0xff]  ;;  %v7571_v46 = vpack.c.bf16 %v5172_v13, %v5170_v22  ;;  %v5192_v22 = vld [vmem:[%s10345_s2 + $0x7b8] sm:$0xff] }
 0xb2c   : > { %v7553_v63 = vpack.c.bf16 %v5151_v37, %v5149_v52 }
 0xb2e   : > { %7538 = vmatpush1.bf16.msra.mxu0 %v7537_v9  ;;  %v5153_v9 = vld [vmem:[%s10345_s2 + $0x680] sm:$0xff] }
 0xb2f   : > { %7540 = vmatprep.subr.bf16.mxu0 %v7539_v21  ;;  %v5158_v21 = vld [vmem:[%s10345_s2 + $0x6a8] sm:$0xff]  ;;  %v7557_v11 = vpack.c.bf16 %v5155_v40, %v5153_v9 }
 0xb30   : > { %v7559_v15 = vpack.c.bf16 %v5160_v41, %v5158_v21  ;;  %v5177_v41 = vld [vmem:[%s10345_s2 + $0x740] sm:$0xff] }
 0xb31   : > { %5456 = vmatmul.mubr.f32.vlgmr.msra.gmra.mrb[24].mxu0 %v4917_v35  ;;  %v7912_v35 = vld [vmem:[%s10346_s4] sm:$0xff] }
 0xb32   : > { %5461 = vmatprep.mubr.f32.mxu0 %v4926_v48  ;;  %7542 = vmatpush1.bf16.msra.mxu0 %v7541_v27  ;;  %v5164_v27 = vld [vmem:[%s10345_s2 + $0x6d8] sm:$0xff]  ;;  %v4384_v39 = vrot.slane %v7912_v35, %v4383_v51  ;;  %v5179_v51 = vld [vmem:[%s10345_s2 + $0x750] sm:$0xff]  ;;  %v5181_v35 = vld [vmem:[%s10345_s2 + $0x760] sm:$0xff] }
 0xb33   : > { %7544 = vmatprep.subr.bf16.mxu0 %v7543_v3  ;;  %v7563_v3 = vpack.c.bf16 %v5164_v27, %v5162_v20  ;;  %v5168_v48 = vld [vmem:[%s10345_s2 + $0x6f8] sm:$0xff]  ;;  %v7581_v20 = vpack.c.bf16 %v5179_v51, %v5177_v41  ;;  %v5197_v41 = vld [vmem:[%s10345_s2 + $0x7e0] sm:$0xff]  ;;  %v5199_v51 = vld [vmem:[%s10345_s2 + $0x7f0] sm:$0xff] }
 0xb34   : > { %v10052_v2 = vadd.f32 %v9815_v54, %v4384_v39  ;;  %v10064_v54 = vadd.f32 %v9839_v16, %v4384_v39  ;;  %v10077_v37 = vadd.f32 %v9860_v5, %v4384_v39  ;;  %v5180_v5 = vld [vmem:[%s10345_s2 + $0x758] sm:$0xff]  ;;  %v10090_v40 = vadd.f32 %v9874_v47, %v4384_v39  ;;  %v5183_v39 = vld [vmem:[%s10345_s2 + $0x770] sm:$0xff] }
 0xb35   : > { %5462 = vmatmul.mubr.f32.gmra.mrb[26].mxu0 %v4925_v10  ;;  %v5165_v10 = vld [vmem:[%s10345_s2 + $0x6e0] sm:$0xff]  ;;  %v7585_v60 = vpack.c.bf16 %v5183_v39, %v5181_v35 }
 0xb36   : > { %5467 = vmatprep.mubr.f32.mxu0 %v4934_v59  ;;  %7546 = vmatpush1.bf16.msra.mxu0 %v7545_v17  ;;  %v7567_v17 = vpack.c.bf16 %v5168_v48, %v5166_v14  ;;  %v4759_v31 = vmul.f32 -1.702, %v10052_v2  ;;  %v10069_v59 = vadd.f32 %v9867_v1, %v9963_v23  ;;  %v4767_v52 = vmul.f32 -1.702, %v10064_v54 }
 0xb37   : > { %7548 = vmatprep.subr.bf16.mxu0 %v7547_v62  ;;  %v5167_v62 = vld [vmem:[%s10345_s2 + $0x6f0] sm:$0xff]  ;;  %v4815_v1 = vmul.f32 1.442695, %v4768_v36  ;;  %v4775_v9 = vmul.f32 -1.702, %v10077_v37 }
 0xb38   : > { %v7569_v24 = vpack.c.bf16 %v5167_v62, %v5165_v10  ;;  %v4797_v16 = vmul.f32 1.442695, %v4759_v31  ;;  %v4776_v38 = vmul.f32 -1.702, %v10069_v59  ;;  %v4783_v47 = vmul.f32 -1.702, %v10090_v40 }
 0xb39   : > { %5468 = vmatmul.mubr.f32.gmra.mrb[28].mxu0 %v4933_v8  ;;  %v5174_v8 = vld [vmem:[%s10345_s2 + $0x728] sm:$0xff]  ;;  %v4829_v32 = vmul.f32 1.442695, %v4775_v9 }
 0xb3a   : > { %5473 = vmatprep.mubr.f32.mxu0 %v4942_v53  ;;  %7550 = vmatpush1.bf16.msra.mxu0 %v7549_v61  ;;  %v5171_v61 = vld [vmem:[%s10345_s2 + $0x710] sm:$0xff]  ;;  %v10082_v53 = vadd.f32 %v9880_v4, %v9963_v23  ;;  %7876 = vpow2.f32 %v4797_v16  ;;  %v4831_v4 = vmul.f32 1.442695, %v4776_v38  ;;  %v4845_v6 = vmul.f32 1.442695, %v4783_v47  ;;  %v5190_v62 = vld [vmem:[%s10345_s2 + $0x7a8] sm:$0xff] }
 0xb3b   : > { %7552 = vmatprep.subr.bf16.mxu0 %v7551_v18  ;;  %v5176_v18 = vld [vmem:[%s10345_s2 + $0x738] sm:$0xff]  ;;  %v7573_v28 = vpack.c.bf16 %v5171_v61, %v5169_v42  ;;  %7878 = vpow2.f32 %v4815_v1  ;;  %v5189_v42 = vld [vmem:[%s10345_s2 + $0x7a0] sm:$0xff]  ;;  %v5191_v61 = vld [vmem:[%s10345_s2 + $0x7b0] sm:$0xff] }
 0xb3c   : > { %v7575_v58 = vpack.c.bf16 %v5176_v18, %v5174_v8  ;;  %v4784_v23 = vmul.f32 -1.702, %v10082_v53  ;;  %v5194_v18 = vld [vmem:[%s10345_s2 + $0x7c8] sm:$0xff]  ;;  %v5196_v16 = vld [vmem:[%s10345_s2 + $0x7d8] sm:$0xff]  ;;  %v7593_v1 = vpack.c.bf16 %v5191_v61, %v5189_v42 }
 0xb3d   : > { %5474 = vmatmul.mubr.f32.gmra.mrb[30].mxu0 %v4941_v44  ;;  %v5178_v44 = vld [vmem:[%s10345_s2 + $0x748] sm:$0xff] }
 0xb3e   : > { %7554 = vmatpush1.bf16.msra.mxu0 %v7553_v63  ;;  %5544 = vmatprep.mubr.f32.mxu0 %v4920_v33  ;;  %v5175_v63 = vld [vmem:[%s10345_s2 + $0x730] sm:$0xff]  ;;  %v7579_v21 = vpack.c.bf16 %v5180_v5, %v5178_v44  ;;  %v4847_v56 = vmul.f32 1.442695, %v4784_v23  ;;  %v5198_v5 = vld [vmem:[%s10345_s2 + $0x7e8] sm:$0xff] }
 0xb3f   : > { %7556 = vmatprep.subr.bf16.mxu0 %v7555_v19  ;;  %v4813_v19 = vmul.f32 1.442695, %v4767_v52  ;;  %v7577_v33 = vpack.c.bf16 %v5175_v63, %v5173_v45  ;;  %v5193_v45 = vld [vmem:[%s10345_s2 + $0x7c0] sm:$0xff]  ;;  %v5195_v63 = vld [vmem:[%s10345_s2 + $0x7d0] sm:$0xff] }
 0xb41   : > { %7880 = vpow2.f32 %v4813_v19  ;;  %v5200_v19 = vld [vmem:[%s10345_s2 + $0x7f8] sm:$0xff] }
 0xb42   : > { %7558 = vmatpush1.bf16.msra.mxu0 %v7557_v11  ;;  %v5182_v11 = vld [vmem:[%s10345_s2 + $0x768] sm:$0xff]  ;;  %7882 = vpow2.f32 %v4831_v4  ;;  %v7597_v4 = vpack.c.bf16 %v5195_v63, %v5193_v45 }
 0xb43   : > { %7560 = vmatprep.subr.bf16.mxu0 %v7559_v15  ;;  %v5184_v15 = vld [vmem:[%s10345_s2 + $0x778] sm:$0xff]  ;;  %7884 = vpow2.f32 %v4829_v32 }
 0xb44   : > { %v7583_v27 = vpack.c.bf16 %v5184_v15, %v5182_v11  ;;  %7886 = vpow2.f32 %v4847_v56  ;;  %v7877_v14 = vpop.eup %7876  ;;  %v7601_v15 = vpack.c.bf16 %v5199_v51, %v5197_v41 }
 0xb45   : > { %v7879_v10 = vpop.eup %7878  ;;  %7888 = vpow2.f32 %v4845_v6  ;;  %v4855_v13 = vadd.f32 1.0, %v7877_v14 }
 0xb46   : > { %7562 = vmatpush1.bf16.msra.mxu0 %v7561_v55  ;;  %v5186_v55 = vld [vmem:[%s10345_s2 + $0x788] sm:$0xff] }
 0xb47   : > { %7564 = vmatprep.subr.bf16.mxu0 %v7563_v3  ;;  %v5188_v3 = vld [vmem:[%s10345_s2 + $0x798] sm:$0xff]  ;;  %7890 = vrcp.f32 %v4855_v13 }
 0xb48   : > { %v7587_v48 = vpack.c.bf16 %v5188_v3, %v5186_v55 }
 0xb4a   : > { %7566 = vmatpush1.bf16.msra.mxu0 %v7565_v50  ;;  %v5185_v50 = vld [vmem:[%s10345_s2 + $0x780] sm:$0xff] }
 0xb4b   : > { %7568 = vmatprep.subr.bf16.mxu0 %v7567_v17  ;;  %v5187_v17 = vld [vmem:[%s10345_s2 + $0x790] sm:$0xff]  ;;  %v7881_v36 = vpop.eup %7880 }
 0xb4c   : > { %v7589_v31 = vpack.c.bf16 %v5187_v17, %v5185_v50  ;;  %v7883_v8 = vpop.eup %7882  ;;  %v4863_v52 = vadd.f32 1.0, %v7881_v36 }
 0xb4d   : > { %v7885_v38 = vpop.eup %7884 }
 0xb4e   : > { %7570 = vmatpush1.bf16.msra.mxu0 %v7569_v24  ;;  %v4864_v24 = vadd.f32 1.0, %v7879_v10  ;;  %v7887_v44 = vpop.eup %7886  ;;  %v4871_v9 = vadd.f32 1.0, %v7885_v38 }
 0xb4f   : > { %7572 = vmatprep.subr.bf16.mxu0 %v7571_v46  ;;  %v7591_v46 = vpack.c.bf16 %v5192_v22, %v5190_v62  ;;  %v7889_v23 = vpop.eup %7888 }
 0xb50   : > { %7892 = vrcp.f32 %v4864_v24  ;;  %v4879_v11 = vadd.f32 1.0, %v7889_v23 }
 0xb51   : > { %7894 = vrcp.f32 %v4863_v52  ;;  %v7891_v32 = vpop.eup %7890 }
 0xb52   : > { %7574 = vmatpush1.bf16.msra.mxu0 %v7573_v28  ;;  %v4872_v28 = vadd.f32 1.0, %v7883_v8  ;;  %v4919_v56 = vmul.f32 %v7891_v32, %v10052_v2 }
 0xb53   : > { %7576 = vmatprep.subr.bf16.mxu0 %v7575_v58  ;;  %v7595_v58 = vpack.c.bf16 %v5196_v16, %v5194_v18 }
 0xb54   : > { %7896 = vrcp.f32 %v4872_v28 }
 0xb55   : > { %7898 = vrcp.f32 %v4871_v9 }
 0xb56   : > { %7578 = vmatpush1.bf16.msra.mxu0 %v7577_v33  ;;  %v4880_v33 = vadd.f32 1.0, %v7887_v44 }
 0xb57   : > { %7580 = vmatprep.subr.bf16.mxu0 %v7579_v21  ;;  %v7599_v21 = vpack.c.bf16 %v5200_v19, %v5198_v5 }
 0xb58   : > { %7900 = vrcp.f32 %v4880_v33 }
 0xb59   : > { %7902 = vrcp.f32 %v4879_v11 }
 0xb5a   : > { %7582 = vmatpush1.bf16.msra.mxu0 %v7581_v20  ;;  %v7893_v47 = vpop.eup %7892 }
 0xb5b   : > { %7584 = vmatprep.subr.bf16.mxu0 %v7583_v27  ;;  %v7895_v20 = vpop.eup %7894  ;;  %v4928_v27 = vmul.f32 %v7893_v47, %v10056_v34 }
 0xb5c   : > { %v4927_v39 = vmul.f32 %v7895_v20, %v10064_v54  ;;  %v5201_v54 = vld [vmem:[%s10348_s22] sm:$0x3] }
 0xb5e   : > { %7586 = vmatpush1.bf16.msra.mxu0 %v7585_v60  ;;  %v7897_v35 = vpop.eup %7896 }
 0xb5f   : > { %7588 = vmatprep.subr.bf16.mxu0 %v7587_v48  ;;  %v7899_v55 = vpop.eup %7898  ;;  %v4936_v3 = vmul.f32 %v7897_v35, %v10069_v59  ;;  %v5206_v59 = vrot.slane %v5201_v54, %v8872_v26  ;;  %v5210_v48 = vrot.slane %v5201_v54, %v8869_v25 }
 0xb60   : > { %v4935_v60 = vmul.f32 %v7899_v55, %v10077_v37 }
 0xb62   : > { %7590 = vmatpush1.bf16.msra.mxu0 %v7589_v31  ;;  %v7901_v6 = vpop.eup %7900 }
 0xb63   : > { %7592 = vmatprep.subr.bf16.mxu0 %v7591_v46  ;;  %v7903_v14 = vpop.eup %7902  ;;  %v4944_v2 = vmul.f32 %v7901_v6, %v10082_v53 }
 0xb64   : > { %v4943_v34 = vmul.f32 %v7903_v14, %v10090_v40 }
 0xb66   : > { %7594 = vmatpush1.bf16.msra.mxu0 %v7593_v1 }
 0xb67   : > { %7596 = vmatprep.subr.bf16.mxu0 %v7595_v58 }
 0xb6a   : > { %7598 = vmatpush1.bf16.msra.mxu0 %v7597_v4 }
 0xb6b   : > { %7600 = vmatprep.subr.bf16.mxu0 %v7599_v21 }
 0xb6e   : > { %7602 = vmatpush1.bf16.msra.mxu0 %v7601_v15 }
 0xb71   : > { %5545 = vmatmul.mubr.f32.vlgmr.msra.gmra.mrb[24].mxu0 %v4919_v56 }
 0xb72   : > { %5550 = vmatprep.mubr.f32.mxu0 %v4928_v27 }
 0xb75   : > { %5551 = vmatmul.mubr.f32.gmra.mrb[26].mxu0 %v4927_v39 }
 0xb76   : > { %5556 = vmatprep.mubr.f32.mxu0 %v4936_v3 }
 0xb79   : > { %5557 = vmatmul.mubr.f32.gmra.mrb[28].mxu0 %v4935_v60 }
 0xb7a   : > { %5562 = vmatprep.mubr.f32.mxu0 %v4944_v2 }
 0xb7d   : > { %5563 = vmatmul.mubr.f32.gmra.mrb[30].mxu0 %v4943_v34 }
 0xc44   : > { %v5546_v50 = vpop.f32.mrb[24].mxu0 }
 0xc45   : > { %v7611_v17 = vadd.f32 %v5546_v50, %v5206_v59  ;;  %v5548_v37 = vpop.f32.mrb[25].mxu0 }
 0xc46   : > { %v7612_v10 = vadd.f32 %v5548_v37, %v5210_v48 }
 0xc47   : > { %v5569_v53 = vadd.f32 %v7611_v17, %v9212_v49 }
 0xc48   : > { %v5570_v62 = vadd.f32 %v7612_v10, %v9214_v57  ;;  %v5552_v22 = vpop.f32.mrb[26].mxu0 }
 0xc49   : > { %5577 = vst [vmem:[#allocation2] sm:$0xff] %v5569_v53  ;;  %v7613_v40 = vadd.f32 %v5552_v22, %v5206_v59  ;;  %v5554_v13 = vpop.f32.mrb[27].mxu0  ;;  %v5589_v22 = vld [vmem:[#allocation9] sm:$0x3] (!%p6675_p11) }
 0xc4a   : > { %5578 = vst [vmem:[#allocation2 + $0x8] sm:$0xff] %v5570_v62  ;;  %v7614_v31 = vadd.f32 %v5554_v13, %v5210_v48  ;;  %v5591_v38 = vadd.f32 (!%p6675_p11), %v5570_v62, %v5569_v53  ;;  %v5659_v13 = vrot.slane (!%p6675_p11), %v5589_v22, %v8872_v26 }
 0xc4b   : > { %v5571_v36 = vadd.f32 %v7613_v40, %v9218_v0  ;;  %v5590_v40 = vld [vmem:[#allocation11] sm:$0x3] (!%p6675_p11) }
 0xc4c   : > { %v5572_v24 = vadd.f32 %v7614_v31, %v9220_v30  ;;  %v5558_v46 = vpop.f32.mrb[28].mxu0  ;;  %5592 = vadd.xlane.f32.xlu0 (!%p6675_p11), %v5591_v38  ;;  %v5663_v31 = vrot.slane (!%p6675_p11), %v5589_v22, %v8869_v25 }
 0xc4d   : > { %5579 = vst [vmem:[#allocation2 + $0x10] sm:$0xff] %v5571_v36  ;;  %v7615_v42 = vadd.f32 %v5558_v46, %v5206_v59  ;;  %v5560_v61 = vpop.f32.mrb[29].mxu0 }
 0xc4e   : > { %5580 = vst [vmem:[#allocation2 + $0x18] sm:$0xff] %v5572_v24  ;;  %v7616_v8 = vadd.f32 %v5560_v61, %v5210_v48  ;;  %v5682_v61 = vrot.slane (!%p6675_p11), %v5590_v40, %v8869_v25 }
 0xc4f   : > { %v5573_v49 = vadd.f32 %v7615_v42, %v9224_v43  ;;  %v5594_v43 = vadd.f32 (!%p6675_p11), %v5572_v24, %v5571_v36  ;;  %v5678_v42 = vrot.slane (!%p6675_p11), %v5590_v40, %v8872_v26 }
 0xc50   : > { %v5574_v57 = vadd.f32 %v7616_v8, %v9226_v29  ;;  %v5564_v18 = vpop.f32.mrb[30].mxu0  ;;  %5588 = sbr.rel (%p6675_p11) target bundleno = 3474 (0xd92), region = 1064 }
 0xc51   : > { %5581 = vst [vmem:[#allocation2 + $0x20] sm:$0xff] %v5573_v49  ;;  %v7617_v16 = vadd.f32 %v5564_v18, %v5206_v59  ;;  %v5566_v52 = vpop.f32.mrb[31].mxu0  ;;  %5595 = vadd.xlane.f32.xlu0 (!%p6675_p11), %v5594_v43 }
 0xc52   : > { %5582 = vst [vmem:[#allocation2 + $0x28] sm:$0xff] %v5574_v57  ;;  %v7618_v1 = vadd.f32 %v5566_v52, %v5210_v48  ;;  %v5597_v28 = vadd.f32 (!%p6675_p11), %v5574_v57, %v5573_v49 }
 0xc53   : > { %v5575_v0 = vadd.f32 %v7617_v16, %v9230_v7 }
 0xc54   : > { %v5576_v30 = vadd.f32 %v7618_v1, %v9232_v12  ;;  %5598 = vadd.xlane.f32.xlu1 (!%p6675_p11), %v5597_v28 }
 0xc55   : > { %5583 = vst [vmem:[#allocation2 + $0x30] sm:$0xff] %v5575_v0 }
 0xc56   : > { %5584 = vst [vmem:[#allocation2 + $0x38] sm:$0xff] %v5576_v30  ;;  %v5600_v29 = vadd.f32 (!%p6675_p11), %v5576_v30, %v5575_v0 }
 0xc58   : > { %5601 = vadd.xlane.f32.xlu1 %v5600_v29 }
 0xcd9   : > { %v5593_v58 = vpop.xlane.xlu0 %5592 }
 0xcda   : > { %v5603_v63 = vmul.f32 0.00390625, %v5593_v58 }
 0xcdc   : > { %v5607_v7 = vsub.f32 %v5569_v53, %v5603_v63  ;;  %v5608_v5 = vsub.f32 %v5570_v62, %v5603_v63 }
 0xcde   : > { %v5596_v9 = vpop.xlane.xlu0 %5595  ;;  %v5615_v21 = vmul.f32 %v5607_v7, %v5607_v7  ;;  %v5616_v41 = vmul.f32 %v5608_v5, %v5608_v5 }
 0xcdf   : > { %v5604_v23 = vmul.f32 0.00390625, %v5596_v9 }
 0xce0   : > { %v5623_v20 = vadd.f32 %v5616_v41, %v5615_v21 }
 0xce1   : > { %v5599_v45 = vpop.xlane.xlu1 %5598  ;;  %v5609_v15 = vsub.f32 %v5571_v36, %v5604_v23  ;;  %v5610_v32 = vsub.f32 %v5572_v24, %v5604_v23 }
 0xce2   : > { %v5605_v44 = vmul.f32 0.00390625, %v5599_v45  ;;  %5624 = vadd.xlane.f32.xlu0 %v5623_v20 }
 0xce3   : > { %v5617_v27 = vmul.f32 %v5609_v15, %v5609_v15  ;;  %v5618_v35 = vmul.f32 %v5610_v32, %v5610_v32 }
 0xce4   : > { %v5611_v12 = vsub.f32 %v5573_v49, %v5605_v44  ;;  %v5612_v19 = vsub.f32 %v5574_v57, %v5605_v44 }
 0xce5   : > { %v5602_v4 = vpop.xlane.xlu1 %5601  ;;  %v5626_v6 = vadd.f32 %v5618_v35, %v5617_v27 }
 0xce6   : > { %v5606_v33 = vmul.f32 0.00390625, %v5602_v4  ;;  %v5619_v51 = vmul.f32 %v5611_v12, %v5611_v12  ;;  %v5620_v11 = vmul.f32 %v5612_v19, %v5612_v19 }
 0xce7   : > { %5627 = vadd.xlane.f32.xlu1 %v5626_v6 }
 0xce8   : > { %v5613_v47 = vsub.f32 %v5575_v0, %v5606_v33  ;;  %v5614_v56 = vsub.f32 %v5576_v30, %v5606_v33  ;;  %v5629_v3 = vadd.f32 %v5620_v11, %v5619_v51 }
 0xcea   : > { %v5621_v39 = vmul.f32 %v5613_v47, %v5613_v47  ;;  %v5622_v55 = vmul.f32 %v5614_v56, %v5614_v56  ;;  %5630 = vadd.xlane.f32.xlu0 %v5629_v3 }
 0xcec   : > { %v5632_v60 = vadd.f32 %v5622_v55, %v5621_v39 }
 0xcee   : > { %5633 = vadd.xlane.f32.xlu1 %v5632_v60 }
 0xd6f   : > { %v5625_v14 = vpop.xlane.xlu0 %5624 }
 0xd70   : > { %v5635_v2 = vmul.f32 0.00390625, %v5625_v14 }
 0xd72   : > { %v5639_v34 = vadd.f32 1e-05, %v5635_v2 }
 0xd74   : > { %v5628_v54 = vpop.xlane.xlu1 %5627  ;;  %7913 = vrsqrt.f32 %v5639_v34 }
 0xd75   : > { %v5636_v59 = vmul.f32 0.00390625, %v5628_v54 }
 0xd77   : > { %v5631_v48 = vpop.xlane.xlu0 %5630  ;;  %v5640_v17 = vadd.f32 1e-05, %v5636_v59 }
 0xd78   : > { %v5637_v50 = vmul.f32 0.00390625, %v5631_v48 }
 0xd79   : > { %7915 = vrsqrt.f32 %v5640_v17 }
 0xd7a   : > { %v5641_v37 = vadd.f32 1e-05, %v5637_v50 }
 0xd7b   : > { %v5634_v10 = vpop.xlane.xlu1 %5633 }
 0xd7c   : > { %v5638_v53 = vmul.f32 0.00390625, %v5634_v10  ;;  %7917 = vrsqrt.f32 %v5641_v37 }
 0xd7e   : > { %v5642_v62 = vadd.f32 1e-05, %v5638_v53  ;;  %v7914_v36 = vpop.eup %7913 }
 0xd7f   : > { %v5647_v24 = vmul.f32 %v7914_v36, %v5607_v7  ;;  %v5648_v46 = vmul.f32 %v7914_v36, %v5608_v5 }
 0xd80   : > { %7919 = vrsqrt.f32 %v5642_v62 }
 0xd81   : > { %v5666_v49 = vmul.f32 %v5659_v13, %v5647_v24  ;;  %v5667_v57 = vmul.f32 %v5663_v31, %v5648_v46 }
 0xd83   : > { %v7916_v8 = vpop.eup %7915  ;;  %v5685_v1 = vadd.f32 %v5678_v42, %v5666_v49  ;;  %v5686_v0 = vadd.f32 %v5682_v61, %v5667_v57 }
 0xd84   : > { %v5649_v16 = vmul.f32 %v7916_v8, %v5609_v15  ;;  %v5650_v52 = vmul.f32 %v7916_v8, %v5610_v32 }
 0xd85   : > { %5693 = vst [vmem:[#allocation12] sm:$0xff] %v5685_v1  ;;  %5694 = vst [vmem:[#allocation12 + $0x8] sm:$0xff] %v5686_v0 }
 0xd86   : > { %v7918_v18 = vpop.eup %7917  ;;  %v5668_v28 = vmul.f32 %v5659_v13, %v5649_v16  ;;  %v5669_v43 = vmul.f32 %v5663_v31, %v5650_v52 }
 0xd87   : > { %v5651_v30 = vmul.f32 %v7918_v18, %v5611_v12  ;;  %v5652_v38 = vmul.f32 %v7918_v18, %v5612_v19 }
 0xd88   : > { %v5687_v26 = vadd.f32 %v5678_v42, %v5668_v28  ;;  %v5688_v63 = vadd.f32 %v5682_v61, %v5669_v43 }
 0xd89   : > { %v5670_v58 = vmul.f32 %v5659_v13, %v5651_v30  ;;  %v5671_v45 = vmul.f32 %v5663_v31, %v5652_v38 }
 0xd8a   : > { %v7920_v29 = vpop.eup %7919  ;;  %5695 = vst [vmem:[#allocation12 + $0x10] sm:$0xff] %v5687_v26  ;;  %5696 = vst [vmem:[#allocation12 + $0x18] sm:$0xff] %v5688_v63 }
 0xd8b   : > { %v5653_v25 = vmul.f32 %v7920_v29, %v5613_v47  ;;  %v5654_v44 = vmul.f32 %v7920_v29, %v5614_v56  ;;  %v5689_v7 = vadd.f32 %v5678_v42, %v5670_v58  ;;  %v5690_v5 = vadd.f32 %v5682_v61, %v5671_v45 }
 0xd8d   : > { %v5672_v9 = vmul.f32 %v5659_v13, %v5653_v25  ;;  %v5673_v4 = vmul.f32 %v5663_v31, %v5654_v44  ;;  %5697 = vst [vmem:[#allocation12 + $0x20] sm:$0xff] %v5689_v7  ;;  %5698 = vst [vmem:[#allocation12 + $0x28] sm:$0xff] %v5690_v5 }
 0xd8f   : > { %v5691_v12 = vadd.f32 %v5678_v42, %v5672_v9  ;;  %v5692_v19 = vadd.f32 %v5682_v61, %v5673_v4 }
 0xd91   : > { %5699 = vst [vmem:[#allocation12 + $0x30] sm:$0xff] %v5691_v12  ;;  %5700 = vst [vmem:[#allocation12 + $0x38] sm:$0xff] %v5692_v19 }
 0xd92 PF: > { %s10350_s12 = sld [smem:[#allocation83_spill]]  ;;  %s8162_s21 = smov [#allocation12]  }
 0xd93   : > { %s5707_s23 = sshll.u32 %s8162_s21, 4  ;;  %s5708_s23 = int_to_ptr.vmem [resolvable:$true] %s5707_s23 }
 0xd94   : > { %s8019_s7 = scalar_lea.vmem %s5708_s23, 1024  ;;  %p8026_p10 = scmp.lt.s32.totalorder %s5708_s23, %s5708_s23 }
 0xd95   : > { %p8020_p2 = scmp.ne.s32.totalorder %s5708_s23, %s8019_s7  ;;  %p8027_p0 = scmp.lt.s32.totalorder %s8019_s7, %s8019_s7 }
 0xd97   : > { %p8028_p1 = por %p8027_p0, %p8026_p10 }
 0xd98   : > { %p7685_p12 = scmp.eq.s32.totalorder %s10350_s12, 11 }
 0xd9a   : > { %p8021_p3 = pnand %p8020_p2, %p7685_p12 }
 0xd9c   : > { %p8022_p4 = pneg %p8021_p3 }
 0xd9e   : > { %p8029_p6 = pnand %p8028_p1, %p8022_p4 }
 0xda0   : > { %8032 = shalt.err (!%p8029_p6)
}
 0xda1   : > { %s10351_s25 = sld [smem:[#allocation127_spill]] }
 0xda7   : > { %s8033_s0 = scalar_lea.hbm %s10351_s25, 1024 }
 0xda8   : > { %p8034_p13 = scmp.ne.s32.totalorder %s10351_s25, %s8033_s0  ;;  %p8039_p8 = scmp.lt.u32.totalorder %s8033_s0, %s10351_s25 }
 0xdaa   : > { %p8035_p5 = pnand %p8034_p13, %p7685_p12 }
 0xdac   : > { %p8036_p7 = pneg %p8035_p5 }
 0xdae   : > { %p8041_p9 = pnand %p8039_p8, %p8036_p7 }
 0xdb0   : > { %8044 = shalt.err (!%p8041_p9)
}
 0xdb1   : > { %s8163_s17 = smov 256   ;;  %s8164_s29 = smov 16  }
 0xdb2   : > { %7666 = dma.vmem_to_hbm [thread:$0]  (%p7685_p12), %s5708_s23, 1024, %s10351_s25, [#allocation8], %s8163_s17, %s8163_s17, %s8164_s29  }
 0xdb3   : > { %8136 = dma.done.wait (%p7685_p12), [#allocation8], 1024  }
 0xdb4   : > { %8138 = vsyncadd (%p7685_p12), [#allocation8], 4294966272 }
 0xdb5 PF: > { %s10352_s21 = sld [smem:[#allocation84_spill]]  ;;  %s10353_s19 = sld [smem:[#allocation81_spill]] }
 0xdb6   : > { %s10354_s1 = sld [smem:[#allocation82_spill]]  ;;  %s10355_s20 = sld [smem:[#allocation85_spill]] }
 0xdbb   : > { %p36_p11 = scmp.ge.s32.totalorder %s10352_s21, 14  }
 0xdbd   :  { %38 = sbr.rel (!%p36_p11) target bundleno = 31 (0x1f), region = 1575 }
 0xdc4   :  { %5723 = vsyncpa [#allocation7], 1 }
 0xdc5   :  { %5725 = vsyncpa [#allocation7 + $0x1], 1 }
 0xdc6   :  { %5726 = vsyncpa [#allocation10], 1 }
 0xdc7   :  { %5727 = vsyncpa [#allocation8], 1 }
 0xdc8   :  { %5729 = vsyncpa [#allocation8 + $0x1], 1 }
 0xdc9   :  { %5730 = vsyncmov [#allocation3] }
 0xdcc   :  { %s5731_s26 = vpop.sfrf %5730 }
 0xdcd   :  { %p6680_p12 = scmp.ne.s32.totalorder %s5731_s26, 0 }
 0xdcf   :  { %5735 = shalt.err (%p6680_p12)  }
 0xdd0   :  { %5737 = vsyncmov [#allocation3 + $0x1] }
 0xdd3   :  { %s5738_s3 = vpop.sfrf %5737 }
 0xdd4   :  { %p6681_p2 = scmp.ne.s32.totalorder %s5738_s3, 0 }
 0xdd6   :  { %5742 = shalt.err (%p6681_p2)  }
 0xdd7   :  { %5744 = vsyncmov [#allocation3 + $0x2] }
 0xdda   :  { %s5745_s18 = vpop.sfrf %5744 }
 0xddb   :  { %p6682_p3 = scmp.ne.s32.totalorder %s5745_s18, 0 }
 0xddd   :  { %5749 = shalt.err (%p6682_p3)  }
 0xdde   :  { %5751 = vsyncmov [#allocation3 + $0x3] }
 0xde1   :  { %s5752_s8 = vpop.sfrf %5751 }
 0xde2   :  { %p6683_p4 = scmp.ne.s32.totalorder %s5752_s8, 0 }
 0xde4   :  { %5756 = shalt.err (%p6683_p4)  }
 0xde5   :  { %5758 = vsyncmov [#allocation3 + $0x4] }
 0xde8   :  { %s5759_s13 = vpop.sfrf %5758 }
 0xde9   :  { %p6684_p10 = scmp.ne.s32.totalorder %s5759_s13, 0 }
 0xdeb   :  { %5763 = shalt.err (%p6684_p10)  }
 0xdec   :  { %5765 = vsyncmov [#allocation3 + $0x5] }
 0xdef   :  { %s5766_s16 = vpop.sfrf %5765 }
 0xdf0   :  { %p6685_p0 = scmp.ne.s32.totalorder %s5766_s16, 0 }
 0xdf2   :  { %5770 = shalt.err (%p6685_p0)  }
 0xdf3   :  { %5772 = vsyncmov [#allocation3 + $0x6] }
 0xdf6   :  { %s5773_s30 = vpop.sfrf %5772 }
 0xdf7   :  { %p6686_p1 = scmp.ne.s32.totalorder %s5773_s30, 0 }
 0xdf9   :  { %5777 = shalt.err (%p6686_p1)  }
 0xdfa   :  { %5779 = vsyncmov [#allocation3 + $0x7] }
 0xdfd   :  { %s5780_s14 = vpop.sfrf %5779 }
 0xdfe   :  { %p6687_p6 = scmp.ne.s32.totalorder %s5780_s14, 0 }
 0xe00   :  { %5784 = shalt.err (%p6687_p6)  }
 0xe01   :  { %5786 = vsyncmov [#allocation3 + $0x8] }
 0xe04   :  { %s5787_s2 = vpop.sfrf %5786 }
 0xe05   :  { %p6688_p13 = scmp.ne.s32.totalorder %s5787_s2, 0 }
 0xe07   :  { %5791 = shalt.err (%p6688_p13)  }
 0xe08   :  { %5793 = vsyncmov [#allocation3 + $0x9] }
 0xe0b   :  { %s5794_s4 = vpop.sfrf %5793 }
 0xe0c   :  { %p6689_p5 = scmp.ne.s32.totalorder %s5794_s4, 0 }
 0xe0e   :  { %5798 = shalt.err (%p6689_p5)  }
 0xe0f   :  { %5800 = vsyncmov [#allocation3 + $0xa] }
 0xe12   :  { %s5801_s5 = vpop.sfrf %5800 }
 0xe13   :  { %p6690_p7 = scmp.ne.s32.totalorder %s5801_s5, 0 }
 0xe15   :  { %5805 = shalt.err (%p6690_p7)  }
 0xe16   :  { %5807 = vsyncmov [#allocation3 + $0xb] }
 0xe19   :  { %s5808_s24 = vpop.sfrf %5807 }
 0xe1a   :  { %p6691_p8 = scmp.ne.s32.totalorder %s5808_s24, 0 }
 0xe1c   :  { %5812 = shalt.err (%p6691_p8)  }
 0xe1d   :  { %5814 = vsyncmov [#allocation3 + $0xc] }
 0xe20   :  { %s5815_s15 = vpop.sfrf %5814 }
 0xe21   :  { %p6692_p9 = scmp.ne.s32.totalorder %s5815_s15, 0 }
 0xe23   :  { %5819 = shalt.err (%p6692_p9)  }
 0xe24   :  { %5821 = vsyncmov [#allocation3 + $0xd] }
 0xe27   :  { %s5822_s22 = vpop.sfrf %5821 }
 0xe28   :  { %p6693_p11 = scmp.ne.s32.totalorder %s5822_s22, 0 }
 0xe2a   :  { %5826 = shalt.err (%p6693_p11)  }
 0xe2b   :  { %5828 = vsyncmov [#allocation3 + $0xe] }
 0xe2e   :  { %s5829_s1 = vpop.sfrf %5828 }
 0xe2f   :  { %p6694_p12 = scmp.ne.s32.totalorder %s5829_s1, 0 }
 0xe31   :  { %5833 = shalt.err (%p6694_p12)  }
 0xe32   :  { %5835 = vsyncmov [#allocation3 + $0xf] }
 0xe35   :  { %s5836_s12 = vpop.sfrf %5835 }
 0xe36   :  { %p6695_p2 = scmp.ne.s32.totalorder %s5836_s12, 0 }
 0xe38   :  { %5840 = shalt.err (%p6695_p2)  }
 0xe39   :  { %5842 = vsyncmov [#allocation3 + $0x10] }
 0xe3c   :  { %s5843_s21 = vpop.sfrf %5842 }
 0xe3d   :  { %p6696_p3 = scmp.ne.s32.totalorder %s5843_s21, 0 }
 0xe3f   :  { %5847 = shalt.err (%p6696_p3)  }
 0xe40   :  { %5849 = vsyncmov [#allocation3 + $0x11] }
 0xe43   :  { %s5850_s23 = vpop.sfrf %5849 }
 0xe44   :  { %p6697_p4 = scmp.ne.s32.totalorder %s5850_s23, 0 }
 0xe46   :  { %5854 = shalt.err (%p6697_p4)  }
 0xe47   :  { %5856 = vsyncmov [#allocation3 + $0x12] }
 0xe4a   :  { %s5857_s7 = vpop.sfrf %5856 }
 0xe4b   :  { %p6698_p10 = scmp.ne.s32.totalorder %s5857_s7, 0 }
 0xe4d   :  { %5861 = shalt.err (%p6698_p10)  }
 0xe4e   :  { %5863 = vsyncmov [#allocation3 + $0x13] }
 0xe51   :  { %s5864_s28 = vpop.sfrf %5863 }
 0xe52   :  { %p6699_p0 = scmp.ne.s32.totalorder %s5864_s28, 0 }
 0xe54   :  { %5868 = shalt.err (%p6699_p0)  }
 0xe55   :  { %5870 = vsyncmov [#allocation3 + $0x14] }
 0xe58   :  { %s5871_s20 = vpop.sfrf %5870 }
 0xe59   :  { %p6700_p1 = scmp.ne.s32.totalorder %s5871_s20, 0 }
 0xe5b   :  { %5875 = shalt.err (%p6700_p1)  }
 0xe5c   :  { %5877 = vsyncmov [#allocation3 + $0x15] }
 0xe5f   :  { %s5878_s25 = vpop.sfrf %5877 }
 0xe60   :  { %p6701_p6 = scmp.ne.s32.totalorder %s5878_s25, 0 }
 0xe62   :  { %5882 = shalt.err (%p6701_p6)  }
 0xe63   :  { %5884 = vsyncmov [#allocation3 + $0x16] }
 0xe66   :  { %s5885_s0 = vpop.sfrf %5884 }
 0xe67   :  { %p6702_p13 = scmp.ne.s32.totalorder %s5885_s0, 0 }
 0xe69   :  { %5889 = shalt.err (%p6702_p13)  }
 0xe6a   :  { %5891 = vsyncmov [#allocation3 + $0x17] }
 0xe6d   :  { %s5892_s27 = vpop.sfrf %5891 }
 0xe6e   :  { %p6703_p5 = scmp.ne.s32.totalorder %s5892_s27, 0 }
 0xe70   :  { %5896 = shalt.err (%p6703_p5)  }
 0xe71   :  { %5898 = vsyncmov [#allocation3 + $0x18] }
 0xe74   :  { %s5899_s11 = vpop.sfrf %5898 }
 0xe75   :  { %p6704_p7 = scmp.ne.s32.totalorder %s5899_s11, 0 }
 0xe77   :  { %5903 = shalt.err (%p6704_p7)  }
 0xe78   :  { %5905 = vsyncmov [#allocation3 + $0x19] }
 0xe7b   :  { %s5906_s6 = vpop.sfrf %5905 }
 0xe7c   :  { %p6705_p8 = scmp.ne.s32.totalorder %s5906_s6, 0 }
 0xe7e   :  { %5910 = shalt.err (%p6705_p8)  }
 0xe7f   :  { %5912 = vsyncmov [#allocation3 + $0x1a] }
 0xe82   :  { %s5913_s9 = vpop.sfrf %5912 }
 0xe83   :  { %p6706_p9 = scmp.ne.s32.totalorder %s5913_s9, 0 }
 0xe85   :  { %5917 = shalt.err (%p6706_p9)  }
 0xe86   :  { %5919 = vsyncmov [#allocation3 + $0x1b] }
 0xe89   :  { %s5920_s17 = vpop.sfrf %5919 }
 0xe8a   :  { %p6707_p11 = scmp.ne.s32.totalorder %s5920_s17, 0 }
 0xe8c   :  { %5924 = shalt.err (%p6707_p11)  }
 0xe8d   :  { %5926 = vsyncmov [#allocation3 + $0x1c] }
 0xe90   :  { %s5927_s29 = vpop.sfrf %5926 }
 0xe91   :  { %p6708_p12 = scmp.ne.s32.totalorder %s5927_s29, 0 }
 0xe93   :  { %5931 = shalt.err (%p6708_p12)  }
 0xe94   :  { %5933 = vsyncmov [#allocation3 + $0x1d] }
 0xe97   :  { %s5934_s10 = vpop.sfrf %5933 }
 0xe98   :  { %p6709_p2 = scmp.ne.s32.totalorder %s5934_s10, 0 }
 0xe9a   :  { %5938 = shalt.err (%p6709_p2)  }
 0xe9b   :  { %5940 = vsyncmov [#allocation3 + $0x1e] }
 0xe9e   :  { %s5941_s19 = vpop.sfrf %5940 }
 0xe9f   :  { %p6710_p3 = scmp.ne.s32.totalorder %s5941_s19, 0 }
 0xea1   :  { %5945 = shalt.err (%p6710_p3)  }
 0xea2   :  { %5947 = vsyncmov [#allocation3 + $0x1f] }
 0xea5   :  { %s5948_s26 = vpop.sfrf %5947 }
 0xea6   :  { %p6711_p4 = scmp.ne.s32.totalorder %s5948_s26, 0 }
 0xea8   :  { %5952 = shalt.err (%p6711_p4)  }

</bundles_post_ra>
